<compile_context>
chip_gen: v7x
topology: tpu7x:2x2x1
jax: 0.10.0
libtpu: 0.0.40
codegen_flags: <defaults>
</compile_context>

<pallas_src>
import functools

import jax
import jax.numpy as jnp
from jax.experimental import pallas as pl
from jax.experimental.pallas import tpu as pltpu

EPS = 1e-5
SLOPE = 0.2  # LeakyReLU negative slope

_CPARAMS = pltpu.CompilerParams(vmem_limit_bytes=32 * 1024 * 1024)


def _vmem():
    return pl.BlockSpec(memory_space=pltpu.MemorySpace.VMEM)


# ----------------------------- in-kernel helpers ---------------------------- #

def _masked_tap(x, ms, a, b, width, m):
    """Tap (a, b) of a k x k window, built from the flat channel-major activation.

    x : (Cin, M + 2*(width+1)) value, zero-padded along columns by width+1.
    ms: (4, M) validity masks, rows = [i >= 1, i <= H-2, j >= 1, j <= W-2].
    Returns the (Cin, M) slice for spatial offset (a-1, b-1), zeroed where the
    offset falls outside the image (boundary / cross-image reads are masked).
    """
    start = a * width + b                      # == (width+1) + (a-1)*width + (b-1)
    t = x[:, start:start + m]
    msk = None
    if a == 0:
        msk = ms[0:1, :]
    elif a == 2:
        msk = ms[1:2, :]
    if b == 0:
        msk = ms[2:3, :] if msk is None else msk * ms[2:3, :]
    elif b == 2:
        msk = ms[3:4, :] if msk is None else msk * ms[3:4, :]
    return t if msk is None else t * msk


# ------------------------------ Pallas kernels ------------------------------ #

def project_kernel(z_ref, w_ref, g_ref, b_ref, o_ref):
    # Fused: ConvTranspose2d(100, C, 4, 1, 0) (== matmul on 1x1 input)
    #        -> BatchNorm(batch stats) -> LeakyReLU(0.2)
    # z: (N, 128) f32 (K padded 100 -> 128); w: (128, 16*C) bf16, cols (kh, kw, c)
    # g, b: (1, C) f32 ; o: (N, 16*C) bf16 (NHWC-flat, lane-dense)
    n = z_ref.shape[0]
    c = g_ref.shape[1]
    y = jnp.dot(z_ref[...].astype(jnp.bfloat16), w_ref[...],
                preferred_element_type=jnp.float32)            # (N, 16*C) f32
    cnt = jnp.float32(n * 16)
    # Per-channel batch stats: reduce over rows and the 16 spatial column-blocks.
    s1 = jnp.zeros((1, c), jnp.float32)
    for s in range(16):
        s1 = s1 + jnp.sum(y[:, s * c:(s + 1) * c], axis=0, keepdims=True)
    mean = s1 / cnt
    s2 = jnp.zeros((1, c), jnp.float32)
    for s in range(16):
        d = y[:, s * c:(s + 1) * c] - mean
        s2 = s2 + jnp.sum(d * d, axis=0, keepdims=True)
    var = s2 / cnt
    scale = g_ref[...] * jax.lax.rsqrt(var + EPS)
    shift = b_ref[...] - mean * scale
    for s in range(16):
        t = y[:, s * c:(s + 1) * c] * scale + shift
        o_ref[:, s * c:(s + 1) * c] = jnp.where(t > 0, t, SLOPE * t).astype(o_ref.dtype)


def block_kernel(x_ref, ms_ref, w_ref, g_ref, b_ref, o_ref, *, n, h, w):
    # Fused: ConvTranspose2d(Cin, Cout, 4, 2, 1, bias=False) via 4-phase
    #        decomposition -> BatchNorm(batch stats) -> LeakyReLU(0.2)
    # x : (Cin, M + 2*(W+1)) bf16, channel-major flat activation (zero-padded cols)
    # ms: (4, M) bf16 boundary masks
    # w : (4, Cout, 4*Cin) bf16 — per-phase transposed weights, cols (dy, dx, cin)
    # g, b: (Cout, 1) f32
    # o : (4, Cout, M) bf16 — per-phase outputs, columns in input (n, i, j) order
    m = n * h * w
    cin = x_ref.shape[0]
    cout = w_ref.shape[1]
    x = x_ref[...]
    ms = ms_ref[...]

    ys = []
    for py in range(2):
        for px in range(2):
            wp = w_ref[2 * py + px]                            # (Cout, 4*Cin)
            acc = jnp.zeros((cout, m), jnp.float32)
            ti = 0
            for dy in range(2):
                for dx in range(2):
                    wk = wp[:, ti * cin:(ti + 1) * cin]        # (Cout, Cin)
                    tap = _masked_tap(x, ms, py + dy, px + dx, w, m)
                    acc = acc + jnp.dot(wk, tap,
                                        preferred_element_type=jnp.float32)
                    ti += 1
            ys.append(acc)                                     # (Cout, M) f32

    # BatchNorm over the FULL output (all 4 phases == all N*2H*2W positions).
    cnt = jnp.float32(4 * m)
    s1 = jnp.zeros((cout, 1), jnp.float32)
    for yp in ys:
        s1 = s1 + jnp.sum(yp, axis=1, keepdims=True)
    mean = s1 / cnt
    s2 = jnp.zeros((cout, 1), jnp.float32)
    for yp in ys:
        d = yp - mean
        s2 = s2 + jnp.sum(d * d, axis=1, keepdims=True)
    var = s2 / cnt
    scale = g_ref[...] * jax.lax.rsqrt(var + EPS)
    shift = b_ref[...] - mean * scale
    for p in range(4):
        t = ys[p] * scale + shift
        o_ref[p] = jnp.where(t > 0, t, SLOPE * t).astype(o_ref.dtype)


def out_conv_kernel(x_ref, ms_ref, w_ref, b_ref, o_ref, *, n, h, w):
    # Fused: Conv2d(Cin, Cout, 3, padding='same') -> + bias -> tanh
    # x : (Cin, M + 2*(W+1)) bf16 ; ms: (4, M) bf16
    # w : (Cout, 9*Cin) bf16, cols ordered (kh, kw, cin) ; b: (Cout, 1) f32
    # o : (Cout, M) f32 — lane-dense (M = N*H*W on lanes)
    m = n * h * w
    cin = x_ref.shape[0]
    cout = w_ref.shape[0]
    x = x_ref[...]
    ms = ms_ref[...]

    acc = jnp.zeros((cout, m), jnp.float32)
    ti = 0
    for a in range(3):
        for b in range(3):
            wk = w_ref[:, ti * cin:(ti + 1) * cin]             # (Cout, Cin)
            tap = _masked_tap(x, ms, a, b, w, m)
            acc = acc + jnp.dot(wk, tap, preferred_element_type=jnp.float32)
            ti += 1
    o_ref[...] = jnp.tanh(acc + b_ref[...])


# --------------------------- pallas_call wrappers --------------------------- #

def pallas_project(z_pad, w_mat, gamma, beta):
    n = z_pad.shape[0]
    c16 = w_mat.shape[1]
    return pl.pallas_call(
        project_kernel,
        out_shape=jax.ShapeDtypeStruct((n, c16), jnp.bfloat16),
        in_specs=[_vmem()] * 4,
        out_specs=_vmem(),
        compiler_params=_CPARAMS,
    )(z_pad, w_mat, gamma, beta)


def pallas_block(x_pad, masks, w_phases, gamma, beta, n, h, w):
    cout = w_phases.shape[1]
    m = n * h * w
    kern = functools.partial(block_kernel, n=n, h=h, w=w)
    return pl.pallas_call(
        kern,
        out_shape=jax.ShapeDtypeStruct((4, cout, m), jnp.bfloat16),
        in_specs=[_vmem()] * 5,
        out_specs=_vmem(),
        compiler_params=_CPARAMS,
    )(x_pad, masks, w_phases, gamma, beta)


def pallas_out_conv(x_pad, masks, w_mat, bias, n, h, w):
    cout = w_mat.shape[0]
    m = n * h * w
    kern = functools.partial(out_conv_kernel, n=n, h=h, w=w)
    return pl.pallas_call(
        kern,
        out_shape=jax.ShapeDtypeStruct((cout, m), jnp.float32),
        in_specs=[_vmem()] * 4,
        out_specs=_vmem(),
        compiler_params=_CPARAMS,
    )(x_pad, masks, w_mat, bias)


# -------------------------------- JAX glue ---------------------------------- #

def _make_masks(n, h, w):
    # Validity masks per flat output position r = (n, i, j):
    # rows = [i >= 1, i <= H-2, j >= 1, j <= W-2]; constant-folded inside jit.
    r = jnp.arange(n * h * w, dtype=jnp.int32)
    j = r % w
    i = (r // w) % h
    ms = jnp.stack([i >= 1, i <= h - 2, j >= 1, j <= w - 2], axis=0)
    return ms.astype(jnp.bfloat16)


def build_phase_weights(w_t):
    # w_t: (Cin, Cout, 4, 4) ConvTranspose2d weight -> (4, Cout, 4*Cin) bf16.
    # Phase (py, px), tap (dy, dx) uses w[:, :, 3-py-2*dy, 3-px-2*dx].
    mats = []
    for py in range(2):
        for px in range(2):
            taps = [w_t[:, :, 3 - py - 2 * dy, 3 - px - 2 * dx]   # (Cin, Cout)
                    for dy in range(2) for dx in range(2)]
            mats.append(jnp.concatenate(taps, axis=0).T)          # (Cout, 4*Cin)
    return jnp.stack(mats, axis=0).astype(jnp.bfloat16)


def project_forward(z, w_p, gamma, beta):
    # z: (N, 100) f32 ; w_p: (100, C, 4, 4) ConvTranspose2d weight.
    n = z.shape[0]
    c = w_p.shape[1]
    w_mat = jnp.transpose(w_p, (0, 2, 3, 1)).reshape(100, 16 * c)
    w_mat = jnp.pad(w_mat, ((0, 28), (0, 0))).astype(jnp.bfloat16)   # K: 100 -> 128
    z_pad = jnp.pad(z, ((0, 0), (0, 28)))
    y = pallas_project(z_pad, w_mat, gamma.reshape(1, c), beta.reshape(1, c))
    # (N, 16*C) NHWC-flat -> channel-major flat (C, N*4*4) for the first Block.
    y = y.reshape(n, 4, 4, c)
    return jnp.transpose(y, (3, 0, 1, 2)).reshape(c, n * 16)


def block_forward_cm(x_cm, w_t, gamma, beta, n, h, w):
    # x_cm: (Cin, N*H*W) bf16 channel-major flat; returns (Cout, N*2H*2W) bf16.
    cout = w_t.shape[1]
    w_phases = build_phase_weights(w_t)
    x_pad = jnp.pad(x_cm, ((0, 0), (w + 1, w + 1)))
    masks = _make_masks(n, h, w)
    o = pallas_block(x_pad, masks, w_phases,
                     gamma.reshape(cout, 1), beta.reshape(cout, 1), n, h, w)
    # Interleave the 4 phases back into (C, N, 2H, 2W)  (tiny JAX-side shuffle).
    y = o.reshape(2, 2, cout, n, h, w)
    y = jnp.transpose(y, (2, 3, 4, 0, 5, 1))          # (C, n, i, py, j, px)
    return y.reshape(cout, n * 2 * h * 2 * w)


def out_forward(x_cm, w_o, b_o, n, h, w):
    # x_cm: (Cin, N*H*W) bf16 ; w_o: (Cout, Cin, 3, 3) ; b_o: (Cout,)
    cout, cin = w_o.shape[0], w_o.shape[1]
    w_mat = jnp.transpose(w_o, (0, 2, 3, 1)).reshape(cout, 9 * cin).astype(jnp.bfloat16)
    x_pad = jnp.pad(x_cm, ((0, 0), (w + 1, w + 1)))
    masks = _make_masks(n, h, w)
    y = pallas_out_conv(x_pad, masks, w_mat, b_o.reshape(cout, 1), n, h, w)
    return y.reshape(cout, n, h, w)                    # (Cout, N, H, W) f32


# ------------------------------- Generator ----------------------------------- #

def init_params(key, img_size, img_ch=1):
    in_ch = img_size * 8
    ks = jax.random.split(key, 6)

    def nrm(k, shape, scale=0.05):
        return (scale * jax.random.normal(k, shape)).astype(jnp.float32)

    def bn(c):
        return jnp.ones((c,), jnp.float32), jnp.zeros((c,), jnp.float32)

    c0, c1, c2, c3 = in_ch, in_ch // 2, in_ch // 4, in_ch // 8
    g0, b0 = bn(c0)
    g1, b1 = bn(c1)
    g2, b2 = bn(c2)
    g3, b3 = bn(c3)
    return {
        "proj_w": nrm(ks[0], (100, c0, 4, 4)), "proj_g": g0, "proj_b": b0,
        "c1_w": nrm(ks[1], (c0, c1, 4, 4)), "c1_g": g1, "c1_b": b1,
        "c2_w": nrm(ks[2], (c1, c2, 4, 4)), "c2_g": g2, "c2_b": b2,
        "c3_w": nrm(ks[3], (c2, c3, 4, 4)), "c3_g": g3, "c3_b": b3,
        "out_w": nrm(ks[4], (img_ch, c3, 3, 3)),
        "out_bias": nrm(ks[5], (img_ch,)),
    }


def generator_forward(params, x_nchw):
    # x_nchw: (N, 100, 1, 1), PyTorch convention.
    n = x_nchw.shape[0]
    z = x_nchw.reshape(n, 100)
    act = project_forward(z, params["proj_w"], params["proj_g"], params["proj_b"])
    act = block_forward_cm(act, params["c1_w"], params["c1_g"], params["c1_b"], n, 4, 4)
    act = block_forward_cm(act, params["c2_w"], params["c2_g"], params["c2_b"], n, 8, 8)
    act = block_forward_cm(act, params["c3_w"], params["c3_g"], params["c3_b"], n, 16, 16)
    y = out_forward(act, params["out_w"], params["out_bias"], n, 32, 32)
    return jnp.transpose(y, (1, 0, 2, 3)).astype(jnp.float32)      # NCHW


if __name__ == "__main__":
    IMG_SIZE = 8          # in_ch = 64 -> channel path 64 -> 32 -> 16 -> 8 -> 1
    IMG_CH = 1
    N = 2

    key = jax.random.PRNGKey(0)
    pkey, xkey = jax.random.split(key)
    params = init_params(pkey, IMG_SIZE, IMG_CH)
    x = jax.random.normal(xkey, (N, 100, 1, 1), dtype=jnp.float32)

    fwd = jax.jit(generator_forward)
    out = jax.block_until_ready(fwd(params, x))

    assert out.shape == (N, IMG_CH, 32, 32), out.shape
    assert bool(jnp.all(jnp.isfinite(out)))
    assert bool(jnp.all(jnp.abs(out) <= 1.0 + 1e-6))   # tanh range
    print("KERNEL_OK")
</pallas_src>

<mosaic_0001>
module attributes {stable_mosaic.version = 11 : i64} {
  func.func @project_kernel(%arg0: memref<2x128xf32, #tpu.memory_space<vmem>>, %arg1: memref<128x1024xbf16, #tpu.memory_space<vmem>>, %arg2: memref<1x64xf32, #tpu.memory_space<vmem>>, %arg3: memref<1x64xf32, #tpu.memory_space<vmem>>, %arg4: memref<2x1024xbf16, #tpu.memory_space<vmem>>) attributes {dimension_semantics = [], scalar_prefetch = 0 : i64, scratch_operands = 0 : i64, tpu.core_type = #tpu.core_type<tc>} {
    %c0 = arith.constant 0 : index
    %c0_0 = arith.constant 0 : index
    %0 = vector.load %arg0[%c0, %c0_0] : memref<2x128xf32, #tpu.memory_space<vmem>>, vector<2x128xf32>
    %1 = arith.truncf %0 : vector<2x128xf32> to vector<2x128xbf16>
    %c0_1 = arith.constant 0 : index
    %c0_2 = arith.constant 0 : index
    %2 = vector.load %arg1[%c0_1, %c0_2] : memref<128x1024xbf16, #tpu.memory_space<vmem>>, vector<128x1024xbf16>
    %cst = arith.constant dense<0.000000e+00> : vector<2x1024xf32>
    %3 = tpu.matmul %1, %2, %cst {dimension_numbers = #tpu.dot_dimension_numbers<[1], [0], [0], [1], [0, 0, 1, 1], [], []>} : vector<2x128xbf16>, vector<128x1024xbf16>, vector<2x1024xf32> -> vector<2x1024xf32>
    %cst_3 = arith.constant 0.000000e+00 : f32
    %4 = vector.broadcast %cst_3 : f32 to vector<1x64xf32>
    %5 = vector.extract_strided_slice %3 {offsets = [0, 0], sizes = [2, 64], strides = [1, 1]} : vector<2x1024xf32> to vector<2x64xf32>
    %cst_4 = arith.constant dense<0.000000e+00> : vector<64xf32>
    %6 = vector.multi_reduction <add>, %5, %cst_4 [0] : vector<2x64xf32> to vector<64xf32>
    %7 = vector.shape_cast %6 : vector<64xf32> to vector<1x64xf32>
    %8 = arith.addf %4, %7 : vector<1x64xf32>
    %9 = vector.extract_strided_slice %3 {offsets = [0, 64], sizes = [2, 64], strides = [1, 1]} : vector<2x1024xf32> to vector<2x64xf32>
    %cst_5 = arith.constant dense<0.000000e+00> : vector<64xf32>
    %10 = vector.multi_reduction <add>, %9, %cst_5 [0] : vector<2x64xf32> to vector<64xf32>
    %11 = vector.shape_cast %10 : vector<64xf32> to vector<1x64xf32>
    %12 = arith.addf %8, %11 : vector<1x64xf32>
    %13 = vector.extract_strided_slice %3 {offsets = [0, 128], sizes = [2, 64], strides = [1, 1]} : vector<2x1024xf32> to vector<2x64xf32>
    %cst_6 = arith.constant dense<0.000000e+00> : vector<64xf32>
    %14 = vector.multi_reduction <add>, %13, %cst_6 [0] : vector<2x64xf32> to vector<64xf32>
    %15 = vector.shape_cast %14 : vector<64xf32> to vector<1x64xf32>
    %16 = arith.addf %12, %15 : vector<1x64xf32>
    %17 = vector.extract_strided_slice %3 {offsets = [0, 192], sizes = [2, 64], strides = [1, 1]} : vector<2x1024xf32> to vector<2x64xf32>
    %cst_7 = arith.constant dense<0.000000e+00> : vector<64xf32>
    %18 = vector.multi_reduction <add>, %17, %cst_7 [0] : vector<2x64xf32> to vector<64xf32>
    %19 = vector.shape_cast %18 : vector<64xf32> to vector<1x64xf32>
    %20 = arith.addf %16, %19 : vector<1x64xf32>
    %21 = vector.extract_strided_slice %3 {offsets = [0, 256], sizes = [2, 64], strides = [1, 1]} : vector<2x1024xf32> to vector<2x64xf32>
    %cst_8 = arith.constant dense<0.000000e+00> : vector<64xf32>
    %22 = vector.multi_reduction <add>, %21, %cst_8 [0] : vector<2x64xf32> to vector<64xf32>
    %23 = vector.shape_cast %22 : vector<64xf32> to vector<1x64xf32>
    %24 = arith.addf %20, %23 : vector<1x64xf32>
    %25 = vector.extract_strided_slice %3 {offsets = [0, 320], sizes = [2, 64], strides = [1, 1]} : vector<2x1024xf32> to vector<2x64xf32>
    %cst_9 = arith.constant dense<0.000000e+00> : vector<64xf32>
    %26 = vector.multi_reduction <add>, %25, %cst_9 [0] : vector<2x64xf32> to vector<64xf32>
    %27 = vector.shape_cast %26 : vector<64xf32> to vector<1x64xf32>
    %28 = arith.addf %24, %27 : vector<1x64xf32>
    %29 = vector.extract_strided_slice %3 {offsets = [0, 384], sizes = [2, 64], strides = [1, 1]} : vector<2x1024xf32> to vector<2x64xf32>
    %cst_10 = arith.constant dense<0.000000e+00> : vector<64xf32>
    %30 = vector.multi_reduction <add>, %29, %cst_10 [0] : vector<2x64xf32> to vector<64xf32>
    %31 = vector.shape_cast %30 : vector<64xf32> to vector<1x64xf32>
    %32 = arith.addf %28, %31 : vector<1x64xf32>
    %33 = vector.extract_strided_slice %3 {offsets = [0, 448], sizes = [2, 64], strides = [1, 1]} : vector<2x1024xf32> to vector<2x64xf32>
    %cst_11 = arith.constant dense<0.000000e+00> : vector<64xf32>
    %34 = vector.multi_reduction <add>, %33, %cst_11 [0] : vector<2x64xf32> to vector<64xf32>
    %35 = vector.shape_cast %34 : vector<64xf32> to vector<1x64xf32>
    %36 = arith.addf %32, %35 : vector<1x64xf32>
    %37 = vector.extract_strided_slice %3 {offsets = [0, 512], sizes = [2, 64], strides = [1, 1]} : vector<2x1024xf32> to vector<2x64xf32>
    %cst_12 = arith.constant dense<0.000000e+00> : vector<64xf32>
    %38 = vector.multi_reduction <add>, %37, %cst_12 [0] : vector<2x64xf32> to vector<64xf32>
    %39 = vector.shape_cast %38 : vector<64xf32> to vector<1x64xf32>
    %40 = arith.addf %36, %39 : vector<1x64xf32>
    %41 = vector.extract_strided_slice %3 {offsets = [0, 576], sizes = [2, 64], strides = [1, 1]} : vector<2x1024xf32> to vector<2x64xf32>
    %cst_13 = arith.constant dense<0.000000e+00> : vector<64xf32>
    %42 = vector.multi_reduction <add>, %41, %cst_13 [0] : vector<2x64xf32> to vector<64xf32>
    %43 = vector.shape_cast %42 : vector<64xf32> to vector<1x64xf32>
    %44 = arith.addf %40, %43 : vector<1x64xf32>
    %45 = vector.extract_strided_slice %3 {offsets = [0, 640], sizes = [2, 64], strides = [1, 1]} : vector<2x1024xf32> to vector<2x64xf32>
    %cst_14 = arith.constant dense<0.000000e+00> : vector<64xf32>
    %46 = vector.multi_reduction <add>, %45, %cst_14 [0] : vector<2x64xf32> to vector<64xf32>
    %47 = vector.shape_cast %46 : vector<64xf32> to vector<1x64xf32>
    %48 = arith.addf %44, %47 : vector<1x64xf32>
    %49 = vector.extract_strided_slice %3 {offsets = [0, 704], sizes = [2, 64], strides = [1, 1]} : vector<2x1024xf32> to vector<2x64xf32>
    %cst_15 = arith.constant dense<0.000000e+00> : vector<64xf32>
    %50 = vector.multi_reduction <add>, %49, %cst_15 [0] : vector<2x64xf32> to vector<64xf32>
    %51 = vector.shape_cast %50 : vector<64xf32> to vector<1x64xf32>
    %52 = arith.addf %48, %51 : vector<1x64xf32>
    %53 = vector.extract_strided_slice %3 {offsets = [0, 768], sizes = [2, 64], strides = [1, 1]} : vector<2x1024xf32> to vector<2x64xf32>
    %cst_16 = arith.constant dense<0.000000e+00> : vector<64xf32>
    %54 = vector.multi_reduction <add>, %53, %cst_16 [0] : vector<2x64xf32> to vector<64xf32>
    %55 = vector.shape_cast %54 : vector<64xf32> to vector<1x64xf32>
    %56 = arith.addf %52, %55 : vector<1x64xf32>
    %57 = vector.extract_strided_slice %3 {offsets = [0, 832], sizes = [2, 64], strides = [1, 1]} : vector<2x1024xf32> to vector<2x64xf32>
    %cst_17 = arith.constant dense<0.000000e+00> : vector<64xf32>
    %58 = vector.multi_reduction <add>, %57, %cst_17 [0] : vector<2x64xf32> to vector<64xf32>
    %59 = vector.shape_cast %58 : vector<64xf32> to vector<1x64xf32>
    %60 = arith.addf %56, %59 : vector<1x64xf32>
    %61 = vector.extract_strided_slice %3 {offsets = [0, 896], sizes = [2, 64], strides = [1, 1]} : vector<2x1024xf32> to vector<2x64xf32>
    %cst_18 = arith.constant dense<0.000000e+00> : vector<64xf32>
    %62 = vector.multi_reduction <add>, %61, %cst_18 [0] : vector<2x64xf32> to vector<64xf32>
    %63 = vector.shape_cast %62 : vector<64xf32> to vector<1x64xf32>
    %64 = arith.addf %60, %63 : vector<1x64xf32>
    %65 = vector.extract_strided_slice %3 {offsets = [0, 960], sizes = [2, 64], strides = [1, 1]} : vector<2x1024xf32> to vector<2x64xf32>
    %cst_19 = arith.constant dense<0.000000e+00> : vector<64xf32>
    %66 = vector.multi_reduction <add>, %65, %cst_19 [0] : vector<2x64xf32> to vector<64xf32>
    %67 = vector.shape_cast %66 : vector<64xf32> to vector<1x64xf32>
    %68 = arith.addf %64, %67 : vector<1x64xf32>
    %cst_20 = arith.constant 3.200000e+01 : f32
    %69 = vector.broadcast %cst_20 : f32 to vector<1x64xf32>
    %70 = arith.divf %68, %69 : vector<1x64xf32>
    %cst_21 = arith.constant 0.000000e+00 : f32
    %71 = vector.broadcast %cst_21 : f32 to vector<1x64xf32>
    %72 = vector.extract_strided_slice %3 {offsets = [0, 0], sizes = [2, 64], strides = [1, 1]} : vector<2x1024xf32> to vector<2x64xf32>
    %73 = vector.broadcast %70 : vector<1x64xf32> to vector<2x64xf32>
    %74 = arith.subf %72, %73 : vector<2x64xf32>
    %75 = arith.mulf %74, %74 : vector<2x64xf32>
    %cst_22 = arith.constant dense<0.000000e+00> : vector<64xf32>
    %76 = vector.multi_reduction <add>, %75, %cst_22 [0] : vector<2x64xf32> to vector<64xf32>
    %77 = vector.shape_cast %76 : vector<64xf32> to vector<1x64xf32>
    %78 = arith.addf %71, %77 : vector<1x64xf32>
    %79 = vector.extract_strided_slice %3 {offsets = [0, 64], sizes = [2, 64], strides = [1, 1]} : vector<2x1024xf32> to vector<2x64xf32>
    %80 = vector.broadcast %70 : vector<1x64xf32> to vector<2x64xf32>
    %81 = arith.subf %79, %80 : vector<2x64xf32>
    %82 = arith.mulf %81, %81 : vector<2x64xf32>
    %cst_23 = arith.constant dense<0.000000e+00> : vector<64xf32>
    %83 = vector.multi_reduction <add>, %82, %cst_23 [0] : vector<2x64xf32> to vector<64xf32>
    %84 = vector.shape_cast %83 : vector<64xf32> to vector<1x64xf32>
    %85 = arith.addf %78, %84 : vector<1x64xf32>
    %86 = vector.extract_strided_slice %3 {offsets = [0, 128], sizes = [2, 64], strides = [1, 1]} : vector<2x1024xf32> to vector<2x64xf32>
    %87 = vector.broadcast %70 : vector<1x64xf32> to vector<2x64xf32>
    %88 = arith.subf %86, %87 : vector<2x64xf32>
    %89 = arith.mulf %88, %88 : vector<2x64xf32>
    %cst_24 = arith.constant dense<0.000000e+00> : vector<64xf32>
    %90 = vector.multi_reduction <add>, %89, %cst_24 [0] : vector<2x64xf32> to vector<64xf32>
    %91 = vector.shape_cast %90 : vector<64xf32> to vector<1x64xf32>
    %92 = arith.addf %85, %91 : vector<1x64xf32>
    %93 = vector.extract_strided_slice %3 {offsets = [0, 192], sizes = [2, 64], strides = [1, 1]} : vector<2x1024xf32> to vector<2x64xf32>
    %94 = vector.broadcast %70 : vector<1x64xf32> to vector<2x64xf32>
    %95 = arith.subf %93, %94 : vector<2x64xf32>
    %96 = arith.mulf %95, %95 : vector<2x64xf32>
    %cst_25 = arith.constant dense<0.000000e+00> : vector<64xf32>
    %97 = vector.multi_reduction <add>, %96, %cst_25 [0] : vector<2x64xf32> to vector<64xf32>
    %98 = vector.shape_cast %97 : vector<64xf32> to vector<1x64xf32>
    %99 = arith.addf %92, %98 : vector<1x64xf32>
    %100 = vector.extract_strided_slice %3 {offsets = [0, 256], sizes = [2, 64], strides = [1, 1]} : vector<2x1024xf32> to vector<2x64xf32>
    %101 = vector.broadcast %70 : vector<1x64xf32> to vector<2x64xf32>
    %102 = arith.subf %100, %101 : vector<2x64xf32>
    %103 = arith.mulf %102, %102 : vector<2x64xf32>
    %cst_26 = arith.constant dense<0.000000e+00> : vector<64xf32>
    %104 = vector.multi_reduction <add>, %103, %cst_26 [0] : vector<2x64xf32> to vector<64xf32>
    %105 = vector.shape_cast %104 : vector<64xf32> to vector<1x64xf32>
    %106 = arith.addf %99, %105 : vector<1x64xf32>
    %107 = vector.extract_strided_slice %3 {offsets = [0, 320], sizes = [2, 64], strides = [1, 1]} : vector<2x1024xf32> to vector<2x64xf32>
    %108 = vector.broadcast %70 : vector<1x64xf32> to vector<2x64xf32>
    %109 = arith.subf %107, %108 : vector<2x64xf32>
    %110 = arith.mulf %109, %109 : vector<2x64xf32>
    %cst_27 = arith.constant dense<0.000000e+00> : vector<64xf32>
    %111 = vector.multi_reduction <add>, %110, %cst_27 [0] : vector<2x64xf32> to vector<64xf32>
    %112 = vector.shape_cast %111 : vector<64xf32> to vector<1x64xf32>
    %113 = arith.addf %106, %112 : vector<1x64xf32>
    %114 = vector.extract_strided_slice %3 {offsets = [0, 384], sizes = [2, 64], strides = [1, 1]} : vector<2x1024xf32> to vector<2x64xf32>
    %115 = vector.broadcast %70 : vector<1x64xf32> to vector<2x64xf32>
    %116 = arith.subf %114, %115 : vector<2x64xf32>
    %117 = arith.mulf %116, %116 : vector<2x64xf32>
    %cst_28 = arith.constant dense<0.000000e+00> : vector<64xf32>
    %118 = vector.multi_reduction <add>, %117, %cst_28 [0] : vector<2x64xf32> to vector<64xf32>
    %119 = vector.shape_cast %118 : vector<64xf32> to vector<1x64xf32>
    %120 = arith.addf %113, %119 : vector<1x64xf32>
    %121 = vector.extract_strided_slice %3 {offsets = [0, 448], sizes = [2, 64], strides = [1, 1]} : vector<2x1024xf32> to vector<2x64xf32>
    %122 = vector.broadcast %70 : vector<1x64xf32> to vector<2x64xf32>
    %123 = arith.subf %121, %122 : vector<2x64xf32>
    %124 = arith.mulf %123, %123 : vector<2x64xf32>
    %cst_29 = arith.constant dense<0.000000e+00> : vector<64xf32>
    %125 = vector.multi_reduction <add>, %124, %cst_29 [0] : vector<2x64xf32> to vector<64xf32>
    %126 = vector.shape_cast %125 : vector<64xf32> to vector<1x64xf32>
    %127 = arith.addf %120, %126 : vector<1x64xf32>
    %128 = vector.extract_strided_slice %3 {offsets = [0, 512], sizes = [2, 64], strides = [1, 1]} : vector<2x1024xf32> to vector<2x64xf32>
    %129 = vector.broadcast %70 : vector<1x64xf32> to vector<2x64xf32>
    %130 = arith.subf %128, %129 : vector<2x64xf32>
    %131 = arith.mulf %130, %130 : vector<2x64xf32>
    %cst_30 = arith.constant dense<0.000000e+00> : vector<64xf32>
    %132 = vector.multi_reduction <add>, %131, %cst_30 [0] : vector<2x64xf32> to vector<64xf32>
    %133 = vector.shape_cast %132 : vector<64xf32> to vector<1x64xf32>
    %134 = arith.addf %127, %133 : vector<1x64xf32>
    %135 = vector.extract_strided_slice %3 {offsets = [0, 576], sizes = [2, 64], strides = [1, 1]} : vector<2x1024xf32> to vector<2x64xf32>
    %136 = vector.broadcast %70 : vector<1x64xf32> to vector<2x64xf32>
    %137 = arith.subf %135, %136 : vector<2x64xf32>
    %138 = arith.mulf %137, %137 : vector<2x64xf32>
    %cst_31 = arith.constant dense<0.000000e+00> : vector<64xf32>
    %139 = vector.multi_reduction <add>, %138, %cst_31 [0] : vector<2x64xf32> to vector<64xf32>
    %140 = vector.shape_cast %139 : vector<64xf32> to vector<1x64xf32>
    %141 = arith.addf %134, %140 : vector<1x64xf32>
    %142 = vector.extract_strided_slice %3 {offsets = [0, 640], sizes = [2, 64], strides = [1, 1]} : vector<2x1024xf32> to vector<2x64xf32>
    %143 = vector.broadcast %70 : vector<1x64xf32> to vector<2x64xf32>
    %144 = arith.subf %142, %143 : vector<2x64xf32>
    %145 = arith.mulf %144, %144 : vector<2x64xf32>
    %cst_32 = arith.constant dense<0.000000e+00> : vector<64xf32>
    %146 = vector.multi_reduction <add>, %145, %cst_32 [0] : vector<2x64xf32> to vector<64xf32>
    %147 = vector.shape_cast %146 : vector<64xf32> to vector<1x64xf32>
    %148 = arith.addf %141, %147 : vector<1x64xf32>
    %149 = vector.extract_strided_slice %3 {offsets = [0, 704], sizes = [2, 64], strides = [1, 1]} : vector<2x1024xf32> to vector<2x64xf32>
    %150 = vector.broadcast %70 : vector<1x64xf32> to vector<2x64xf32>
    %151 = arith.subf %149, %150 : vector<2x64xf32>
    %152 = arith.mulf %151, %151 : vector<2x64xf32>
    %cst_33 = arith.constant dense<0.000000e+00> : vector<64xf32>
    %153 = vector.multi_reduction <add>, %152, %cst_33 [0] : vector<2x64xf32> to vector<64xf32>
    %154 = vector.shape_cast %153 : vector<64xf32> to vector<1x64xf32>
    %155 = arith.addf %148, %154 : vector<1x64xf32>
    %156 = vector.extract_strided_slice %3 {offsets = [0, 768], sizes = [2, 64], strides = [1, 1]} : vector<2x1024xf32> to vector<2x64xf32>
    %157 = vector.broadcast %70 : vector<1x64xf32> to vector<2x64xf32>
    %158 = arith.subf %156, %157 : vector<2x64xf32>
    %159 = arith.mulf %158, %158 : vector<2x64xf32>
    %cst_34 = arith.constant dense<0.000000e+00> : vector<64xf32>
    %160 = vector.multi_reduction <add>, %159, %cst_34 [0] : vector<2x64xf32> to vector<64xf32>
    %161 = vector.shape_cast %160 : vector<64xf32> to vector<1x64xf32>
    %162 = arith.addf %155, %161 : vector<1x64xf32>
    %163 = vector.extract_strided_slice %3 {offsets = [0, 832], sizes = [2, 64], strides = [1, 1]} : vector<2x1024xf32> to vector<2x64xf32>
    %164 = vector.broadcast %70 : vector<1x64xf32> to vector<2x64xf32>
    %165 = arith.subf %163, %164 : vector<2x64xf32>
    %166 = arith.mulf %165, %165 : vector<2x64xf32>
    %cst_35 = arith.constant dense<0.000000e+00> : vector<64xf32>
    %167 = vector.multi_reduction <add>, %166, %cst_35 [0] : vector<2x64xf32> to vector<64xf32>
    %168 = vector.shape_cast %167 : vector<64xf32> to vector<1x64xf32>
    %169 = arith.addf %162, %168 : vector<1x64xf32>
    %170 = vector.extract_strided_slice %3 {offsets = [0, 896], sizes = [2, 64], strides = [1, 1]} : vector<2x1024xf32> to vector<2x64xf32>
    %171 = vector.broadcast %70 : vector<1x64xf32> to vector<2x64xf32>
    %172 = arith.subf %170, %171 : vector<2x64xf32>
    %173 = arith.mulf %172, %172 : vector<2x64xf32>
    %cst_36 = arith.constant dense<0.000000e+00> : vector<64xf32>
    %174 = vector.multi_reduction <add>, %173, %cst_36 [0] : vector<2x64xf32> to vector<64xf32>
    %175 = vector.shape_cast %174 : vector<64xf32> to vector<1x64xf32>
    %176 = arith.addf %169, %175 : vector<1x64xf32>
    %177 = vector.extract_strided_slice %3 {offsets = [0, 960], sizes = [2, 64], strides = [1, 1]} : vector<2x1024xf32> to vector<2x64xf32>
    %178 = vector.broadcast %70 : vector<1x64xf32> to vector<2x64xf32>
    %179 = arith.subf %177, %178 : vector<2x64xf32>
    %180 = arith.mulf %179, %179 : vector<2x64xf32>
    %cst_37 = arith.constant dense<0.000000e+00> : vector<64xf32>
    %181 = vector.multi_reduction <add>, %180, %cst_37 [0] : vector<2x64xf32> to vector<64xf32>
    %182 = vector.shape_cast %181 : vector<64xf32> to vector<1x64xf32>
    %183 = arith.addf %176, %182 : vector<1x64xf32>
    %cst_38 = arith.constant 3.200000e+01 : f32
    %184 = vector.broadcast %cst_38 : f32 to vector<1x64xf32>
    %185 = arith.divf %183, %184 : vector<1x64xf32>
    %c0_39 = arith.constant 0 : index
    %c0_40 = arith.constant 0 : index
    %186 = vector.load %arg2[%c0_39, %c0_40] : memref<1x64xf32, #tpu.memory_space<vmem>>, vector<1x64xf32>
    %cst_41 = arith.constant 9.99999974E-6 : f32
    %187 = vector.broadcast %cst_41 : f32 to vector<1x64xf32>
    %188 = arith.addf %185, %187 : vector<1x64xf32>
    %189 = math.rsqrt %188 : vector<1x64xf32>
    %190 = arith.mulf %186, %189 : vector<1x64xf32>
    %c0_42 = arith.constant 0 : index
    %c0_43 = arith.constant 0 : index
    %191 = vector.load %arg3[%c0_42, %c0_43] : memref<1x64xf32, #tpu.memory_space<vmem>>, vector<1x64xf32>
    %192 = arith.mulf %70, %190 : vector<1x64xf32>
    %193 = arith.subf %191, %192 : vector<1x64xf32>
    %194 = vector.extract_strided_slice %3 {offsets = [0, 0], sizes = [2, 64], strides = [1, 1]} : vector<2x1024xf32> to vector<2x64xf32>
    %195 = vector.broadcast %190 : vector<1x64xf32> to vector<2x64xf32>
    %196 = arith.mulf %194, %195 : vector<2x64xf32>
    %197 = vector.broadcast %193 : vector<1x64xf32> to vector<2x64xf32>
    %198 = arith.addf %196, %197 : vector<2x64xf32>
    %cst_44 = arith.constant 0.000000e+00 : f32
    %199 = vector.broadcast %cst_44 : f32 to vector<2x64xf32>
    %200 = arith.cmpf ogt, %198, %199 : vector<2x64xf32>
    %cst_45 = arith.constant 2.000000e-01 : f32
    %201 = vector.broadcast %cst_45 : f32 to vector<2x64xf32>
    %202 = arith.mulf %201, %198 : vector<2x64xf32>
    %203 = arith.select %200, %198, %202 : vector<2x64xi1>, vector<2x64xf32>
    %204 = arith.truncf %203 : vector<2x64xf32> to vector<2x64xbf16>
    %c0_46 = arith.constant 0 : index
    %c0_47 = arith.constant 0 : index
    %205 = vector.load %arg4[%c0_46, %c0_47] : memref<2x1024xbf16, #tpu.memory_space<vmem>>, vector<2x64xbf16>
    tpu.vector_store %arg4[%c0_46, %c0_47], %204 {strides = array<i32>} : memref<2x1024xbf16, #tpu.memory_space<vmem>>, vector<2x64xbf16>,
    %206 = vector.extract_strided_slice %3 {offsets = [0, 64], sizes = [2, 64], strides = [1, 1]} : vector<2x1024xf32> to vector<2x64xf32>
    %207 = vector.broadcast %190 : vector<1x64xf32> to vector<2x64xf32>
    %208 = arith.mulf %206, %207 : vector<2x64xf32>
    %209 = vector.broadcast %193 : vector<1x64xf32> to vector<2x64xf32>
    %210 = arith.addf %208, %209 : vector<2x64xf32>
    %cst_48 = arith.constant 0.000000e+00 : f32
    %211 = vector.broadcast %cst_48 : f32 to vector<2x64xf32>
    %212 = arith.cmpf ogt, %210, %211 : vector<2x64xf32>
    %cst_49 = arith.constant 2.000000e-01 : f32
    %213 = vector.broadcast %cst_49 : f32 to vector<2x64xf32>
    %214 = arith.mulf %213, %210 : vector<2x64xf32>
    %215 = arith.select %212, %210, %214 : vector<2x64xi1>, vector<2x64xf32>
    %216 = arith.truncf %215 : vector<2x64xf32> to vector<2x64xbf16>
    %c0_50 = arith.constant 0 : index
    %c64 = arith.constant 64 : index
    %217 = vector.load %arg4[%c0_50, %c64] : memref<2x1024xbf16, #tpu.memory_space<vmem>>, vector<2x64xbf16>
    tpu.vector_store %arg4[%c0_50, %c64], %216 {strides = array<i32>} : memref<2x1024xbf16, #tpu.memory_space<vmem>>, vector<2x64xbf16>,
    %218 = vector.extract_strided_slice %3 {offsets = [0, 128], sizes = [2, 64], strides = [1, 1]} : vector<2x1024xf32> to vector<2x64xf32>
    %219 = vector.broadcast %190 : vector<1x64xf32> to vector<2x64xf32>
    %220 = arith.mulf %218, %219 : vector<2x64xf32>
    %221 = vector.broadcast %193 : vector<1x64xf32> to vector<2x64xf32>
    %222 = arith.addf %220, %221 : vector<2x64xf32>
    %cst_51 = arith.constant 0.000000e+00 : f32
    %223 = vector.broadcast %cst_51 : f32 to vector<2x64xf32>
    %224 = arith.cmpf ogt, %222, %223 : vector<2x64xf32>
    %cst_52 = arith.constant 2.000000e-01 : f32
    %225 = vector.broadcast %cst_52 : f32 to vector<2x64xf32>
    %226 = arith.mulf %225, %222 : vector<2x64xf32>
    %227 = arith.select %224, %222, %226 : vector<2x64xi1>, vector<2x64xf32>
    %228 = arith.truncf %227 : vector<2x64xf32> to vector<2x64xbf16>
    %c0_53 = arith.constant 0 : index
    %c128 = arith.constant 128 : index
    %229 = vector.load %arg4[%c0_53, %c128] : memref<2x1024xbf16, #tpu.memory_space<vmem>>, vector<2x64xbf16>
    tpu.vector_store %arg4[%c0_53, %c128], %228 {strides = array<i32>} : memref<2x1024xbf16, #tpu.memory_space<vmem>>, vector<2x64xbf16>,
    %230 = vector.extract_strided_slice %3 {offsets = [0, 192], sizes = [2, 64], strides = [1, 1]} : vector<2x1024xf32> to vector<2x64xf32>
    %231 = vector.broadcast %190 : vector<1x64xf32> to vector<2x64xf32>
    %232 = arith.mulf %230, %231 : vector<2x64xf32>
    %233 = vector.broadcast %193 : vector<1x64xf32> to vector<2x64xf32>
    %234 = arith.addf %232, %233 : vector<2x64xf32>
    %cst_54 = arith.constant 0.000000e+00 : f32
    %235 = vector.broadcast %cst_54 : f32 to vector<2x64xf32>
    %236 = arith.cmpf ogt, %234, %235 : vector<2x64xf32>
    %cst_55 = arith.constant 2.000000e-01 : f32
    %237 = vector.broadcast %cst_55 : f32 to vector<2x64xf32>
    %238 = arith.mulf %237, %234 : vector<2x64xf32>
    %239 = arith.select %236, %234, %238 : vector<2x64xi1>, vector<2x64xf32>
    %240 = arith.truncf %239 : vector<2x64xf32> to vector<2x64xbf16>
    %c0_56 = arith.constant 0 : index
    %c192 = arith.constant 192 : index
    %241 = vector.load %arg4[%c0_56, %c192] : memref<2x1024xbf16, #tpu.memory_space<vmem>>, vector<2x64xbf16>
    tpu.vector_store %arg4[%c0_56, %c192], %240 {strides = array<i32>} : memref<2x1024xbf16, #tpu.memory_space<vmem>>, vector<2x64xbf16>,
    %242 = vector.extract_strided_slice %3 {offsets = [0, 256], sizes = [2, 64], strides = [1, 1]} : vector<2x1024xf32> to vector<2x64xf32>
    %243 = vector.broadcast %190 : vector<1x64xf32> to vector<2x64xf32>
    %244 = arith.mulf %242, %243 : vector<2x64xf32>
    %245 = vector.broadcast %193 : vector<1x64xf32> to vector<2x64xf32>
    %246 = arith.addf %244, %245 : vector<2x64xf32>
    %cst_57 = arith.constant 0.000000e+00 : f32
    %247 = vector.broadcast %cst_57 : f32 to vector<2x64xf32>
    %248 = arith.cmpf ogt, %246, %247 : vector<2x64xf32>
    %cst_58 = arith.constant 2.000000e-01 : f32
    %249 = vector.broadcast %cst_58 : f32 to vector<2x64xf32>
    %250 = arith.mulf %249, %246 : vector<2x64xf32>
    %251 = arith.select %248, %246, %250 : vector<2x64xi1>, vector<2x64xf32>
    %252 = arith.truncf %251 : vector<2x64xf32> to vector<2x64xbf16>
    %c0_59 = arith.constant 0 : index
    %c256 = arith.constant 256 : index
    %253 = vector.load %arg4[%c0_59, %c256] : memref<2x1024xbf16, #tpu.memory_space<vmem>>, vector<2x64xbf16>
    tpu.vector_store %arg4[%c0_59, %c256], %252 {strides = array<i32>} : memref<2x1024xbf16, #tpu.memory_space<vmem>>, vector<2x64xbf16>,
    %254 = vector.extract_strided_slice %3 {offsets = [0, 320], sizes = [2, 64], strides = [1, 1]} : vector<2x1024xf32> to vector<2x64xf32>
    %255 = vector.broadcast %190 : vector<1x64xf32> to vector<2x64xf32>
    %256 = arith.mulf %254, %255 : vector<2x64xf32>
    %257 = vector.broadcast %193 : vector<1x64xf32> to vector<2x64xf32>
    %258 = arith.addf %256, %257 : vector<2x64xf32>
    %cst_60 = arith.constant 0.000000e+00 : f32
    %259 = vector.broadcast %cst_60 : f32 to vector<2x64xf32>
    %260 = arith.cmpf ogt, %258, %259 : vector<2x64xf32>
    %cst_61 = arith.constant 2.000000e-01 : f32
    %261 = vector.broadcast %cst_61 : f32 to vector<2x64xf32>
    %262 = arith.mulf %261, %258 : vector<2x64xf32>
    %263 = arith.select %260, %258, %262 : vector<2x64xi1>, vector<2x64xf32>
    %264 = arith.truncf %263 : vector<2x64xf32> to vector<2x64xbf16>
    %c0_62 = arith.constant 0 : index
    %c320 = arith.constant 320 : index
    %265 = vector.load %arg4[%c0_62, %c320] : memref<2x1024xbf16, #tpu.memory_space<vmem>>, vector<2x64xbf16>
    tpu.vector_store %arg4[%c0_62, %c320], %264 {strides = array<i32>} : memref<2x1024xbf16, #tpu.memory_space<vmem>>, vector<2x64xbf16>,
    %266 = vector.extract_strided_slice %3 {offsets = [0, 384], sizes = [2, 64], strides = [1, 1]} : vector<2x1024xf32> to vector<2x64xf32>
    %267 = vector.broadcast %190 : vector<1x64xf32> to vector<2x64xf32>
    %268 = arith.mulf %266, %267 : vector<2x64xf32>
    %269 = vector.broadcast %193 : vector<1x64xf32> to vector<2x64xf32>
    %270 = arith.addf %268, %269 : vector<2x64xf32>
    %cst_63 = arith.constant 0.000000e+00 : f32
    %271 = vector.broadcast %cst_63 : f32 to vector<2x64xf32>
    %272 = arith.cmpf ogt, %270, %271 : vector<2x64xf32>
    %cst_64 = arith.constant 2.000000e-01 : f32
    %273 = vector.broadcast %cst_64 : f32 to vector<2x64xf32>
    %274 = arith.mulf %273, %270 : vector<2x64xf32>
    %275 = arith.select %272, %270, %274 : vector<2x64xi1>, vector<2x64xf32>
    %276 = arith.truncf %275 : vector<2x64xf32> to vector<2x64xbf16>
    %c0_65 = arith.constant 0 : index
    %c384 = arith.constant 384 : index
    %277 = vector.load %arg4[%c0_65, %c384] : memref<2x1024xbf16, #tpu.memory_space<vmem>>, vector<2x64xbf16>
    tpu.vector_store %arg4[%c0_65, %c384], %276 {strides = array<i32>} : memref<2x1024xbf16, #tpu.memory_space<vmem>>, vector<2x64xbf16>,
    %278 = vector.extract_strided_slice %3 {offsets = [0, 448], sizes = [2, 64], strides = [1, 1]} : vector<2x1024xf32> to vector<2x64xf32>
    %279 = vector.broadcast %190 : vector<1x64xf32> to vector<2x64xf32>
    %280 = arith.mulf %278, %279 : vector<2x64xf32>
    %281 = vector.broadcast %193 : vector<1x64xf32> to vector<2x64xf32>
    %282 = arith.addf %280, %281 : vector<2x64xf32>
    %cst_66 = arith.constant 0.000000e+00 : f32
    %283 = vector.broadcast %cst_66 : f32 to vector<2x64xf32>
    %284 = arith.cmpf ogt, %282, %283 : vector<2x64xf32>
    %cst_67 = arith.constant 2.000000e-01 : f32
    %285 = vector.broadcast %cst_67 : f32 to vector<2x64xf32>
    %286 = arith.mulf %285, %282 : vector<2x64xf32>
    %287 = arith.select %284, %282, %286 : vector<2x64xi1>, vector<2x64xf32>
    %288 = arith.truncf %287 : vector<2x64xf32> to vector<2x64xbf16>
    %c0_68 = arith.constant 0 : index
    %c448 = arith.constant 448 : index
    %289 = vector.load %arg4[%c0_68, %c448] : memref<2x1024xbf16, #tpu.memory_space<vmem>>, vector<2x64xbf16>
    tpu.vector_store %arg4[%c0_68, %c448], %288 {strides = array<i32>} : memref<2x1024xbf16, #tpu.memory_space<vmem>>, vector<2x64xbf16>,
    %290 = vector.extract_strided_slice %3 {offsets = [0, 512], sizes = [2, 64], strides = [1, 1]} : vector<2x1024xf32> to vector<2x64xf32>
    %291 = vector.broadcast %190 : vector<1x64xf32> to vector<2x64xf32>
    %292 = arith.mulf %290, %291 : vector<2x64xf32>
    %293 = vector.broadcast %193 : vector<1x64xf32> to vector<2x64xf32>
    %294 = arith.addf %292, %293 : vector<2x64xf32>
    %cst_69 = arith.constant 0.000000e+00 : f32
    %295 = vector.broadcast %cst_69 : f32 to vector<2x64xf32>
    %296 = arith.cmpf ogt, %294, %295 : vector<2x64xf32>
    %cst_70 = arith.constant 2.000000e-01 : f32
    %297 = vector.broadcast %cst_70 : f32 to vector<2x64xf32>
    %298 = arith.mulf %297, %294 : vector<2x64xf32>
    %299 = arith.select %296, %294, %298 : vector<2x64xi1>, vector<2x64xf32>
    %300 = arith.truncf %299 : vector<2x64xf32> to vector<2x64xbf16>
    %c0_71 = arith.constant 0 : index
    %c512 = arith.constant 512 : index
    %301 = vector.load %arg4[%c0_71, %c512] : memref<2x1024xbf16, #tpu.memory_space<vmem>>, vector<2x64xbf16>
    tpu.vector_store %arg4[%c0_71, %c512], %300 {strides = array<i32>} : memref<2x1024xbf16, #tpu.memory_space<vmem>>, vector<2x64xbf16>,
    %302 = vector.extract_strided_slice %3 {offsets = [0, 576], sizes = [2, 64], strides = [1, 1]} : vector<2x1024xf32> to vector<2x64xf32>
    %303 = vector.broadcast %190 : vector<1x64xf32> to vector<2x64xf32>
    %304 = arith.mulf %302, %303 : vector<2x64xf32>
    %305 = vector.broadcast %193 : vector<1x64xf32> to vector<2x64xf32>
    %306 = arith.addf %304, %305 : vector<2x64xf32>
    %cst_72 = arith.constant 0.000000e+00 : f32
    %307 = vector.broadcast %cst_72 : f32 to vector<2x64xf32>
    %308 = arith.cmpf ogt, %306, %307 : vector<2x64xf32>
    %cst_73 = arith.constant 2.000000e-01 : f32
    %309 = vector.broadcast %cst_73 : f32 to vector<2x64xf32>
    %310 = arith.mulf %309, %306 : vector<2x64xf32>
    %311 = arith.select %308, %306, %310 : vector<2x64xi1>, vector<2x64xf32>
    %312 = arith.truncf %311 : vector<2x64xf32> to vector<2x64xbf16>
    %c0_74 = arith.constant 0 : index
    %c576 = arith.constant 576 : index
    %313 = vector.load %arg4[%c0_74, %c576] : memref<2x1024xbf16, #tpu.memory_space<vmem>>, vector<2x64xbf16>
    tpu.vector_store %arg4[%c0_74, %c576], %312 {strides = array<i32>} : memref<2x1024xbf16, #tpu.memory_space<vmem>>, vector<2x64xbf16>,
    %314 = vector.extract_strided_slice %3 {offsets = [0, 640], sizes = [2, 64], strides = [1, 1]} : vector<2x1024xf32> to vector<2x64xf32>
    %315 = vector.broadcast %190 : vector<1x64xf32> to vector<2x64xf32>
    %316 = arith.mulf %314, %315 : vector<2x64xf32>
    %317 = vector.broadcast %193 : vector<1x64xf32> to vector<2x64xf32>
    %318 = arith.addf %316, %317 : vector<2x64xf32>
    %cst_75 = arith.constant 0.000000e+00 : f32
    %319 = vector.broadcast %cst_75 : f32 to vector<2x64xf32>
    %320 = arith.cmpf ogt, %318, %319 : vector<2x64xf32>
    %cst_76 = arith.constant 2.000000e-01 : f32
    %321 = vector.broadcast %cst_76 : f32 to vector<2x64xf32>
    %322 = arith.mulf %321, %318 : vector<2x64xf32>
    %323 = arith.select %320, %318, %322 : vector<2x64xi1>, vector<2x64xf32>
    %324 = arith.truncf %323 : vector<2x64xf32> to vector<2x64xbf16>
    %c0_77 = arith.constant 0 : index
    %c640 = arith.constant 640 : index
    %325 = vector.load %arg4[%c0_77, %c640] : memref<2x1024xbf16, #tpu.memory_space<vmem>>, vector<2x64xbf16>
    tpu.vector_store %arg4[%c0_77, %c640], %324 {strides = array<i32>} : memref<2x1024xbf16, #tpu.memory_space<vmem>>, vector<2x64xbf16>,
    %326 = vector.extract_strided_slice %3 {offsets = [0, 704], sizes = [2, 64], strides = [1, 1]} : vector<2x1024xf32> to vector<2x64xf32>
    %327 = vector.broadcast %190 : vector<1x64xf32> to vector<2x64xf32>
    %328 = arith.mulf %326, %327 : vector<2x64xf32>
    %329 = vector.broadcast %193 : vector<1x64xf32> to vector<2x64xf32>
    %330 = arith.addf %328, %329 : vector<2x64xf32>
    %cst_78 = arith.constant 0.000000e+00 : f32
    %331 = vector.broadcast %cst_78 : f32 to vector<2x64xf32>
    %332 = arith.cmpf ogt, %330, %331 : vector<2x64xf32>
    %cst_79 = arith.constant 2.000000e-01 : f32
    %333 = vector.broadcast %cst_79 : f32 to vector<2x64xf32>
    %334 = arith.mulf %333, %330 : vector<2x64xf32>
    %335 = arith.select %332, %330, %334 : vector<2x64xi1>, vector<2x64xf32>
    %336 = arith.truncf %335 : vector<2x64xf32> to vector<2x64xbf16>
    %c0_80 = arith.constant 0 : index
    %c704 = arith.constant 704 : index
    %337 = vector.load %arg4[%c0_80, %c704] : memref<2x1024xbf16, #tpu.memory_space<vmem>>, vector<2x64xbf16>
    tpu.vector_store %arg4[%c0_80, %c704], %336 {strides = array<i32>} : memref<2x1024xbf16, #tpu.memory_space<vmem>>, vector<2x64xbf16>,
    %338 = vector.extract_strided_slice %3 {offsets = [0, 768], sizes = [2, 64], strides = [1, 1]} : vector<2x1024xf32> to vector<2x64xf32>
    %339 = vector.broadcast %190 : vector<1x64xf32> to vector<2x64xf32>
    %340 = arith.mulf %338, %339 : vector<2x64xf32>
    %341 = vector.broadcast %193 : vector<1x64xf32> to vector<2x64xf32>
    %342 = arith.addf %340, %341 : vector<2x64xf32>
    %cst_81 = arith.constant 0.000000e+00 : f32
    %343 = vector.broadcast %cst_81 : f32 to vector<2x64xf32>
    %344 = arith.cmpf ogt, %342, %343 : vector<2x64xf32>
    %cst_82 = arith.constant 2.000000e-01 : f32
    %345 = vector.broadcast %cst_82 : f32 to vector<2x64xf32>
    %346 = arith.mulf %345, %342 : vector<2x64xf32>
    %347 = arith.select %344, %342, %346 : vector<2x64xi1>, vector<2x64xf32>
    %348 = arith.truncf %347 : vector<2x64xf32> to vector<2x64xbf16>
    %c0_83 = arith.constant 0 : index
    %c768 = arith.constant 768 : index
    %349 = vector.load %arg4[%c0_83, %c768] : memref<2x1024xbf16, #tpu.memory_space<vmem>>, vector<2x64xbf16>
    tpu.vector_store %arg4[%c0_83, %c768], %348 {strides = array<i32>} : memref<2x1024xbf16, #tpu.memory_space<vmem>>, vector<2x64xbf16>,
    %350 = vector.extract_strided_slice %3 {offsets = [0, 832], sizes = [2, 64], strides = [1, 1]} : vector<2x1024xf32> to vector<2x64xf32>
    %351 = vector.broadcast %190 : vector<1x64xf32> to vector<2x64xf32>
    %352 = arith.mulf %350, %351 : vector<2x64xf32>
    %353 = vector.broadcast %193 : vector<1x64xf32> to vector<2x64xf32>
    %354 = arith.addf %352, %353 : vector<2x64xf32>
    %cst_84 = arith.constant 0.000000e+00 : f32
    %355 = vector.broadcast %cst_84 : f32 to vector<2x64xf32>
    %356 = arith.cmpf ogt, %354, %355 : vector<2x64xf32>
    %cst_85 = arith.constant 2.000000e-01 : f32
    %357 = vector.broadcast %cst_85 : f32 to vector<2x64xf32>
    %358 = arith.mulf %357, %354 : vector<2x64xf32>
    %359 = arith.select %356, %354, %358 : vector<2x64xi1>, vector<2x64xf32>
    %360 = arith.truncf %359 : vector<2x64xf32> to vector<2x64xbf16>
    %c0_86 = arith.constant 0 : index
    %c832 = arith.constant 832 : index
    %361 = vector.load %arg4[%c0_86, %c832] : memref<2x1024xbf16, #tpu.memory_space<vmem>>, vector<2x64xbf16>
    tpu.vector_store %arg4[%c0_86, %c832], %360 {strides = array<i32>} : memref<2x1024xbf16, #tpu.memory_space<vmem>>, vector<2x64xbf16>,
    %362 = vector.extract_strided_slice %3 {offsets = [0, 896], sizes = [2, 64], strides = [1, 1]} : vector<2x1024xf32> to vector<2x64xf32>
    %363 = vector.broadcast %190 : vector<1x64xf32> to vector<2x64xf32>
    %364 = arith.mulf %362, %363 : vector<2x64xf32>
    %365 = vector.broadcast %193 : vector<1x64xf32> to vector<2x64xf32>
    %366 = arith.addf %364, %365 : vector<2x64xf32>
    %cst_87 = arith.constant 0.000000e+00 : f32
    %367 = vector.broadcast %cst_87 : f32 to vector<2x64xf32>
    %368 = arith.cmpf ogt, %366, %367 : vector<2x64xf32>
    %cst_88 = arith.constant 2.000000e-01 : f32
    %369 = vector.broadcast %cst_88 : f32 to vector<2x64xf32>
    %370 = arith.mulf %369, %366 : vector<2x64xf32>
    %371 = arith.select %368, %366, %370 : vector<2x64xi1>, vector<2x64xf32>
    %372 = arith.truncf %371 : vector<2x64xf32> to vector<2x64xbf16>
    %c0_89 = arith.constant 0 : index
    %c896 = arith.constant 896 : index
    %373 = vector.load %arg4[%c0_89, %c896] : memref<2x1024xbf16, #tpu.memory_space<vmem>>, vector<2x64xbf16>
    tpu.vector_store %arg4[%c0_89, %c896], %372 {strides = array<i32>} : memref<2x1024xbf16, #tpu.memory_space<vmem>>, vector<2x64xbf16>,
    %374 = vector.extract_strided_slice %3 {offsets = [0, 960], sizes = [2, 64], strides = [1, 1]} : vector<2x1024xf32> to vector<2x64xf32>
    %375 = vector.broadcast %190 : vector<1x64xf32> to vector<2x64xf32>
    %376 = arith.mulf %374, %375 : vector<2x64xf32>
    %377 = vector.broadcast %193 : vector<1x64xf32> to vector<2x64xf32>
    %378 = arith.addf %376, %377 : vector<2x64xf32>
    %cst_90 = arith.constant 0.000000e+00 : f32
    %379 = vector.broadcast %cst_90 : f32 to vector<2x64xf32>
    %380 = arith.cmpf ogt, %378, %379 : vector<2x64xf32>
    %cst_91 = arith.constant 2.000000e-01 : f32
    %381 = vector.broadcast %cst_91 : f32 to vector<2x64xf32>
    %382 = arith.mulf %381, %378 : vector<2x64xf32>
    %383 = arith.select %380, %378, %382 : vector<2x64xi1>, vector<2x64xf32>
    %384 = arith.truncf %383 : vector<2x64xf32> to vector<2x64xbf16>
    %c0_92 = arith.constant 0 : index
    %c960 = arith.constant 960 : index
    %385 = vector.load %arg4[%c0_92, %c960] : memref<2x1024xbf16, #tpu.memory_space<vmem>>, vector<2x64xbf16>
    tpu.vector_store %arg4[%c0_92, %c960], %384 {strides = array<i32>} : memref<2x1024xbf16, #tpu.memory_space<vmem>>, vector<2x64xbf16>,
    return
  }
}

module attributes {stable_mosaic.version = 11 : i64} {
  func.func @block_kernel(%arg0: memref<64x42xbf16, #tpu.memory_space<vmem>>, %arg1: memref<4x32xbf16, #tpu.memory_space<vmem>>, %arg2: memref<4x32x256xbf16, #tpu.memory_space<vmem>>, %arg3: memref<32x1xf32, #tpu.memory_space<vmem>>, %arg4: memref<32x1xf32, #tpu.memory_space<vmem>>, %arg5: memref<4x32x32xbf16, #tpu.memory_space<vmem>>) attributes {dimension_semantics = [], scalar_prefetch = 0 : i64, scratch_operands = 0 : i64, tpu.core_type = #tpu.core_type<tc>} {
    %c0 = arith.constant 0 : index
    %c0_0 = arith.constant 0 : index
    %0 = vector.load %arg0[%c0, %c0_0] : memref<64x42xbf16, #tpu.memory_space<vmem>>, vector<64x42xbf16>
    %c0_1 = arith.constant 0 : index
    %c0_2 = arith.constant 0 : index
    %1 = vector.load %arg1[%c0_1, %c0_2] : memref<4x32xbf16, #tpu.memory_space<vmem>>, vector<4x32xbf16>
    %c0_3 = arith.constant 0 : index
    %c0_4 = arith.constant 0 : index
    %c0_5 = arith.constant 0 : index
    %2 = vector.load %arg2[%c0_3, %c0_4, %c0_5] : memref<4x32x256xbf16, #tpu.memory_space<vmem>>, vector<1x32x256xbf16>
    %3 = vector.shape_cast %2 : vector<1x32x256xbf16> to vector<32x256xbf16>
    %cst = arith.constant 0.000000e+00 : f32
    %4 = vector.broadcast %cst : f32 to vector<32x32xf32>
    %5 = vector.extract_strided_slice %3 {offsets = [0, 0], sizes = [32, 64], strides = [1, 1]} : vector<32x256xbf16> to vector<32x64xbf16>
    %6 = vector.extract_strided_slice %0 {offsets = [0, 0], sizes = [64, 32], strides = [1, 1]} : vector<64x42xbf16> to vector<64x32xbf16>
    %7 = vector.extract_strided_slice %1 {offsets = [0, 0], sizes = [1, 32], strides = [1, 1]} : vector<4x32xbf16> to vector<1x32xbf16>
    %8 = vector.extract_strided_slice %1 {offsets = [2, 0], sizes = [1, 32], strides = [1, 1]} : vector<4x32xbf16> to vector<1x32xbf16>
    %9 = arith.mulf %7, %8 : vector<1x32xbf16>
    %10 = vector.broadcast %9 : vector<1x32xbf16> to vector<64x32xbf16>
    %11 = arith.mulf %6, %10 : vector<64x32xbf16>
    %cst_6 = arith.constant dense<0.000000e+00> : vector<32x32xf32>
    %12 = tpu.matmul %5, %11, %cst_6 {dimension_numbers = #tpu.dot_dimension_numbers<[1], [0], [0], [1], [0, 0, 1, 1], [], []>} : vector<32x64xbf16>, vector<64x32xbf16>, vector<32x32xf32> -> vector<32x32xf32>
    %13 = arith.addf %4, %12 : vector<32x32xf32>
    %14 = vector.extract_strided_slice %3 {offsets = [0, 64], sizes = [32, 64], strides = [1, 1]} : vector<32x256xbf16> to vector<32x64xbf16>
    %15 = vector.extract_strided_slice %0 {offsets = [0, 1], sizes = [64, 32], strides = [1, 1]} : vector<64x42xbf16> to vector<64x32xbf16>
    %16 = vector.extract_strided_slice %1 {offsets = [0, 0], sizes = [1, 32], strides = [1, 1]} : vector<4x32xbf16> to vector<1x32xbf16>
    %17 = vector.broadcast %16 : vector<1x32xbf16> to vector<64x32xbf16>
    %18 = arith.mulf %15, %17 : vector<64x32xbf16>
    %cst_7 = arith.constant dense<0.000000e+00> : vector<32x32xf32>
    %19 = tpu.matmul %14, %18, %cst_7 {dimension_numbers = #tpu.dot_dimension_numbers<[1], [0], [0], [1], [0, 0, 1, 1], [], []>} : vector<32x64xbf16>, vector<64x32xbf16>, vector<32x32xf32> -> vector<32x32xf32>
    %20 = arith.addf %13, %19 : vector<32x32xf32>
    %21 = vector.extract_strided_slice %3 {offsets = [0, 128], sizes = [32, 64], strides = [1, 1]} : vector<32x256xbf16> to vector<32x64xbf16>
    %22 = vector.extract_strided_slice %0 {offsets = [0, 4], sizes = [64, 32], strides = [1, 1]} : vector<64x42xbf16> to vector<64x32xbf16>
    %23 = vector.extract_strided_slice %1 {offsets = [2, 0], sizes = [1, 32], strides = [1, 1]} : vector<4x32xbf16> to vector<1x32xbf16>
    %24 = vector.broadcast %23 : vector<1x32xbf16> to vector<64x32xbf16>
    %25 = arith.mulf %22, %24 : vector<64x32xbf16>
    %cst_8 = arith.constant dense<0.000000e+00> : vector<32x32xf32>
    %26 = tpu.matmul %21, %25, %cst_8 {dimension_numbers = #tpu.dot_dimension_numbers<[1], [0], [0], [1], [0, 0, 1, 1], [], []>} : vector<32x64xbf16>, vector<64x32xbf16>, vector<32x32xf32> -> vector<32x32xf32>
    %27 = arith.addf %20, %26 : vector<32x32xf32>
    %28 = vector.extract_strided_slice %3 {offsets = [0, 192], sizes = [32, 64], strides = [1, 1]} : vector<32x256xbf16> to vector<32x64xbf16>
    %29 = vector.extract_strided_slice %0 {offsets = [0, 5], sizes = [64, 32], strides = [1, 1]} : vector<64x42xbf16> to vector<64x32xbf16>
    %cst_9 = arith.constant dense<0.000000e+00> : vector<32x32xf32>
    %30 = tpu.matmul %28, %29, %cst_9 {dimension_numbers = #tpu.dot_dimension_numbers<[1], [0], [0], [1], [0, 0, 1, 1], [], []>} : vector<32x64xbf16>, vector<64x32xbf16>, vector<32x32xf32> -> vector<32x32xf32>
    %31 = arith.addf %27, %30 : vector<32x32xf32>
    %c1 = arith.constant 1 : index
    %c0_10 = arith.constant 0 : index
    %c0_11 = arith.constant 0 : index
    %32 = vector.load %arg2[%c1, %c0_10, %c0_11] : memref<4x32x256xbf16, #tpu.memory_space<vmem>>, vector<1x32x256xbf16>
    %33 = vector.shape_cast %32 : vector<1x32x256xbf16> to vector<32x256xbf16>
    %cst_12 = arith.constant 0.000000e+00 : f32
    %34 = vector.broadcast %cst_12 : f32 to vector<32x32xf32>
    %35 = vector.extract_strided_slice %33 {offsets = [0, 0], sizes = [32, 64], strides = [1, 1]} : vector<32x256xbf16> to vector<32x64xbf16>
    %36 = vector.extract_strided_slice %0 {offsets = [0, 1], sizes = [64, 32], strides = [1, 1]} : vector<64x42xbf16> to vector<64x32xbf16>
    %37 = vector.extract_strided_slice %1 {offsets = [0, 0], sizes = [1, 32], strides = [1, 1]} : vector<4x32xbf16> to vector<1x32xbf16>
    %38 = vector.broadcast %37 : vector<1x32xbf16> to vector<64x32xbf16>
    %39 = arith.mulf %36, %38 : vector<64x32xbf16>
    %cst_13 = arith.constant dense<0.000000e+00> : vector<32x32xf32>
    %40 = tpu.matmul %35, %39, %cst_13 {dimension_numbers = #tpu.dot_dimension_numbers<[1], [0], [0], [1], [0, 0, 1, 1], [], []>} : vector<32x64xbf16>, vector<64x32xbf16>, vector<32x32xf32> -> vector<32x32xf32>
    %41 = arith.addf %34, %40 : vector<32x32xf32>
    %42 = vector.extract_strided_slice %33 {offsets = [0, 64], sizes = [32, 64], strides = [1, 1]} : vector<32x256xbf16> to vector<32x64xbf16>
    %43 = vector.extract_strided_slice %0 {offsets = [0, 2], sizes = [64, 32], strides = [1, 1]} : vector<64x42xbf16> to vector<64x32xbf16>
    %44 = vector.extract_strided_slice %1 {offsets = [0, 0], sizes = [1, 32], strides = [1, 1]} : vector<4x32xbf16> to vector<1x32xbf16>
    %45 = vector.extract_strided_slice %1 {offsets = [3, 0], sizes = [1, 32], strides = [1, 1]} : vector<4x32xbf16> to vector<1x32xbf16>
    %46 = arith.mulf %44, %45 : vector<1x32xbf16>
    %47 = vector.broadcast %46 : vector<1x32xbf16> to vector<64x32xbf16>
    %48 = arith.mulf %43, %47 : vector<64x32xbf16>
    %cst_14 = arith.constant dense<0.000000e+00> : vector<32x32xf32>
    %49 = tpu.matmul %42, %48, %cst_14 {dimension_numbers = #tpu.dot_dimension_numbers<[1], [0], [0], [1], [0, 0, 1, 1], [], []>} : vector<32x64xbf16>, vector<64x32xbf16>, vector<32x32xf32> -> vector<32x32xf32>
    %50 = arith.addf %41, %49 : vector<32x32xf32>
    %51 = vector.extract_strided_slice %33 {offsets = [0, 128], sizes = [32, 64], strides = [1, 1]} : vector<32x256xbf16> to vector<32x64xbf16>
    %52 = vector.extract_strided_slice %0 {offsets = [0, 5], sizes = [64, 32], strides = [1, 1]} : vector<64x42xbf16> to vector<64x32xbf16>
    %cst_15 = arith.constant dense<0.000000e+00> : vector<32x32xf32>
    %53 = tpu.matmul %51, %52, %cst_15 {dimension_numbers = #tpu.dot_dimension_numbers<[1], [0], [0], [1], [0, 0, 1, 1], [], []>} : vector<32x64xbf16>, vector<64x32xbf16>, vector<32x32xf32> -> vector<32x32xf32>
    %54 = arith.addf %50, %53 : vector<32x32xf32>
    %55 = vector.extract_strided_slice %33 {offsets = [0, 192], sizes = [32, 64], strides = [1, 1]} : vector<32x256xbf16> to vector<32x64xbf16>
    %56 = vector.extract_strided_slice %0 {offsets = [0, 6], sizes = [64, 32], strides = [1, 1]} : vector<64x42xbf16> to vector<64x32xbf16>
    %57 = vector.extract_strided_slice %1 {offsets = [3, 0], sizes = [1, 32], strides = [1, 1]} : vector<4x32xbf16> to vector<1x32xbf16>
    %58 = vector.broadcast %57 : vector<1x32xbf16> to vector<64x32xbf16>
    %59 = arith.mulf %56, %58 : vector<64x32xbf16>
    %cst_16 = arith.constant dense<0.000000e+00> : vector<32x32xf32>
    %60 = tpu.matmul %55, %59, %cst_16 {dimension_numbers = #tpu.dot_dimension_numbers<[1], [0], [0], [1], [0, 0, 1, 1], [], []>} : vector<32x64xbf16>, vector<64x32xbf16>, vector<32x32xf32> -> vector<32x32xf32>
    %61 = arith.addf %54, %60 : vector<32x32xf32>
    %c2 = arith.constant 2 : index
    %c0_17 = arith.constant 0 : index
    %c0_18 = arith.constant 0 : index
    %62 = vector.load %arg2[%c2, %c0_17, %c0_18] : memref<4x32x256xbf16, #tpu.memory_space<vmem>>, vector<1x32x256xbf16>
    %63 = vector.shape_cast %62 : vector<1x32x256xbf16> to vector<32x256xbf16>
    %cst_19 = arith.constant 0.000000e+00 : f32
    %64 = vector.broadcast %cst_19 : f32 to vector<32x32xf32>
    %65 = vector.extract_strided_slice %63 {offsets = [0, 0], sizes = [32, 64], strides = [1, 1]} : vector<32x256xbf16> to vector<32x64xbf16>
    %66 = vector.extract_strided_slice %0 {offsets = [0, 4], sizes = [64, 32], strides = [1, 1]} : vector<64x42xbf16> to vector<64x32xbf16>
    %67 = vector.extract_strided_slice %1 {offsets = [2, 0], sizes = [1, 32], strides = [1, 1]} : vector<4x32xbf16> to vector<1x32xbf16>
    %68 = vector.broadcast %67 : vector<1x32xbf16> to vector<64x32xbf16>
    %69 = arith.mulf %66, %68 : vector<64x32xbf16>
    %cst_20 = arith.constant dense<0.000000e+00> : vector<32x32xf32>
    %70 = tpu.matmul %65, %69, %cst_20 {dimension_numbers = #tpu.dot_dimension_numbers<[1], [0], [0], [1], [0, 0, 1, 1], [], []>} : vector<32x64xbf16>, vector<64x32xbf16>, vector<32x32xf32> -> vector<32x32xf32>
    %71 = arith.addf %64, %70 : vector<32x32xf32>
    %72 = vector.extract_strided_slice %63 {offsets = [0, 64], sizes = [32, 64], strides = [1, 1]} : vector<32x256xbf16> to vector<32x64xbf16>
    %73 = vector.extract_strided_slice %0 {offsets = [0, 5], sizes = [64, 32], strides = [1, 1]} : vector<64x42xbf16> to vector<64x32xbf16>
    %cst_21 = arith.constant dense<0.000000e+00> : vector<32x32xf32>
    %74 = tpu.matmul %72, %73, %cst_21 {dimension_numbers = #tpu.dot_dimension_numbers<[1], [0], [0], [1], [0, 0, 1, 1], [], []>} : vector<32x64xbf16>, vector<64x32xbf16>, vector<32x32xf32> -> vector<32x32xf32>
    %75 = arith.addf %71, %74 : vector<32x32xf32>
    %76 = vector.extract_strided_slice %63 {offsets = [0, 128], sizes = [32, 64], strides = [1, 1]} : vector<32x256xbf16> to vector<32x64xbf16>
    %77 = vector.extract_strided_slice %0 {offsets = [0, 8], sizes = [64, 32], strides = [1, 1]} : vector<64x42xbf16> to vector<64x32xbf16>
    %78 = vector.extract_strided_slice %1 {offsets = [1, 0], sizes = [1, 32], strides = [1, 1]} : vector<4x32xbf16> to vector<1x32xbf16>
    %79 = vector.extract_strided_slice %1 {offsets = [2, 0], sizes = [1, 32], strides = [1, 1]} : vector<4x32xbf16> to vector<1x32xbf16>
    %80 = arith.mulf %78, %79 : vector<1x32xbf16>
    %81 = vector.broadcast %80 : vector<1x32xbf16> to vector<64x32xbf16>
    %82 = arith.mulf %77, %81 : vector<64x32xbf16>
    %cst_22 = arith.constant dense<0.000000e+00> : vector<32x32xf32>
    %83 = tpu.matmul %76, %82, %cst_22 {dimension_numbers = #tpu.dot_dimension_numbers<[1], [0], [0], [1], [0, 0, 1, 1], [], []>} : vector<32x64xbf16>, vector<64x32xbf16>, vector<32x32xf32> -> vector<32x32xf32>
    %84 = arith.addf %75, %83 : vector<32x32xf32>
    %85 = vector.extract_strided_slice %63 {offsets = [0, 192], sizes = [32, 64], strides = [1, 1]} : vector<32x256xbf16> to vector<32x64xbf16>
    %86 = vector.extract_strided_slice %0 {offsets = [0, 9], sizes = [64, 32], strides = [1, 1]} : vector<64x42xbf16> to vector<64x32xbf16>
    %87 = vector.extract_strided_slice %1 {offsets = [1, 0], sizes = [1, 32], strides = [1, 1]} : vector<4x32xbf16> to vector<1x32xbf16>
    %88 = vector.broadcast %87 : vector<1x32xbf16> to vector<64x32xbf16>
    %89 = arith.mulf %86, %88 : vector<64x32xbf16>
    %cst_23 = arith.constant dense<0.000000e+00> : vector<32x32xf32>
    %90 = tpu.matmul %85, %89, %cst_23 {dimension_numbers = #tpu.dot_dimension_numbers<[1], [0], [0], [1], [0, 0, 1, 1], [], []>} : vector<32x64xbf16>, vector<64x32xbf16>, vector<32x32xf32> -> vector<32x32xf32>
    %91 = arith.addf %84, %90 : vector<32x32xf32>
    %c3 = arith.constant 3 : index
    %c0_24 = arith.constant 0 : index
    %c0_25 = arith.constant 0 : index
    %92 = vector.load %arg2[%c3, %c0_24, %c0_25] : memref<4x32x256xbf16, #tpu.memory_space<vmem>>, vector<1x32x256xbf16>
    %93 = vector.shape_cast %92 : vector<1x32x256xbf16> to vector<32x256xbf16>
    %cst_26 = arith.constant 0.000000e+00 : f32
    %94 = vector.broadcast %cst_26 : f32 to vector<32x32xf32>
    %95 = vector.extract_strided_slice %93 {offsets = [0, 0], sizes = [32, 64], strides = [1, 1]} : vector<32x256xbf16> to vector<32x64xbf16>
    %96 = vector.extract_strided_slice %0 {offsets = [0, 5], sizes = [64, 32], strides = [1, 1]} : vector<64x42xbf16> to vector<64x32xbf16>
    %cst_27 = arith.constant dense<0.000000e+00> : vector<32x32xf32>
    %97 = tpu.matmul %95, %96, %cst_27 {dimension_numbers = #tpu.dot_dimension_numbers<[1], [0], [0], [1], [0, 0, 1, 1], [], []>} : vector<32x64xbf16>, vector<64x32xbf16>, vector<32x32xf32> -> vector<32x32xf32>
    %98 = arith.addf %94, %97 : vector<32x32xf32>
    %99 = vector.extract_strided_slice %93 {offsets = [0, 64], sizes = [32, 64], strides = [1, 1]} : vector<32x256xbf16> to vector<32x64xbf16>
    %100 = vector.extract_strided_slice %0 {offsets = [0, 6], sizes = [64, 32], strides = [1, 1]} : vector<64x42xbf16> to vector<64x32xbf16>
    %101 = vector.extract_strided_slice %1 {offsets = [3, 0], sizes = [1, 32], strides = [1, 1]} : vector<4x32xbf16> to vector<1x32xbf16>
    %102 = vector.broadcast %101 : vector<1x32xbf16> to vector<64x32xbf16>
    %103 = arith.mulf %100, %102 : vector<64x32xbf16>
    %cst_28 = arith.constant dense<0.000000e+00> : vector<32x32xf32>
    %104 = tpu.matmul %99, %103, %cst_28 {dimension_numbers = #tpu.dot_dimension_numbers<[1], [0], [0], [1], [0, 0, 1, 1], [], []>} : vector<32x64xbf16>, vector<64x32xbf16>, vector<32x32xf32> -> vector<32x32xf32>
    %105 = arith.addf %98, %104 : vector<32x32xf32>
    %106 = vector.extract_strided_slice %93 {offsets = [0, 128], sizes = [32, 64], strides = [1, 1]} : vector<32x256xbf16> to vector<32x64xbf16>
    %107 = vector.extract_strided_slice %0 {offsets = [0, 9], sizes = [64, 32], strides = [1, 1]} : vector<64x42xbf16> to vector<64x32xbf16>
    %108 = vector.extract_strided_slice %1 {offsets = [1, 0], sizes = [1, 32], strides = [1, 1]} : vector<4x32xbf16> to vector<1x32xbf16>
    %109 = vector.broadcast %108 : vector<1x32xbf16> to vector<64x32xbf16>
    %110 = arith.mulf %107, %109 : vector<64x32xbf16>
    %cst_29 = arith.constant dense<0.000000e+00> : vector<32x32xf32>
    %111 = tpu.matmul %106, %110, %cst_29 {dimension_numbers = #tpu.dot_dimension_numbers<[1], [0], [0], [1], [0, 0, 1, 1], [], []>} : vector<32x64xbf16>, vector<64x32xbf16>, vector<32x32xf32> -> vector<32x32xf32>
    %112 = arith.addf %105, %111 : vector<32x32xf32>
    %113 = vector.extract_strided_slice %93 {offsets = [0, 192], sizes = [32, 64], strides = [1, 1]} : vector<32x256xbf16> to vector<32x64xbf16>
    %114 = vector.extract_strided_slice %0 {offsets = [0, 10], sizes = [64, 32], strides = [1, 1]} : vector<64x42xbf16> to vector<64x32xbf16>
    %115 = vector.extract_strided_slice %1 {offsets = [1, 0], sizes = [1, 32], strides = [1, 1]} : vector<4x32xbf16> to vector<1x32xbf16>
    %116 = vector.extract_strided_slice %1 {offsets = [3, 0], sizes = [1, 32], strides = [1, 1]} : vector<4x32xbf16> to vector<1x32xbf16>
    %117 = arith.mulf %115, %116 : vector<1x32xbf16>
    %118 = vector.broadcast %117 : vector<1x32xbf16> to vector<64x32xbf16>
    %119 = arith.mulf %114, %118 : vector<64x32xbf16>
    %cst_30 = arith.constant dense<0.000000e+00> : vector<32x32xf32>
    %120 = tpu.matmul %113, %119, %cst_30 {dimension_numbers = #tpu.dot_dimension_numbers<[1], [0], [0], [1], [0, 0, 1, 1], [], []>} : vector<32x64xbf16>, vector<64x32xbf16>, vector<32x32xf32> -> vector<32x32xf32>
    %121 = arith.addf %112, %120 : vector<32x32xf32>
    %cst_31 = arith.constant 0.000000e+00 : f32
    %122 = vector.broadcast %cst_31 : f32 to vector<32x1xf32>
    %cst_32 = arith.constant dense<0.000000e+00> : vector<32xf32>
    %123 = vector.multi_reduction <add>, %31, %cst_32 [1] : vector<32x32xf32> to vector<32xf32>
    %124 = vector.shape_cast %123 : vector<32xf32> to vector<32x1xf32>
    %125 = arith.addf %122, %124 : vector<32x1xf32>
    %cst_33 = arith.constant dense<0.000000e+00> : vector<32xf32>
    %126 = vector.multi_reduction <add>, %61, %cst_33 [1] : vector<32x32xf32> to vector<32xf32>
    %127 = vector.shape_cast %126 : vector<32xf32> to vector<32x1xf32>
    %128 = arith.addf %125, %127 : vector<32x1xf32>
    %cst_34 = arith.constant dense<0.000000e+00> : vector<32xf32>
    %129 = vector.multi_reduction <add>, %91, %cst_34 [1] : vector<32x32xf32> to vector<32xf32>
    %130 = vector.shape_cast %129 : vector<32xf32> to vector<32x1xf32>
    %131 = arith.addf %128, %130 : vector<32x1xf32>
    %cst_35 = arith.constant dense<0.000000e+00> : vector<32xf32>
    %132 = vector.multi_reduction <add>, %121, %cst_35 [1] : vector<32x32xf32> to vector<32xf32>
    %133 = vector.shape_cast %132 : vector<32xf32> to vector<32x1xf32>
    %134 = arith.addf %131, %133 : vector<32x1xf32>
    %cst_36 = arith.constant 1.280000e+02 : f32
    %135 = vector.broadcast %cst_36 : f32 to vector<32x1xf32>
    %136 = arith.divf %134, %135 : vector<32x1xf32>
    %cst_37 = arith.constant 0.000000e+00 : f32
    %137 = vector.broadcast %cst_37 : f32 to vector<32x1xf32>
    %138 = vector.broadcast %136 : vector<32x1xf32> to vector<32x32xf32>
    %139 = arith.subf %31, %138 : vector<32x32xf32>
    %140 = arith.mulf %139, %139 : vector<32x32xf32>
    %cst_38 = arith.constant dense<0.000000e+00> : vector<32xf32>
    %141 = vector.multi_reduction <add>, %140, %cst_38 [1] : vector<32x32xf32> to vector<32xf32>
    %142 = vector.shape_cast %141 : vector<32xf32> to vector<32x1xf32>
    %143 = arith.addf %137, %142 : vector<32x1xf32>
    %144 = vector.broadcast %136 : vector<32x1xf32> to vector<32x32xf32>
    %145 = arith.subf %61, %144 : vector<32x32xf32>
    %146 = arith.mulf %145, %145 : vector<32x32xf32>
    %cst_39 = arith.constant dense<0.000000e+00> : vector<32xf32>
    %147 = vector.multi_reduction <add>, %146, %cst_39 [1] : vector<32x32xf32> to vector<32xf32>
    %148 = vector.shape_cast %147 : vector<32xf32> to vector<32x1xf32>
    %149 = arith.addf %143, %148 : vector<32x1xf32>
    %150 = vector.broadcast %136 : vector<32x1xf32> to vector<32x32xf32>
    %151 = arith.subf %91, %150 : vector<32x32xf32>
    %152 = arith.mulf %151, %151 : vector<32x32xf32>
    %cst_40 = arith.constant dense<0.000000e+00> : vector<32xf32>
    %153 = vector.multi_reduction <add>, %152, %cst_40 [1] : vector<32x32xf32> to vector<32xf32>
    %154 = vector.shape_cast %153 : vector<32xf32> to vector<32x1xf32>
    %155 = arith.addf %149, %154 : vector<32x1xf32>
    %156 = vector.broadcast %136 : vector<32x1xf32> to vector<32x32xf32>
    %157 = arith.subf %121, %156 : vector<32x32xf32>
    %158 = arith.mulf %157, %157 : vector<32x32xf32>
    %cst_41 = arith.constant dense<0.000000e+00> : vector<32xf32>
    %159 = vector.multi_reduction <add>, %158, %cst_41 [1] : vector<32x32xf32> to vector<32xf32>
    %160 = vector.shape_cast %159 : vector<32xf32> to vector<32x1xf32>
    %161 = arith.addf %155, %160 : vector<32x1xf32>
    %cst_42 = arith.constant 1.280000e+02 : f32
    %162 = vector.broadcast %cst_42 : f32 to vector<32x1xf32>
    %163 = arith.divf %161, %162 : vector<32x1xf32>
    %c0_43 = arith.constant 0 : index
    %c0_44 = arith.constant 0 : index
    %164 = vector.load %arg3[%c0_43, %c0_44] : memref<32x1xf32, #tpu.memory_space<vmem>>, vector<32x1xf32>
    %cst_45 = arith.constant 9.99999974E-6 : f32
    %165 = vector.broadcast %cst_45 : f32 to vector<32x1xf32>
    %166 = arith.addf %163, %165 : vector<32x1xf32>
    %167 = math.rsqrt %166 : vector<32x1xf32>
    %168 = arith.mulf %164, %167 : vector<32x1xf32>
    %c0_46 = arith.constant 0 : index
    %c0_47 = arith.constant 0 : index
    %169 = vector.load %arg4[%c0_46, %c0_47] : memref<32x1xf32, #tpu.memory_space<vmem>>, vector<32x1xf32>
    %170 = arith.mulf %136, %168 : vector<32x1xf32>
    %171 = arith.subf %169, %170 : vector<32x1xf32>
    %172 = vector.broadcast %168 : vector<32x1xf32> to vector<32x32xf32>
    %173 = arith.mulf %31, %172 : vector<32x32xf32>
    %174 = vector.broadcast %171 : vector<32x1xf32> to vector<32x32xf32>
    %175 = arith.addf %173, %174 : vector<32x32xf32>
    %cst_48 = arith.constant 0.000000e+00 : f32
    %176 = vector.broadcast %cst_48 : f32 to vector<32x32xf32>
    %177 = arith.cmpf ogt, %175, %176 : vector<32x32xf32>
    %cst_49 = arith.constant 2.000000e-01 : f32
    %178 = vector.broadcast %cst_49 : f32 to vector<32x32xf32>
    %179 = arith.mulf %178, %175 : vector<32x32xf32>
    %180 = arith.select %177, %175, %179 : vector<32x32xi1>, vector<32x32xf32>
    %181 = arith.truncf %180 : vector<32x32xf32> to vector<32x32xbf16>
    %c0_50 = arith.constant 0 : index
    %c0_51 = arith.constant 0 : index
    %c0_52 = arith.constant 0 : index
    %182 = vector.load %arg5[%c0_50, %c0_51, %c0_52] : memref<4x32x32xbf16, #tpu.memory_space<vmem>>, vector<1x32x32xbf16>
    %183 = vector.shape_cast %182 : vector<1x32x32xbf16> to vector<32x32xbf16>
    %184 = vector.shape_cast %181 : vector<32x32xbf16> to vector<1x32x32xbf16>
    tpu.vector_store %arg5[%c0_50, %c0_51, %c0_52], %184 {strides = array<i32>} : memref<4x32x32xbf16, #tpu.memory_space<vmem>>, vector<1x32x32xbf16>,
    %185 = vector.broadcast %168 : vector<32x1xf32> to vector<32x32xf32>
    %186 = arith.mulf %61, %185 : vector<32x32xf32>
    %187 = vector.broadcast %171 : vector<32x1xf32> to vector<32x32xf32>
    %188 = arith.addf %186, %187 : vector<32x32xf32>
    %cst_53 = arith.constant 0.000000e+00 : f32
    %189 = vector.broadcast %cst_53 : f32 to vector<32x32xf32>
    %190 = arith.cmpf ogt, %188, %189 : vector<32x32xf32>
    %cst_54 = arith.constant 2.000000e-01 : f32
    %191 = vector.broadcast %cst_54 : f32 to vector<32x32xf32>
    %192 = arith.mulf %191, %188 : vector<32x32xf32>
    %193 = arith.select %190, %188, %192 : vector<32x32xi1>, vector<32x32xf32>
    %194 = arith.truncf %193 : vector<32x32xf32> to vector<32x32xbf16>
    %c1_55 = arith.constant 1 : index
    %c0_56 = arith.constant 0 : index
    %c0_57 = arith.constant 0 : index
    %195 = vector.load %arg5[%c1_55, %c0_56, %c0_57] : memref<4x32x32xbf16, #tpu.memory_space<vmem>>, vector<1x32x32xbf16>
    %196 = vector.shape_cast %195 : vector<1x32x32xbf16> to vector<32x32xbf16>
    %197 = vector.shape_cast %194 : vector<32x32xbf16> to vector<1x32x32xbf16>
    tpu.vector_store %arg5[%c1_55, %c0_56, %c0_57], %197 {strides = array<i32>} : memref<4x32x32xbf16, #tpu.memory_space<vmem>>, vector<1x32x32xbf16>,
    %198 = vector.broadcast %168 : vector<32x1xf32> to vector<32x32xf32>
    %199 = arith.mulf %91, %198 : vector<32x32xf32>
    %200 = vector.broadcast %171 : vector<32x1xf32> to vector<32x32xf32>
    %201 = arith.addf %199, %200 : vector<32x32xf32>
    %cst_58 = arith.constant 0.000000e+00 : f32
    %202 = vector.broadcast %cst_58 : f32 to vector<32x32xf32>
    %203 = arith.cmpf ogt, %201, %202 : vector<32x32xf32>
    %cst_59 = arith.constant 2.000000e-01 : f32
    %204 = vector.broadcast %cst_59 : f32 to vector<32x32xf32>
    %205 = arith.mulf %204, %201 : vector<32x32xf32>
    %206 = arith.select %203, %201, %205 : vector<32x32xi1>, vector<32x32xf32>
    %207 = arith.truncf %206 : vector<32x32xf32> to vector<32x32xbf16>
    %c2_60 = arith.constant 2 : index
    %c0_61 = arith.constant 0 : index
    %c0_62 = arith.constant 0 : index
    %208 = vector.load %arg5[%c2_60, %c0_61, %c0_62] : memref<4x32x32xbf16, #tpu.memory_space<vmem>>, vector<1x32x32xbf16>
    %209 = vector.shape_cast %208 : vector<1x32x32xbf16> to vector<32x32xbf16>
    %210 = vector.shape_cast %207 : vector<32x32xbf16> to vector<1x32x32xbf16>
    tpu.vector_store %arg5[%c2_60, %c0_61, %c0_62], %210 {strides = array<i32>} : memref<4x32x32xbf16, #tpu.memory_space<vmem>>, vector<1x32x32xbf16>,
    %211 = vector.broadcast %168 : vector<32x1xf32> to vector<32x32xf32>
    %212 = arith.mulf %121, %211 : vector<32x32xf32>
    %213 = vector.broadcast %171 : vector<32x1xf32> to vector<32x32xf32>
    %214 = arith.addf %212, %213 : vector<32x32xf32>
    %cst_63 = arith.constant 0.000000e+00 : f32
    %215 = vector.broadcast %cst_63 : f32 to vector<32x32xf32>
    %216 = arith.cmpf ogt, %214, %215 : vector<32x32xf32>
    %cst_64 = arith.constant 2.000000e-01 : f32
    %217 = vector.broadcast %cst_64 : f32 to vector<32x32xf32>
    %218 = arith.mulf %217, %214 : vector<32x32xf32>
    %219 = arith.select %216, %214, %218 : vector<32x32xi1>, vector<32x32xf32>
    %220 = arith.truncf %219 : vector<32x32xf32> to vector<32x32xbf16>
    %c3_65 = arith.constant 3 : index
    %c0_66 = arith.constant 0 : index
    %c0_67 = arith.constant 0 : index
    %221 = vector.load %arg5[%c3_65, %c0_66, %c0_67] : memref<4x32x32xbf16, #tpu.memory_space<vmem>>, vector<1x32x32xbf16>
    %222 = vector.shape_cast %221 : vector<1x32x32xbf16> to vector<32x32xbf16>
    %223 = vector.shape_cast %220 : vector<32x32xbf16> to vector<1x32x32xbf16>
    tpu.vector_store %arg5[%c3_65, %c0_66, %c0_67], %223 {strides = array<i32>} : memref<4x32x32xbf16, #tpu.memory_space<vmem>>, vector<1x32x32xbf16>,
    return
  }
}

module attributes {stable_mosaic.version = 11 : i64} {
  func.func @block_kernel(%arg0: memref<32x146xbf16, #tpu.memory_space<vmem>>, %arg1: memref<4x128xbf16, #tpu.memory_space<vmem>>, %arg2: memref<4x16x128xbf16, #tpu.memory_space<vmem>>, %arg3: memref<16x1xf32, #tpu.memory_space<vmem>>, %arg4: memref<16x1xf32, #tpu.memory_space<vmem>>, %arg5: memref<4x16x128xbf16, #tpu.memory_space<vmem>>) attributes {dimension_semantics = [], scalar_prefetch = 0 : i64, scratch_operands = 0 : i64, tpu.core_type = #tpu.core_type<tc>} {
    %c0 = arith.constant 0 : index
    %c0_0 = arith.constant 0 : index
    %0 = vector.load %arg0[%c0, %c0_0] : memref<32x146xbf16, #tpu.memory_space<vmem>>, vector<32x146xbf16>
    %c0_1 = arith.constant 0 : index
    %c0_2 = arith.constant 0 : index
    %1 = vector.load %arg1[%c0_1, %c0_2] : memref<4x128xbf16, #tpu.memory_space<vmem>>, vector<4x128xbf16>
    %c0_3 = arith.constant 0 : index
    %c0_4 = arith.constant 0 : index
    %c0_5 = arith.constant 0 : index
    %2 = vector.load %arg2[%c0_3, %c0_4, %c0_5] : memref<4x16x128xbf16, #tpu.memory_space<vmem>>, vector<1x16x128xbf16>
    %3 = vector.shape_cast %2 : vector<1x16x128xbf16> to vector<16x128xbf16>
    %cst = arith.constant 0.000000e+00 : f32
    %4 = vector.broadcast %cst : f32 to vector<16x128xf32>
    %5 = vector.extract_strided_slice %3 {offsets = [0, 0], sizes = [16, 32], strides = [1, 1]} : vector<16x128xbf16> to vector<16x32xbf16>
    %6 = vector.extract_strided_slice %0 {offsets = [0, 0], sizes = [32, 128], strides = [1, 1]} : vector<32x146xbf16> to vector<32x128xbf16>
    %7 = vector.extract_strided_slice %1 {offsets = [0, 0], sizes = [1, 128], strides = [1, 1]} : vector<4x128xbf16> to vector<1x128xbf16>
    %8 = vector.extract_strided_slice %1 {offsets = [2, 0], sizes = [1, 128], strides = [1, 1]} : vector<4x128xbf16> to vector<1x128xbf16>
    %9 = arith.mulf %7, %8 : vector<1x128xbf16>
    %10 = vector.broadcast %9 : vector<1x128xbf16> to vector<32x128xbf16>
    %11 = arith.mulf %6, %10 : vector<32x128xbf16>
    %cst_6 = arith.constant dense<0.000000e+00> : vector<16x128xf32>
    %12 = tpu.matmul %5, %11, %cst_6 {dimension_numbers = #tpu.dot_dimension_numbers<[1], [0], [0], [1], [0, 0, 1, 1], [], []>} : vector<16x32xbf16>, vector<32x128xbf16>, vector<16x128xf32> -> vector<16x128xf32>
    %13 = arith.addf %4, %12 : vector<16x128xf32>
    %14 = vector.extract_strided_slice %3 {offsets = [0, 32], sizes = [16, 32], strides = [1, 1]} : vector<16x128xbf16> to vector<16x32xbf16>
    %15 = vector.extract_strided_slice %0 {offsets = [0, 1], sizes = [32, 128], strides = [1, 1]} : vector<32x146xbf16> to vector<32x128xbf16>
    %16 = vector.extract_strided_slice %1 {offsets = [0, 0], sizes = [1, 128], strides = [1, 1]} : vector<4x128xbf16> to vector<1x128xbf16>
    %17 = vector.broadcast %16 : vector<1x128xbf16> to vector<32x128xbf16>
    %18 = arith.mulf %15, %17 : vector<32x128xbf16>
    %cst_7 = arith.constant dense<0.000000e+00> : vector<16x128xf32>
    %19 = tpu.matmul %14, %18, %cst_7 {dimension_numbers = #tpu.dot_dimension_numbers<[1], [0], [0], [1], [0, 0, 1, 1], [], []>} : vector<16x32xbf16>, vector<32x128xbf16>, vector<16x128xf32> -> vector<16x128xf32>
    %20 = arith.addf %13, %19 : vector<16x128xf32>
    %21 = vector.extract_strided_slice %3 {offsets = [0, 64], sizes = [16, 32], strides = [1, 1]} : vector<16x128xbf16> to vector<16x32xbf16>
    %22 = vector.extract_strided_slice %0 {offsets = [0, 8], sizes = [32, 128], strides = [1, 1]} : vector<32x146xbf16> to vector<32x128xbf16>
    %23 = vector.extract_strided_slice %1 {offsets = [2, 0], sizes = [1, 128], strides = [1, 1]} : vector<4x128xbf16> to vector<1x128xbf16>
    %24 = vector.broadcast %23 : vector<1x128xbf16> to vector<32x128xbf16>
    %25 = arith.mulf %22, %24 : vector<32x128xbf16>
    %cst_8 = arith.constant dense<0.000000e+00> : vector<16x128xf32>
    %26 = tpu.matmul %21, %25, %cst_8 {dimension_numbers = #tpu.dot_dimension_numbers<[1], [0], [0], [1], [0, 0, 1, 1], [], []>} : vector<16x32xbf16>, vector<32x128xbf16>, vector<16x128xf32> -> vector<16x128xf32>
    %27 = arith.addf %20, %26 : vector<16x128xf32>
    %28 = vector.extract_strided_slice %3 {offsets = [0, 96], sizes = [16, 32], strides = [1, 1]} : vector<16x128xbf16> to vector<16x32xbf16>
    %29 = vector.extract_strided_slice %0 {offsets = [0, 9], sizes = [32, 128], strides = [1, 1]} : vector<32x146xbf16> to vector<32x128xbf16>
    %cst_9 = arith.constant dense<0.000000e+00> : vector<16x128xf32>
    %30 = tpu.matmul %28, %29, %cst_9 {dimension_numbers = #tpu.dot_dimension_numbers<[1], [0], [0], [1], [0, 0, 1, 1], [], []>} : vector<16x32xbf16>, vector<32x128xbf16>, vector<16x128xf32> -> vector<16x128xf32>
    %31 = arith.addf %27, %30 : vector<16x128xf32>
    %c1 = arith.constant 1 : index
    %c0_10 = arith.constant 0 : index
    %c0_11 = arith.constant 0 : index
    %32 = vector.load %arg2[%c1, %c0_10, %c0_11] : memref<4x16x128xbf16, #tpu.memory_space<vmem>>, vector<1x16x128xbf16>
    %33 = vector.shape_cast %32 : vector<1x16x128xbf16> to vector<16x128xbf16>
    %cst_12 = arith.constant 0.000000e+00 : f32
    %34 = vector.broadcast %cst_12 : f32 to vector<16x128xf32>
    %35 = vector.extract_strided_slice %33 {offsets = [0, 0], sizes = [16, 32], strides = [1, 1]} : vector<16x128xbf16> to vector<16x32xbf16>
    %36 = vector.extract_strided_slice %0 {offsets = [0, 1], sizes = [32, 128], strides = [1, 1]} : vector<32x146xbf16> to vector<32x128xbf16>
    %37 = vector.extract_strided_slice %1 {offsets = [0, 0], sizes = [1, 128], strides = [1, 1]} : vector<4x128xbf16> to vector<1x128xbf16>
    %38 = vector.broadcast %37 : vector<1x128xbf16> to vector<32x128xbf16>
    %39 = arith.mulf %36, %38 : vector<32x128xbf16>
    %cst_13 = arith.constant dense<0.000000e+00> : vector<16x128xf32>
    %40 = tpu.matmul %35, %39, %cst_13 {dimension_numbers = #tpu.dot_dimension_numbers<[1], [0], [0], [1], [0, 0, 1, 1], [], []>} : vector<16x32xbf16>, vector<32x128xbf16>, vector<16x128xf32> -> vector<16x128xf32>
    %41 = arith.addf %34, %40 : vector<16x128xf32>
    %42 = vector.extract_strided_slice %33 {offsets = [0, 32], sizes = [16, 32], strides = [1, 1]} : vector<16x128xbf16> to vector<16x32xbf16>
    %43 = vector.extract_strided_slice %0 {offsets = [0, 2], sizes = [32, 128], strides = [1, 1]} : vector<32x146xbf16> to vector<32x128xbf16>
    %44 = vector.extract_strided_slice %1 {offsets = [0, 0], sizes = [1, 128], strides = [1, 1]} : vector<4x128xbf16> to vector<1x128xbf16>
    %45 = vector.extract_strided_slice %1 {offsets = [3, 0], sizes = [1, 128], strides = [1, 1]} : vector<4x128xbf16> to vector<1x128xbf16>
    %46 = arith.mulf %44, %45 : vector<1x128xbf16>
    %47 = vector.broadcast %46 : vector<1x128xbf16> to vector<32x128xbf16>
    %48 = arith.mulf %43, %47 : vector<32x128xbf16>
    %cst_14 = arith.constant dense<0.000000e+00> : vector<16x128xf32>
    %49 = tpu.matmul %42, %48, %cst_14 {dimension_numbers = #tpu.dot_dimension_numbers<[1], [0], [0], [1], [0, 0, 1, 1], [], []>} : vector<16x32xbf16>, vector<32x128xbf16>, vector<16x128xf32> -> vector<16x128xf32>
    %50 = arith.addf %41, %49 : vector<16x128xf32>
    %51 = vector.extract_strided_slice %33 {offsets = [0, 64], sizes = [16, 32], strides = [1, 1]} : vector<16x128xbf16> to vector<16x32xbf16>
    %52 = vector.extract_strided_slice %0 {offsets = [0, 9], sizes = [32, 128], strides = [1, 1]} : vector<32x146xbf16> to vector<32x128xbf16>
    %cst_15 = arith.constant dense<0.000000e+00> : vector<16x128xf32>
    %53 = tpu.matmul %51, %52, %cst_15 {dimension_numbers = #tpu.dot_dimension_numbers<[1], [0], [0], [1], [0, 0, 1, 1], [], []>} : vector<16x32xbf16>, vector<32x128xbf16>, vector<16x128xf32> -> vector<16x128xf32>
    %54 = arith.addf %50, %53 : vector<16x128xf32>
    %55 = vector.extract_strided_slice %33 {offsets = [0, 96], sizes = [16, 32], strides = [1, 1]} : vector<16x128xbf16> to vector<16x32xbf16>
    %56 = vector.extract_strided_slice %0 {offsets = [0, 10], sizes = [32, 128], strides = [1, 1]} : vector<32x146xbf16> to vector<32x128xbf16>
    %57 = vector.extract_strided_slice %1 {offsets = [3, 0], sizes = [1, 128], strides = [1, 1]} : vector<4x128xbf16> to vector<1x128xbf16>
    %58 = vector.broadcast %57 : vector<1x128xbf16> to vector<32x128xbf16>
    %59 = arith.mulf %56, %58 : vector<32x128xbf16>
    %cst_16 = arith.constant dense<0.000000e+00> : vector<16x128xf32>
    %60 = tpu.matmul %55, %59, %cst_16 {dimension_numbers = #tpu.dot_dimension_numbers<[1], [0], [0], [1], [0, 0, 1, 1], [], []>} : vector<16x32xbf16>, vector<32x128xbf16>, vector<16x128xf32> -> vector<16x128xf32>
    %61 = arith.addf %54, %60 : vector<16x128xf32>
    %c2 = arith.constant 2 : index
    %c0_17 = arith.constant 0 : index
    %c0_18 = arith.constant 0 : index
    %62 = vector.load %arg2[%c2, %c0_17, %c0_18] : memref<4x16x128xbf16, #tpu.memory_space<vmem>>, vector<1x16x128xbf16>
    %63 = vector.shape_cast %62 : vector<1x16x128xbf16> to vector<16x128xbf16>
    %cst_19 = arith.constant 0.000000e+00 : f32
    %64 = vector.broadcast %cst_19 : f32 to vector<16x128xf32>
    %65 = vector.extract_strided_slice %63 {offsets = [0, 0], sizes = [16, 32], strides = [1, 1]} : vector<16x128xbf16> to vector<16x32xbf16>
    %66 = vector.extract_strided_slice %0 {offsets = [0, 8], sizes = [32, 128], strides = [1, 1]} : vector<32x146xbf16> to vector<32x128xbf16>
    %67 = vector.extract_strided_slice %1 {offsets = [2, 0], sizes = [1, 128], strides = [1, 1]} : vector<4x128xbf16> to vector<1x128xbf16>
    %68 = vector.broadcast %67 : vector<1x128xbf16> to vector<32x128xbf16>
    %69 = arith.mulf %66, %68 : vector<32x128xbf16>
    %cst_20 = arith.constant dense<0.000000e+00> : vector<16x128xf32>
    %70 = tpu.matmul %65, %69, %cst_20 {dimension_numbers = #tpu.dot_dimension_numbers<[1], [0], [0], [1], [0, 0, 1, 1], [], []>} : vector<16x32xbf16>, vector<32x128xbf16>, vector<16x128xf32> -> vector<16x128xf32>
    %71 = arith.addf %64, %70 : vector<16x128xf32>
    %72 = vector.extract_strided_slice %63 {offsets = [0, 32], sizes = [16, 32], strides = [1, 1]} : vector<16x128xbf16> to vector<16x32xbf16>
    %73 = vector.extract_strided_slice %0 {offsets = [0, 9], sizes = [32, 128], strides = [1, 1]} : vector<32x146xbf16> to vector<32x128xbf16>
    %cst_21 = arith.constant dense<0.000000e+00> : vector<16x128xf32>
    %74 = tpu.matmul %72, %73, %cst_21 {dimension_numbers = #tpu.dot_dimension_numbers<[1], [0], [0], [1], [0, 0, 1, 1], [], []>} : vector<16x32xbf16>, vector<32x128xbf16>, vector<16x128xf32> -> vector<16x128xf32>
    %75 = arith.addf %71, %74 : vector<16x128xf32>
    %76 = vector.extract_strided_slice %63 {offsets = [0, 64], sizes = [16, 32], strides = [1, 1]} : vector<16x128xbf16> to vector<16x32xbf16>
    %77 = vector.extract_strided_slice %0 {offsets = [0, 16], sizes = [32, 128], strides = [1, 1]} : vector<32x146xbf16> to vector<32x128xbf16>
    %78 = vector.extract_strided_slice %1 {offsets = [1, 0], sizes = [1, 128], strides = [1, 1]} : vector<4x128xbf16> to vector<1x128xbf16>
    %79 = vector.extract_strided_slice %1 {offsets = [2, 0], sizes = [1, 128], strides = [1, 1]} : vector<4x128xbf16> to vector<1x128xbf16>
    %80 = arith.mulf %78, %79 : vector<1x128xbf16>
    %81 = vector.broadcast %80 : vector<1x128xbf16> to vector<32x128xbf16>
    %82 = arith.mulf %77, %81 : vector<32x128xbf16>
    %cst_22 = arith.constant dense<0.000000e+00> : vector<16x128xf32>
    %83 = tpu.matmul %76, %82, %cst_22 {dimension_numbers = #tpu.dot_dimension_numbers<[1], [0], [0], [1], [0, 0, 1, 1], [], []>} : vector<16x32xbf16>, vector<32x128xbf16>, vector<16x128xf32> -> vector<16x128xf32>
    %84 = arith.addf %75, %83 : vector<16x128xf32>
    %85 = vector.extract_strided_slice %63 {offsets = [0, 96], sizes = [16, 32], strides = [1, 1]} : vector<16x128xbf16> to vector<16x32xbf16>
    %86 = vector.extract_strided_slice %0 {offsets = [0, 17], sizes = [32, 128], strides = [1, 1]} : vector<32x146xbf16> to vector<32x128xbf16>
    %87 = vector.extract_strided_slice %1 {offsets = [1, 0], sizes = [1, 128], strides = [1, 1]} : vector<4x128xbf16> to vector<1x128xbf16>
    %88 = vector.broadcast %87 : vector<1x128xbf16> to vector<32x128xbf16>
    %89 = arith.mulf %86, %88 : vector<32x128xbf16>
    %cst_23 = arith.constant dense<0.000000e+00> : vector<16x128xf32>
    %90 = tpu.matmul %85, %89, %cst_23 {dimension_numbers = #tpu.dot_dimension_numbers<[1], [0], [0], [1], [0, 0, 1, 1], [], []>} : vector<16x32xbf16>, vector<32x128xbf16>, vector<16x128xf32> -> vector<16x128xf32>
    %91 = arith.addf %84, %90 : vector<16x128xf32>
    %c3 = arith.constant 3 : index
    %c0_24 = arith.constant 0 : index
    %c0_25 = arith.constant 0 : index
    %92 = vector.load %arg2[%c3, %c0_24, %c0_25] : memref<4x16x128xbf16, #tpu.memory_space<vmem>>, vector<1x16x128xbf16>
    %93 = vector.shape_cast %92 : vector<1x16x128xbf16> to vector<16x128xbf16>
    %cst_26 = arith.constant 0.000000e+00 : f32
    %94 = vector.broadcast %cst_26 : f32 to vector<16x128xf32>
    %95 = vector.extract_strided_slice %93 {offsets = [0, 0], sizes = [16, 32], strides = [1, 1]} : vector<16x128xbf16> to vector<16x32xbf16>
    %96 = vector.extract_strided_slice %0 {offsets = [0, 9], sizes = [32, 128], strides = [1, 1]} : vector<32x146xbf16> to vector<32x128xbf16>
    %cst_27 = arith.constant dense<0.000000e+00> : vector<16x128xf32>
    %97 = tpu.matmul %95, %96, %cst_27 {dimension_numbers = #tpu.dot_dimension_numbers<[1], [0], [0], [1], [0, 0, 1, 1], [], []>} : vector<16x32xbf16>, vector<32x128xbf16>, vector<16x128xf32> -> vector<16x128xf32>
    %98 = arith.addf %94, %97 : vector<16x128xf32>
    %99 = vector.extract_strided_slice %93 {offsets = [0, 32], sizes = [16, 32], strides = [1, 1]} : vector<16x128xbf16> to vector<16x32xbf16>
    %100 = vector.extract_strided_slice %0 {offsets = [0, 10], sizes = [32, 128], strides = [1, 1]} : vector<32x146xbf16> to vector<32x128xbf16>
    %101 = vector.extract_strided_slice %1 {offsets = [3, 0], sizes = [1, 128], strides = [1, 1]} : vector<4x128xbf16> to vector<1x128xbf16>
    %102 = vector.broadcast %101 : vector<1x128xbf16> to vector<32x128xbf16>
    %103 = arith.mulf %100, %102 : vector<32x128xbf16>
    %cst_28 = arith.constant dense<0.000000e+00> : vector<16x128xf32>
    %104 = tpu.matmul %99, %103, %cst_28 {dimension_numbers = #tpu.dot_dimension_numbers<[1], [0], [0], [1], [0, 0, 1, 1], [], []>} : vector<16x32xbf16>, vector<32x128xbf16>, vector<16x128xf32> -> vector<16x128xf32>
    %105 = arith.addf %98, %104 : vector<16x128xf32>
    %106 = vector.extract_strided_slice %93 {offsets = [0, 64], sizes = [16, 32], strides = [1, 1]} : vector<16x128xbf16> to vector<16x32xbf16>
    %107 = vector.extract_strided_slice %0 {offsets = [0, 17], sizes = [32, 128], strides = [1, 1]} : vector<32x146xbf16> to vector<32x128xbf16>
    %108 = vector.extract_strided_slice %1 {offsets = [1, 0], sizes = [1, 128], strides = [1, 1]} : vector<4x128xbf16> to vector<1x128xbf16>
    %109 = vector.broadcast %108 : vector<1x128xbf16> to vector<32x128xbf16>
    %110 = arith.mulf %107, %109 : vector<32x128xbf16>
    %cst_29 = arith.constant dense<0.000000e+00> : vector<16x128xf32>
    %111 = tpu.matmul %106, %110, %cst_29 {dimension_numbers = #tpu.dot_dimension_numbers<[1], [0], [0], [1], [0, 0, 1, 1], [], []>} : vector<16x32xbf16>, vector<32x128xbf16>, vector<16x128xf32> -> vector<16x128xf32>
    %112 = arith.addf %105, %111 : vector<16x128xf32>
    %113 = vector.extract_strided_slice %93 {offsets = [0, 96], sizes = [16, 32], strides = [1, 1]} : vector<16x128xbf16> to vector<16x32xbf16>
    %114 = vector.extract_strided_slice %0 {offsets = [0, 18], sizes = [32, 128], strides = [1, 1]} : vector<32x146xbf16> to vector<32x128xbf16>
    %115 = vector.extract_strided_slice %1 {offsets = [1, 0], sizes = [1, 128], strides = [1, 1]} : vector<4x128xbf16> to vector<1x128xbf16>
    %116 = vector.extract_strided_slice %1 {offsets = [3, 0], sizes = [1, 128], strides = [1, 1]} : vector<4x128xbf16> to vector<1x128xbf16>
    %117 = arith.mulf %115, %116 : vector<1x128xbf16>
    %118 = vector.broadcast %117 : vector<1x128xbf16> to vector<32x128xbf16>
    %119 = arith.mulf %114, %118 : vector<32x128xbf16>
    %cst_30 = arith.constant dense<0.000000e+00> : vector<16x128xf32>
    %120 = tpu.matmul %113, %119, %cst_30 {dimension_numbers = #tpu.dot_dimension_numbers<[1], [0], [0], [1], [0, 0, 1, 1], [], []>} : vector<16x32xbf16>, vector<32x128xbf16>, vector<16x128xf32> -> vector<16x128xf32>
    %121 = arith.addf %112, %120 : vector<16x128xf32>
    %cst_31 = arith.constant 0.000000e+00 : f32
    %122 = vector.broadcast %cst_31 : f32 to vector<16x1xf32>
    %cst_32 = arith.constant dense<0.000000e+00> : vector<16xf32>
    %123 = vector.multi_reduction <add>, %31, %cst_32 [1] : vector<16x128xf32> to vector<16xf32>
    %124 = vector.shape_cast %123 : vector<16xf32> to vector<16x1xf32>
    %125 = arith.addf %122, %124 : vector<16x1xf32>
    %cst_33 = arith.constant dense<0.000000e+00> : vector<16xf32>
    %126 = vector.multi_reduction <add>, %61, %cst_33 [1] : vector<16x128xf32> to vector<16xf32>
    %127 = vector.shape_cast %126 : vector<16xf32> to vector<16x1xf32>
    %128 = arith.addf %125, %127 : vector<16x1xf32>
    %cst_34 = arith.constant dense<0.000000e+00> : vector<16xf32>
    %129 = vector.multi_reduction <add>, %91, %cst_34 [1] : vector<16x128xf32> to vector<16xf32>
    %130 = vector.shape_cast %129 : vector<16xf32> to vector<16x1xf32>
    %131 = arith.addf %128, %130 : vector<16x1xf32>
    %cst_35 = arith.constant dense<0.000000e+00> : vector<16xf32>
    %132 = vector.multi_reduction <add>, %121, %cst_35 [1] : vector<16x128xf32> to vector<16xf32>
    %133 = vector.shape_cast %132 : vector<16xf32> to vector<16x1xf32>
    %134 = arith.addf %131, %133 : vector<16x1xf32>
    %cst_36 = arith.constant 5.120000e+02 : f32
    %135 = vector.broadcast %cst_36 : f32 to vector<16x1xf32>
    %136 = arith.divf %134, %135 : vector<16x1xf32>
    %cst_37 = arith.constant 0.000000e+00 : f32
    %137 = vector.broadcast %cst_37 : f32 to vector<16x1xf32>
    %138 = vector.broadcast %136 : vector<16x1xf32> to vector<16x128xf32>
    %139 = arith.subf %31, %138 : vector<16x128xf32>
    %140 = arith.mulf %139, %139 : vector<16x128xf32>
    %cst_38 = arith.constant dense<0.000000e+00> : vector<16xf32>
    %141 = vector.multi_reduction <add>, %140, %cst_38 [1] : vector<16x128xf32> to vector<16xf32>
    %142 = vector.shape_cast %141 : vector<16xf32> to vector<16x1xf32>
    %143 = arith.addf %137, %142 : vector<16x1xf32>
    %144 = vector.broadcast %136 : vector<16x1xf32> to vector<16x128xf32>
    %145 = arith.subf %61, %144 : vector<16x128xf32>
    %146 = arith.mulf %145, %145 : vector<16x128xf32>
    %cst_39 = arith.constant dense<0.000000e+00> : vector<16xf32>
    %147 = vector.multi_reduction <add>, %146, %cst_39 [1] : vector<16x128xf32> to vector<16xf32>
    %148 = vector.shape_cast %147 : vector<16xf32> to vector<16x1xf32>
    %149 = arith.addf %143, %148 : vector<16x1xf32>
    %150 = vector.broadcast %136 : vector<16x1xf32> to vector<16x128xf32>
    %151 = arith.subf %91, %150 : vector<16x128xf32>
    %152 = arith.mulf %151, %151 : vector<16x128xf32>
    %cst_40 = arith.constant dense<0.000000e+00> : vector<16xf32>
    %153 = vector.multi_reduction <add>, %152, %cst_40 [1] : vector<16x128xf32> to vector<16xf32>
    %154 = vector.shape_cast %153 : vector<16xf32> to vector<16x1xf32>
    %155 = arith.addf %149, %154 : vector<16x1xf32>
    %156 = vector.broadcast %136 : vector<16x1xf32> to vector<16x128xf32>
    %157 = arith.subf %121, %156 : vector<16x128xf32>
    %158 = arith.mulf %157, %157 : vector<16x128xf32>
    %cst_41 = arith.constant dense<0.000000e+00> : vector<16xf32>
    %159 = vector.multi_reduction <add>, %158, %cst_41 [1] : vector<16x128xf32> to vector<16xf32>
    %160 = vector.shape_cast %159 : vector<16xf32> to vector<16x1xf32>
    %161 = arith.addf %155, %160 : vector<16x1xf32>
    %cst_42 = arith.constant 5.120000e+02 : f32
    %162 = vector.broadcast %cst_42 : f32 to vector<16x1xf32>
    %163 = arith.divf %161, %162 : vector<16x1xf32>
    %c0_43 = arith.constant 0 : index
    %c0_44 = arith.constant 0 : index
    %164 = vector.load %arg3[%c0_43, %c0_44] : memref<16x1xf32, #tpu.memory_space<vmem>>, vector<16x1xf32>
    %cst_45 = arith.constant 9.99999974E-6 : f32
    %165 = vector.broadcast %cst_45 : f32 to vector<16x1xf32>
    %166 = arith.addf %163, %165 : vector<16x1xf32>
    %167 = math.rsqrt %166 : vector<16x1xf32>
    %168 = arith.mulf %164, %167 : vector<16x1xf32>
    %c0_46 = arith.constant 0 : index
    %c0_47 = arith.constant 0 : index
    %169 = vector.load %arg4[%c0_46, %c0_47] : memref<16x1xf32, #tpu.memory_space<vmem>>, vector<16x1xf32>
    %170 = arith.mulf %136, %168 : vector<16x1xf32>
    %171 = arith.subf %169, %170 : vector<16x1xf32>
    %172 = vector.broadcast %168 : vector<16x1xf32> to vector<16x128xf32>
    %173 = arith.mulf %31, %172 : vector<16x128xf32>
    %174 = vector.broadcast %171 : vector<16x1xf32> to vector<16x128xf32>
    %175 = arith.addf %173, %174 : vector<16x128xf32>
    %cst_48 = arith.constant 0.000000e+00 : f32
    %176 = vector.broadcast %cst_48 : f32 to vector<16x128xf32>
    %177 = arith.cmpf ogt, %175, %176 : vector<16x128xf32>
    %cst_49 = arith.constant 2.000000e-01 : f32
    %178 = vector.broadcast %cst_49 : f32 to vector<16x128xf32>
    %179 = arith.mulf %178, %175 : vector<16x128xf32>
    %180 = arith.select %177, %175, %179 : vector<16x128xi1>, vector<16x128xf32>
    %181 = arith.truncf %180 : vector<16x128xf32> to vector<16x128xbf16>
    %c0_50 = arith.constant 0 : index
    %c0_51 = arith.constant 0 : index
    %c0_52 = arith.constant 0 : index
    %182 = vector.load %arg5[%c0_50, %c0_51, %c0_52] : memref<4x16x128xbf16, #tpu.memory_space<vmem>>, vector<1x16x128xbf16>
    %183 = vector.shape_cast %182 : vector<1x16x128xbf16> to vector<16x128xbf16>
    %184 = vector.shape_cast %181 : vector<16x128xbf16> to vector<1x16x128xbf16>
    tpu.vector_store %arg5[%c0_50, %c0_51, %c0_52], %184 {strides = array<i32>} : memref<4x16x128xbf16, #tpu.memory_space<vmem>>, vector<1x16x128xbf16>,
    %185 = vector.broadcast %168 : vector<16x1xf32> to vector<16x128xf32>
    %186 = arith.mulf %61, %185 : vector<16x128xf32>
    %187 = vector.broadcast %171 : vector<16x1xf32> to vector<16x128xf32>
    %188 = arith.addf %186, %187 : vector<16x128xf32>
    %cst_53 = arith.constant 0.000000e+00 : f32
    %189 = vector.broadcast %cst_53 : f32 to vector<16x128xf32>
    %190 = arith.cmpf ogt, %188, %189 : vector<16x128xf32>
    %cst_54 = arith.constant 2.000000e-01 : f32
    %191 = vector.broadcast %cst_54 : f32 to vector<16x128xf32>
    %192 = arith.mulf %191, %188 : vector<16x128xf32>
    %193 = arith.select %190, %188, %192 : vector<16x128xi1>, vector<16x128xf32>
    %194 = arith.truncf %193 : vector<16x128xf32> to vector<16x128xbf16>
    %c1_55 = arith.constant 1 : index
    %c0_56 = arith.constant 0 : index
    %c0_57 = arith.constant 0 : index
    %195 = vector.load %arg5[%c1_55, %c0_56, %c0_57] : memref<4x16x128xbf16, #tpu.memory_space<vmem>>, vector<1x16x128xbf16>
    %196 = vector.shape_cast %195 : vector<1x16x128xbf16> to vector<16x128xbf16>
    %197 = vector.shape_cast %194 : vector<16x128xbf16> to vector<1x16x128xbf16>
    tpu.vector_store %arg5[%c1_55, %c0_56, %c0_57], %197 {strides = array<i32>} : memref<4x16x128xbf16, #tpu.memory_space<vmem>>, vector<1x16x128xbf16>,
    %198 = vector.broadcast %168 : vector<16x1xf32> to vector<16x128xf32>
    %199 = arith.mulf %91, %198 : vector<16x128xf32>
    %200 = vector.broadcast %171 : vector<16x1xf32> to vector<16x128xf32>
    %201 = arith.addf %199, %200 : vector<16x128xf32>
    %cst_58 = arith.constant 0.000000e+00 : f32
    %202 = vector.broadcast %cst_58 : f32 to vector<16x128xf32>
    %203 = arith.cmpf ogt, %201, %202 : vector<16x128xf32>
    %cst_59 = arith.constant 2.000000e-01 : f32
    %204 = vector.broadcast %cst_59 : f32 to vector<16x128xf32>
    %205 = arith.mulf %204, %201 : vector<16x128xf32>
    %206 = arith.select %203, %201, %205 : vector<16x128xi1>, vector<16x128xf32>
    %207 = arith.truncf %206 : vector<16x128xf32> to vector<16x128xbf16>
    %c2_60 = arith.constant 2 : index
    %c0_61 = arith.constant 0 : index
    %c0_62 = arith.constant 0 : index
    %208 = vector.load %arg5[%c2_60, %c0_61, %c0_62] : memref<4x16x128xbf16, #tpu.memory_space<vmem>>, vector<1x16x128xbf16>
    %209 = vector.shape_cast %208 : vector<1x16x128xbf16> to vector<16x128xbf16>
    %210 = vector.shape_cast %207 : vector<16x128xbf16> to vector<1x16x128xbf16>
    tpu.vector_store %arg5[%c2_60, %c0_61, %c0_62], %210 {strides = array<i32>} : memref<4x16x128xbf16, #tpu.memory_space<vmem>>, vector<1x16x128xbf16>,
    %211 = vector.broadcast %168 : vector<16x1xf32> to vector<16x128xf32>
    %212 = arith.mulf %121, %211 : vector<16x128xf32>
    %213 = vector.broadcast %171 : vector<16x1xf32> to vector<16x128xf32>
    %214 = arith.addf %212, %213 : vector<16x128xf32>
    %cst_63 = arith.constant 0.000000e+00 : f32
    %215 = vector.broadcast %cst_63 : f32 to vector<16x128xf32>
    %216 = arith.cmpf ogt, %214, %215 : vector<16x128xf32>
    %cst_64 = arith.constant 2.000000e-01 : f32
    %217 = vector.broadcast %cst_64 : f32 to vector<16x128xf32>
    %218 = arith.mulf %217, %214 : vector<16x128xf32>
    %219 = arith.select %216, %214, %218 : vector<16x128xi1>, vector<16x128xf32>
    %220 = arith.truncf %219 : vector<16x128xf32> to vector<16x128xbf16>
    %c3_65 = arith.constant 3 : index
    %c0_66 = arith.constant 0 : index
    %c0_67 = arith.constant 0 : index
    %221 = vector.load %arg5[%c3_65, %c0_66, %c0_67] : memref<4x16x128xbf16, #tpu.memory_space<vmem>>, vector<1x16x128xbf16>
    %222 = vector.shape_cast %221 : vector<1x16x128xbf16> to vector<16x128xbf16>
    %223 = vector.shape_cast %220 : vector<16x128xbf16> to vector<1x16x128xbf16>
    tpu.vector_store %arg5[%c3_65, %c0_66, %c0_67], %223 {strides = array<i32>} : memref<4x16x128xbf16, #tpu.memory_space<vmem>>, vector<1x16x128xbf16>,
    return
  }
}

module attributes {stable_mosaic.version = 11 : i64} {
  func.func @block_kernel(%arg0: memref<16x546xbf16, #tpu.memory_space<vmem>>, %arg1: memref<4x512xbf16, #tpu.memory_space<vmem>>, %arg2: memref<4x8x64xbf16, #tpu.memory_space<vmem>>, %arg3: memref<8x1xf32, #tpu.memory_space<vmem>>, %arg4: memref<8x1xf32, #tpu.memory_space<vmem>>, %arg5: memref<4x8x512xbf16, #tpu.memory_space<vmem>>) attributes {dimension_semantics = [], scalar_prefetch = 0 : i64, scratch_operands = 0 : i64, tpu.core_type = #tpu.core_type<tc>} {
    %c0 = arith.constant 0 : index
    %c0_0 = arith.constant 0 : index
    %0 = vector.load %arg0[%c0, %c0_0] : memref<16x546xbf16, #tpu.memory_space<vmem>>, vector<16x546xbf16>
    %c0_1 = arith.constant 0 : index
    %c0_2 = arith.constant 0 : index
    %1 = vector.load %arg1[%c0_1, %c0_2] : memref<4x512xbf16, #tpu.memory_space<vmem>>, vector<4x512xbf16>
    %c0_3 = arith.constant 0 : index
    %c0_4 = arith.constant 0 : index
    %c0_5 = arith.constant 0 : index
    %2 = vector.load %arg2[%c0_3, %c0_4, %c0_5] : memref<4x8x64xbf16, #tpu.memory_space<vmem>>, vector<1x8x64xbf16>
    %3 = vector.shape_cast %2 : vector<1x8x64xbf16> to vector<8x64xbf16>
    %cst = arith.constant 0.000000e+00 : f32
    %4 = vector.broadcast %cst : f32 to vector<8x512xf32>
    %5 = vector.extract_strided_slice %3 {offsets = [0, 0], sizes = [8, 16], strides = [1, 1]} : vector<8x64xbf16> to vector<8x16xbf16>
    %6 = vector.extract_strided_slice %0 {offsets = [0, 0], sizes = [16, 512], strides = [1, 1]} : vector<16x546xbf16> to vector<16x512xbf16>
    %7 = vector.extract_strided_slice %1 {offsets = [0, 0], sizes = [1, 512], strides = [1, 1]} : vector<4x512xbf16> to vector<1x512xbf16>
    %8 = vector.extract_strided_slice %1 {offsets = [2, 0], sizes = [1, 512], strides = [1, 1]} : vector<4x512xbf16> to vector<1x512xbf16>
    %9 = arith.mulf %7, %8 : vector<1x512xbf16>
    %10 = vector.broadcast %9 : vector<1x512xbf16> to vector<16x512xbf16>
    %11 = arith.mulf %6, %10 : vector<16x512xbf16>
    %cst_6 = arith.constant dense<0.000000e+00> : vector<8x512xf32>
    %12 = tpu.matmul %5, %11, %cst_6 {dimension_numbers = #tpu.dot_dimension_numbers<[1], [0], [0], [1], [0, 0, 1, 1], [], []>} : vector<8x16xbf16>, vector<16x512xbf16>, vector<8x512xf32> -> vector<8x512xf32>
    %13 = arith.addf %4, %12 : vector<8x512xf32>
    %14 = vector.extract_strided_slice %3 {offsets = [0, 16], sizes = [8, 16], strides = [1, 1]} : vector<8x64xbf16> to vector<8x16xbf16>
    %15 = vector.extract_strided_slice %0 {offsets = [0, 1], sizes = [16, 512], strides = [1, 1]} : vector<16x546xbf16> to vector<16x512xbf16>
    %16 = vector.extract_strided_slice %1 {offsets = [0, 0], sizes = [1, 512], strides = [1, 1]} : vector<4x512xbf16> to vector<1x512xbf16>
    %17 = vector.broadcast %16 : vector<1x512xbf16> to vector<16x512xbf16>
    %18 = arith.mulf %15, %17 : vector<16x512xbf16>
    %cst_7 = arith.constant dense<0.000000e+00> : vector<8x512xf32>
    %19 = tpu.matmul %14, %18, %cst_7 {dimension_numbers = #tpu.dot_dimension_numbers<[1], [0], [0], [1], [0, 0, 1, 1], [], []>} : vector<8x16xbf16>, vector<16x512xbf16>, vector<8x512xf32> -> vector<8x512xf32>
    %20 = arith.addf %13, %19 : vector<8x512xf32>
    %21 = vector.extract_strided_slice %3 {offsets = [0, 32], sizes = [8, 16], strides = [1, 1]} : vector<8x64xbf16> to vector<8x16xbf16>
    %22 = vector.extract_strided_slice %0 {offsets = [0, 16], sizes = [16, 512], strides = [1, 1]} : vector<16x546xbf16> to vector<16x512xbf16>
    %23 = vector.extract_strided_slice %1 {offsets = [2, 0], sizes = [1, 512], strides = [1, 1]} : vector<4x512xbf16> to vector<1x512xbf16>
    %24 = vector.broadcast %23 : vector<1x512xbf16> to vector<16x512xbf16>
    %25 = arith.mulf %22, %24 : vector<16x512xbf16>
    %cst_8 = arith.constant dense<0.000000e+00> : vector<8x512xf32>
    %26 = tpu.matmul %21, %25, %cst_8 {dimension_numbers = #tpu.dot_dimension_numbers<[1], [0], [0], [1], [0, 0, 1, 1], [], []>} : vector<8x16xbf16>, vector<16x512xbf16>, vector<8x512xf32> -> vector<8x512xf32>
    %27 = arith.addf %20, %26 : vector<8x512xf32>
    %28 = vector.extract_strided_slice %3 {offsets = [0, 48], sizes = [8, 16], strides = [1, 1]} : vector<8x64xbf16> to vector<8x16xbf16>
    %29 = vector.extract_strided_slice %0 {offsets = [0, 17], sizes = [16, 512], strides = [1, 1]} : vector<16x546xbf16> to vector<16x512xbf16>
    %cst_9 = arith.constant dense<0.000000e+00> : vector<8x512xf32>
    %30 = tpu.matmul %28, %29, %cst_9 {dimension_numbers = #tpu.dot_dimension_numbers<[1], [0], [0], [1], [0, 0, 1, 1], [], []>} : vector<8x16xbf16>, vector<16x512xbf16>, vector<8x512xf32> -> vector<8x512xf32>
    %31 = arith.addf %27, %30 : vector<8x512xf32>
    %c1 = arith.constant 1 : index
    %c0_10 = arith.constant 0 : index
    %c0_11 = arith.constant 0 : index
    %32 = vector.load %arg2[%c1, %c0_10, %c0_11] : memref<4x8x64xbf16, #tpu.memory_space<vmem>>, vector<1x8x64xbf16>
    %33 = vector.shape_cast %32 : vector<1x8x64xbf16> to vector<8x64xbf16>
    %cst_12 = arith.constant 0.000000e+00 : f32
    %34 = vector.broadcast %cst_12 : f32 to vector<8x512xf32>
    %35 = vector.extract_strided_slice %33 {offsets = [0, 0], sizes = [8, 16], strides = [1, 1]} : vector<8x64xbf16> to vector<8x16xbf16>
    %36 = vector.extract_strided_slice %0 {offsets = [0, 1], sizes = [16, 512], strides = [1, 1]} : vector<16x546xbf16> to vector<16x512xbf16>
    %37 = vector.extract_strided_slice %1 {offsets = [0, 0], sizes = [1, 512], strides = [1, 1]} : vector<4x512xbf16> to vector<1x512xbf16>
    %38 = vector.broadcast %37 : vector<1x512xbf16> to vector<16x512xbf16>
    %39 = arith.mulf %36, %38 : vector<16x512xbf16>
    %cst_13 = arith.constant dense<0.000000e+00> : vector<8x512xf32>
    %40 = tpu.matmul %35, %39, %cst_13 {dimension_numbers = #tpu.dot_dimension_numbers<[1], [0], [0], [1], [0, 0, 1, 1], [], []>} : vector<8x16xbf16>, vector<16x512xbf16>, vector<8x512xf32> -> vector<8x512xf32>
    %41 = arith.addf %34, %40 : vector<8x512xf32>
    %42 = vector.extract_strided_slice %33 {offsets = [0, 16], sizes = [8, 16], strides = [1, 1]} : vector<8x64xbf16> to vector<8x16xbf16>
    %43 = vector.extract_strided_slice %0 {offsets = [0, 2], sizes = [16, 512], strides = [1, 1]} : vector<16x546xbf16> to vector<16x512xbf16>
    %44 = vector.extract_strided_slice %1 {offsets = [0, 0], sizes = [1, 512], strides = [1, 1]} : vector<4x512xbf16> to vector<1x512xbf16>
    %45 = vector.extract_strided_slice %1 {offsets = [3, 0], sizes = [1, 512], strides = [1, 1]} : vector<4x512xbf16> to vector<1x512xbf16>
    %46 = arith.mulf %44, %45 : vector<1x512xbf16>
    %47 = vector.broadcast %46 : vector<1x512xbf16> to vector<16x512xbf16>
    %48 = arith.mulf %43, %47 : vector<16x512xbf16>
    %cst_14 = arith.constant dense<0.000000e+00> : vector<8x512xf32>
    %49 = tpu.matmul %42, %48, %cst_14 {dimension_numbers = #tpu.dot_dimension_numbers<[1], [0], [0], [1], [0, 0, 1, 1], [], []>} : vector<8x16xbf16>, vector<16x512xbf16>, vector<8x512xf32> -> vector<8x512xf32>
    %50 = arith.addf %41, %49 : vector<8x512xf32>
    %51 = vector.extract_strided_slice %33 {offsets = [0, 32], sizes = [8, 16], strides = [1, 1]} : vector<8x64xbf16> to vector<8x16xbf16>
    %52 = vector.extract_strided_slice %0 {offsets = [0, 17], sizes = [16, 512], strides = [1, 1]} : vector<16x546xbf16> to vector<16x512xbf16>
    %cst_15 = arith.constant dense<0.000000e+00> : vector<8x512xf32>
    %53 = tpu.matmul %51, %52, %cst_15 {dimension_numbers = #tpu.dot_dimension_numbers<[1], [0], [0], [1], [0, 0, 1, 1], [], []>} : vector<8x16xbf16>, vector<16x512xbf16>, vector<8x512xf32> -> vector<8x512xf32>
    %54 = arith.addf %50, %53 : vector<8x512xf32>
    %55 = vector.extract_strided_slice %33 {offsets = [0, 48], sizes = [8, 16], strides = [1, 1]} : vector<8x64xbf16> to vector<8x16xbf16>
    %56 = vector.extract_strided_slice %0 {offsets = [0, 18], sizes = [16, 512], strides = [1, 1]} : vector<16x546xbf16> to vector<16x512xbf16>
    %57 = vector.extract_strided_slice %1 {offsets = [3, 0], sizes = [1, 512], strides = [1, 1]} : vector<4x512xbf16> to vector<1x512xbf16>
    %58 = vector.broadcast %57 : vector<1x512xbf16> to vector<16x512xbf16>
    %59 = arith.mulf %56, %58 : vector<16x512xbf16>
    %cst_16 = arith.constant dense<0.000000e+00> : vector<8x512xf32>
    %60 = tpu.matmul %55, %59, %cst_16 {dimension_numbers = #tpu.dot_dimension_numbers<[1], [0], [0], [1], [0, 0, 1, 1], [], []>} : vector<8x16xbf16>, vector<16x512xbf16>, vector<8x512xf32> -> vector<8x512xf32>
    %61 = arith.addf %54, %60 : vector<8x512xf32>
    %c2 = arith.constant 2 : index
    %c0_17 = arith.constant 0 : index
    %c0_18 = arith.constant 0 : index
    %62 = vector.load %arg2[%c2, %c0_17, %c0_18] : memref<4x8x64xbf16, #tpu.memory_space<vmem>>, vector<1x8x64xbf16>
    %63 = vector.shape_cast %62 : vector<1x8x64xbf16> to vector<8x64xbf16>
    %cst_19 = arith.constant 0.000000e+00 : f32
    %64 = vector.broadcast %cst_19 : f32 to vector<8x512xf32>
    %65 = vector.extract_strided_slice %63 {offsets = [0, 0], sizes = [8, 16], strides = [1, 1]} : vector<8x64xbf16> to vector<8x16xbf16>
    %66 = vector.extract_strided_slice %0 {offsets = [0, 16], sizes = [16, 512], strides = [1, 1]} : vector<16x546xbf16> to vector<16x512xbf16>
    %67 = vector.extract_strided_slice %1 {offsets = [2, 0], sizes = [1, 512], strides = [1, 1]} : vector<4x512xbf16> to vector<1x512xbf16>
    %68 = vector.broadcast %67 : vector<1x512xbf16> to vector<16x512xbf16>
    %69 = arith.mulf %66, %68 : vector<16x512xbf16>
    %cst_20 = arith.constant dense<0.000000e+00> : vector<8x512xf32>
    %70 = tpu.matmul %65, %69, %cst_20 {dimension_numbers = #tpu.dot_dimension_numbers<[1], [0], [0], [1], [0, 0, 1, 1], [], []>} : vector<8x16xbf16>, vector<16x512xbf16>, vector<8x512xf32> -> vector<8x512xf32>
    %71 = arith.addf %64, %70 : vector<8x512xf32>
    %72 = vector.extract_strided_slice %63 {offsets = [0, 16], sizes = [8, 16], strides = [1, 1]} : vector<8x64xbf16> to vector<8x16xbf16>
    %73 = vector.extract_strided_slice %0 {offsets = [0, 17], sizes = [16, 512], strides = [1, 1]} : vector<16x546xbf16> to vector<16x512xbf16>
    %cst_21 = arith.constant dense<0.000000e+00> : vector<8x512xf32>
    %74 = tpu.matmul %72, %73, %cst_21 {dimension_numbers = #tpu.dot_dimension_numbers<[1], [0], [0], [1], [0, 0, 1, 1], [], []>} : vector<8x16xbf16>, vector<16x512xbf16>, vector<8x512xf32> -> vector<8x512xf32>
    %75 = arith.addf %71, %74 : vector<8x512xf32>
    %76 = vector.extract_strided_slice %63 {offsets = [0, 32], sizes = [8, 16], strides = [1, 1]} : vector<8x64xbf16> to vector<8x16xbf16>
    %77 = vector.extract_strided_slice %0 {offsets = [0, 32], sizes = [16, 512], strides = [1, 1]} : vector<16x546xbf16> to vector<16x512xbf16>
    %78 = vector.extract_strided_slice %1 {offsets = [1, 0], sizes = [1, 512], strides = [1, 1]} : vector<4x512xbf16> to vector<1x512xbf16>
    %79 = vector.extract_strided_slice %1 {offsets = [2, 0], sizes = [1, 512], strides = [1, 1]} : vector<4x512xbf16> to vector<1x512xbf16>
    %80 = arith.mulf %78, %79 : vector<1x512xbf16>
    %81 = vector.broadcast %80 : vector<1x512xbf16> to vector<16x512xbf16>
    %82 = arith.mulf %77, %81 : vector<16x512xbf16>
    %cst_22 = arith.constant dense<0.000000e+00> : vector<8x512xf32>
    %83 = tpu.matmul %76, %82, %cst_22 {dimension_numbers = #tpu.dot_dimension_numbers<[1], [0], [0], [1], [0, 0, 1, 1], [], []>} : vector<8x16xbf16>, vector<16x512xbf16>, vector<8x512xf32> -> vector<8x512xf32>
    %84 = arith.addf %75, %83 : vector<8x512xf32>
    %85 = vector.extract_strided_slice %63 {offsets = [0, 48], sizes = [8, 16], strides = [1, 1]} : vector<8x64xbf16> to vector<8x16xbf16>
    %86 = vector.extract_strided_slice %0 {offsets = [0, 33], sizes = [16, 512], strides = [1, 1]} : vector<16x546xbf16> to vector<16x512xbf16>
    %87 = vector.extract_strided_slice %1 {offsets = [1, 0], sizes = [1, 512], strides = [1, 1]} : vector<4x512xbf16> to vector<1x512xbf16>
    %88 = vector.broadcast %87 : vector<1x512xbf16> to vector<16x512xbf16>
    %89 = arith.mulf %86, %88 : vector<16x512xbf16>
    %cst_23 = arith.constant dense<0.000000e+00> : vector<8x512xf32>
    %90 = tpu.matmul %85, %89, %cst_23 {dimension_numbers = #tpu.dot_dimension_numbers<[1], [0], [0], [1], [0, 0, 1, 1], [], []>} : vector<8x16xbf16>, vector<16x512xbf16>, vector<8x512xf32> -> vector<8x512xf32>
    %91 = arith.addf %84, %90 : vector<8x512xf32>
    %c3 = arith.constant 3 : index
    %c0_24 = arith.constant 0 : index
    %c0_25 = arith.constant 0 : index
    %92 = vector.load %arg2[%c3, %c0_24, %c0_25] : memref<4x8x64xbf16, #tpu.memory_space<vmem>>, vector<1x8x64xbf16>
    %93 = vector.shape_cast %92 : vector<1x8x64xbf16> to vector<8x64xbf16>
    %cst_26 = arith.constant 0.000000e+00 : f32
    %94 = vector.broadcast %cst_26 : f32 to vector<8x512xf32>
    %95 = vector.extract_strided_slice %93 {offsets = [0, 0], sizes = [8, 16], strides = [1, 1]} : vector<8x64xbf16> to vector<8x16xbf16>
    %96 = vector.extract_strided_slice %0 {offsets = [0, 17], sizes = [16, 512], strides = [1, 1]} : vector<16x546xbf16> to vector<16x512xbf16>
    %cst_27 = arith.constant dense<0.000000e+00> : vector<8x512xf32>
    %97 = tpu.matmul %95, %96, %cst_27 {dimension_numbers = #tpu.dot_dimension_numbers<[1], [0], [0], [1], [0, 0, 1, 1], [], []>} : vector<8x16xbf16>, vector<16x512xbf16>, vector<8x512xf32> -> vector<8x512xf32>
    %98 = arith.addf %94, %97 : vector<8x512xf32>
    %99 = vector.extract_strided_slice %93 {offsets = [0, 16], sizes = [8, 16], strides = [1, 1]} : vector<8x64xbf16> to vector<8x16xbf16>
    %100 = vector.extract_strided_slice %0 {offsets = [0, 18], sizes = [16, 512], strides = [1, 1]} : vector<16x546xbf16> to vector<16x512xbf16>
    %101 = vector.extract_strided_slice %1 {offsets = [3, 0], sizes = [1, 512], strides = [1, 1]} : vector<4x512xbf16> to vector<1x512xbf16>
    %102 = vector.broadcast %101 : vector<1x512xbf16> to vector<16x512xbf16>
    %103 = arith.mulf %100, %102 : vector<16x512xbf16>
    %cst_28 = arith.constant dense<0.000000e+00> : vector<8x512xf32>
    %104 = tpu.matmul %99, %103, %cst_28 {dimension_numbers = #tpu.dot_dimension_numbers<[1], [0], [0], [1], [0, 0, 1, 1], [], []>} : vector<8x16xbf16>, vector<16x512xbf16>, vector<8x512xf32> -> vector<8x512xf32>
    %105 = arith.addf %98, %104 : vector<8x512xf32>
    %106 = vector.extract_strided_slice %93 {offsets = [0, 32], sizes = [8, 16], strides = [1, 1]} : vector<8x64xbf16> to vector<8x16xbf16>
    %107 = vector.extract_strided_slice %0 {offsets = [0, 33], sizes = [16, 512], strides = [1, 1]} : vector<16x546xbf16> to vector<16x512xbf16>
    %108 = vector.extract_strided_slice %1 {offsets = [1, 0], sizes = [1, 512], strides = [1, 1]} : vector<4x512xbf16> to vector<1x512xbf16>
    %109 = vector.broadcast %108 : vector<1x512xbf16> to vector<16x512xbf16>
    %110 = arith.mulf %107, %109 : vector<16x512xbf16>
    %cst_29 = arith.constant dense<0.000000e+00> : vector<8x512xf32>
    %111 = tpu.matmul %106, %110, %cst_29 {dimension_numbers = #tpu.dot_dimension_numbers<[1], [0], [0], [1], [0, 0, 1, 1], [], []>} : vector<8x16xbf16>, vector<16x512xbf16>, vector<8x512xf32> -> vector<8x512xf32>
    %112 = arith.addf %105, %111 : vector<8x512xf32>
    %113 = vector.extract_strided_slice %93 {offsets = [0, 48], sizes = [8, 16], strides = [1, 1]} : vector<8x64xbf16> to vector<8x16xbf16>
    %114 = vector.extract_strided_slice %0 {offsets = [0, 34], sizes = [16, 512], strides = [1, 1]} : vector<16x546xbf16> to vector<16x512xbf16>
    %115 = vector.extract_strided_slice %1 {offsets = [1, 0], sizes = [1, 512], strides = [1, 1]} : vector<4x512xbf16> to vector<1x512xbf16>
    %116 = vector.extract_strided_slice %1 {offsets = [3, 0], sizes = [1, 512], strides = [1, 1]} : vector<4x512xbf16> to vector<1x512xbf16>
    %117 = arith.mulf %115, %116 : vector<1x512xbf16>
    %118 = vector.broadcast %117 : vector<1x512xbf16> to vector<16x512xbf16>
    %119 = arith.mulf %114, %118 : vector<16x512xbf16>
    %cst_30 = arith.constant dense<0.000000e+00> : vector<8x512xf32>
    %120 = tpu.matmul %113, %119, %cst_30 {dimension_numbers = #tpu.dot_dimension_numbers<[1], [0], [0], [1], [0, 0, 1, 1], [], []>} : vector<8x16xbf16>, vector<16x512xbf16>, vector<8x512xf32> -> vector<8x512xf32>
    %121 = arith.addf %112, %120 : vector<8x512xf32>
    %cst_31 = arith.constant 0.000000e+00 : f32
    %122 = vector.broadcast %cst_31 : f32 to vector<8x1xf32>
    %cst_32 = arith.constant dense<0.000000e+00> : vector<8xf32>
    %123 = vector.multi_reduction <add>, %31, %cst_32 [1] : vector<8x512xf32> to vector<8xf32>
    %124 = vector.shape_cast %123 : vector<8xf32> to vector<8x1xf32>
    %125 = arith.addf %122, %124 : vector<8x1xf32>
    %cst_33 = arith.constant dense<0.000000e+00> : vector<8xf32>
    %126 = vector.multi_reduction <add>, %61, %cst_33 [1] : vector<8x512xf32> to vector<8xf32>
    %127 = vector.shape_cast %126 : vector<8xf32> to vector<8x1xf32>
    %128 = arith.addf %125, %127 : vector<8x1xf32>
    %cst_34 = arith.constant dense<0.000000e+00> : vector<8xf32>
    %129 = vector.multi_reduction <add>, %91, %cst_34 [1] : vector<8x512xf32> to vector<8xf32>
    %130 = vector.shape_cast %129 : vector<8xf32> to vector<8x1xf32>
    %131 = arith.addf %128, %130 : vector<8x1xf32>
    %cst_35 = arith.constant dense<0.000000e+00> : vector<8xf32>
    %132 = vector.multi_reduction <add>, %121, %cst_35 [1] : vector<8x512xf32> to vector<8xf32>
    %133 = vector.shape_cast %132 : vector<8xf32> to vector<8x1xf32>
    %134 = arith.addf %131, %133 : vector<8x1xf32>
    %cst_36 = arith.constant 2.048000e+03 : f32
    %135 = vector.broadcast %cst_36 : f32 to vector<8x1xf32>
    %136 = arith.divf %134, %135 : vector<8x1xf32>
    %cst_37 = arith.constant 0.000000e+00 : f32
    %137 = vector.broadcast %cst_37 : f32 to vector<8x1xf32>
    %138 = vector.broadcast %136 : vector<8x1xf32> to vector<8x512xf32>
    %139 = arith.subf %31, %138 : vector<8x512xf32>
    %140 = arith.mulf %139, %139 : vector<8x512xf32>
    %cst_38 = arith.constant dense<0.000000e+00> : vector<8xf32>
    %141 = vector.multi_reduction <add>, %140, %cst_38 [1] : vector<8x512xf32> to vector<8xf32>
    %142 = vector.shape_cast %141 : vector<8xf32> to vector<8x1xf32>
    %143 = arith.addf %137, %142 : vector<8x1xf32>
    %144 = vector.broadcast %136 : vector<8x1xf32> to vector<8x512xf32>
    %145 = arith.subf %61, %144 : vector<8x512xf32>
    %146 = arith.mulf %145, %145 : vector<8x512xf32>
    %cst_39 = arith.constant dense<0.000000e+00> : vector<8xf32>
    %147 = vector.multi_reduction <add>, %146, %cst_39 [1] : vector<8x512xf32> to vector<8xf32>
    %148 = vector.shape_cast %147 : vector<8xf32> to vector<8x1xf32>
    %149 = arith.addf %143, %148 : vector<8x1xf32>
    %150 = vector.broadcast %136 : vector<8x1xf32> to vector<8x512xf32>
    %151 = arith.subf %91, %150 : vector<8x512xf32>
    %152 = arith.mulf %151, %151 : vector<8x512xf32>
    %cst_40 = arith.constant dense<0.000000e+00> : vector<8xf32>
    %153 = vector.multi_reduction <add>, %152, %cst_40 [1] : vector<8x512xf32> to vector<8xf32>
    %154 = vector.shape_cast %153 : vector<8xf32> to vector<8x1xf32>
    %155 = arith.addf %149, %154 : vector<8x1xf32>
    %156 = vector.broadcast %136 : vector<8x1xf32> to vector<8x512xf32>
    %157 = arith.subf %121, %156 : vector<8x512xf32>
    %158 = arith.mulf %157, %157 : vector<8x512xf32>
    %cst_41 = arith.constant dense<0.000000e+00> : vector<8xf32>
    %159 = vector.multi_reduction <add>, %158, %cst_41 [1] : vector<8x512xf32> to vector<8xf32>
    %160 = vector.shape_cast %159 : vector<8xf32> to vector<8x1xf32>
    %161 = arith.addf %155, %160 : vector<8x1xf32>
    %cst_42 = arith.constant 2.048000e+03 : f32
    %162 = vector.broadcast %cst_42 : f32 to vector<8x1xf32>
    %163 = arith.divf %161, %162 : vector<8x1xf32>
    %c0_43 = arith.constant 0 : index
    %c0_44 = arith.constant 0 : index
    %164 = vector.load %arg3[%c0_43, %c0_44] : memref<8x1xf32, #tpu.memory_space<vmem>>, vector<8x1xf32>
    %cst_45 = arith.constant 9.99999974E-6 : f32
    %165 = vector.broadcast %cst_45 : f32 to vector<8x1xf32>
    %166 = arith.addf %163, %165 : vector<8x1xf32>
    %167 = math.rsqrt %166 : vector<8x1xf32>
    %168 = arith.mulf %164, %167 : vector<8x1xf32>
    %c0_46 = arith.constant 0 : index
    %c0_47 = arith.constant 0 : index
    %169 = vector.load %arg4[%c0_46, %c0_47] : memref<8x1xf32, #tpu.memory_space<vmem>>, vector<8x1xf32>
    %170 = arith.mulf %136, %168 : vector<8x1xf32>
    %171 = arith.subf %169, %170 : vector<8x1xf32>
    %172 = vector.broadcast %168 : vector<8x1xf32> to vector<8x512xf32>
    %173 = arith.mulf %31, %172 : vector<8x512xf32>
    %174 = vector.broadcast %171 : vector<8x1xf32> to vector<8x512xf32>
    %175 = arith.addf %173, %174 : vector<8x512xf32>
    %cst_48 = arith.constant 0.000000e+00 : f32
    %176 = vector.broadcast %cst_48 : f32 to vector<8x512xf32>
    %177 = arith.cmpf ogt, %175, %176 : vector<8x512xf32>
    %cst_49 = arith.constant 2.000000e-01 : f32
    %178 = vector.broadcast %cst_49 : f32 to vector<8x512xf32>
    %179 = arith.mulf %178, %175 : vector<8x512xf32>
    %180 = arith.select %177, %175, %179 : vector<8x512xi1>, vector<8x512xf32>
    %181 = arith.truncf %180 : vector<8x512xf32> to vector<8x512xbf16>
    %c0_50 = arith.constant 0 : index
    %c0_51 = arith.constant 0 : index
    %c0_52 = arith.constant 0 : index
    %182 = vector.load %arg5[%c0_50, %c0_51, %c0_52] : memref<4x8x512xbf16, #tpu.memory_space<vmem>>, vector<1x8x512xbf16>
    %183 = vector.shape_cast %182 : vector<1x8x512xbf16> to vector<8x512xbf16>
    %184 = vector.shape_cast %181 : vector<8x512xbf16> to vector<1x8x512xbf16>
    tpu.vector_store %arg5[%c0_50, %c0_51, %c0_52], %184 {strides = array<i32>} : memref<4x8x512xbf16, #tpu.memory_space<vmem>>, vector<1x8x512xbf16>,
    %185 = vector.broadcast %168 : vector<8x1xf32> to vector<8x512xf32>
    %186 = arith.mulf %61, %185 : vector<8x512xf32>
    %187 = vector.broadcast %171 : vector<8x1xf32> to vector<8x512xf32>
    %188 = arith.addf %186, %187 : vector<8x512xf32>
    %cst_53 = arith.constant 0.000000e+00 : f32
    %189 = vector.broadcast %cst_53 : f32 to vector<8x512xf32>
    %190 = arith.cmpf ogt, %188, %189 : vector<8x512xf32>
    %cst_54 = arith.constant 2.000000e-01 : f32
    %191 = vector.broadcast %cst_54 : f32 to vector<8x512xf32>
    %192 = arith.mulf %191, %188 : vector<8x512xf32>
    %193 = arith.select %190, %188, %192 : vector<8x512xi1>, vector<8x512xf32>
    %194 = arith.truncf %193 : vector<8x512xf32> to vector<8x512xbf16>
    %c1_55 = arith.constant 1 : index
    %c0_56 = arith.constant 0 : index
    %c0_57 = arith.constant 0 : index
    %195 = vector.load %arg5[%c1_55, %c0_56, %c0_57] : memref<4x8x512xbf16, #tpu.memory_space<vmem>>, vector<1x8x512xbf16>
    %196 = vector.shape_cast %195 : vector<1x8x512xbf16> to vector<8x512xbf16>
    %197 = vector.shape_cast %194 : vector<8x512xbf16> to vector<1x8x512xbf16>
    tpu.vector_store %arg5[%c1_55, %c0_56, %c0_57], %197 {strides = array<i32>} : memref<4x8x512xbf16, #tpu.memory_space<vmem>>, vector<1x8x512xbf16>,
    %198 = vector.broadcast %168 : vector<8x1xf32> to vector<8x512xf32>
    %199 = arith.mulf %91, %198 : vector<8x512xf32>
    %200 = vector.broadcast %171 : vector<8x1xf32> to vector<8x512xf32>
    %201 = arith.addf %199, %200 : vector<8x512xf32>
    %cst_58 = arith.constant 0.000000e+00 : f32
    %202 = vector.broadcast %cst_58 : f32 to vector<8x512xf32>
    %203 = arith.cmpf ogt, %201, %202 : vector<8x512xf32>
    %cst_59 = arith.constant 2.000000e-01 : f32
    %204 = vector.broadcast %cst_59 : f32 to vector<8x512xf32>
    %205 = arith.mulf %204, %201 : vector<8x512xf32>
    %206 = arith.select %203, %201, %205 : vector<8x512xi1>, vector<8x512xf32>
    %207 = arith.truncf %206 : vector<8x512xf32> to vector<8x512xbf16>
    %c2_60 = arith.constant 2 : index
    %c0_61 = arith.constant 0 : index
    %c0_62 = arith.constant 0 : index
    %208 = vector.load %arg5[%c2_60, %c0_61, %c0_62] : memref<4x8x512xbf16, #tpu.memory_space<vmem>>, vector<1x8x512xbf16>
    %209 = vector.shape_cast %208 : vector<1x8x512xbf16> to vector<8x512xbf16>
    %210 = vector.shape_cast %207 : vector<8x512xbf16> to vector<1x8x512xbf16>
    tpu.vector_store %arg5[%c2_60, %c0_61, %c0_62], %210 {strides = array<i32>} : memref<4x8x512xbf16, #tpu.memory_space<vmem>>, vector<1x8x512xbf16>,
    %211 = vector.broadcast %168 : vector<8x1xf32> to vector<8x512xf32>
    %212 = arith.mulf %121, %211 : vector<8x512xf32>
    %213 = vector.broadcast %171 : vector<8x1xf32> to vector<8x512xf32>
    %214 = arith.addf %212, %213 : vector<8x512xf32>
    %cst_63 = arith.constant 0.000000e+00 : f32
    %215 = vector.broadcast %cst_63 : f32 to vector<8x512xf32>
    %216 = arith.cmpf ogt, %214, %215 : vector<8x512xf32>
    %cst_64 = arith.constant 2.000000e-01 : f32
    %217 = vector.broadcast %cst_64 : f32 to vector<8x512xf32>
    %218 = arith.mulf %217, %214 : vector<8x512xf32>
    %219 = arith.select %216, %214, %218 : vector<8x512xi1>, vector<8x512xf32>
    %220 = arith.truncf %219 : vector<8x512xf32> to vector<8x512xbf16>
    %c3_65 = arith.constant 3 : index
    %c0_66 = arith.constant 0 : index
    %c0_67 = arith.constant 0 : index
    %221 = vector.load %arg5[%c3_65, %c0_66, %c0_67] : memref<4x8x512xbf16, #tpu.memory_space<vmem>>, vector<1x8x512xbf16>
    %222 = vector.shape_cast %221 : vector<1x8x512xbf16> to vector<8x512xbf16>
    %223 = vector.shape_cast %220 : vector<8x512xbf16> to vector<1x8x512xbf16>
    tpu.vector_store %arg5[%c3_65, %c0_66, %c0_67], %223 {strides = array<i32>} : memref<4x8x512xbf16, #tpu.memory_space<vmem>>, vector<1x8x512xbf16>,
    return
  }
}

module attributes {stable_mosaic.version = 11 : i64} {
  func.func @out_conv_kernel(%arg0: memref<8x2114xbf16, #tpu.memory_space<vmem>>, %arg1: memref<4x2048xbf16, #tpu.memory_space<vmem>>, %arg2: memref<1x72xbf16, #tpu.memory_space<vmem>>, %arg3: memref<1x1xf32, #tpu.memory_space<vmem>>, %arg4: memref<1x2048xf32, #tpu.memory_space<vmem>>) attributes {dimension_semantics = [], scalar_prefetch = 0 : i64, scratch_operands = 0 : i64, tpu.core_type = #tpu.core_type<tc>} {
    %c0 = arith.constant 0 : index
    %c0_0 = arith.constant 0 : index
    %0 = vector.load %arg0[%c0, %c0_0] : memref<8x2114xbf16, #tpu.memory_space<vmem>>, vector<8x2114xbf16>
    %c0_1 = arith.constant 0 : index
    %c0_2 = arith.constant 0 : index
    %1 = vector.load %arg1[%c0_1, %c0_2] : memref<4x2048xbf16, #tpu.memory_space<vmem>>, vector<4x2048xbf16>
    %cst = arith.constant 0.000000e+00 : f32
    %2 = vector.broadcast %cst : f32 to vector<1x2048xf32>
    %c0_3 = arith.constant 0 : index
    %c0_4 = arith.constant 0 : index
    %3 = vector.load %arg2[%c0_3, %c0_4] : memref<1x72xbf16, #tpu.memory_space<vmem>>, vector<1x8xbf16>
    %4 = vector.extract_strided_slice %0 {offsets = [0, 0], sizes = [8, 2048], strides = [1, 1]} : vector<8x2114xbf16> to vector<8x2048xbf16>
    %5 = vector.extract_strided_slice %1 {offsets = [0, 0], sizes = [1, 2048], strides = [1, 1]} : vector<4x2048xbf16> to vector<1x2048xbf16>
    %6 = vector.extract_strided_slice %1 {offsets = [2, 0], sizes = [1, 2048], strides = [1, 1]} : vector<4x2048xbf16> to vector<1x2048xbf16>
    %7 = arith.mulf %5, %6 : vector<1x2048xbf16>
    %8 = vector.broadcast %7 : vector<1x2048xbf16> to vector<8x2048xbf16>
    %9 = arith.mulf %4, %8 : vector<8x2048xbf16>
    %cst_5 = arith.constant dense<0.000000e+00> : vector<1x2048xf32>
    %10 = tpu.matmul %3, %9, %cst_5 {dimension_numbers = #tpu.dot_dimension_numbers<[1], [0], [0], [1], [0, 0, 1, 1], [], []>} : vector<1x8xbf16>, vector<8x2048xbf16>, vector<1x2048xf32> -> vector<1x2048xf32>
    %11 = arith.addf %2, %10 : vector<1x2048xf32>
    %c0_6 = arith.constant 0 : index
    %c8 = arith.constant 8 : index
    %12 = vector.load %arg2[%c0_6, %c8] : memref<1x72xbf16, #tpu.memory_space<vmem>>, vector<1x8xbf16>
    %13 = vector.extract_strided_slice %0 {offsets = [0, 1], sizes = [8, 2048], strides = [1, 1]} : vector<8x2114xbf16> to vector<8x2048xbf16>
    %14 = vector.extract_strided_slice %1 {offsets = [0, 0], sizes = [1, 2048], strides = [1, 1]} : vector<4x2048xbf16> to vector<1x2048xbf16>
    %15 = vector.broadcast %14 : vector<1x2048xbf16> to vector<8x2048xbf16>
    %16 = arith.mulf %13, %15 : vector<8x2048xbf16>
    %cst_7 = arith.constant dense<0.000000e+00> : vector<1x2048xf32>
    %17 = tpu.matmul %12, %16, %cst_7 {dimension_numbers = #tpu.dot_dimension_numbers<[1], [0], [0], [1], [0, 0, 1, 1], [], []>} : vector<1x8xbf16>, vector<8x2048xbf16>, vector<1x2048xf32> -> vector<1x2048xf32>
    %18 = arith.addf %11, %17 : vector<1x2048xf32>
    %c0_8 = arith.constant 0 : index
    %c16 = arith.constant 16 : index
    %19 = vector.load %arg2[%c0_8, %c16] : memref<1x72xbf16, #tpu.memory_space<vmem>>, vector<1x8xbf16>
    %20 = vector.extract_strided_slice %0 {offsets = [0, 2], sizes = [8, 2048], strides = [1, 1]} : vector<8x2114xbf16> to vector<8x2048xbf16>
    %21 = vector.extract_strided_slice %1 {offsets = [0, 0], sizes = [1, 2048], strides = [1, 1]} : vector<4x2048xbf16> to vector<1x2048xbf16>
    %22 = vector.extract_strided_slice %1 {offsets = [3, 0], sizes = [1, 2048], strides = [1, 1]} : vector<4x2048xbf16> to vector<1x2048xbf16>
    %23 = arith.mulf %21, %22 : vector<1x2048xbf16>
    %24 = vector.broadcast %23 : vector<1x2048xbf16> to vector<8x2048xbf16>
    %25 = arith.mulf %20, %24 : vector<8x2048xbf16>
    %cst_9 = arith.constant dense<0.000000e+00> : vector<1x2048xf32>
    %26 = tpu.matmul %19, %25, %cst_9 {dimension_numbers = #tpu.dot_dimension_numbers<[1], [0], [0], [1], [0, 0, 1, 1], [], []>} : vector<1x8xbf16>, vector<8x2048xbf16>, vector<1x2048xf32> -> vector<1x2048xf32>
    %27 = arith.addf %18, %26 : vector<1x2048xf32>
    %c0_10 = arith.constant 0 : index
    %c24 = arith.constant 24 : index
    %28 = vector.load %arg2[%c0_10, %c24] : memref<1x72xbf16, #tpu.memory_space<vmem>>, vector<1x8xbf16>
    %29 = vector.extract_strided_slice %0 {offsets = [0, 32], sizes = [8, 2048], strides = [1, 1]} : vector<8x2114xbf16> to vector<8x2048xbf16>
    %30 = vector.extract_strided_slice %1 {offsets = [2, 0], sizes = [1, 2048], strides = [1, 1]} : vector<4x2048xbf16> to vector<1x2048xbf16>
    %31 = vector.broadcast %30 : vector<1x2048xbf16> to vector<8x2048xbf16>
    %32 = arith.mulf %29, %31 : vector<8x2048xbf16>
    %cst_11 = arith.constant dense<0.000000e+00> : vector<1x2048xf32>
    %33 = tpu.matmul %28, %32, %cst_11 {dimension_numbers = #tpu.dot_dimension_numbers<[1], [0], [0], [1], [0, 0, 1, 1], [], []>} : vector<1x8xbf16>, vector<8x2048xbf16>, vector<1x2048xf32> -> vector<1x2048xf32>
    %34 = arith.addf %27, %33 : vector<1x2048xf32>
    %c0_12 = arith.constant 0 : index
    %c32 = arith.constant 32 : index
    %35 = vector.load %arg2[%c0_12, %c32] : memref<1x72xbf16, #tpu.memory_space<vmem>>, vector<1x8xbf16>
    %36 = vector.extract_strided_slice %0 {offsets = [0, 33], sizes = [8, 2048], strides = [1, 1]} : vector<8x2114xbf16> to vector<8x2048xbf16>
    %cst_13 = arith.constant dense<0.000000e+00> : vector<1x2048xf32>
    %37 = tpu.matmul %35, %36, %cst_13 {dimension_numbers = #tpu.dot_dimension_numbers<[1], [0], [0], [1], [0, 0, 1, 1], [], []>} : vector<1x8xbf16>, vector<8x2048xbf16>, vector<1x2048xf32> -> vector<1x2048xf32>
    %38 = arith.addf %34, %37 : vector<1x2048xf32>
    %c0_14 = arith.constant 0 : index
    %c40 = arith.constant 40 : index
    %39 = vector.load %arg2[%c0_14, %c40] : memref<1x72xbf16, #tpu.memory_space<vmem>>, vector<1x8xbf16>
    %40 = vector.extract_strided_slice %0 {offsets = [0, 34], sizes = [8, 2048], strides = [1, 1]} : vector<8x2114xbf16> to vector<8x2048xbf16>
    %41 = vector.extract_strided_slice %1 {offsets = [3, 0], sizes = [1, 2048], strides = [1, 1]} : vector<4x2048xbf16> to vector<1x2048xbf16>
    %42 = vector.broadcast %41 : vector<1x2048xbf16> to vector<8x2048xbf16>
    %43 = arith.mulf %40, %42 : vector<8x2048xbf16>
    %cst_15 = arith.constant dense<0.000000e+00> : vector<1x2048xf32>
    %44 = tpu.matmul %39, %43, %cst_15 {dimension_numbers = #tpu.dot_dimension_numbers<[1], [0], [0], [1], [0, 0, 1, 1], [], []>} : vector<1x8xbf16>, vector<8x2048xbf16>, vector<1x2048xf32> -> vector<1x2048xf32>
    %45 = arith.addf %38, %44 : vector<1x2048xf32>
    %c0_16 = arith.constant 0 : index
    %c48 = arith.constant 48 : index
    %46 = vector.load %arg2[%c0_16, %c48] : memref<1x72xbf16, #tpu.memory_space<vmem>>, vector<1x8xbf16>
    %47 = vector.extract_strided_slice %0 {offsets = [0, 64], sizes = [8, 2048], strides = [1, 1]} : vector<8x2114xbf16> to vector<8x2048xbf16>
    %48 = vector.extract_strided_slice %1 {offsets = [1, 0], sizes = [1, 2048], strides = [1, 1]} : vector<4x2048xbf16> to vector<1x2048xbf16>
    %49 = vector.extract_strided_slice %1 {offsets = [2, 0], sizes = [1, 2048], strides = [1, 1]} : vector<4x2048xbf16> to vector<1x2048xbf16>
    %50 = arith.mulf %48, %49 : vector<1x2048xbf16>
    %51 = vector.broadcast %50 : vector<1x2048xbf16> to vector<8x2048xbf16>
    %52 = arith.mulf %47, %51 : vector<8x2048xbf16>
    %cst_17 = arith.constant dense<0.000000e+00> : vector<1x2048xf32>
    %53 = tpu.matmul %46, %52, %cst_17 {dimension_numbers = #tpu.dot_dimension_numbers<[1], [0], [0], [1], [0, 0, 1, 1], [], []>} : vector<1x8xbf16>, vector<8x2048xbf16>, vector<1x2048xf32> -> vector<1x2048xf32>
    %54 = arith.addf %45, %53 : vector<1x2048xf32>
    %c0_18 = arith.constant 0 : index
    %c56 = arith.constant 56 : index
    %55 = vector.load %arg2[%c0_18, %c56] : memref<1x72xbf16, #tpu.memory_space<vmem>>, vector<1x8xbf16>
    %56 = vector.extract_strided_slice %0 {offsets = [0, 65], sizes = [8, 2048], strides = [1, 1]} : vector<8x2114xbf16> to vector<8x2048xbf16>
    %57 = vector.extract_strided_slice %1 {offsets = [1, 0], sizes = [1, 2048], strides = [1, 1]} : vector<4x2048xbf16> to vector<1x2048xbf16>
    %58 = vector.broadcast %57 : vector<1x2048xbf16> to vector<8x2048xbf16>
    %59 = arith.mulf %56, %58 : vector<8x2048xbf16>
    %cst_19 = arith.constant dense<0.000000e+00> : vector<1x2048xf32>
    %60 = tpu.matmul %55, %59, %cst_19 {dimension_numbers = #tpu.dot_dimension_numbers<[1], [0], [0], [1], [0, 0, 1, 1], [], []>} : vector<1x8xbf16>, vector<8x2048xbf16>, vector<1x2048xf32> -> vector<1x2048xf32>
    %61 = arith.addf %54, %60 : vector<1x2048xf32>
    %c0_20 = arith.constant 0 : index
    %c64 = arith.constant 64 : index
    %62 = vector.load %arg2[%c0_20, %c64] : memref<1x72xbf16, #tpu.memory_space<vmem>>, vector<1x8xbf16>
    %63 = vector.extract_strided_slice %0 {offsets = [0, 66], sizes = [8, 2048], strides = [1, 1]} : vector<8x2114xbf16> to vector<8x2048xbf16>
    %64 = vector.extract_strided_slice %1 {offsets = [1, 0], sizes = [1, 2048], strides = [1, 1]} : vector<4x2048xbf16> to vector<1x2048xbf16>
    %65 = vector.extract_strided_slice %1 {offsets = [3, 0], sizes = [1, 2048], strides = [1, 1]} : vector<4x2048xbf16> to vector<1x2048xbf16>
    %66 = arith.mulf %64, %65 : vector<1x2048xbf16>
    %67 = vector.broadcast %66 : vector<1x2048xbf16> to vector<8x2048xbf16>
    %68 = arith.mulf %63, %67 : vector<8x2048xbf16>
    %cst_21 = arith.constant dense<0.000000e+00> : vector<1x2048xf32>
    %69 = tpu.matmul %62, %68, %cst_21 {dimension_numbers = #tpu.dot_dimension_numbers<[1], [0], [0], [1], [0, 0, 1, 1], [], []>} : vector<1x8xbf16>, vector<8x2048xbf16>, vector<1x2048xf32> -> vector<1x2048xf32>
    %70 = arith.addf %61, %69 : vector<1x2048xf32>
    %c0_22 = arith.constant 0 : index
    %c0_23 = arith.constant 0 : index
    %71 = vector.load %arg3[%c0_22, %c0_23] : memref<1x1xf32, #tpu.memory_space<vmem>>, vector<1x1xf32>
    %72 = vector.broadcast %71 : vector<1x1xf32> to vector<1x2048xf32>
    %73 = arith.addf %70, %72 : vector<1x2048xf32>
    %74 = math.tanh %73 : vector<1x2048xf32>
    %c0_24 = arith.constant 0 : index
    %c0_25 = arith.constant 0 : index
    %75 = vector.load %arg4[%c0_24, %c0_25] : memref<1x2048xf32, #tpu.memory_space<vmem>>, vector<1x2048xf32>
    tpu.vector_store %arg4[%c0_24, %c0_25], %74 {strides = array<i32>} : memref<1x2048xf32, #tpu.memory_space<vmem>>, vector<1x2048xf32>,
    return
  }
}

</mosaic_0001>

<bundles_post_ra>
// kernel: generator_forward.5
= control target key start
LH: loop header
LB: loop body
LE: loop exit
PB: predicated region body
PF: predicated region fallthrough
CT: control target
= control target key end

     0   :  { %v1144_v3 = vmov 0   ;;  %vm577_vm0 = vcmask 1041920   ;;  %vm568_vm1 = vcmask 517120   ;;  %vm958_vm2 = vcmask 516096   ;;  %s1602_s1 = inlined_call_operand.vmem [shape: bf16[128,1024], index: 1, kind: input, shape index: {}]   ;;  %s1603_s0 = inlined_call_operand.vmem [shape: f32[2,128], index: 0, kind: input, shape index: {}]   ;;  %s1604_s2 = inlined_call_operand.vmem [shape: f32[1,64], index: 2, kind: input, shape index: {}]   ;;  %s1605_s3 = inlined_call_operand.vmem [shape: f32[1,64], index: 3, kind: input, shape index: {}]   ;;  %s1606_s4 = inlined_call_operand.vmem [shape: bf16[2,1024], index: 4, kind: output, shape index: {}]  }
   0x1   :  { %v20_v0 = vld [vmem:[%s1602_s1] sm:$0xff]  ;;  %v21_v2 = vld [vmem:[%s1602_s1 + $0x8] sm:$0xff]  ;;  %436 = vmatprep.mubr.bf16.mxu0 %v1144_v3  ;;  %477 = vmatprep.mubr.bf16.mxu1 %v1144_v3  ;;  %v22_v63 = vld [vmem:[%s1602_s1 + $0x10] sm:$0xff]  ;;  %vm972_vm11 = vcmask 1040896  }
   0x2   :  { %v24_v1 = vld [vmem:[%s1602_s1 + $0x20] sm:$0xff]  ;;  %v25_v5 = vld [vmem:[%s1602_s1 + $0x28] sm:$0xff] }
   0x3   :  { %v1077_v4 = vcombine.high %v20_v0, %v24_v1  ;;  %v1076_v6 = vcombine.low %v20_v0, %v24_v1  ;;  %v28_v7 = vld [vmem:[%s1602_s1 + $0x40] sm:$0xff]  ;;  %v1079_v9 = vcombine.high %v21_v2, %v25_v5  ;;  %v1078_v10 = vcombine.low %v21_v2, %v25_v5  ;;  %v29_v12 = vld [vmem:[%s1602_s1 + $0x48] sm:$0xff]  ;;  %v26_v0 = vld [vmem:[%s1602_s1 + $0x30] sm:$0xff] }
   0x4   :  { %v32_v8 = vld [vmem:[%s1602_s1 + $0x60] sm:$0xff]  ;;  %v33_v13 = vld [vmem:[%s1602_s1 + $0x68] sm:$0xff]  ;;  %v23_v1 = vld [vmem:[%s1602_s1 + $0x18] sm:$0xff] }
   0x5   :  { %v1085_v11 = vcombine.high %v28_v7, %v32_v8  ;;  %v36_v14 = vld [vmem:[%s1602_s1 + $0x80] sm:$0xff]  ;;  %404 = vmatprep.subr.bf16.mxu0 %v1077_v4  ;;  %v1087_v15 = vcombine.high %v29_v12, %v33_v13  ;;  %v37_v17 = vld [vmem:[%s1602_s1 + $0x88] sm:$0xff]  ;;  %445 = vmatprep.subr.bf16.mxu1 %v1079_v9  ;;  %v1084_v19 = vcombine.low %v28_v7, %v32_v8  ;;  %v27_v2 = vld [vmem:[%s1602_s1 + $0x38] sm:$0xff] }
   0x6   :  { %v40_v16 = vld [vmem:[%s1602_s1 + $0xa0] sm:$0xff]  ;;  %v41_v18 = vld [vmem:[%s1602_s1 + $0xa8] sm:$0xff]  ;;  %405 = vmatpush1.bf16.msra.mxu0 %v1076_v6  ;;  %446 = vmatpush1.bf16.msra.mxu1 %v1078_v10  ;;  %v1086_v20 = vcombine.low %v29_v12, %v33_v13  ;;  %v1081_v7 = vcombine.high %v22_v63, %v26_v0  ;;  %v1083_v8 = vcombine.high %v23_v1, %v27_v2  ;;  %v30_v9 = vld [vmem:[%s1602_s1 + $0x50] sm:$0xff] }
   0x7   :  { %406 = vmatprep.subr.bf16.mxu0 %v1085_v11  ;;  %v1093_v21 = vcombine.high %v36_v14, %v40_v16  ;;  %447 = vmatprep.subr.bf16.mxu1 %v1087_v15  ;;  %v1095_v22 = vcombine.high %v37_v17, %v41_v18  ;;  %v44_v23 = vld [vmem:[%s1602_s1 + $0xc0] sm:$0xff]  ;;  %v45_v25 = vld [vmem:[%s1602_s1 + $0xc8] sm:$0xff]  ;;  %v1092_v27 = vcombine.low %v36_v14, %v40_v16  ;;  %v34_v10 = vld [vmem:[%s1602_s1 + $0x70] sm:$0xff] }
   0x8   :  { %v48_v24 = vld [vmem:[%s1602_s1 + $0xe0] sm:$0xff]  ;;  %v49_v26 = vld [vmem:[%s1602_s1 + $0xe8] sm:$0xff]  ;;  %v1094_v28 = vcombine.low %v37_v17, %v41_v18  ;;  %v31_v12 = vld [vmem:[%s1602_s1 + $0x58] sm:$0xff]  ;;  %v1080_v14 = vcombine.low %v22_v63, %v26_v0  ;;  %v1082_v15 = vcombine.low %v23_v1, %v27_v2  ;;  %v1089_v16 = vcombine.high %v30_v9, %v34_v10 }
   0x9   :  { %v1101_v29 = vcombine.high %v44_v23, %v48_v24  ;;  %v1103_v30 = vcombine.high %v45_v25, %v49_v26  ;;  %v52_v31 = vld [vmem:[%s1602_s1 + $0x100] sm:$0xff]  ;;  %v53_v33 = vld [vmem:[%s1602_s1 + $0x108] sm:$0xff]  ;;  %v1100_v35 = vcombine.low %v44_v23, %v48_v24  ;;  %v1102_v36 = vcombine.low %v45_v25, %v49_v26  ;;  %v35_v13 = vld [vmem:[%s1602_s1 + $0x78] sm:$0xff] }
   0xa   :  { %407 = vmatpush1.bf16.msra.mxu0 %v1084_v19  ;;  %448 = vmatpush1.bf16.msra.mxu1 %v1086_v20  ;;  %v56_v32 = vld [vmem:[%s1602_s1 + $0x120] sm:$0xff]  ;;  %v57_v34 = vld [vmem:[%s1602_s1 + $0x128] sm:$0xff]  ;;  %v1091_v17 = vcombine.high %v31_v12, %v35_v13  ;;  %v38_v18 = vld [vmem:[%s1602_s1 + $0x90] sm:$0xff]  ;;  %v1090_v23 = vcombine.low %v31_v12, %v35_v13 }
   0xb   :  { %408 = vmatprep.subr.bf16.mxu0 %v1093_v21  ;;  %449 = vmatprep.subr.bf16.mxu1 %v1095_v22  ;;  %v1109_v37 = vcombine.high %v52_v31, %v56_v32  ;;  %v1111_v38 = vcombine.high %v53_v33, %v57_v34  ;;  %v60_v39 = vld [vmem:[%s1602_s1 + $0x140] sm:$0xff]  ;;  %v61_v41 = vld [vmem:[%s1602_s1 + $0x148] sm:$0xff]  ;;  %v1108_v43 = vcombine.low %v52_v31, %v56_v32  ;;  %v42_v19 = vld [vmem:[%s1602_s1 + $0xb0] sm:$0xff] }
   0xc   :  { %v64_v40 = vld [vmem:[%s1602_s1 + $0x160] sm:$0xff]  ;;  %v65_v42 = vld [vmem:[%s1602_s1 + $0x168] sm:$0xff]  ;;  %v1110_v44 = vcombine.low %v53_v33, %v57_v34  ;;  %v39_v20 = vld [vmem:[%s1602_s1 + $0x98] sm:$0xff]  ;;  %v1088_v22 = vcombine.low %v30_v9, %v34_v10  ;;  %v1097_v24 = vcombine.high %v38_v18, %v42_v19 }
   0xd   :  { %v1117_v45 = vcombine.high %v60_v39, %v64_v40  ;;  %v1119_v46 = vcombine.high %v61_v41, %v65_v42  ;;  %v68_v47 = vld [vmem:[%s1602_s1 + $0x180] sm:$0xff]  ;;  %v69_v49 = vld [vmem:[%s1602_s1 + $0x188] sm:$0xff]  ;;  %v1116_v51 = vcombine.low %v60_v39, %v64_v40  ;;  %v1118_v52 = vcombine.low %v61_v41, %v65_v42  ;;  %v43_v21 = vld [vmem:[%s1602_s1 + $0xb8] sm:$0xff] }
   0xe   :  { %409 = vmatpush1.bf16.msra.mxu0 %v1092_v27  ;;  %450 = vmatpush1.bf16.msra.mxu1 %v1094_v28  ;;  %v72_v48 = vld [vmem:[%s1602_s1 + $0x1a0] sm:$0xff]  ;;  %v73_v50 = vld [vmem:[%s1602_s1 + $0x1a8] sm:$0xff]  ;;  %v1099_v25 = vcombine.high %v39_v20, %v43_v21  ;;  %v46_v26 = vld [vmem:[%s1602_s1 + $0xd0] sm:$0xff]  ;;  %v1098_v31 = vcombine.low %v39_v20, %v43_v21 }
   0xf   :  { %410 = vmatprep.subr.bf16.mxu0 %v1101_v29  ;;  %451 = vmatprep.subr.bf16.mxu1 %v1103_v30  ;;  %v1125_v53 = vcombine.high %v68_v47, %v72_v48  ;;  %v1127_v54 = vcombine.high %v69_v49, %v73_v50  ;;  %v76_v55 = vld [vmem:[%s1602_s1 + $0x1c0] sm:$0xff]  ;;  %v77_v57 = vld [vmem:[%s1602_s1 + $0x1c8] sm:$0xff]  ;;  %v1124_v59 = vcombine.low %v68_v47, %v72_v48  ;;  %v50_v27 = vld [vmem:[%s1602_s1 + $0xf0] sm:$0xff] }
  0x10   :  { %v80_v56 = vld [vmem:[%s1602_s1 + $0x1e0] sm:$0xff]  ;;  %v81_v58 = vld [vmem:[%s1602_s1 + $0x1e8] sm:$0xff]  ;;  %v1126_v60 = vcombine.low %v69_v49, %v73_v50  ;;  %v47_v28 = vld [vmem:[%s1602_s1 + $0xd8] sm:$0xff]  ;;  %v1096_v30 = vcombine.low %v38_v18, %v42_v19  ;;  %v1105_v32 = vcombine.high %v46_v26, %v50_v27 }
  0x11   :  { %v1133_v61 = vcombine.high %v76_v55, %v80_v56  ;;  %v1135_v62 = vcombine.high %v77_v57, %v81_v58  ;;  %v1132_v4 = vcombine.low %v76_v55, %v80_v56  ;;  %v18_v5 = vld [vmem:[%s1603_s0] sm:$0x3]  ;;  %v1134_v6 = vcombine.low %v77_v57, %v81_v58  ;;  %v51_v29 = vld [vmem:[%s1602_s1 + $0xf8] sm:$0xff]  ;;  %v54_v34 = vld [vmem:[%s1602_s1 + $0x110] sm:$0xff] }
  0x12   :  { %411 = vmatpush1.bf16.msra.mxu0 %v1100_v35  ;;  %452 = vmatpush1.bf16.msra.mxu1 %v1102_v36  ;;  %v1290_v11 = vpack.c.bf16 %v18_v5, %v18_v5  ;;  %v1107_v33 = vcombine.high %v47_v28, %v51_v29  ;;  %v58_v35 = vld [vmem:[%s1602_s1 + $0x130] sm:$0xff]  ;;  %v59_v36 = vld [vmem:[%s1602_s1 + $0x138] sm:$0xff] }
  0x13   :  { %412 = vmatprep.subr.bf16.mxu0 %v1109_v37  ;;  %453 = vmatprep.subr.bf16.mxu1 %v1111_v38  ;;  %v1104_v37 = vcombine.low %v46_v26, %v50_v27  ;;  %v1106_v38 = vcombine.low %v47_v28, %v51_v29  ;;  %v1113_v39 = vcombine.high %v54_v34, %v58_v35  ;;  %v62_v41 = vld [vmem:[%s1602_s1 + $0x150] sm:$0xff] }
  0x14   :  { %v66_v42 = vld [vmem:[%s1602_s1 + $0x170] sm:$0xff] }
  0x15   :  { %v1121_v47 = vcombine.high %v62_v41, %v66_v42  ;;  %v70_v49 = vld [vmem:[%s1602_s1 + $0x190] sm:$0xff] }
  0x16   :  { %413 = vmatpush1.bf16.msra.mxu0 %v1108_v43  ;;  %454 = vmatpush1.bf16.msra.mxu1 %v1110_v44  ;;  %v63_v43 = vld [vmem:[%s1602_s1 + $0x158] sm:$0xff]  ;;  %v74_v50 = vld [vmem:[%s1602_s1 + $0x1b0] sm:$0xff] }
  0x17   :  { %414 = vmatprep.subr.bf16.mxu0 %v1117_v45  ;;  %455 = vmatprep.subr.bf16.mxu1 %v1119_v46  ;;  %v67_v44 = vld [vmem:[%s1602_s1 + $0x178] sm:$0xff]  ;;  %v1112_v45 = vcombine.low %v54_v34, %v58_v35  ;;  %v1129_v55 = vcombine.high %v70_v49, %v74_v50  ;;  %v78_v57 = vld [vmem:[%s1602_s1 + $0x1d0] sm:$0xff] }
  0x18   :  { %v1123_v48 = vcombine.high %v63_v43, %v67_v44  ;;  %v82_v58 = vld [vmem:[%s1602_s1 + $0x1f0] sm:$0xff] }
  0x19   :  { %v1137_v63 = vcombine.high %v78_v57, %v82_v58  ;;  %v1136_v1 = vcombine.low %v78_v57, %v82_v58 }
  0x1a   :  { %415 = vmatpush1.bf16.msra.mxu0 %v1116_v51  ;;  %456 = vmatpush1.bf16.msra.mxu1 %v1118_v52  ;;  %v71_v51 = vld [vmem:[%s1602_s1 + $0x198] sm:$0xff] }
  0x1b   :  { %416 = vmatprep.subr.bf16.mxu0 %v1125_v53  ;;  %457 = vmatprep.subr.bf16.mxu1 %v1127_v54  ;;  %v75_v52 = vld [vmem:[%s1602_s1 + $0x1b8] sm:$0xff]  ;;  %v1120_v53 = vcombine.low %v62_v41, %v66_v42  ;;  %v1122_v54 = vcombine.low %v63_v43, %v67_v44 }
  0x1c   :  { %v1131_v56 = vcombine.high %v71_v51, %v75_v52 }
  0x1e   :  { %417 = vmatpush1.bf16.msra.mxu0 %v1124_v59  ;;  %458 = vmatpush1.bf16.msra.mxu1 %v1126_v60  ;;  %v79_v59 = vld [vmem:[%s1602_s1 + $0x1d8] sm:$0xff] }
  0x1f   :  { %418 = vmatprep.subr.bf16.mxu0 %v1133_v61  ;;  %459 = vmatprep.subr.bf16.mxu1 %v1135_v62  ;;  %v83_v60 = vld [vmem:[%s1602_s1 + $0x1f8] sm:$0xff]  ;;  %v1128_v61 = vcombine.low %v70_v49, %v74_v50  ;;  %v1130_v62 = vcombine.low %v71_v51, %v75_v52 }
  0x20   :  { %v1139_v0 = vcombine.high %v79_v59, %v83_v60  ;;  %v1138_v2 = vcombine.low %v79_v59, %v83_v60 }
  0x22   :  { %419 = vmatpush1.bf16.msra.mxu0 %v1132_v4  ;;  %460 = vmatpush1.bf16.msra.mxu1 %v1134_v6 }
  0x23   :  { %486 = vmatprep.subr.bf16.mxu0 %v1081_v7  ;;  %527 = vmatprep.subr.bf16.mxu1 %v1083_v8 }
  0x25   :  { %437 = vmatmul.mubr.bf16.vlgmr.msra.gmra.mrb[0].mxu0 %v1290_v11  ;;  %478 = vmatmul.mubr.bf16.vlgmr.msra.gmra.mrb[0].mxu1 %v1290_v11 }
  0x26   :  { %487 = vmatpush1.bf16.msra.mxu0 %v1080_v14  ;;  %528 = vmatpush1.bf16.msra.mxu1 %v1082_v15 }
  0x27   :  { %488 = vmatprep.subr.bf16.mxu0 %v1089_v16  ;;  %529 = vmatprep.subr.bf16.mxu1 %v1091_v17 }
  0x28   :  { %518 = vmatprep.mubr.bf16.mxu0 %v1144_v3  ;;  %559 = vmatprep.mubr.bf16.mxu1 %v1144_v3  ;;  %v55_v3 = vld [vmem:[%s1602_s1 + $0x118] sm:$0xff]  ;;  %s1145_s1 = smov 64  }
  0x29   :  { %v1115_v40 = vcombine.high %v55_v3, %v59_v36  ;;  %v1114_v46 = vcombine.low %v55_v3, %v59_v36 }
  0x2a   :  { %489 = vmatpush1.bf16.msra.mxu0 %v1088_v22  ;;  %530 = vmatpush1.bf16.msra.mxu1 %v1090_v23 }
  0x2b   :  { %490 = vmatprep.subr.bf16.mxu0 %v1097_v24  ;;  %531 = vmatprep.subr.bf16.mxu1 %v1099_v25 }
  0x2e   :  { %491 = vmatpush1.bf16.msra.mxu0 %v1096_v30  ;;  %532 = vmatpush1.bf16.msra.mxu1 %v1098_v31 }
  0x2f   :  { %492 = vmatprep.subr.bf16.mxu0 %v1105_v32  ;;  %533 = vmatprep.subr.bf16.mxu1 %v1107_v33 }
  0x32   :  { %493 = vmatpush1.bf16.msra.mxu0 %v1104_v37  ;;  %534 = vmatpush1.bf16.msra.mxu1 %v1106_v38 }
  0x33   :  { %494 = vmatprep.subr.bf16.mxu0 %v1113_v39  ;;  %535 = vmatprep.subr.bf16.mxu1 %v1115_v40 }
  0x36   :  { %495 = vmatpush1.bf16.msra.mxu0 %v1112_v45  ;;  %536 = vmatpush1.bf16.msra.mxu1 %v1114_v46 }
  0x37   :  { %496 = vmatprep.subr.bf16.mxu0 %v1121_v47  ;;  %537 = vmatprep.subr.bf16.mxu1 %v1123_v48 }
  0x3a   :  { %497 = vmatpush1.bf16.msra.mxu0 %v1120_v53  ;;  %538 = vmatpush1.bf16.msra.mxu1 %v1122_v54 }
  0x3b   :  { %498 = vmatprep.subr.bf16.mxu0 %v1129_v55  ;;  %539 = vmatprep.subr.bf16.mxu1 %v1131_v56 }
  0x3e   :  { %499 = vmatpush1.bf16.msra.mxu0 %v1128_v61  ;;  %540 = vmatpush1.bf16.msra.mxu1 %v1130_v62 }
  0x3f   :  { %500 = vmatprep.subr.bf16.mxu0 %v1137_v63  ;;  %541 = vmatprep.subr.bf16.mxu1 %v1139_v0 }
  0x42   :  { %501 = vmatpush1.bf16.msra.mxu0 %v1136_v1  ;;  %542 = vmatpush1.bf16.msra.mxu1 %v1138_v2 }
  0x45   :  { %519 = vmatmul.mubr.bf16.vlgmr.msra.gmra.mrb[4].mxu0 %v1290_v11  ;;  %560 = vmatmul.mubr.bf16.vlgmr.msra.gmra.mrb[4].mxu1 %v1290_v11 }
  0xf8   :  { %v1376_v4 = vpop.f32.mrb[0].mxu0  ;;  %v1378_v5 = vpop.f32.mrb[0].mxu1 }
  0xf9   :  { %v1380_v6 = vpop.f32.mrb[1].mxu0  ;;  %v578_v7 = vsel %vm577_vm0, %v1376_v4, 0.0  ;;  %v1384_v9 = vpop.f32.mrb[1].mxu1  ;;  %v618_v10 = vsel %vm577_vm0, %v1378_v5, 0.0 }
  0xfa   :  { %v442_v8 = vpop.f32.mrb[2].mxu0  ;;  %v579_v12 = vrot.slane %v578_v7, 4  ;;  %v598_v11 = vsel %vm577_vm0, %v1380_v6, 0.0  ;;  %v483_v14 = vpop.f32.mrb[2].mxu1  ;;  %v619_v15 = vrot.slane %v618_v10, 4  ;;  %v638_v16 = vsel %vm577_vm0, %v1384_v9, 0.0 }
  0xfb   :  { %v443_v13 = vpop.f32.mrb[3].mxu0  ;;  %v599_v17 = vrot.slane %v598_v11, 4  ;;  %v484_v18 = vpop.f32.mrb[3].mxu1  ;;  %v639_v20 = vrot.slane %v638_v16, 4 }
  0xfc   :  { %v580_v19 = vadd.f32 %v579_v12, %v578_v7  ;;  %v620_v21 = vadd.f32 %v619_v15, %v618_v10 }
  0xfd   :  { %v600_v22 = vadd.f32 %v599_v17, %v598_v11  ;;  %v640_v24 = vadd.f32 %v639_v20, %v638_v16  ;;  %v569_v16 = vsel %vm568_vm1, %v1376_v4, 0.0  ;;  %v590_v17 = vsel %vm568_vm1, %v1380_v6, 0.0 }
  0xfe   :  { %v581_v23 = vrot.slane %v580_v19, 2  ;;  %v621_v25 = vrot.slane %v620_v21, 2  ;;  %v570_v18 = vrot.slane %v569_v16, 4  ;;  %v610_v20 = vsel %vm568_vm1, %v1378_v5, 0.0 }
  0xff   :  { %v601_v26 = vrot.slane %v600_v22, 2  ;;  %v641_v28 = vrot.slane %v640_v24, 2 }
 0x100   :  { %v582_v27 = vadd.f32 %v581_v23, %v580_v19  ;;  %v622_v29 = vadd.f32 %v621_v25, %v620_v21  ;;  %v591_v19 = vrot.slane %v590_v17, 4  ;;  %v571_v21 = vadd.f32 %v570_v18, %v569_v16 }
 0x101   :  { %v602_v30 = vadd.f32 %v601_v26, %v600_v22  ;;  %v642_v32 = vadd.f32 %v641_v28, %v640_v24  ;;  %v630_v22 = vsel %vm568_vm1, %v1384_v9, 0.0  ;;  %v611_v23 = vrot.slane %v610_v20, 4 }
 0x102   :  { %v583_v31 = vrot.slane %v582_v27, 1  ;;  %v623_v33 = vrot.slane %v622_v29, 1  ;;  %v592_v24 = vadd.f32 %v591_v19, %v590_v17  ;;  %v572_v25 = vrot.slane %v571_v21, 2 }
 0x103   :  { %v643_v35 = vrot.slane %v642_v32, 1  ;;  %v603_v3 = vrot.slane %v602_v30, 1  ;;  %v631_v26 = vrot.slane %v630_v22, 4 }
 0x104   :  { %v584_v34 = vadd.f32 %v583_v31, %v582_v27  ;;  %v624_v36 = vadd.f32 %v623_v33, %v622_v29  ;;  %v612_v27 = vadd.f32 %v611_v23, %v610_v20  ;;  %v593_v28 = vrot.slane %v592_v24, 2 }
 0x105   :  { %v644_v37 = vadd.f32 %v643_v35, %v642_v32  ;;  %v604_v38 = vadd.f32 %v603_v3, %v602_v30  ;;  %v573_v30 = vadd.f32 %v572_v25, %v571_v21  ;;  %v632_v31 = vadd.f32 %v631_v26, %v630_v22 }
 0x106   :  { %586 = vrot.lane.b32.xlu0 %v584_v34, %s1145_s1  ;;  %626 = vrot.lane.b32.xlu1 %v624_v36, %s1145_s1  ;;  %v613_v32 = vrot.slane %v612_v27, 2  ;;  %v594_v33 = vadd.f32 %v593_v28, %v592_v24 }
 0x107   :  { %v574_v35 = vrot.slane %v573_v30, 1  ;;  %v633_v3 = vrot.slane %v632_v31, 2 }
 0x108   :  { %v614_v36 = vadd.f32 %v613_v32, %v612_v27  ;;  %v732_v32 = vlaneseq }
 0x10a   :  { %606 = vrot.lane.b32.xlu0 %v604_v38, %s1145_s1  ;;  %646 = vrot.lane.b32.xlu1 %v644_v37, %s1145_s1  ;;  %v595_v37 = vrot.slane %v594_v33, 1 }
 0x118   :  { %v1396_v39 = vpop.f32.mrb[4].mxu0  ;;  %v1400_v41 = vpop.f32.mrb[4].mxu1 }
 0x119   :  { %v1398_v40 = vpop.f32.mrb[5].mxu0  ;;  %v658_v42 = vsel %vm577_vm0, %v1396_v39, 0.0  ;;  %v1404_v44 = vpop.f32.mrb[5].mxu1  ;;  %v698_v47 = vsel %vm577_vm0, %v1400_v41, 0.0  ;;  %v650_v29 = vsel %vm568_vm1, %v1396_v39, 0.0 }
 0x11a   :  { %v524_v43 = vpop.f32.mrb[6].mxu0  ;;  %v659_v45 = vrot.slane %v658_v42, 4  ;;  %v678_v46 = vsel %vm577_vm0, %v1398_v40, 0.0  ;;  %v565_v49 = vpop.f32.mrb[6].mxu1  ;;  %v699_v51 = vrot.slane %v698_v47, 4  ;;  %v718_v52 = vsel %vm577_vm0, %v1404_v44, 0.0 }
 0x11b   :  { %v525_v48 = vpop.f32.mrb[7].mxu0  ;;  %v679_v50 = vrot.slane %v678_v46, 4  ;;  %v566_v53 = vpop.f32.mrb[7].mxu1  ;;  %v719_v55 = vrot.slane %v718_v52, 4  ;;  %v651_v34 = vrot.slane %v650_v29, 4 }
 0x11c   :  { %v660_v54 = vadd.f32 %v659_v45, %v658_v42  ;;  %v700_v57 = vadd.f32 %v699_v51, %v698_v47  ;;  %v575_v42 = vadd.f32 %v574_v35, %v573_v30  ;;  %v634_v45 = vadd.f32 %v633_v3, %v632_v31 }
 0x11d   :  { %v680_v56 = vadd.f32 %v679_v50, %v678_v46  ;;  %v720_v59 = vadd.f32 %v719_v55, %v718_v52  ;;  %v652_v38 = vadd.f32 %v651_v34, %v650_v29  ;;  %v615_v47 = vrot.slane %v614_v36, 1 }
 0x11e   :  { %v661_v58 = vrot.slane %v660_v54, 2  ;;  %v701_v61 = vrot.slane %v700_v57, 2  ;;  %v596_v48 = vadd.f32 %v595_v37, %v594_v33 }
 0x11f   :  { %v681_v60 = vrot.slane %v680_v56, 2  ;;  %v721_v63 = vrot.slane %v720_v59, 2  ;;  %v653_v49 = vrot.slane %v652_v38, 2  ;;  %v616_v52 = vadd.f32 %v615_v47, %v614_v36 }
 0x120   :  { %v662_v62 = vadd.f32 %v661_v58, %v660_v54  ;;  %v702_v1 = vadd.f32 %v701_v61, %v700_v57  ;;  %v635_v54 = vrot.slane %v634_v45, 1  ;;  %v670_v61 = vsel %vm568_vm1, %v1398_v40, 0.0 }
 0x121   :  { %v682_v0 = vadd.f32 %v681_v60, %v680_v56  ;;  %v722_v7 = vadd.f32 %v721_v63, %v720_v59  ;;  %v654_v55 = vadd.f32 %v653_v49, %v652_v38  ;;  %v733_v36 = vshrl.u32 %v732_v32, 7 }
 0x122   :  { %v663_v2 = vrot.slane %v662_v62, 1  ;;  %v703_v12 = vrot.slane %v702_v1, 1  ;;  %v636_v59 = vadd.f32 %v635_v54, %v634_v45 }
 0x123   :  { %v683_v8 = vrot.slane %v682_v0, 1  ;;  %v723_v13 = vrot.slane %v722_v7, 1  ;;  %v655_v60 = vrot.slane %v654_v55, 1 }
 0x124   :  { %v664_v10 = vadd.f32 %v663_v2, %v662_v62  ;;  %v704_v14 = vadd.f32 %v703_v12, %v702_v1  ;;  %v671_v2 = vrot.slane %v670_v61, 4 }
 0x125   :  { %v684_v11 = vadd.f32 %v683_v8, %v682_v0  ;;  %v724_v15 = vadd.f32 %v723_v13, %v722_v7  ;;  %v656_v1 = vadd.f32 %v655_v60, %v654_v55  ;;  %v690_v7 = vsel %vm568_vm1, %v1400_v41, 0.0 }
 0x126   :  { %666 = vrot.lane.b32.xlu0 %v664_v10, %s1145_s1  ;;  %v672_v10 = vadd.f32 %v671_v2, %v670_v61  ;;  %v691_v12 = vrot.slane %v690_v7, 4 }
 0x127   :  { %686 = vrot.lane.b32.xlu1 %v684_v11, %s1145_s1  ;;  %v710_v11 = vsel %vm568_vm1, %v1404_v44, 0.0 }
 0x128   :  { %v673_v13 = vrot.slane %v672_v10, 2 }
 0x12a   :  { %706 = vrot.lane.b32.xlu0 %v704_v14, %s1145_s1  ;;  %v692_v14 = vadd.f32 %v691_v12, %v690_v7  ;;  %v674_v16 = vadd.f32 %v673_v13, %v672_v10 }
 0x12b   :  { %726 = vrot.lane.b32.xlu1 %v724_v15, %s1145_s1  ;;  %v711_v15 = vrot.slane %v710_v11, 4 }
 0x12c   :  { %v693_v17 = vrot.slane %v692_v14, 2  ;;  %v675_v19 = vrot.slane %v674_v16, 1 }
 0x12d   :  { %v712_v18 = vadd.f32 %v711_v15, %v710_v11 }
 0x12e   :  { %v694_v20 = vadd.f32 %v693_v17, %v692_v14  ;;  %v676_v24 = vadd.f32 %v675_v19, %v674_v16 }
 0x12f   :  { %v713_v21 = vrot.slane %v712_v18, 2 }
 0x130   :  { %v695_v25 = vrot.slane %v694_v20, 1 }
 0x131   :  { %v714_v26 = vadd.f32 %v713_v21, %v712_v18 }
 0x132   :  { %v696_v30 = vadd.f32 %v695_v25, %v694_v20 }
 0x133   :  { %v715_v31 = vrot.slane %v714_v26, 1 }
 0x135   :  { %v716_v3 = vadd.f32 %v715_v31, %v714_v26 }
 0x178   :  { %v587_v43 = vpop.permute.xlu0 %586  ;;  %v627_v56 = vpop.permute.xlu1 %626 }
 0x179   :  { %v589_v46 = vadd.f32 %v587_v43, %v575_v42  ;;  %v1432_v42 = vsub.s32 0, %v733_v36 }
 0x17b   :  { %v597_v50 = vadd.f32 %v596_v48, %v589_v46 }
 0x17c   :  { %v607_v51 = vpop.permute.xlu0 %606  ;;  %v647_v63 = vpop.permute.xlu1 %646 }
 0x17d   :  { %v609_v53 = vadd.f32 %v607_v51, %v597_v50 }
 0x17f   :  { %v617_v57 = vadd.f32 %v616_v52, %v609_v53 }
 0x181   :  { %v629_v58 = vadd.f32 %v627_v56, %v617_v57 }
 0x183   :  { %v637_v62 = vadd.f32 %v636_v59, %v629_v58 }
 0x185   :  { %v649_v0 = vadd.f32 %v647_v63, %v637_v62 }
 0x187   :  { %v657_v8 = vadd.f32 %v656_v1, %v649_v0 }
 0x198   :  { %v667_v22 = vpop.permute.xlu0 %666 }
 0x199   :  { %v669_v23 = vadd.f32 %v667_v22, %v657_v8  ;;  %v687_v28 = vpop.permute.xlu1 %686 }
 0x19b   :  { %v677_v27 = vadd.f32 %v676_v24, %v669_v23 }
 0x19c   :  { %v707_v34 = vpop.permute.xlu0 %706 }
 0x19d   :  { %v689_v29 = vadd.f32 %v687_v28, %v677_v27  ;;  %v727_v38 = vpop.permute.xlu1 %726 }
 0x19f   :  { %v697_v33 = vadd.f32 %v696_v30, %v689_v29 }
 0x1a1   :  { %v709_v35 = vadd.f32 %v707_v34, %v697_v33 }
 0x1a3   :  { %v717_v37 = vadd.f32 %v716_v3, %v709_v35 }
 0x1a5   :  { %v729_v43 = vadd.f32 %v727_v38, %v717_v37 }
 0x1a7   :  { %v1434_v45 = vmul.f32 0.03125, %v729_v43 }
 0x1a9   :  { %v735_v46 = vrot.slane %v1434_v45, %v1432_v42 }
 0x1ab   :  { %747 = vrot.lane.b32.xlu0 %v735_v46, %s1145_s1  ;;  %v1440_v47 = vsub.f32 %v1376_v4, %v735_v46  ;;  %v1443_v48 = vsub.f32 %v1380_v6, %v735_v46  ;;  %v1446_v49 = vsub.f32 %v1378_v5, %v735_v46  ;;  %v1449_v50 = vsub.f32 %v1384_v9, %v735_v46 }
 0x1ac   :  { %v1452_v51 = vsub.f32 %v1396_v39, %v735_v46  ;;  %v1455_v52 = vsub.f32 %v1398_v40, %v735_v46  ;;  %v1458_v53 = vsub.f32 %v1400_v41, %v735_v46  ;;  %v1461_v54 = vsub.f32 %v1404_v44, %v735_v46 }
 0x21d   :  { %v748_v55 = vpop.permute.xlu0 %747 }
 0x21e   :  { %v774_v56 = vsub.f32 %v1380_v6, %v748_v55  ;;  %v750_v57 = vsub.f32 %v1376_v4, %v748_v55  ;;  %v822_v58 = vsub.f32 %v1384_v9, %v748_v55  ;;  %v798_v59 = vsub.f32 %v1378_v5, %v748_v55 }
 0x21f   :  { %v870_v60 = vsub.f32 %v1398_v40, %v748_v55  ;;  %v846_v61 = vsub.f32 %v1396_v39, %v748_v55  ;;  %v918_v62 = vsub.f32 %v1404_v44, %v748_v55  ;;  %v894_v63 = vsub.f32 %v1400_v41, %v748_v55 }
 0x220   :  { %v775_v0 = vmul.f32 %v774_v56, %v774_v56  ;;  %v751_v1 = vmul.f32 %v750_v57, %v750_v57  ;;  %v823_v2 = vmul.f32 %v822_v58, %v822_v58  ;;  %v799_v7 = vmul.f32 %v798_v59, %v798_v59 }
 0x221   :  { %v871_v8 = vmul.f32 %v870_v60, %v870_v60  ;;  %v847_v10 = vmul.f32 %v846_v61, %v846_v61  ;;  %v919_v12 = vmul.f32 %v918_v62, %v918_v62  ;;  %v895_v11 = vmul.f32 %v894_v63, %v894_v63 }
 0x222   :  { %v776_v13 = vsel %vm577_vm0, %v775_v0, 0.0  ;;  %v752_v14 = vsel %vm577_vm0, %v751_v1, 0.0  ;;  %v824_v15 = vsel %vm577_vm0, %v823_v2, 0.0  ;;  %v800_v16 = vsel %vm577_vm0, %v799_v7, 0.0 }
 0x223   :  { %v777_v17 = vrot.slane %v776_v13, 4  ;;  %v753_v18 = vrot.slane %v752_v14, 4  ;;  %v825_v19 = vrot.slane %v824_v15, 4  ;;  %v801_v20 = vrot.slane %v800_v16, 4 }
 0x224   :  { %v872_v21 = vsel %vm577_vm0, %v871_v8, 0.0  ;;  %v848_v22 = vsel %vm577_vm0, %v847_v10, 0.0  ;;  %v920_v23 = vsel %vm577_vm0, %v919_v12, 0.0  ;;  %v896_v24 = vsel %vm577_vm0, %v895_v11, 0.0 }
 0x225   :  { %v778_v25 = vadd.f32 %v777_v17, %v776_v13  ;;  %v754_v26 = vadd.f32 %v753_v18, %v752_v14  ;;  %v826_v27 = vadd.f32 %v825_v19, %v824_v15  ;;  %v802_v28 = vadd.f32 %v801_v20, %v800_v16 }
 0x226   :  { %v873_v29 = vrot.slane %v872_v21, 4  ;;  %v849_v30 = vrot.slane %v848_v22, 4  ;;  %v921_v31 = vrot.slane %v920_v23, 4  ;;  %v897_v32 = vrot.slane %v896_v24, 4 }
 0x227   :  { %v779_v33 = vrot.slane %v778_v25, 2  ;;  %v755_v34 = vrot.slane %v754_v26, 2  ;;  %v827_v35 = vrot.slane %v826_v27, 2  ;;  %v803_v3 = vrot.slane %v802_v28, 2 }
 0x228   :  { %v874_v36 = vadd.f32 %v873_v29, %v872_v21  ;;  %v850_v37 = vadd.f32 %v849_v30, %v848_v22  ;;  %v922_v38 = vadd.f32 %v921_v31, %v920_v23  ;;  %v898_v43 = vadd.f32 %v897_v32, %v896_v24 }
 0x229   :  { %v780_v46 = vadd.f32 %v779_v33, %v778_v25  ;;  %v756_v55 = vadd.f32 %v755_v34, %v754_v26  ;;  %v828_v56 = vadd.f32 %v827_v35, %v826_v27  ;;  %v804_v57 = vadd.f32 %v803_v3, %v802_v28 }
 0x22a   :  { %v875_v58 = vrot.slane %v874_v36, 2  ;;  %v851_v59 = vrot.slane %v850_v37, 2  ;;  %v923_v0 = vrot.slane %v922_v38, 2  ;;  %v899_v1 = vrot.slane %v898_v43, 2 }
 0x22b   :  { %v781_v60 = vrot.slane %v780_v46, 1  ;;  %v757_v61 = vrot.slane %v756_v55, 1  ;;  %v829_v62 = vrot.slane %v828_v56, 1  ;;  %v805_v63 = vrot.slane %v804_v57, 1 }
 0x22c   :  { %v876_v8 = vadd.f32 %v875_v58, %v874_v36  ;;  %v852_v10 = vadd.f32 %v851_v59, %v850_v37  ;;  %v924_v12 = vadd.f32 %v923_v0, %v922_v38  ;;  %v900_v11 = vadd.f32 %v899_v1, %v898_v43 }
 0x22d   :  { %v782_v2 = vadd.f32 %v781_v60, %v780_v46  ;;  %v758_v7 = vadd.f32 %v757_v61, %v756_v55  ;;  %v830_v13 = vadd.f32 %v829_v62, %v828_v56  ;;  %v806_v14 = vadd.f32 %v805_v63, %v804_v57 }
 0x22e   :  { %v877_v15 = vrot.slane %v876_v8, 1  ;;  %v853_v16 = vrot.slane %v852_v10, 1  ;;  %v925_v19 = vrot.slane %v924_v12, 1  ;;  %v901_v20 = vrot.slane %v900_v11, 1 }
 0x22f   :  { %784 = vrot.lane.b32.xlu0 %v782_v2, %s1145_s1  ;;  %760 = vrot.lane.b32.xlu1 %v758_v7, %s1145_s1  ;;  %v737_v23 = vmul.f32 %v1440_v47, %v1440_v47  ;;  %v765_v24 = vmul.f32 %v1443_v48, %v1443_v48  ;;  %v789_v27 = vmul.f32 %v1446_v49, %v1446_v49 }
 0x230   :  { %v878_v17 = vadd.f32 %v877_v15, %v876_v8  ;;  %v854_v18 = vadd.f32 %v853_v16, %v852_v10  ;;  %v926_v21 = vadd.f32 %v925_v19, %v924_v12  ;;  %v902_v22 = vadd.f32 %v901_v20, %v900_v11 }
 0x231   :  { %v738_v25 = vsel %vm568_vm1, %v737_v23, 0.0  ;;  %v766_v26 = vsel %vm568_vm1, %v765_v24, 0.0  ;;  %v813_v30 = vmul.f32 %v1449_v50, %v1449_v50  ;;  %v790_v31 = vsel %vm568_vm1, %v789_v27, 0.0 }
 0x232   :  { %v739_v28 = vrot.slane %v738_v25, 4  ;;  %v767_v29 = vrot.slane %v766_v26, 4  ;;  %v791_v47 = vrot.slane %v790_v31, 4  ;;  %v837_v48 = vmul.f32 %v1452_v51, %v1452_v51 }
 0x233   :  { %832 = vrot.lane.b32.xlu0 %v830_v13, %s1145_s1  ;;  %808 = vrot.lane.b32.xlu1 %v806_v14, %s1145_s1  ;;  %v814_v34 = vsel %vm568_vm1, %v813_v30, 0.0  ;;  %v861_v49 = vmul.f32 %v1455_v52, %v1455_v52  ;;  %v885_v46 = vmul.f32 %v1458_v53, %v1458_v53  ;;  %v909_v61 = vmul.f32 %v1461_v54, %v1461_v54 }
 0x234   :  { %v740_v32 = vadd.f32 %v739_v28, %v738_v25  ;;  %v768_v33 = vadd.f32 %v767_v29, %v766_v26  ;;  %v815_v3 = vrot.slane %v814_v34, 4  ;;  %v792_v37 = vadd.f32 %v791_v47, %v790_v31 }
 0x235   :  { %v838_v38 = vsel %vm568_vm1, %v837_v48, 0.0  ;;  %v862_v58 = vsel %vm568_vm1, %v861_v49, 0.0  ;;  %v886_v0 = vsel %vm568_vm1, %v885_v46, 0.0  ;;  %v910_v10 = vsel %vm568_vm1, %v909_v61, 0.0 }
 0x236   :  { %v741_v35 = vrot.slane %v740_v32, 2  ;;  %v769_v36 = vrot.slane %v768_v33, 2  ;;  %v816_v43 = vadd.f32 %v815_v3, %v814_v34  ;;  %v793_v56 = vrot.slane %v792_v37, 2 }
 0x237   :  { %880 = vrot.lane.b32.xlu0 %v878_v17, %s1145_s1  ;;  %856 = vrot.lane.b32.xlu1 %v854_v18, %s1145_s1  ;;  %v839_v57 = vrot.slane %v838_v38, 4  ;;  %v863_v60 = vrot.slane %v862_v58, 4  ;;  %v887_v8 = vrot.slane %v886_v0, 4  ;;  %v911_v18 = vrot.slane %v910_v10, 4 }
 0x238   :  { %v742_v50 = vadd.f32 %v741_v35, %v740_v32  ;;  %v770_v55 = vadd.f32 %v769_v36, %v768_v33  ;;  %v817_v59 = vrot.slane %v816_v43, 2  ;;  %v794_v52 = vadd.f32 %v793_v56, %v792_v37 }
 0x239   :  { %v840_v63 = vadd.f32 %v839_v57, %v838_v38  ;;  %v864_v53 = vadd.f32 %v863_v60, %v862_v58  ;;  %v888_v54 = vadd.f32 %v887_v8, %v886_v0  ;;  %v912_v26 = vadd.f32 %v911_v18, %v910_v10 }
 0x23a   :  { %v743_v51 = vrot.slane %v742_v50, 1  ;;  %v771_v62 = vrot.slane %v770_v55, 1  ;;  %v818_v7 = vadd.f32 %v817_v59, %v816_v43  ;;  %v795_v13 = vrot.slane %v794_v52, 1 }
 0x23b   :  { %928 = vrot.lane.b32.xlu0 %v926_v21, %s1145_s1  ;;  %904 = vrot.lane.b32.xlu1 %v902_v22, %s1145_s1  ;;  %v841_v14 = vrot.slane %v840_v63, 2  ;;  %v865_v17 = vrot.slane %v864_v53, 2  ;;  %v889_v25 = vrot.slane %v888_v54, 2  ;;  %v913_v33 = vrot.slane %v912_v26, 2 }
 0x23c   :  { %v744_v1 = vadd.f32 %v743_v51, %v742_v50  ;;  %v772_v11 = vadd.f32 %v771_v62, %v770_v55  ;;  %v796_v20 = vadd.f32 %v795_v13, %v794_v52  ;;  %v819_v21 = vrot.slane %v818_v7, 1 }
 0x23d   :  { %v842_v22 = vadd.f32 %v841_v14, %v840_v63  ;;  %v866_v30 = vadd.f32 %v865_v17, %v864_v53  ;;  %v890_v35 = vadd.f32 %v889_v25, %v888_v54  ;;  %v914_v50 = vadd.f32 %v913_v33, %v912_v26  ;;  %v937_v53 = vld [vmem:[%s1605_s3] sm:$0x1] }
 0x23e   :  { %v820_v28 = vadd.f32 %v819_v21, %v818_v7 }
 0x23f   :  { %v843_v29 = vrot.slane %v842_v22, 1  ;;  %v867_v48 = vrot.slane %v866_v30, 1  ;;  %v891_v38 = vrot.slane %v890_v35, 1  ;;  %v915_v57 = vrot.slane %v914_v50, 1 }
 0x241   :  { %v844_v34 = vadd.f32 %v843_v29, %v842_v22  ;;  %v868_v49 = vadd.f32 %v867_v48, %v866_v30  ;;  %v892_v56 = vadd.f32 %v891_v38, %v890_v35  ;;  %v916_v60 = vadd.f32 %v915_v57, %v914_v50 }
 0x2a1   :  { %v761_v2 = vpop.permute.xlu1 %760  ;;  %v785_v16 = vpop.permute.xlu0 %784 }
 0x2a2   :  { %v763_v12 = vadd.f32 %v761_v2, %v744_v1  ;;  %v933_v1 = vld [vmem:[%s1604_s2] sm:$0x1] }
 0x2a4   :  { %v773_v15 = vadd.f32 %v772_v11, %v763_v12 }
 0x2a5   :  { %v809_v24 = vpop.permute.xlu1 %808  ;;  %v833_v32 = vpop.permute.xlu0 %832 }
 0x2a6   :  { %v787_v19 = vadd.f32 %v785_v16, %v773_v15 }
 0x2a8   :  { %v797_v23 = vadd.f32 %v796_v20, %v787_v19 }
 0x2a9   :  { %v857_v36 = vpop.permute.xlu1 %856  ;;  %v881_v46 = vpop.permute.xlu0 %880 }
 0x2aa   :  { %v811_v27 = vadd.f32 %v809_v24, %v797_v23 }
 0x2ac   :  { %v821_v31 = vadd.f32 %v820_v28, %v811_v27 }
 0x2ad   :  { %v905_v51 = vpop.permute.xlu1 %904  ;;  %v929_v62 = vpop.permute.xlu0 %928 }
 0x2ae   :  { %v835_v47 = vadd.f32 %v833_v32, %v821_v31 }
 0x2b0   :  { %v845_v3 = vadd.f32 %v844_v34, %v835_v47 }
 0x2b2   :  { %v859_v37 = vadd.f32 %v857_v36, %v845_v3 }
 0x2b4   :  { %v869_v43 = vadd.f32 %v868_v49, %v859_v37 }
 0x2b6   :  { %v883_v55 = vadd.f32 %v881_v46, %v869_v43 }
 0x2b8   :  { %v893_v58 = vadd.f32 %v892_v56, %v883_v55 }
 0x2ba   :  { %v907_v59 = vadd.f32 %v905_v51, %v893_v58 }
 0x2bc   :  { %v917_v61 = vadd.f32 %v916_v60, %v907_v59 }
 0x2be   :  { %v931_v52 = vadd.f32 %v929_v62, %v917_v61 }
 0x2c0   :  { %v932_v63 = vmul.f32 0.03125, %v931_v52 }
 0x2c2   :  { %v934_v0 = vadd.f32 1e-05, %v932_v63 }
 0x2c4   :  { %1142 = vrsqrt.f32 %v934_v0 }
 0x2ce   :  { %v1143_v2 = vpop.eup %1142 }
 0x2cf   :  { %v936_v7 = vmul.f32 %v1143_v2, %v933_v1 }
 0x2d1   :  { %v938_v8 = vmul.f32 %v936_v7, %v1434_v45  ;;  %v944_v10 = vrot.slane %v936_v7, %v1432_v42 }
 0x2d3   :  { %v939_v12 = vsub.f32 %v937_v53, %v938_v8  ;;  %960 = vrot.lane.b32.xlu1 %v944_v10, %s1145_s1  ;;  %v946_v11 = vmul.f32 %v944_v10, %v1376_v4  ;;  %v974_v13 = vmul.f32 %v944_v10, %v1380_v6  ;;  %v988_v14 = vmul.f32 %v944_v10, %v1378_v5 }
 0x2d4   :  { %v1002_v15 = vmul.f32 %v944_v10, %v1384_v9  ;;  %v1016_v16 = vmul.f32 %v944_v10, %v1396_v39  ;;  %v1030_v17 = vmul.f32 %v944_v10, %v1398_v40  ;;  %v1044_v54 = vmul.f32 %v944_v10, %v1400_v41 }
 0x2d5   :  { %v951_v45 = vrot.slane %v939_v12, %v1432_v42  ;;  %v1058_v18 = vmul.f32 %v944_v10, %v1404_v44 }
 0x2d7   :  { %964 = vrot.lane.b32.xlu0 %v951_v45, %s1145_s1  ;;  %v953_v19 = vadd.f32 %v951_v45, %v946_v11  ;;  %v975_v20 = vadd.f32 %v974_v13, %v951_v45  ;;  %v989_v21 = vadd.f32 %v988_v14, %v951_v45  ;;  %v1003_v22 = vadd.f32 %v1002_v15, %v951_v45 }
 0x2d8   :  { %v1017_v23 = vadd.f32 %v1016_v16, %v951_v45  ;;  %v1031_v24 = vadd.f32 %v1030_v17, %v951_v45  ;;  %v1045_v25 = vadd.f32 %v1044_v54, %v951_v45  ;;  %v1059_v26 = vadd.f32 %v1058_v18, %v951_v45 }
 0x2d9   :  { %vm954_vm3 = vcmp.gt.f32.partialorder %v953_v19, 0.0  ;;  %v955_v27 = vmul.f32 0.2, %v953_v19  ;;  %vm976_vm4 = vcmp.gt.f32.partialorder %v975_v20, 0.0  ;;  %v977_v28 = vmul.f32 0.2, %v975_v20 }
 0x2da   :  { %vm990_vm5 = vcmp.gt.f32.partialorder %v989_v21, 0.0  ;;  %v991_v29 = vmul.f32 0.2, %v989_v21  ;;  %vm1004_vm6 = vcmp.gt.f32.partialorder %v1003_v22, 0.0  ;;  %v1005_v42 = vmul.f32 0.2, %v1003_v22 }
 0x2db   :  { %v956_v30 = vsel %vm954_vm3, %v953_v19, %v955_v27  ;;  %v978_v31 = vsel %vm976_vm4, %v975_v20, %v977_v28  ;;  %vm1018_vm7 = vcmp.gt.f32.partialorder %v1017_v23, 0.0  ;;  %v1019_v32 = vmul.f32 0.2, %v1017_v23 }
 0x2dc   :  { %v957_v33 = vpack.c.bf16 %v956_v30, %v956_v30  ;;  %v979_v47 = vpack.c.bf16 %v978_v31, %v978_v31  ;;  %v992_v34 = vsel %vm990_vm5, %v989_v21, %v991_v29  ;;  %v1006_v48 = vsel %vm1004_vm6, %v1003_v22, %v1005_v42 }
 0x2dd   :  { %v993_v35 = vpack.c.bf16 %v992_v34, %v992_v34  ;;  %v1007_v3 = vpack.c.bf16 %v1006_v48, %v1006_v48  ;;  %v1020_v36 = vsel %vm1018_vm7, %v1017_v23, %v1019_v32  ;;  %vm1032_vm8 = vcmp.gt.f32.partialorder %v1031_v24, 0.0 }
 0x2de   :  { %959 = vst.msk [vmem:[%s1606_s4] sm:$0x1] %vm958_vm2, %v957_v33  ;;  %980 = vst.msk [vmem:[%s1606_s4 + $0x1] sm:$0x1] %vm958_vm2, %v979_v47  ;;  %v1021_v37 = vpack.c.bf16 %v1020_v36, %v1020_v36  ;;  %v1033_v49 = vmul.f32 0.2, %v1031_v24 }
 0x2df   :  { %vm1046_vm9 = vcmp.gt.f32.partialorder %v1045_v25, 0.0  ;;  %v1047_v38 = vmul.f32 0.2, %v1045_v25  ;;  %994 = vst.msk [vmem:[%s1606_s4 + $0x2] sm:$0x1] %vm958_vm2, %v993_v35  ;;  %vm1060_vm10 = vcmp.gt.f32.partialorder %v1059_v26, 0.0 }
 0x2e0   :  { %1008 = vst.msk [vmem:[%s1606_s4 + $0x3] sm:$0x1] %vm958_vm2, %v1007_v3  ;;  %v1061_v50 = vmul.f32 0.2, %v1059_v26  ;;  %1022 = vst.msk [vmem:[%s1606_s4 + $0x4] sm:$0x1] %vm958_vm2, %v1021_v37  ;;  %v1034_v43 = vsel %vm1032_vm8, %v1031_v24, %v1033_v49 }
 0x2e1   :  { %v1048_v46 = vsel %vm1046_vm9, %v1045_v25, %v1047_v38  ;;  %v1035_v55 = vpack.c.bf16 %v1034_v43, %v1034_v43 }
 0x2e2   :  { %v1049_v56 = vpack.c.bf16 %v1048_v46, %v1048_v46  ;;  %v1062_v57 = vsel %vm1060_vm10, %v1059_v26, %v1061_v50 }
 0x2e3   :  { %v1063_v58 = vpack.c.bf16 %v1062_v57, %v1062_v57  ;;  %1036 = vst.msk [vmem:[%s1606_s4 + $0x5] sm:$0x1] %vm958_vm2, %v1035_v55 }
 0x2e4   :  { %1050 = vst.msk [vmem:[%s1606_s4 + $0x6] sm:$0x1] %vm958_vm2, %v1049_v56 }
 0x2e5   :  { %1064 = vst.msk [vmem:[%s1606_s4 + $0x7] sm:$0x1] %vm958_vm2, %v1063_v58 }
 0x345   :  { %v961_v51 = vpop.permute.xlu1 %960 }
 0x346   :  { %v963_v59 = vmul.f32 %v961_v51, %v1376_v4  ;;  %v981_v60 = vmul.f32 %v961_v51, %v1380_v6  ;;  %v995_v61 = vmul.f32 %v961_v51, %v1378_v5  ;;  %v1009_v62 = vmul.f32 %v961_v51, %v1384_v9 }
 0x347   :  { %v1023_v52 = vmul.f32 %v961_v51, %v1396_v39  ;;  %v1037_v63 = vmul.f32 %v961_v51, %v1398_v40  ;;  %v1051_v0 = vmul.f32 %v961_v51, %v1400_v41  ;;  %v1065_v1 = vmul.f32 %v961_v51, %v1404_v44 }
 0x349   :  { %v965_v2 = vpop.permute.xlu0 %964 }
 0x34a   :  { %v967_v7 = vadd.f32 %v965_v2, %v963_v59  ;;  %v982_v53 = vadd.f32 %v981_v60, %v965_v2  ;;  %v996_v8 = vadd.f32 %v995_v61, %v965_v2  ;;  %v1010_v10 = vadd.f32 %v1009_v62, %v965_v2 }
 0x34b   :  { %v1024_v4 = vadd.f32 %v1023_v52, %v965_v2  ;;  %v1038_v12 = vadd.f32 %v1037_v63, %v965_v2  ;;  %v1052_v6 = vadd.f32 %v1051_v0, %v965_v2  ;;  %v1066_v11 = vadd.f32 %v1065_v1, %v965_v2 }
 0x34c   :  { %vm968_vm12 = vcmp.gt.f32.partialorder %v967_v7, 0.0  ;;  %v969_v5 = vmul.f32 0.2, %v967_v7  ;;  %vm983_vm13 = vcmp.gt.f32.partialorder %v982_v53, 0.0  ;;  %v984_v9 = vmul.f32 0.2, %v982_v53 }
 0x34d   :  { %vm997_vm14 = vcmp.gt.f32.partialorder %v996_v8, 0.0  ;;  %v998_v39 = vmul.f32 0.2, %v996_v8  ;;  %vm1011_vm15 = vcmp.gt.f32.partialorder %v1010_v10, 0.0  ;;  %v1012_v40 = vmul.f32 0.2, %v1010_v10 }
 0x34e   :  { %v970_v41 = vsel %vm968_vm12, %v967_v7, %v969_v5  ;;  %v985_v13 = vsel %vm983_vm13, %v982_v53, %v984_v9  ;;  %vm1025_vm0 = vcmp.gt.f32.partialorder %v1024_v4, 0.0  ;;  %v1026_v44 = vmul.f32 0.2, %v1024_v4 }
 0x34f   :  { %v971_v14 = vpack.c.bf16 %v970_v41, %v970_v41  ;;  %v986_v15 = vpack.c.bf16 %v985_v13, %v985_v13  ;;  %v999_v16 = vsel %vm997_vm14, %v996_v8, %v998_v39  ;;  %v1013_v17 = vsel %vm1011_vm15, %v1010_v10, %v1012_v40 }
 0x350   :  { %v1000_v54 = vpack.c.bf16 %v999_v16, %v999_v16  ;;  %v1014_v45 = vpack.c.bf16 %v1013_v17, %v1013_v17  ;;  %v1027_v18 = vsel %vm1025_vm0, %v1024_v4, %v1026_v44  ;;  %vm1039_vm1 = vcmp.gt.f32.partialorder %v1038_v12, 0.0 }
 0x351   :  { %973 = vst.msk [vmem:[%s1606_s4] sm:$0x1] %vm972_vm11, %v971_v14  ;;  %987 = vst.msk [vmem:[%s1606_s4 + $0x1] sm:$0x1] %vm972_vm11, %v986_v15  ;;  %v1028_v19 = vpack.c.bf16 %v1027_v18, %v1027_v18  ;;  %v1040_v20 = vmul.f32 0.2, %v1038_v12 }
 0x352   :  { %vm1053_vm2 = vcmp.gt.f32.partialorder %v1052_v6, 0.0  ;;  %v1054_v21 = vmul.f32 0.2, %v1052_v6  ;;  %1001 = vst.msk [vmem:[%s1606_s4 + $0x2] sm:$0x1] %vm972_vm11, %v1000_v54  ;;  %vm1067_vm3 = vcmp.gt.f32.partialorder %v1066_v11, 0.0 }
 0x353   :  { %1015 = vst.msk [vmem:[%s1606_s4 + $0x3] sm:$0x1] %vm972_vm11, %v1014_v45  ;;  %v1068_v22 = vmul.f32 0.2, %v1066_v11  ;;  %1029 = vst.msk [vmem:[%s1606_s4 + $0x4] sm:$0x1] %vm972_vm11, %v1028_v19  ;;  %v1041_v23 = vsel %vm1039_vm1, %v1038_v12, %v1040_v20 }
 0x354   :  { %v1055_v24 = vsel %vm1053_vm2, %v1052_v6, %v1054_v21  ;;  %v1042_v25 = vpack.c.bf16 %v1041_v23, %v1041_v23 }
 0x355   :  { %v1056_v26 = vpack.c.bf16 %v1055_v24, %v1055_v24  ;;  %v1069_v27 = vsel %vm1067_vm3, %v1066_v11, %v1068_v22 }
 0x356   :  { %v1070_v28 = vpack.c.bf16 %v1069_v27, %v1069_v27  ;;  %1043 = vst.msk [vmem:[%s1606_s4 + $0x5] sm:$0x1] %vm972_vm11, %v1042_v25 }
 0x357   :  { %1057 = vst.msk [vmem:[%s1606_s4 + $0x6] sm:$0x1] %vm972_vm11, %v1056_v26 }
 0x358   :  { %1071 = vst.msk [vmem:[%s1606_s4 + $0x7] sm:$0x1] %vm972_vm11, %v1070_v28 }

// kernel: generator_forward.6
= control target key start
LH: loop header
LB: loop body
LE: loop exit
PB: predicated region body
PF: predicated region fallthrough
CT: control target
= control target key end

     0   :  { %v42_v0 = vlaneseq  ;;  %s2463_s20 = smov 1   ;;  %s2464_s21 = smov 4   ;;  %vm125_vm0 = vcmask 523264   ;;  %vm1515_vm1 = vcmask 261120   ;;  %vm1789_vm2 = vcmask 257024   ;;  %s3129_s1 = inlined_call_operand.vmem [shape: bf16[4,32], index: 1, kind: input, shape index: {}]   ;;  %s3130_s2 = inlined_call_operand.vmem [shape: bf16[4,32,256], index: 2, kind: input, shape index: {}]   ;;  %s3131_s0 = inlined_call_operand.vmem [shape: bf16[64,42], index: 0, kind: input, shape index: {}]   ;;  %s3132_s3 = inlined_call_operand.vmem [shape: f32[32,1], index: 3, kind: input, shape index: {}]   ;;  %s3133_s4 = inlined_call_operand.vmem [shape: f32[32,1], index: 4, kind: input, shape index: {}]   ;;  %s3134_s5 = inlined_call_operand.vmem [shape: bf16[4,32,32], index: 5, kind: output, shape index: {}]  }
   0x1   :  { %v29_v1 = vld [vmem:[%s3129_s1] sm:$0x3]  ;;  %s2465_s1 = smov 2   ;;  %s2466_s22 = smov 6   ;;  %v2529_v34 = vld [vmem:[%s3131_s0 + $0x4] sm:$0xf] }
   0x2   :  { %v43_v2 = vshrl.u32 %v42_v0, 7  ;;  %v59_v3 = vpack.i.b16 %v29_v1, %v29_v1  ;;  %v475_v4 = vshrl.u32 %v29_v1, 16  ;;  %v967_v19 = vshll.u32 %v29_v1, 16  ;;  %v2524_v33 = vld [vmem:[%s3131_s0] sm:$0xf]  ;;  %s2467_s10 = smov 127  }
   0x3   :  { %v1921_v26 = vrot.slane %v29_v1, 9  ;;  %v2534_v36 = vld [vmem:[%s3131_s0 + $0x8] sm:$0xf]  ;;  %v2539_v37 = vld [vmem:[%s3131_s0 + $0xc] sm:$0xf]  ;;  %s2468_s15 = smov 126  }
   0x4   :  { %v44_v5 = vsub.s32 0, %v43_v2  ;;  %v1957_v6 = vrot.slane %v475_v4, 9  ;;  %v262_v7 = vsub.s32 1, %v43_v2  ;;  %v723_v8 = vpack.i.b16 %v475_v4, %v475_v4  ;;  %v2548_v44 = vld [vmem:[%s3131_s0 + $0x10] sm:$0xf]  ;;  %s2469_s17 = smov 64  }
   0x5   :  { %v1990_v20 = vrot.slane %v967_v19, 9  ;;  %v38_v27 = vmul.bf16 %v1921_v26, %v29_v1  ;;  %v2553_v45 = vld [vmem:[%s3131_s0 + $0x14] sm:$0xf]  ;;  %v2564_v54 = vld [vmem:[%s3131_s0 + $0x18] sm:$0xf]  ;;  %s2470_s23 = smov 124   ;;  %v1948_v19 = vcombine.low %v2534_v36, %v2539_v37 }
   0x6   :  { %v64_v9 = vrot.slane %v59_v3, %v44_v5  ;;  %v480_v10 = vmul.bf16 %v1957_v6, %v29_v1  ;;  %v263_v11 = vrot.slane %v59_v3, %v262_v7  ;;  %v728_v12 = vrot.slane %v723_v8, %v262_v7  ;;  %v2569_v55 = vld [vmem:[%s3131_s0 + $0x1c] sm:$0xf]  ;;  %v2580_v2 = vld [vmem:[%s3130_s2] ss:$8 sps:$4 sm:$0xff]   ;;  %s2471_s24 = smov 123   ;;  %s2472_s25 = smov 8  }
   0x7   :  { %v972_v21 = vmul.bf16 %v1990_v20, %v29_v1  ;;  %v2515_v25 = vrot.slane %v723_v8, %v44_v5  ;;  %v1399_v28 = vshrl.u32 %v38_v27, 16  ;;  %v40_v30 = vpack.i.b16 %v38_v27, %v38_v27  ;;  %v2592_v6 = vld [vmem:[%s3130_s2 + $0x20] ss:$8 sps:$4 sm:$0xff]   ;;  %s2473_s26 = smov 9   ;;  %s2474_s27 = smov 122  }
   0x8   :  { %v1923_v13 = vcombine.low %v64_v9, %v64_v9  ;;  %v482_v14 = vpack.i.b16 %v480_v10, %v480_v10  ;;  %v1938_v15 = vcombine.low %v263_v11, %v263_v11  ;;  %v1973_v17 = vcombine.low %v728_v12, %v728_v12  ;;  %v2603_v9 = vld [vmem:[%s3130_s2 + $0x30] ss:$8 sps:$4 sm:$0xff]   ;;  %s2475_s28 = smov 10  }
   0x9   :  { %v974_v22 = vshrl.u32 %v972_v21, 16  ;;  %v1400_v29 = vpack.i.b16 %v1399_v28, %v1399_v28  ;;  %v2519_v32 = vrot.slane %v40_v30, %v44_v5  ;;  %v1947_v11 = vcombine.low %v2524_v33, %v2529_v34 }
   0xa   :  { %68 = vrot.lane.b32.xlu0 %v1923_v13, %s2463_s20  ;;  %v487_v16 = vrot.slane %v482_v14, %v44_v5  ;;  %267 = vrot.lane.b32.xlu1 %v1938_v15, %s2464_s21  ;;  %v2000_v15 = vcombine.low %v2515_v25, %v2515_v25  ;;  %v1950_v28 = vcombine.low %v2564_v54, %v2569_v55  ;;  %s2476_s20 = smov 120   ;;  %s2477_s21 = smov 119  }
   0xb   :  { %v975_v23 = vpack.i.b16 %v974_v22, %v974_v22  ;;  %v2517_v31 = vrot.slane %v1400_v29, %v44_v5 }
   0xc   :  { %v1958_v18 = vcombine.low %v487_v16, %v487_v16 }
   0xd   :  { %v2513_v24 = vrot.slane %v975_v23, %v44_v5  ;;  %v2587_v5 = vld [vmem:[%s3130_s2 + $0x10] ss:$8 sps:$4 sm:$0xff]  }
   0xe   :  { %491 = vrot.lane.b32.xlu0 %v1958_v18, %s2465_s1  ;;  %732 = vrot.lane.b32.xlu1 %v1973_v17, %s2466_s22  ;;  %s2478_s1 = smov 118  }
   0xf   :  { %v1991_v12 = vcombine.low %v2513_v24, %v2513_v24  ;;  %v1949_v24 = vcombine.low %v2548_v44, %v2553_v45 }
  0x7c   :  { %v69_v35 = vpop.permute.xlu0 %68  ;;  %v268_v3 = vpop.permute.xlu1 %267 }
  0x7d   :  { %v71_v38 = vmul.bf16 %v69_v35, %v2524_v33  ;;  %v72_v39 = vmul.bf16 %v69_v35, %v2529_v34  ;;  %v73_v41 = vmul.bf16 %v69_v35, %v2534_v36  ;;  %v74_v42 = vmul.bf16 %v69_v35, %v2539_v37 }
  0x7e   :  { %v75_v52 = vmul.bf16 %v69_v35, %v2548_v44  ;;  %v76_v53 = vmul.bf16 %v69_v35, %v2553_v45  ;;  %v77_v57 = vmul.bf16 %v69_v35, %v2564_v54  ;;  %v78_v61 = vmul.bf16 %v69_v35, %v2569_v55 }
  0x7f   :  { %v1926_v40 = vcombine.low %v71_v38, %v72_v39  ;;  %v1927_v51 = vcombine.low %v73_v41, %v74_v42  ;;  %v270_v7 = vmul.bf16 %v268_v3, %v2524_v33  ;;  %v271_v8 = vmul.bf16 %v268_v3, %v2529_v34 }
  0x80   :  { %v492_v43 = vpop.permute.xlu0 %491  ;;  %v1928_v58 = vcombine.low %v75_v52, %v76_v53  ;;  %v1929_v63 = vcombine.low %v77_v57, %v78_v61  ;;  %v272_v13 = vmul.bf16 %v268_v3, %v2534_v36  ;;  %v273_v14 = vmul.bf16 %v268_v3, %v2539_v37  ;;  %v733_v20 = vpop.permute.xlu1 %732  ;;  %v2679_v52 = vld [vmem:[%s3130_s2 + $0x50] ss:$8 sps:$4 sm:$0xff]   ;;  %v2688_v53 = vld [vmem:[%s3130_s2 + $0x60] ss:$8 sps:$4 sm:$0xff]  }
  0x81   :  { %113 = vrot.lane.b32.xlu0 %v1926_v40, %s2467_s10  ;;  %v494_v46 = vmul.bf16 %v492_v43, %v2524_v33  ;;  %v495_v47 = vmul.bf16 %v492_v43, %v2529_v34  ;;  %v496_v48 = vmul.bf16 %v492_v43, %v2534_v36  ;;  %v497_v49 = vmul.bf16 %v492_v43, %v2539_v37 }
  0x82   :  { %v498_v59 = vmul.bf16 %v492_v43, %v2548_v44  ;;  %v499_v60 = vmul.bf16 %v492_v43, %v2553_v45  ;;  %v500_v0 = vmul.bf16 %v492_v43, %v2564_v54  ;;  %v501_v1 = vmul.bf16 %v492_v43, %v2569_v55 }
  0x83   :  { %v1961_v50 = vcombine.low %v494_v46, %v495_v47  ;;  %v1962_v56 = vcombine.low %v496_v48, %v497_v49  ;;  %v1941_v10 = vcombine.low %v270_v7, %v271_v8  ;;  %v1942_v16 = vcombine.low %v272_v13, %v273_v14  ;;  %v2651_v48 = vld [vmem:[%s3130_s2 + $0x14] ss:$8 sps:$4 sm:$0xff]   ;;  %v2660_v49 = vld [vmem:[%s3130_s2 + $0x24] ss:$8 sps:$4 sm:$0xff]  }
  0x84   :  { %v1963_v62 = vcombine.low %v498_v59, %v499_v60  ;;  %v1964_v4 = vcombine.low %v500_v0, %v501_v1  ;;  %v274_v17 = vmul.bf16 %v268_v3, %v2548_v44  ;;  %v275_v18 = vmul.bf16 %v268_v3, %v2553_v45 }
  0x85   :  { %536 = vrot.lane.b32.xlu1 %v1961_v50, %s2468_s15  ;;  %115 = vrot.lane.b32.xlu0 %v1927_v51, %s2467_s10  ;;  %v276_v22 = vmul.bf16 %v268_v3, %v2564_v54  ;;  %v277_v23 = vmul.bf16 %v268_v3, %v2569_v55  ;;  %v735_v25 = vmul.bf16 %v733_v20, %v2524_v33  ;;  %v2665_v50 = vld [vmem:[%s3130_s2 + $0x34] ss:$8 sps:$4 sm:$0xff]   ;;  %v2674_v51 = vld [vmem:[%s3130_s2 + $0x40] ss:$8 sps:$4 sm:$0xff]  }
  0x86   :  { %v1943_v21 = vcombine.low %v274_v17, %v275_v18  ;;  %v736_v26 = vmul.bf16 %v733_v20, %v2529_v34  ;;  %v737_v30 = vmul.bf16 %v733_v20, %v2534_v36  ;;  %v738_v35 = vmul.bf16 %v733_v20, %v2539_v37 }
  0x87   :  { %v1944_v27 = vcombine.low %v276_v22, %v277_v23  ;;  %v2021_v38 = vcombine.low %v2517_v31, %v2517_v31  ;;  %v739_v39 = vmul.bf16 %v733_v20, %v2548_v44  ;;  %v740_v40 = vmul.bf16 %v733_v20, %v2553_v45  ;;  %v2646_v31 = vld [vmem:[%s3130_s2 + $0x4] ss:$8 sps:$4 sm:$0xff]  }
  0x88   :  { %v1974_v29 = vcombine.low %v735_v25, %v736_v26  ;;  %v1975_v41 = vcombine.low %v737_v30, %v738_v35  ;;  %v741_v42 = vmul.bf16 %v733_v20, %v2564_v54  ;;  %v742_v43 = vmul.bf16 %v733_v20, %v2569_v55 }
  0x89   :  { %538 = vrot.lane.b32.xlu1 %v1962_v56, %s2468_s15  ;;  %117 = vrot.lane.b32.xlu0 %v1928_v58, %s2467_s10  ;;  %v1976_v46 = vcombine.low %v739_v39, %v740_v40  ;;  %v2693_v56 = vld [vmem:[%s3130_s2 + $0x70] ss:$8 sps:$4 sm:$0xff]   ;;  %v1922_v58 = vcombine.low %v2519_v32, %v2519_v32 }
  0x8a   :  { %v1977_v47 = vcombine.low %v741_v42, %v742_v43 }
  0x8b   :  { %v50_v61 = vmul.bf16 %v1922_v58, %v2524_v33  ;;  %v52_v32 = vmul.bf16 %v1922_v58, %v2534_v36  ;;  %v53_v7 = vmul.bf16 %v1922_v58, %v2539_v37  ;;  %v55_v13 = vmul.bf16 %v1922_v58, %v2553_v45 }
  0x8c   :  { %v56_v17 = vmul.bf16 %v1922_v58, %v2564_v54  ;;  %v57_v18 = vmul.bf16 %v1922_v58, %v2569_v55 }
  0x8d   :  { %540 = vrot.lane.b32.xlu1 %v1963_v62, %s2468_s15  ;;  %119 = vrot.lane.b32.xlu0 %v1929_v63, %s2467_s10  ;;  %v51_v62 = vmul.bf16 %v1922_v58, %v2529_v34 }
  0x8f   :  { %v1932_v1 = vcombine.low %v50_v61, %v51_v62 }
  0x91   :  { %542 = vrot.lane.b32.xlu1 %v1964_v4, %s2468_s15  ;;  %89 = vrot.lane.b32.xlu0 %v2580_v2, %s2469_s17 }
  0x95   :  { %91 = vrot.lane.b32.xlu1 %v2587_v5, %s2469_s17  ;;  %512 = vrot.lane.b32.xlu0 %v2592_v6, %s2469_s17 }
  0x99   :  { %514 = vrot.lane.b32.xlu1 %v2603_v9, %s2469_s17  ;;  %304 = vrot.lane.b32.xlu0 %v1941_v10, %s2470_s23 }
  0x9d   :  { %399 = vrot.lane.b32.xlu1 %v1947_v11, %s2471_s24  ;;  %984 = vrot.lane.b32.xlu0 %v1991_v12, %s2472_s25  ;;  %v1933_v11 = vcombine.low %v52_v32, %v53_v7  ;;  %v54_v12 = vmul.bf16 %v1922_v58, %v2548_v44 }
  0xa1   :  { %306 = vrot.lane.b32.xlu1 %v1942_v16, %s2470_s23  ;;  %1099 = vrot.lane.b32.xlu0 %v2000_v15, %s2473_s26  ;;  %v1934_v16 = vcombine.low %v54_v12, %v55_v13 }
  0xa5   :  { %401 = vrot.lane.b32.xlu1 %v1948_v19, %s2471_s24  ;;  %308 = vrot.lane.b32.xlu0 %v1943_v21, %s2470_s23  ;;  %v1935_v21 = vcombine.low %v56_v17, %v57_v18  ;;  %v2830_v17 = vld [vmem:[%s3130_s2 + $0x74] ss:$8 sps:$4 sm:$0xff]  }
  0xa9   :  { %403 = vrot.lane.b32.xlu1 %v1949_v24, %s2471_s24  ;;  %310 = vrot.lane.b32.xlu0 %v1944_v27, %s2470_s23 }
  0xad   :  { %405 = vrot.lane.b32.xlu1 %v1950_v28, %s2471_s24  ;;  %767 = vrot.lane.b32.xlu0 %v1974_v29, %s2474_s27 }
  0xb1   :  { %1409 = vrot.lane.b32.xlu1 %v2021_v38, %s2475_s28  ;;  %769 = vrot.lane.b32.xlu0 %v1975_v41, %s2474_s27 }
  0xb5   :  { %771 = vrot.lane.b32.xlu1 %v1976_v46, %s2474_s27  ;;  %773 = vrot.lane.b32.xlu0 %v1977_v47, %s2474_s27 }
  0xb9   :  { %375 = vrot.lane.b32.xlu1 %v2646_v31, %s2469_s17  ;;  %377 = vrot.lane.b32.xlu0 %v2651_v48, %s2469_s17 }
  0xbd   :  { %743 = vrot.lane.b32.xlu1 %v2660_v49, %s2469_s17  ;;  %745 = vrot.lane.b32.xlu0 %v2665_v50, %s2469_s17 }
  0xc1   :  { %853 = vrot.lane.b32.xlu1 %v2674_v51, %s2469_s17  ;;  %855 = vrot.lane.b32.xlu0 %v2679_v52, %s2469_s17 }
  0xc5   :  { %1220 = vrot.lane.b32.xlu1 %v2688_v53, %s2469_s17  ;;  %1222 = vrot.lane.b32.xlu0 %v2693_v56, %s2469_s17 }
  0xf3   :  { %v114_v57 = vpop.permute.xlu0 %113 }
  0xf4   :  { %2168 = vmatprep.subr.bf16.mxu0 %v114_v57 }
  0xf5   :  { %2169 = vmatpush3.bf16.msra.mxu0 %v114_v57 }
  0xf7   :  { %v537_v59 = vpop.permute.xlu1 %536  ;;  %v116_v60 = vpop.permute.xlu0 %115 }
  0xf8   :  { %2170 = vmatprep.subr.bf16.mxu0 %v116_v60  ;;  %2216 = vmatprep.subr.bf16.mxu1 %v537_v59 }
  0xf9   :  { %2171 = vmatpush3.bf16.msra.mxu0 %v116_v60  ;;  %2217 = vmatpush3.bf16.msra.mxu1 %v537_v59 }
  0xfb   :  { %v539_v63 = vpop.permute.xlu1 %538  ;;  %v118_v0 = vpop.permute.xlu0 %117 }
  0xfc   :  { %2172 = vmatprep.subr.bf16.mxu0 %v118_v0  ;;  %2218 = vmatprep.subr.bf16.mxu1 %v539_v63 }
  0xfd   :  { %2173 = vmatpush3.bf16.msra.mxu0 %v118_v0  ;;  %2219 = vmatpush3.bf16.msra.mxu1 %v539_v63 }
  0xff   :  { %v541_v3 = vpop.permute.xlu1 %540  ;;  %v2703_v4 = vpop.permute.xlu0 %119 }
 0x100   :  { %2174 = vmatprep.subr.bf16.mxu0 %v2703_v4  ;;  %2220 = vmatprep.subr.bf16.mxu1 %v541_v3 }
 0x101   :  { %2175 = vmatpush3.bf16.msra.mxu0 %v2703_v4  ;;  %2221 = vmatpush3.bf16.msra.mxu1 %v541_v3 }
 0x102   :  { %2180 = vmatprep.subr.bf16.mxu0 %v1932_v1 }
 0x103   :  { %v543_v8 = vpop.permute.xlu1 %542  ;;  %v90_v10 = vpop.permute.xlu0 %89 }
 0x104   :  { %2176 = vmatprep.mubr.msk.bf16.mxu0 %vm125_vm0, %v90_v10  ;;  %2222 = vmatprep.subr.bf16.mxu1 %v543_v8 }
 0x105   :  { %2223 = vmatpush3.bf16.msra.mxu1 %v543_v8 }
 0x106   :  { %2228 = vmatprep.subr.bf16.mxu1 %v114_v57 }
 0x107   :  { %v92_v14 = vpop.permute.xlu1 %91  ;;  %v513_v15 = vpop.permute.xlu0 %512 }
 0x108   :  { %2177 = vmatmul.mubr.msk.bf16.vlgmr.msra.gmra.mrb[0].mxu0 %vm125_vm0, %v92_v14  ;;  %2224 = vmatprep.mubr.msk.bf16.mxu1 %vm125_vm0, %v513_v15 }
 0x109   :  { %2181 = vmatpush3.bf16.msra.mxu0 %v1932_v1  ;;  %2188 = vmatprep.mubr.msk.bf16.mxu0 %vm125_vm0, %v2580_v2 }
 0x10a   :  { %2182 = vmatprep.subr.bf16.mxu0 %v1933_v11 }
 0x10b   :  { %v515_v19 = vpop.permute.xlu1 %514  ;;  %v2718_v20 = vpop.permute.xlu0 %304 }
 0x10c   :  { %2225 = vmatmul.mubr.msk.bf16.vlgmr.msra.gmra.mrb[0].mxu1 %vm125_vm0, %v515_v19 }
 0x10d   :  { %2183 = vmatpush3.bf16.msra.mxu0 %v1933_v11  ;;  %2229 = vmatpush3.bf16.msra.mxu1 %v114_v57 }
 0x10e   :  { %2230 = vmatprep.subr.bf16.mxu1 %v116_v60  ;;  %2184 = vmatprep.subr.bf16.mxu0 %v1934_v16 }
 0x10f   :  { %v2721_v22 = vpop.permute.xlu1 %399  ;;  %v985_v23 = vpop.permute.xlu0 %984  ;;  %2236 = vmatprep.mubr.msk.bf16.mxu1 %vm125_vm0, %v2592_v6 }
 0x110   :  { %v987_v2 = vmul.bf16 %v985_v23, %v2524_v33  ;;  %v988_v24 = vmul.bf16 %v985_v23, %v2529_v34  ;;  %v989_v26 = vmul.bf16 %v985_v23, %v2534_v36  ;;  %v990_v27 = vmul.bf16 %v985_v23, %v2539_v37 }
 0x111   :  { %2185 = vmatpush3.bf16.msra.mxu0 %v1934_v16  ;;  %2231 = vmatpush3.bf16.msra.mxu1 %v116_v60  ;;  %v991_v35 = vmul.bf16 %v985_v23, %v2548_v44  ;;  %v992_v42 = vmul.bf16 %v985_v23, %v2553_v45  ;;  %v993_v58 = vmul.bf16 %v985_v23, %v2564_v54  ;;  %v2453_v16 = vld [vmem:[%s3130_s2 + $0x64] ss:$8 sps:$4 sm:$0xff]  }
 0x112   :  { %2232 = vmatprep.subr.bf16.mxu1 %v118_v0  ;;  %2186 = vmatprep.subr.bf16.mxu0 %v1935_v21  ;;  %v1994_v25 = vcombine.low %v987_v2, %v988_v24  ;;  %v1995_v40 = vcombine.low %v989_v26, %v990_v27  ;;  %v994_v59 = vmul.bf16 %v985_v23, %v2569_v55 }
 0x113   :  { %v2729_v28 = vpop.permute.xlu1 %306  ;;  %v1100_v29 = vpop.permute.xlu0 %1099  ;;  %v1996_v57 = vcombine.low %v991_v35, %v992_v42 }
 0x114   :  { %1021 = vrot.lane.b32.xlu1 %v1994_v25, %s2476_s20  ;;  %v1102_v6 = vmul.bf16 %v1100_v29, %v2524_v33  ;;  %v1103_v30 = vmul.bf16 %v1100_v29, %v2529_v34  ;;  %v1104_v38 = vmul.bf16 %v1100_v29, %v2534_v36  ;;  %v1105_v39 = vmul.bf16 %v1100_v29, %v2539_v37 }
 0x115   :  { %2233 = vmatpush3.bf16.msra.mxu1 %v118_v0  ;;  %2187 = vmatpush3.bf16.msra.mxu0 %v1935_v21  ;;  %v1106_v61 = vmul.bf16 %v1100_v29, %v2548_v44  ;;  %v1107_v62 = vmul.bf16 %v1100_v29, %v2553_v45  ;;  %v1997_v63 = vcombine.low %v993_v58, %v994_v59 }
 0x116   :  { %2192 = vmatprep.subr.bf16.mxu0 %v2718_v20  ;;  %2234 = vmatprep.subr.bf16.mxu1 %v2703_v4  ;;  %v2001_v41 = vcombine.low %v1102_v6, %v1103_v30  ;;  %v2002_v47 = vcombine.low %v1104_v38, %v1105_v39  ;;  %v1109_v1 = vmul.bf16 %v1100_v29, %v2569_v55 }
 0x117   :  { %v2740_v43 = vpop.permute.xlu1 %401  ;;  %v2742_v46 = vpop.permute.xlu0 %308 }
 0x118   :  { %1023 = vrot.lane.b32.xlu1 %v1995_v40, %s2476_s20  ;;  %1134 = vrot.lane.b32.xlu0 %v2001_v41, %s2477_s21 }
 0x119   :  { %2235 = vmatpush3.bf16.msra.mxu1 %v2703_v4  ;;  %2189 = vmatmul.mubr.msk.bf16.vlgmr.msra.gmra.mrb[0].mxu0 %vm125_vm0, %v2587_v5 }
 0x11a   :  { %2193 = vmatpush3.bf16.msra.mxu0 %v2718_v20  ;;  %2240 = vmatprep.subr.bf16.mxu1 %v2721_v22 }
 0x11b   :  { %2194 = vmatprep.subr.bf16.mxu0 %v2729_v28  ;;  %v2754_v60 = vpop.permute.xlu1 %403  ;;  %2200 = vmatprep.mubr.msk.bf16.mxu0 %vm125_vm0, %v2646_v31  ;;  %v2765_v5 = vpop.permute.xlu0 %310  ;;  %v2003_v31 = vcombine.low %v1106_v61, %v1107_v62 }
 0x11c   :  { %2237 = vmatmul.mubr.msk.bf16.vlgmr.msra.gmra.mrb[0].mxu1 %vm125_vm0, %v2603_v9  ;;  %1025 = vrot.lane.b32.xlu1 %v1996_v57, %s2476_s20  ;;  %v1108_v9 = vmul.bf16 %v1100_v29, %v2564_v54 }
 0x11d   :  { %2241 = vmatpush3.bf16.msra.mxu1 %v2721_v22  ;;  %1136 = vrot.lane.b32.xlu0 %v2002_v47, %s2477_s21 }
 0x11e   :  { %2195 = vmatpush3.bf16.msra.mxu0 %v2729_v28  ;;  %2242 = vmatprep.subr.bf16.mxu1 %v2740_v43  ;;  %v2004_v32 = vcombine.low %v1108_v9, %v1109_v1 }
 0x11f   :  { %2196 = vmatprep.subr.bf16.mxu0 %v2742_v46  ;;  %v2770_v0 = vpop.permute.xlu1 %405  ;;  %2248 = vmatprep.mubr.msk.bf16.mxu1 %vm125_vm0, %v2660_v49  ;;  %v2781_v3 = vpop.permute.xlu0 %767 }
 0x120   :  { %1027 = vrot.lane.b32.xlu1 %v1997_v63, %s2476_s20 }
 0x121   :  { %2243 = vmatpush3.bf16.msra.mxu1 %v2740_v43  ;;  %1138 = vrot.lane.b32.xlu0 %v2003_v31, %s2477_s21 }
 0x122   :  { %2197 = vmatpush3.bf16.msra.mxu0 %v2742_v46  ;;  %2244 = vmatprep.subr.bf16.mxu1 %v2754_v60 }
 0x123   :  { %2198 = vmatprep.subr.bf16.mxu0 %v2765_v5  ;;  %v1410_v4 = vpop.permute.xlu1 %1409  ;;  %v770_v14 = vpop.permute.xlu0 %769 }
 0x124   :  { %v1412_v7 = vmul.bf16 %v1410_v4, %v2524_v33  ;;  %v1413_v49 = vmul.bf16 %v1410_v4, %v2529_v34  ;;  %v1414_v8 = vmul.bf16 %v1410_v4, %v2534_v36  ;;  %v1415_v10 = vmul.bf16 %v1410_v4, %v2539_v37 }
 0x125   :  { %2245 = vmatpush3.bf16.msra.mxu1 %v2754_v60  ;;  %1140 = vrot.lane.b32.xlu0 %v2004_v32, %s2477_s21  ;;  %v1416_v11 = vmul.bf16 %v1410_v4, %v2548_v44  ;;  %v1417_v12 = vmul.bf16 %v1410_v4, %v2553_v45  ;;  %v1418_v13 = vmul.bf16 %v1410_v4, %v2564_v54 }
 0x126   :  { %2199 = vmatpush3.bf16.msra.mxu0 %v2765_v5  ;;  %2246 = vmatprep.subr.bf16.mxu1 %v2770_v0  ;;  %v2022_v33 = vcombine.low %v1412_v7, %v1413_v49  ;;  %v2023_v34 = vcombine.low %v1414_v8, %v1415_v10  ;;  %v1419_v36 = vmul.bf16 %v1410_v4, %v2569_v55  ;;  %v2808_v55 = vld [vmem:[%s3130_s2 + $0x44] ss:$8 sps:$4 sm:$0xff]  }
 0x127   :  { %2204 = vmatprep.subr.bf16.mxu0 %v2721_v22  ;;  %v772_v37 = vpop.permute.xlu1 %771  ;;  %v2024_v44 = vcombine.low %v1416_v11, %v1417_v12  ;;  %v774_v15 = vpop.permute.xlu0 %773 }
 0x128   :  { %1444 = vrot.lane.b32.xlu1 %v2022_v33, %s2478_s1  ;;  %v2025_v45 = vcombine.low %v1418_v13, %v1419_v36 }
 0x129   :  { %2247 = vmatpush3.bf16.msra.mxu1 %v2770_v0  ;;  %1446 = vrot.lane.b32.xlu0 %v2023_v34, %s2478_s1 }
 0x12a   :  { %2201 = vmatmul.mubr.msk.bf16.vlgmr.msra.gmra.mrb[0].mxu0 %vm125_vm0, %v2651_v48  ;;  %2252 = vmatprep.subr.bf16.mxu1 %v2781_v3  ;;  %v2813_v48 = vld [vmem:[%s3130_s2 + $0x54] ss:$8 sps:$4 sm:$0xff]  }
 0x12b   :  { %2205 = vmatpush3.bf16.msra.mxu0 %v2721_v22  ;;  %v376_v54 = vpop.permute.xlu1 %375  ;;  %v378_v18 = vpop.permute.xlu0 %377 }
 0x12c   :  { %2206 = vmatprep.subr.bf16.mxu0 %v2740_v43  ;;  %2249 = vmatmul.mubr.msk.bf16.vlgmr.msra.gmra.mrb[0].mxu1 %vm125_vm0, %v2665_v50 }
 0x12d   :  { %1448 = vrot.lane.b32.xlu1 %v2024_v44, %s2478_s1  ;;  %1450 = vrot.lane.b32.xlu0 %v2025_v45, %s2478_s1 }
 0x12e   :  { %2253 = vmatpush3.bf16.msra.mxu1 %v2781_v3  ;;  %2212 = vmatprep.mubr.msk.bf16.mxu0 %vm125_vm0, %v376_v54 }
 0x12f   :  { %2207 = vmatpush3.bf16.msra.mxu0 %v2740_v43  ;;  %2254 = vmatprep.subr.bf16.mxu1 %v770_v14  ;;  %v744_v50 = vpop.permute.xlu1 %743  ;;  %v746_v21 = vpop.permute.xlu0 %745 }
 0x130   :  { %2208 = vmatprep.subr.bf16.mxu0 %v2754_v60  ;;  %2260 = vmatprep.mubr.msk.bf16.mxu1 %vm125_vm0, %v744_v50 }
 0x131   :  { %1110 = vrot.lane.b32.xlu1 %v2808_v55, %s2469_s17  ;;  %1112 = vrot.lane.b32.xlu0 %v2813_v48, %s2469_s17 }
 0x132   :  { %2255 = vmatpush3.bf16.msra.mxu1 %v770_v14 }
 0x133   :  { %2209 = vmatpush3.bf16.msra.mxu0 %v2754_v60  ;;  %2256 = vmatprep.subr.bf16.mxu1 %v772_v37  ;;  %v854_v19 = vpop.permute.xlu1 %853  ;;  %v856_v2 = vpop.permute.xlu0 %855 }
 0x134   :  { %2210 = vmatprep.subr.bf16.mxu0 %v2770_v0 }
 0x135   :  { %1420 = vrot.lane.b32.xlu1 %v2453_v16, %s2469_s17  ;;  %1422 = vrot.lane.b32.xlu0 %v2830_v17, %s2469_s17 }
 0x136   :  { %2257 = vmatpush3.bf16.msra.mxu1 %v772_v37 }
 0x137   :  { %2211 = vmatpush3.bf16.msra.mxu0 %v2770_v0  ;;  %2258 = vmatprep.subr.bf16.mxu1 %v774_v15  ;;  %v1221_v23 = vpop.permute.xlu1 %1220  ;;  %v1223_v24 = vpop.permute.xlu0 %1222 }
 0x138   :  { %2264 = vmatprep.subr.bf16.mxu0 %v2721_v22 }
 0x13a   :  { %2213 = vmatmul.mubr.msk.bf16.vlgmr.msra.gmra.mrb[0].mxu0 %vm125_vm0, %v378_v18  ;;  %2259 = vmatpush3.bf16.msra.mxu1 %v774_v15 }
 0x13b   :  { %2265 = vmatpush3.bf16.msra.mxu0 %v2721_v22  ;;  %2312 = vmatprep.subr.bf16.mxu1 %v2781_v3 }
 0x13c   :  { %2266 = vmatprep.subr.bf16.mxu0 %v2740_v43  ;;  %2272 = vmatprep.mubr.msk.bf16.mxu0 %vm125_vm0, %v854_v19 }
 0x13d   :  { %2261 = vmatmul.mubr.msk.bf16.vlgmr.msra.gmra.mrb[0].mxu1 %vm125_vm0, %v746_v21 }
 0x13e   :  { %2313 = vmatpush3.bf16.msra.mxu1 %v2781_v3  ;;  %2320 = vmatprep.mubr.msk.bf16.mxu1 %vm125_vm0, %v1221_v23 }
 0x13f   :  { %2267 = vmatpush3.bf16.msra.mxu0 %v2740_v43  ;;  %2314 = vmatprep.subr.bf16.mxu1 %v770_v14 }
 0x140   :  { %2268 = vmatprep.subr.bf16.mxu0 %v2754_v60 }
 0x142   :  { %2315 = vmatpush3.bf16.msra.mxu1 %v770_v14 }
 0x143   :  { %2269 = vmatpush3.bf16.msra.mxu0 %v2754_v60  ;;  %2316 = vmatprep.subr.bf16.mxu1 %v772_v37 }
 0x144   :  { %2270 = vmatprep.subr.bf16.mxu0 %v2770_v0 }
 0x146   :  { %2317 = vmatpush3.bf16.msra.mxu1 %v772_v37 }
 0x147   :  { %2271 = vmatpush3.bf16.msra.mxu0 %v2770_v0  ;;  %2318 = vmatprep.subr.bf16.mxu1 %v774_v15 }
 0x148   :  { %2276 = vmatprep.subr.bf16.mxu0 %v2718_v20 }
 0x14a   :  { %2273 = vmatmul.mubr.msk.bf16.vlgmr.msra.gmra.mrb[4].mxu0 %vm125_vm0, %v856_v2  ;;  %2319 = vmatpush3.bf16.msra.mxu1 %v774_v15 }
 0x14b   :  { %2277 = vmatpush3.bf16.msra.mxu0 %v2718_v20  ;;  %2324 = vmatprep.subr.bf16.mxu1 %v2721_v22 }
 0x14c   :  { %2278 = vmatprep.subr.bf16.mxu0 %v2729_v28  ;;  %2284 = vmatprep.mubr.msk.bf16.mxu0 %vm125_vm0, %v2674_v51 }
 0x14d   :  { %2321 = vmatmul.mubr.msk.bf16.vlgmr.msra.gmra.mrb[4].mxu1 %vm125_vm0, %v1223_v24 }
 0x14e   :  { %2325 = vmatpush3.bf16.msra.mxu1 %v2721_v22  ;;  %2332 = vmatprep.mubr.msk.bf16.mxu1 %vm125_vm0, %v2688_v53 }
 0x14f   :  { %2279 = vmatpush3.bf16.msra.mxu0 %v2729_v28  ;;  %2326 = vmatprep.subr.bf16.mxu1 %v2740_v43 }
 0x150   :  { %2280 = vmatprep.subr.bf16.mxu0 %v2742_v46 }
 0x152   :  { %2327 = vmatpush3.bf16.msra.mxu1 %v2740_v43 }
 0x153   :  { %2281 = vmatpush3.bf16.msra.mxu0 %v2742_v46  ;;  %2328 = vmatprep.subr.bf16.mxu1 %v2754_v60 }
 0x154   :  { %2282 = vmatprep.subr.bf16.mxu0 %v2765_v5 }
 0x156   :  { %2329 = vmatpush3.bf16.msra.mxu1 %v2754_v60 }
 0x157   :  { %2283 = vmatpush3.bf16.msra.mxu0 %v2765_v5  ;;  %2330 = vmatprep.subr.bf16.mxu1 %v2770_v0 }
 0x15a   :  { %2331 = vmatpush3.bf16.msra.mxu1 %v2770_v0  ;;  %2285 = vmatmul.mubr.msk.bf16.vlgmr.msra.gmra.mrb[4].mxu0 %vm125_vm0, %v2679_v52 }
 0x15b   :  { %2296 = vmatprep.mubr.msk.bf16.mxu0 %vm125_vm0, %v2808_v55 }
 0x15d   :  { %2333 = vmatmul.mubr.msk.bf16.vlgmr.msra.gmra.mrb[4].mxu1 %vm125_vm0, %v2693_v56 }
 0x15e   :  { %2344 = vmatprep.mubr.msk.bf16.mxu1 %vm125_vm0, %v2453_v16 }
 0x186   :  { %v1022_v51 = vpop.permute.xlu1 %1021 }
 0x187   :  { %2288 = vmatprep.subr.bf16.mxu0 %v1022_v51 }
 0x188   :  { %2289 = vmatpush3.bf16.msra.mxu0 %v1022_v51 }
 0x18a   :  { %v1024_v53 = vpop.permute.xlu1 %1023  ;;  %v1135_v20 = vpop.permute.xlu0 %1134 }
 0x18b   :  { %2290 = vmatprep.subr.bf16.mxu0 %v1024_v53  ;;  %2336 = vmatprep.subr.bf16.mxu1 %v1135_v20 }
 0x18c   :  { %2291 = vmatpush3.bf16.msra.mxu0 %v1024_v53  ;;  %2337 = vmatpush3.bf16.msra.mxu1 %v1135_v20 }
 0x18e   :  { %v1026_v22 = vpop.permute.xlu1 %1025 }
 0x18f   :  { %v1137_v25 = vpop.permute.xlu0 %1136  ;;  %2292 = vmatprep.subr.bf16.mxu0 %v1026_v22 }
 0x190   :  { %2338 = vmatprep.subr.bf16.mxu1 %v1137_v25  ;;  %2293 = vmatpush3.bf16.msra.mxu0 %v1026_v22 }
 0x191   :  { %2339 = vmatpush3.bf16.msra.mxu1 %v1137_v25 }
 0x192   :  { %v1028_v52 = vpop.permute.xlu1 %1027 }
 0x193   :  { %v1139_v26 = vpop.permute.xlu0 %1138  ;;  %2294 = vmatprep.subr.bf16.mxu0 %v1028_v52 }
 0x194   :  { %2340 = vmatprep.subr.bf16.mxu1 %v1139_v26  ;;  %2295 = vmatpush3.bf16.msra.mxu0 %v1028_v52 }
 0x195   :  { %2341 = vmatpush3.bf16.msra.mxu1 %v1139_v26  ;;  %2300 = vmatprep.subr.bf16.mxu0 %v1135_v20 }
 0x197   :  { %v1141_v56 = vpop.permute.xlu0 %1140  ;;  %2297 = vmatmul.mubr.msk.bf16.vlgmr.msra.gmra.mrb[4].mxu0 %vm125_vm0, %v2813_v48 }
 0x198   :  { %2342 = vmatprep.subr.bf16.mxu1 %v1141_v56  ;;  %2301 = vmatpush3.bf16.msra.mxu0 %v1135_v20 }
 0x199   :  { %2343 = vmatpush3.bf16.msra.mxu1 %v1141_v56  ;;  %2302 = vmatprep.subr.bf16.mxu0 %v1137_v25 }
 0x19a   :  { %v1445_v27 = vpop.permute.xlu1 %1444 }
 0x19b   :  { %v1447_v28 = vpop.permute.xlu0 %1446  ;;  %2348 = vmatprep.subr.bf16.mxu1 %v1445_v27 }
 0x19c   :  { %2303 = vmatpush3.bf16.msra.mxu0 %v1137_v25  ;;  %2345 = vmatmul.mubr.msk.bf16.vlgmr.msra.gmra.mrb[4].mxu1 %vm125_vm0, %v2830_v17 }
 0x19d   :  { %2349 = vmatpush3.bf16.msra.mxu1 %v1445_v27  ;;  %2304 = vmatprep.subr.bf16.mxu0 %v1139_v26 }
 0x19e   :  { %2350 = vmatprep.subr.bf16.mxu1 %v1447_v28 }
 0x19f   :  { %v1449_v29 = vpop.permute.xlu1 %1448  ;;  %v1451_v6 = vpop.permute.xlu0 %1450 }
 0x1a0   :  { %2305 = vmatpush3.bf16.msra.mxu0 %v1139_v26 }
 0x1a1   :  { %2351 = vmatpush3.bf16.msra.mxu1 %v1447_v28  ;;  %2306 = vmatprep.subr.bf16.mxu0 %v1141_v56 }
 0x1a2   :  { %2352 = vmatprep.subr.bf16.mxu1 %v1449_v29 }
 0x1a3   :  { %v1111_v30 = vpop.permute.xlu1 %1110  ;;  %v1113_v35 = vpop.permute.xlu0 %1112 }
 0x1a4   :  { %2307 = vmatpush3.bf16.msra.mxu0 %v1141_v56  ;;  %2308 = vmatprep.mubr.msk.bf16.mxu0 %vm125_vm0, %v1111_v30 }
 0x1a5   :  { %2353 = vmatpush3.bf16.msra.mxu1 %v1449_v29 }
 0x1a6   :  { %2354 = vmatprep.subr.bf16.mxu1 %v1451_v6 }
 0x1a7   :  { %2309 = vmatmul.mubr.msk.bf16.vlgmr.msra.gmra.mrb[4].mxu0 %vm125_vm0, %v1113_v35  ;;  %v1421_v38 = vpop.permute.xlu1 %1420  ;;  %v1423_v39 = vpop.permute.xlu0 %1422 }
 0x1a8   :  { %2356 = vmatprep.mubr.msk.bf16.mxu1 %vm125_vm0, %v1421_v38 }
 0x1a9   :  { %2355 = vmatpush3.bf16.msra.mxu1 %v1451_v6 }
 0x1ac   :  { %2357 = vmatmul.mubr.msk.bf16.vlgmr.msra.gmra.mrb[4].mxu1 %vm125_vm0, %v1423_v39 }
 0x20d   :  { %v2889_v40 = vpop.f32.mrb[0].mxu0 }
 0x20e   :  { %v2891_v41 = vpop.f32.mrb[1].mxu0  ;;  %v1522_v42 = vsel %vm1515_vm1, %v2889_v40, 0.0 }
 0x20f   :  { %1523 = vadd.xlane.f32.xlu0 %v1522_v42  ;;  %v2895_v43 = vpop.f32.mrb[2].mxu0  ;;  %v1516_v46 = vsel %vm1515_vm1, %v2891_v41, 0.0 }
 0x210   :  { %1517 = vadd.xlane.f32.xlu1 %v1516_v46  ;;  %v2899_v47 = vpop.f32.mrb[3].mxu0  ;;  %v2901_v57 = vpop.f32.mrb[0].mxu1  ;;  %v1525_v62 = vsel %vm1515_vm1, %v2895_v43, 0.0 }
 0x211   :  { %v2903_v58 = vpop.f32.mrb[1].mxu1  ;;  %v1519_v59 = vsel %vm1515_vm1, %v2899_v47, 0.0  ;;  %v1538_v5 = vsel %vm1515_vm1, %v2901_v57, 0.0 }
 0x212   :  { %v2907_v60 = vpop.f32.mrb[2].mxu1  ;;  %v1532_v0 = vsel %vm1515_vm1, %v2903_v58, 0.0 }
 0x213   :  { %1520 = vadd.xlane.f32.xlu0 %v1519_v59  ;;  %v2909_v61 = vpop.f32.mrb[3].mxu1  ;;  %v1541_v63 = vsel %vm1515_vm1, %v2907_v60, 0.0 }
 0x214   :  { %1526 = vadd.xlane.f32.xlu1 %v1525_v62  ;;  %v1535_v31 = vsel %vm1515_vm1, %v2909_v61, 0.0 }
 0x217   :  { %1539 = vadd.xlane.f32.xlu0 %v1538_v5 }
 0x218   :  { %1542 = vadd.xlane.f32.xlu1 %v1541_v63 }
 0x21b   :  { %1533 = vadd.xlane.f32.xlu0 %v1532_v0 }
 0x21c   :  { %1536 = vadd.xlane.f32.xlu1 %v1535_v31 }
 0x27a   :  { %v2921_v9 = vpop.f32.mrb[4].mxu0 }
 0x27b   :  { %v2923_v1 = vpop.f32.mrb[5].mxu0  ;;  %v1554_v3 = vsel %vm1515_vm1, %v2921_v9, 0.0 }
 0x27c   :  { %1555 = vadd.xlane.f32.xlu0 %v1554_v3  ;;  %v2927_v4 = vpop.f32.mrb[6].mxu0  ;;  %v1548_v8 = vsel %vm1515_vm1, %v2923_v1, 0.0 }
 0x27d   :  { %v2929_v32 = vpop.f32.mrb[7].mxu0  ;;  %v1557_v7 = vsel %vm1515_vm1, %v2927_v4, 0.0 }
 0x27e   :  { %1558 = vadd.xlane.f32.xlu1 %v1557_v7  ;;  %v1551_v12 = vsel %vm1515_vm1, %v2929_v32, 0.0 }
 0x27f   :  { %v2933_v49 = vpop.f32.mrb[4].mxu1 }
 0x280   :  { %v2937_v10 = vpop.f32.mrb[5].mxu1  ;;  %1549 = vadd.xlane.f32.xlu0 %v1548_v8  ;;  %v1570_v36 = vsel %vm1515_vm1, %v2933_v49, 0.0 }
 0x281   :  { %v2939_v11 = vpop.f32.mrb[6].mxu1  ;;  %v1564_v33 = vsel %vm1515_vm1, %v2937_v10, 0.0 }
 0x282   :  { %v2943_v13 = vpop.f32.mrb[7].mxu1  ;;  %1552 = vadd.xlane.f32.xlu1 %v1551_v12  ;;  %v1573_v37 = vsel %vm1515_vm1, %v2939_v11, 0.0 }
 0x283   :  { %v1567_v34 = vsel %vm1515_vm1, %v2943_v13, 0.0 }
 0x284   :  { %1565 = vadd.xlane.f32.xlu0 %v1564_v33 }
 0x286   :  { %1568 = vadd.xlane.f32.xlu1 %v1567_v34 }
 0x288   :  { %1571 = vadd.xlane.f32.xlu0 %v1570_v36 }
 0x28a   :  { %1574 = vadd.xlane.f32.xlu1 %v1573_v37 }
 0x29c   :  { %v1524_v14 = vpop.xlane.xlu0 %1523 }
 0x29d   :  { %v1518_v44 = vpop.xlane.xlu1 %1517 }
 0x2a0   :  { %v1521_v45 = vpop.xlane.xlu0 %1520 }
 0x2a1   :  { %v1527_v54 = vpop.xlane.xlu1 %1526 }
 0x2a4   :  { %v1540_v55 = vpop.xlane.xlu0 %1539 }
 0x2a5   :  { %v1543_v48 = vpop.xlane.xlu1 %1542  ;;  %v1546_v23 = vadd.f32 %v1540_v55, %v1524_v14 }
 0x2a6   :  { %v1547_v24 = vadd.f32 %v1543_v48, %v1527_v54 }
 0x2a8   :  { %v1534_v15 = vpop.xlane.xlu0 %1533 }
 0x2a9   :  { %v1537_v50 = vpop.xlane.xlu1 %1536  ;;  %v1544_v53 = vadd.f32 %v1534_v15, %v1518_v44 }
 0x2aa   :  { %v1545_v56 = vadd.f32 %v1537_v50, %v1521_v45 }
 0x309   :  { %v1556_v16 = vpop.xlane.xlu0 %1555 }
 0x30a   :  { %v1562_v51 = vadd.f32 %v1556_v16, %v1546_v23 }
 0x30b   :  { %v1559_v17 = vpop.xlane.xlu1 %1558 }
 0x30c   :  { %v1563_v22 = vadd.f32 %v1559_v17, %v1547_v24 }
 0x30d   :  { %v1550_v18 = vpop.xlane.xlu0 %1549 }
 0x30e   :  { %v1560_v52 = vadd.f32 %v1550_v18, %v1544_v53 }
 0x30f   :  { %v1553_v19 = vpop.xlane.xlu1 %1552 }
 0x310   :  { %v1561_v6 = vadd.f32 %v1553_v19, %v1545_v56 }
 0x311   :  { %v1566_v21 = vpop.xlane.xlu0 %1565 }
 0x312   :  { %v1576_v29 = vadd.f32 %v1566_v21, %v1560_v52 }
 0x313   :  { %v1569_v2 = vpop.xlane.xlu1 %1568 }
 0x314   :  { %v1577_v39 = vadd.f32 %v1569_v2, %v1561_v6  ;;  %v2965_v62 = vmul.f32 0.0078125, %v1576_v29 }
 0x315   :  { %v1572_v20 = vpop.xlane.xlu0 %1571 }
 0x316   :  { %v1578_v25 = vadd.f32 %v1572_v20, %v1562_v51  ;;  %v2970_v3 = vmul.f32 0.0078125, %v1577_v39  ;;  %v1585_v36 = vsub.f32 %v2891_v41, %v2965_v62  ;;  %v1609_v55 = vsub.f32 %v2903_v58, %v2965_v62 }
 0x317   :  { %v1575_v26 = vpop.xlane.xlu1 %1574  ;;  %v1633_v18 = vsub.f32 %v2923_v1, %v2965_v62  ;;  %v1657_v51 = vsub.f32 %v2937_v10, %v2965_v62 }
 0x318   :  { %v2953_v27 = vmul.f32 0.0078125, %v1578_v25  ;;  %v1579_v28 = vadd.f32 %v1575_v26, %v1563_v22  ;;  %v1586_v44 = vsub.f32 %v2899_v47, %v2970_v3  ;;  %v1589_v54 = vmul.f32 %v1585_v36, %v1585_v36 }
 0x319   :  { %v1610_v50 = vsub.f32 %v2909_v61, %v2970_v3  ;;  %v1613_v17 = vmul.f32 %v1609_v55, %v1609_v55  ;;  %v1634_v23 = vsub.f32 %v2929_v32, %v2970_v3  ;;  %v1637_v24 = vmul.f32 %v1633_v18, %v1633_v18 }
 0x31a   :  { %v2955_v30 = vmul.f32 0.0078125, %v1579_v28  ;;  %v1587_v35 = vsub.f32 %v2889_v40, %v2953_v27  ;;  %v1611_v38 = vsub.f32 %v2901_v57, %v2953_v27  ;;  %v1635_v31 = vsub.f32 %v2921_v9, %v2953_v27 }
 0x31b   :  { %v1590_v15 = vmul.f32 %v1586_v44, %v1586_v44  ;;  %v1593_v16 = vsel %vm1515_vm1, %v1589_v54, 0.0  ;;  %v1614_v21 = vmul.f32 %v1610_v50, %v1610_v50  ;;  %v1617_v2 = vsel %vm1515_vm1, %v1613_v17, 0.0 }
 0x31c   :  { %v1591_v42 = vmul.f32 %v1587_v35, %v1587_v35  ;;  %v1588_v46 = vsub.f32 %v2895_v43, %v2955_v30  ;;  %v1612_v59 = vsub.f32 %v2907_v60, %v2955_v30  ;;  %v1615_v0 = vmul.f32 %v1611_v38, %v1611_v38 }
 0x31d   :  { %v1636_v12 = vsub.f32 %v2927_v4, %v2955_v30  ;;  %v1639_v34 = vmul.f32 %v1635_v31, %v1635_v31  ;;  %v1596_v19 = vsel %vm1515_vm1, %v1590_v15, 0.0  ;;  %v1620_v53 = vsel %vm1515_vm1, %v1614_v21, 0.0 }
 0x31e   :  { %v1599_v5 = vsel %vm1515_vm1, %v1591_v42, 0.0  ;;  %v1592_v63 = vmul.f32 %v1588_v46, %v1588_v46  ;;  %v1616_v8 = vmul.f32 %v1612_v59, %v1612_v59  ;;  %v1623_v33 = vsel %vm1515_vm1, %v1615_v0, 0.0 }
 0x31f   :  { %1600 = vadd.xlane.f32.xlu0 %v1599_v5  ;;  %v1640_v14 = vmul.f32 %v1636_v12, %v1636_v12  ;;  %v1647_v45 = vsel %vm1515_vm1, %v1639_v34, 0.0  ;;  %v1638_v20 = vmul.f32 %v1634_v23, %v1634_v23  ;;  %v1658_v22 = vsub.f32 %v2943_v13, %v2970_v3 }
 0x320   :  { %v1602_v7 = vsel %vm1515_vm1, %v1592_v63, 0.0  ;;  %v1626_v37 = vsel %vm1515_vm1, %v1616_v8, 0.0  ;;  %v1641_v25 = vsel %vm1515_vm1, %v1637_v24, 0.0  ;;  %v1661_v52 = vmul.f32 %v1657_v51, %v1657_v51 }
 0x321   :  { %1603 = vadd.xlane.f32.xlu1 %v1602_v7  ;;  %v1650_v48 = vsel %vm1515_vm1, %v1640_v14, 0.0  ;;  %v1659_v26 = vsub.f32 %v2933_v49, %v2953_v27  ;;  %v1644_v56 = vsel %vm1515_vm1, %v1638_v20, 0.0  ;;  %v1662_v28 = vmul.f32 %v1658_v22, %v1658_v22 }
 0x322   :  { %v1660_v29 = vsub.f32 %v2939_v11, %v2955_v30  ;;  %v1665_v6 = vsel %vm1515_vm1, %v1661_v52, 0.0  ;;  %v2479_v59 = vmov 0  }
 0x323   :  { %1624 = vadd.xlane.f32.xlu0 %v1623_v33  ;;  %v1663_v35 = vmul.f32 %v1659_v26, %v1659_v26  ;;  %v1668_v38 = vsel %vm1515_vm1, %v1662_v28, 0.0  ;;  %2426 = vset.pattern.permute.xlu1 %v2479_v59 }
 0x324   :  { %v1664_v39 = vmul.f32 %v1660_v29, %v1660_v29  ;;  %2425 = vset.pattern.permute.xlu0 %v2479_v59  ;;  %v1685_v29 = vld [vmem:[%s3132_s3] sm:$0xff]  ;;  %v1688_v59 = vld [vmem:[%s3132_s3 + $0x18] sm:$0xff] }
 0x325   :  { %1627 = vadd.xlane.f32.xlu1 %v1626_v37  ;;  %v1671_v42 = vsel %vm1515_vm1, %v1663_v35, 0.0 }
 0x326   :  { %v1674_v46 = vsel %vm1515_vm1, %v1664_v39, 0.0 }
 0x327   :  { %1648 = vadd.xlane.f32.xlu0 %v1647_v45 }
 0x329   :  { %1651 = vadd.xlane.f32.xlu1 %v1650_v48 }
 0x32b   :  { %1594 = vadd.xlane.f32.xlu0 %v1593_v16 }
 0x32d   :  { %1597 = vadd.xlane.f32.xlu1 %v1596_v19 }
 0x32f   :  { %1618 = vadd.xlane.f32.xlu0 %v1617_v2 }
 0x331   :  { %1621 = vadd.xlane.f32.xlu1 %v1620_v53 }
 0x333   :  { %1642 = vadd.xlane.f32.xlu0 %v1641_v25 }
 0x335   :  { %1645 = vadd.xlane.f32.xlu1 %v1644_v56 }
 0x337   :  { %1666 = vadd.xlane.f32.xlu0 %v1665_v6 }
 0x339   :  { %1669 = vadd.xlane.f32.xlu1 %v1668_v38  ;;  %v1687_v38 = vld [vmem:[%s3132_s3 + $0x10] sm:$0xff] }
 0x33b   :  { %1672 = vadd.xlane.f32.xlu0 %v1671_v42 }
 0x33d   :  { %1675 = vadd.xlane.f32.xlu1 %v1674_v46 }
 0x3ac   :  { %v1601_v5 = vpop.xlane.xlu0 %1600 }
 0x3ae   :  { %v1604_v63 = vpop.xlane.xlu1 %1603 }
 0x3b0   :  { %v1625_v0 = vpop.xlane.xlu0 %1624 }
 0x3b1   :  { %v1631_v55 = vadd.f32 %v1625_v0, %v1601_v5  ;;  %v1686_v0 = vld [vmem:[%s3132_s3 + $0x8] sm:$0xff] }
 0x3b2   :  { %v1628_v31 = vpop.xlane.xlu1 %1627 }
 0x3b3   :  { %v1632_v16 = vadd.f32 %v1628_v31, %v1604_v63 }
 0x3b4   :  { %v1649_v7 = vpop.xlane.xlu0 %1648 }
 0x3b5   :  { %v1655_v17 = vadd.f32 %v1649_v7, %v1631_v55 }
 0x3b6   :  { %v1652_v8 = vpop.xlane.xlu1 %1651 }
 0x3b7   :  { %v1656_v23 = vadd.f32 %v1652_v8, %v1632_v16  ;;  %v1703_v8 = vld [vmem:[%s3133_s4 + $0x10] sm:$0xff] }
 0x3b8   :  { %v1595_v12 = vpop.xlane.xlu0 %1594 }
 0x3ba   :  { %v1598_v33 = vpop.xlane.xlu1 %1597 }
 0x3bc   :  { %v1619_v34 = vpop.xlane.xlu0 %1618 }
 0x3bd   :  { %v1629_v14 = vadd.f32 %v1619_v34, %v1595_v12  ;;  %v1701_v34 = vld [vmem:[%s3133_s4] sm:$0xff] }
 0x3be   :  { %v1622_v36 = vpop.xlane.xlu1 %1621 }
 0x3bf   :  { %v1630_v48 = vadd.f32 %v1622_v36, %v1598_v33 }
 0x3c0   :  { %v1643_v37 = vpop.xlane.xlu0 %1642 }
 0x3c1   :  { %v1653_v45 = vadd.f32 %v1643_v37, %v1629_v14 }
 0x3c2   :  { %v1646_v44 = vpop.xlane.xlu1 %1645 }
 0x3c3   :  { %v1654_v18 = vadd.f32 %v1646_v44, %v1630_v48 }
 0x3c4   :  { %v1667_v54 = vpop.xlane.xlu0 %1666 }
 0x3c5   :  { %v1677_v15 = vadd.f32 %v1667_v54, %v1653_v45 }
 0x3c6   :  { %v1670_v50 = vpop.xlane.xlu1 %1669 }
 0x3c7   :  { %v1681_v19 = vmul.f32 0.0078125, %v1677_v15  ;;  %v1678_v24 = vadd.f32 %v1670_v50, %v1654_v18 }
 0x3c8   :  { %v1673_v21 = vpop.xlane.xlu0 %1672 }
 0x3c9   :  { %v1689_v2 = vadd.f32 1e-05, %v1681_v19  ;;  %v1679_v51 = vadd.f32 %v1673_v21, %v1655_v17  ;;  %v1682_v25 = vmul.f32 0.0078125, %v1678_v24 }
 0x3ca   :  { %v1676_v53 = vpop.xlane.xlu1 %1675 }
 0x3cb   :  { %2455 = vrsqrt.f32 %v1689_v2  ;;  %v1683_v20 = vmul.f32 0.0078125, %v1679_v51  ;;  %v1680_v22 = vadd.f32 %v1676_v53, %v1656_v23  ;;  %v1690_v28 = vadd.f32 1e-05, %v1682_v25 }
 0x3cd   :  { %v1691_v52 = vadd.f32 1e-05, %v1683_v20  ;;  %v1684_v26 = vmul.f32 0.0078125, %v1680_v22 }
 0x3cf   :  { %2457 = vrsqrt.f32 %v1691_v52  ;;  %v1692_v56 = vadd.f32 1e-05, %v1684_v26 }
 0x3d1   :  { %2459 = vrsqrt.f32 %v1692_v56 }
 0x3d2   :  { %2461 = vrsqrt.f32 %v1690_v28 }
 0x3d5   :  { %v2456_v6 = vpop.eup %2455 }
 0x3d6   :  { %v1697_v35 = vmul.f32 %v2456_v6, %v1685_v29 }
 0x3d8   :  { %1715 = vperm.xlu0 %2425, %v1697_v35   ;;  %v1705_v33 = vmul.f32 %v1697_v35, %v2965_v62  ;;  %v1704_v62 = vld [vmem:[%s3133_s4 + $0x18] sm:$0xff] }
 0x3d9   :  { %v2458_v39 = vpop.eup %2457 }
 0x3da   :  { %v1699_v42 = vmul.f32 %v2458_v39, %v1687_v38  ;;  %v1709_v36 = vsub.f32 %v1701_v34, %v1705_v33 }
 0x3db   :  { %v2460_v46 = vpop.eup %2459 }
 0x3dc   :  { %1725 = vperm.xlu1 %2426, %v1699_v42   ;;  %v1700_v5 = vmul.f32 %v2460_v46, %v1688_v59  ;;  %v2462_v63 = vpop.eup %2461  ;;  %v1707_v7 = vmul.f32 %v1699_v42, %v2953_v27  ;;  %v1702_v27 = vld [vmem:[%s3133_s4 + $0x8] sm:$0xff] }
 0x3dd   :  { %v1698_v31 = vmul.f32 %v2462_v63, %v1686_v0 }
 0x3de   :  { %v1711_v12 = vsub.f32 %v1703_v8, %v1707_v7  ;;  %v1708_v14 = vmul.f32 %v1700_v5, %v2955_v30 }
 0x3df   :  { %v1706_v37 = vmul.f32 %v1698_v31, %v2970_v3 }
 0x3e0   :  { %1730 = vperm.xlu1 %2426, %v1700_v5   ;;  %v1712_v45 = vsub.f32 %v1704_v62, %v1708_v14 }
 0x3e1   :  { %v1710_v44 = vsub.f32 %v1702_v27, %v1706_v37 }
 0x3e4   :  { %1720 = vperm.xlu1 %2426, %v1698_v31  }
 0x3e8   :  { %1749 = vperm.xlu1 %2426, %v1711_v12  }
 0x3ec   :  { %1739 = vperm.xlu1 %2426, %v1709_v36  }
 0x3f0   :  { %1744 = vperm.xlu1 %2426, %v1710_v44  }
 0x3f4   :  { %1754 = vperm.xlu1 %2426, %v1712_v45  }
 0x457   :  { %v1716_v48 = vpop.permute.xlu0 %1715 }
 0x458   :  { %v1733_v3 = vmul.f32 %v1716_v48, %v2891_v41  ;;  %v1794_v50 = vmul.f32 %v1716_v48, %v2903_v58  ;;  %v1835_v16 = vmul.f32 %v1716_v48, %v2923_v1  ;;  %v1876_v30 = vmul.f32 %v1716_v48, %v2937_v10 }
 0x45b   :  { %v1726_v54 = vpop.permute.xlu1 %1725 }
 0x45c   :  { %v1735_v17 = vmul.f32 %v2889_v40, %v1726_v54  ;;  %v1796_v18 = vmul.f32 %v2901_v57, %v1726_v54  ;;  %v1837_v19 = vmul.f32 %v2921_v9, %v1726_v54  ;;  %v1878_v21 = vmul.f32 %v2933_v49, %v1726_v54 }
 0x45f   :  { %v1731_v55 = vpop.permute.xlu1 %1730 }
 0x460   :  { %v3046_v2 = vmul.f32 %v2895_v43, %v1731_v55  ;;  %v3049_v41 = vmul.f32 %v2907_v60, %v1731_v55  ;;  %v3052_v58 = vmul.f32 %v2927_v4, %v1731_v55  ;;  %v3055_v1 = vmul.f32 %v2939_v11, %v1731_v55 }
 0x463   :  { %v1721_v15 = vpop.permute.xlu1 %1720 }
 0x464   :  { %v1734_v9 = vmul.f32 %v1721_v15, %v2899_v47  ;;  %v1795_v49 = vmul.f32 %v1721_v15, %v2909_v61  ;;  %v1836_v43 = vmul.f32 %v1721_v15, %v2929_v32  ;;  %v1877_v51 = vmul.f32 %v1721_v15, %v2943_v13 }
 0x467   :  { %v1750_v23 = vpop.permute.xlu1 %1749 }
 0x468   :  { %v1759_v40 = vadd.f32 %v1750_v23, %v1735_v17  ;;  %v1800_v10 = vadd.f32 %v1796_v18, %v1750_v23  ;;  %v1841_v57 = vadd.f32 %v1837_v19, %v1750_v23  ;;  %v1882_v24 = vadd.f32 %v1878_v21, %v1750_v23 }
 0x46a   :  { %vm1763_vm3 = vcmp.gt.f32.partialorder %v1759_v40, 0.0  ;;  %v1767_v60 = vmul.f32 0.2, %v1759_v40  ;;  %vm1804_vm4 = vcmp.gt.f32.partialorder %v1800_v10, 0.0  ;;  %v1808_v4 = vmul.f32 0.2, %v1800_v10 }
 0x46b   :  { %vm1845_vm5 = vcmp.gt.f32.partialorder %v1841_v57, 0.0  ;;  %v1849_v53 = vmul.f32 0.2, %v1841_v57  ;;  %vm1886_vm6 = vcmp.gt.f32.partialorder %v1882_v24, 0.0  ;;  %v1890_v11 = vmul.f32 0.2, %v1882_v24  ;;  %v1740_v20 = vpop.permute.xlu1 %1739 }
 0x46c   :  { %v1771_v22 = vsel %vm1763_vm3, %v1759_v40, %v1767_v60  ;;  %v1812_v25 = vsel %vm1804_vm4, %v1800_v10, %v1808_v4  ;;  %v1757_v52 = vadd.f32 %v1740_v20, %v1733_v3  ;;  %v1798_v26 = vadd.f32 %v1794_v50, %v1740_v20 }
 0x46d   :  { %v2058_v47 = vpack.c.bf16 %v1771_v22, %v1771_v22  ;;  %v2062_v56 = vpack.c.bf16 %v1812_v25, %v1812_v25  ;;  %v1853_v61 = vsel %vm1845_vm5, %v1841_v57, %v1849_v53  ;;  %v1894_v28 = vsel %vm1886_vm6, %v1882_v24, %v1890_v11 }
 0x46e   :  { %v2066_v32 = vpack.c.bf16 %v1853_v61, %v1853_v61  ;;  %v2070_v29 = vpack.c.bf16 %v1894_v28, %v1894_v28  ;;  %vm1761_vm7 = vcmp.gt.f32.partialorder %v1757_v52, 0.0  ;;  %v1765_v13 = vmul.f32 0.2, %v1757_v52 }
 0x46f   :  { %1792 = vst.msk [vmem:[%s3134_s5 + $0x8] sm:$0xf] %vm1789_vm2, %v2058_v47  ;;  %2038 = vst.msk [vmem:[%s3134_s5 + $0x18] sm:$0xf] %vm1789_vm2, %v2062_v56  ;;  %vm1802_vm8 = vcmp.gt.f32.partialorder %v1798_v26, 0.0  ;;  %v1839_v35 = vadd.f32 %v1835_v16, %v1740_v20  ;;  %v1880_v38 = vadd.f32 %v1876_v30, %v1740_v20  ;;  %v1745_v39 = vpop.permute.xlu1 %1744 }
 0x470   :  { %v1806_v6 = vmul.f32 0.2, %v1798_v26  ;;  %2046 = vst.msk [vmem:[%s3134_s5 + $0x28] sm:$0xf] %vm1789_vm2, %v2066_v32  ;;  %2054 = vst.msk [vmem:[%s3134_s5 + $0x38] sm:$0xf] %vm1789_vm2, %v2070_v29  ;;  %v1769_v42 = vsel %vm1761_vm7, %v1757_v52, %v1765_v13  ;;  %v1758_v46 = vadd.f32 %v1745_v39, %v1734_v9  ;;  %v1799_v59 = vadd.f32 %v1795_v49, %v1745_v39 }
 0x471   :  { %v1840_v5 = vadd.f32 %v1836_v43, %v1745_v39  ;;  %v2056_v63 = vpack.c.bf16 %v1769_v42, %v1769_v42  ;;  %vm1843_vm9 = vcmp.gt.f32.partialorder %v1839_v35, 0.0  ;;  %v1847_v31 = vmul.f32 0.2, %v1839_v35 }
 0x472   :  { %v1810_v0 = vsel %vm1802_vm8, %v1798_v26, %v1806_v6  ;;  %vm1884_vm10 = vcmp.gt.f32.partialorder %v1880_v38, 0.0  ;;  %v1888_v8 = vmul.f32 0.2, %v1880_v38  ;;  %vm1762_vm11 = vcmp.gt.f32.partialorder %v1758_v46, 0.0 }
 0x473   :  { %v2060_v7 = vpack.c.bf16 %v1810_v0, %v1810_v0  ;;  %1790 = vst.msk [vmem:[%s3134_s5] sm:$0xf] %vm1789_vm2, %v2056_v63  ;;  %v1851_v12 = vsel %vm1843_vm9, %v1839_v35, %v1847_v31  ;;  %v1766_v33 = vmul.f32 0.2, %v1758_v46  ;;  %vm1803_vm12 = vcmp.gt.f32.partialorder %v1799_v59, 0.0  ;;  %v1755_v36 = vpop.permute.xlu1 %1754 }
 0x474   :  { %v1807_v34 = vmul.f32 0.2, %v1799_v59  ;;  %v2064_v37 = vpack.c.bf16 %v1851_v12, %v1851_v12  ;;  %v1892_v27 = vsel %vm1884_vm10, %v1880_v38, %v1888_v8  ;;  %vm1844_vm13 = vcmp.gt.f32.partialorder %v1840_v5, 0.0 }
 0x475   :  { %2036 = vst.msk [vmem:[%s3134_s5 + $0x10] sm:$0xf] %vm1789_vm2, %v2060_v7  ;;  %v1848_v14 = vmul.f32 0.2, %v1840_v5  ;;  %v2068_v44 = vpack.c.bf16 %v1892_v27, %v1892_v27  ;;  %v1770_v62 = vsel %vm1762_vm11, %v1758_v46, %v1766_v33  ;;  %v1881_v54 = vadd.f32 %v1877_v51, %v1745_v39 }
 0x476   :  { %v1811_v45 = vsel %vm1803_vm12, %v1799_v59, %v1807_v34  ;;  %2044 = vst.msk [vmem:[%s3134_s5 + $0x20] sm:$0xf] %vm1789_vm2, %v2064_v37  ;;  %v2057_v55 = vpack.c.bf16 %v1770_v62, %v1770_v62  ;;  %v1760_v3 = vadd.f32 %v1755_v36, %v3046_v2  ;;  %v1801_v30 = vadd.f32 %v3049_v41, %v1755_v36 }
 0x477   :  { %v2061_v48 = vpack.c.bf16 %v1811_v45, %v1811_v45  ;;  %v1852_v15 = vsel %vm1844_vm13, %v1840_v5, %v1848_v14  ;;  %2052 = vst.msk [vmem:[%s3134_s5 + $0x30] sm:$0xf] %vm1789_vm2, %v2068_v44  ;;  %vm1885_vm14 = vcmp.gt.f32.partialorder %v1881_v54, 0.0  ;;  %v1889_v16 = vmul.f32 0.2, %v1881_v54 }
 0x478   :  { %v2065_v50 = vpack.c.bf16 %v1852_v15, %v1852_v15  ;;  %1791 = vst.msk [vmem:[%s3134_s5 + $0x4] sm:$0xf] %vm1789_vm2, %v2057_v55  ;;  %vm1764_vm15 = vcmp.gt.f32.partialorder %v1760_v3, 0.0  ;;  %v1768_v17 = vmul.f32 0.2, %v1760_v3  ;;  %v1842_v18 = vadd.f32 %v3052_v58, %v1755_v36 }
 0x479   :  { %2037 = vst.msk [vmem:[%s3134_s5 + $0x14] sm:$0xf] %vm1789_vm2, %v2061_v48  ;;  %v1883_v19 = vadd.f32 %v3055_v1, %v1755_v36  ;;  %v1893_v21 = vsel %vm1885_vm14, %v1881_v54, %v1889_v16  ;;  %vm1805_vm0 = vcmp.gt.f32.partialorder %v1801_v30, 0.0  ;;  %v1809_v23 = vmul.f32 0.2, %v1801_v30 }
 0x47a   :  { %2045 = vst.msk [vmem:[%s3134_s5 + $0x24] sm:$0xf] %vm1789_vm2, %v2065_v50  ;;  %v2069_v2 = vpack.c.bf16 %v1893_v21, %v1893_v21  ;;  %v1772_v41 = vsel %vm1764_vm15, %v1760_v3, %v1768_v17  ;;  %vm1846_vm1 = vcmp.gt.f32.partialorder %v1842_v18, 0.0  ;;  %v1850_v40 = vmul.f32 0.2, %v1842_v18 }
 0x47b   :  { %v2059_v10 = vpack.c.bf16 %v1772_v41, %v1772_v41  ;;  %v1813_v57 = vsel %vm1805_vm0, %v1801_v30, %v1809_v23  ;;  %vm1887_vm3 = vcmp.gt.f32.partialorder %v1883_v19, 0.0  ;;  %v1891_v24 = vmul.f32 0.2, %v1883_v19 }
 0x47c   :  { %2053 = vst.msk [vmem:[%s3134_s5 + $0x34] sm:$0xf] %vm1789_vm2, %v2069_v2  ;;  %v2063_v58 = vpack.c.bf16 %v1813_v57, %v1813_v57  ;;  %v1854_v1 = vsel %vm1846_vm1, %v1842_v18, %v1850_v40 }
 0x47d   :  { %1793 = vst.msk [vmem:[%s3134_s5 + $0xc] sm:$0xf] %vm1789_vm2, %v2059_v10  ;;  %v2067_v9 = vpack.c.bf16 %v1854_v1, %v1854_v1  ;;  %v1895_v49 = vsel %vm1887_vm3, %v1883_v19, %v1891_v24 }
 0x47e   :  { %2039 = vst.msk [vmem:[%s3134_s5 + $0x1c] sm:$0xf] %vm1789_vm2, %v2063_v58  ;;  %v2071_v43 = vpack.c.bf16 %v1895_v49, %v1895_v49 }
 0x47f   :  { %2047 = vst.msk [vmem:[%s3134_s5 + $0x2c] sm:$0xf] %vm1789_vm2, %v2067_v9 }
 0x480   :  { %2055 = vst.msk [vmem:[%s3134_s5 + $0x3c] sm:$0xf] %vm1789_vm2, %v2071_v43 }

// kernel: generator_forward.7
= control target key start
LH: loop header
LB: loop body
LE: loop exit
PB: predicated region body
PF: predicated region fallthrough
CT: control target
= control target key end

     0   :  { %v36_v0 = vlaneseq  ;;  %s1777_s20 = smov 1   ;;  %s1779_s21 = smov 2   ;;  %v1783_v35 = vmov 0.0   ;;  %vm61_vm0 = vcmask 7168   ;;  %vm398_vm1 = vcmask 15360   ;;  %s2107_s1 = inlined_call_operand.vmem [shape: bf16[4,128], index: 1, kind: input, shape index: {}]   ;;  %s2108_s2 = inlined_call_operand.vmem [shape: bf16[4,16,128], index: 2, kind: input, shape index: {}]   ;;  %s2109_s0 = inlined_call_operand.vmem [shape: bf16[32,146], index: 0, kind: input, shape index: {}]   ;;  %s2110_s3 = inlined_call_operand.vmem [shape: f32[16,1], index: 3, kind: input, shape index: {}]   ;;  %s2111_s4 = inlined_call_operand.vmem [shape: f32[16,1], index: 4, kind: input, shape index: {}]   ;;  %s2112_s5 = inlined_call_operand.vmem [shape: bf16[4,16,128], index: 5, kind: output, shape index: {}]  }
   0x1   :  { %v25_v1 = vld [vmem:[%s2107_s1] sm:$0x3]  ;;  %s1778_s1 = smov 8   ;;  %s1780_s22 = smov 10   ;;  %1566 = vmatprep.subr.bf16.mxu0 %v1783_v35  ;;  %1598 = vmatprep.subr.bf16.mxu1 %v1783_v35  ;;  %v1845_v38 = vld [vmem:[%s2109_s0 + $0x8] sm:$0xff]  ;;  %v1850_v40 = vld [vmem:[%s2109_s0 + $0x10] sm:$0xff] }
   0x2   :  { %v37_v2 = vshrl.u32 %v36_v0, 7  ;;  %v49_v3 = vpack.i.b16 %v25_v1, %v25_v1  ;;  %v379_v4 = vshrl.u32 %v25_v1, 16  ;;  %v771_v5 = vshll.u32 %v25_v1, 16  ;;  %s1781_s23 = smov 17   ;;  %s1782_s24 = smov 16   ;;  %v1840_v37 = vld [vmem:[%s2109_s0] sm:$0xff] }
   0x3   :  { %v1402_v26 = vrot.slane %v25_v1, 9  ;;  %v1855_v41 = vld [vmem:[%s2109_s0 + $0x18] sm:$0xff]  ;;  %s1784_s8 = smov 127   ;;  %vm215_vm2 = vcmask 64512   ;;  %vm1785_vm3 = vmmov 0   ;;  %s1786_s0 = smov 126  }
   0x4   :  { %v38_v6 = vsub.s32 0, %v37_v2  ;;  %v1427_v7 = vrot.slane %v379_v4, 9  ;;  %v207_v8 = vsub.s32 1, %v37_v2  ;;  %v577_v9 = vpack.i.b16 %v379_v4, %v379_v4  ;;  %1570 = vmatprep.mubr.msk.bf16.mxu0 %vm1785_vm3, %v1783_v35  ;;  %1602 = vmatprep.mubr.msk.bf16.mxu1 %vm1785_vm3, %v1783_v35  ;;  %v1879_v4 = vld [vmem:[%s2108_s2] sm:$0xff]   ;;  %s1787_s13 = smov 96   ;;  %s1788_s14 = smov 120  }
   0x5   :  { %v1448_v10 = vrot.slane %v771_v5, 9  ;;  %v32_v29 = vmul.bf16 %v1402_v26, %v25_v1  ;;  %s1789_s15 = smov 18   ;;  %s1790_s16 = smov 119   ;;  %vm589_vm4 = vcmask 80896   ;;  %vm885_vm5 = vcmask 138240  }
   0x6   :  { %v54_v11 = vrot.slane %v49_v3, %v38_v6  ;;  %v384_v12 = vmul.bf16 %v1427_v7, %v25_v1  ;;  %v208_v13 = vrot.slane %v49_v3, %v207_v8  ;;  %v582_v14 = vrot.slane %v577_v9, %v207_v8  ;;  %v1874_v3 = vld [vmem:[%s2108_s2 + $0x8] sm:$0xff]   ;;  %s1791_s17 = smov 64   ;;  %s1792_s18 = smov 118  }
   0x7   :  { %v776_v15 = vmul.bf16 %v1448_v10, %v25_v1  ;;  %v878_v22 = vrot.slane %v577_v9, %v38_v6  ;;  %v1115_v30 = vshrl.u32 %v32_v29, 16  ;;  %v34_v32 = vpack.i.b16 %v32_v29, %v32_v29  ;;  %s1793_s19 = smov 32  }
   0x8   :  { %v1404_v16 = vcombine.low %v54_v11, %v54_v11  ;;  %v386_v17 = vpack.i.b16 %v384_v12, %v384_v12  ;;  %v1414_v18 = vcombine.low %v208_v13, %v208_v13  ;;  %v1437_v21 = vcombine.low %v582_v14, %v582_v14 }
   0x9   :  { %v778_v19 = vshrl.u32 %v776_v15, 16  ;;  %v1455_v27 = vcombine.low %v878_v22, %v878_v22  ;;  %v1116_v31 = vpack.i.b16 %v1115_v30, %v1115_v30  ;;  %v1833_v34 = vrot.slane %v34_v32, %v38_v6 }
   0xa   :  { %58 = vrot.lane.b32.xlu0 %v1404_v16, %s1777_s20  ;;  %v391_v20 = vrot.slane %v386_v17, %v38_v6  ;;  %212 = vrot.lane.b32.xlu1 %v1414_v18, %s1778_s1  ;;  %v1420_v9 = vcombine.low %v1840_v37, %v1845_v38  ;;  %v1421_v13 = vcombine.high %v1840_v37, %v1845_v38  ;;  %vm791_vm6 = vcmask 130048  }
   0xb   :  { %v779_v23 = vpack.i.b16 %v778_v19, %v778_v19  ;;  %v1831_v33 = vrot.slane %v1116_v31, %v38_v6  ;;  %v1422_v15 = vcombine.low %v1850_v40, %v1855_v41  ;;  %v1910_v31 = vld [vmem:[%s2108_s2 + $0x10] sm:$0xff]   ;;  %vm99_vm7 = vcmask 1039360  }
   0xc   :  { %v1428_v24 = vcombine.low %v391_v20, %v391_v20  ;;  %v1423_v20 = vcombine.high %v1850_v40, %v1855_v41  ;;  %vm436_vm8 = vcmask 1031168   ;;  %vm104_vm9 = vcmask 261120  }
   0xd   :  { %v784_v25 = vrot.slane %v779_v23, %v38_v6  ;;  %v1467_v6 = vcombine.low %v1831_v33, %v1831_v33  ;;  %vm1128_vm10 = vcmask 146432   ;;  %vm248_vm11 = vcmask 982016  }
   0xe   :  { %395 = vrot.lane.b32.xlu0 %v1428_v24, %s1779_s21  ;;  %586 = vrot.lane.b32.xlu1 %v1437_v21, %s1780_s22  ;;  %vm325_vm12 = vcmask 973824   ;;  %vm622_vm13 = vcmask 965632   ;;  %vm824_vm14 = vcmask 916480   ;;  %vm918_vm15 = vcmask 908288  }
   0xf   :  { %v1449_v28 = vcombine.low %v784_v25, %v784_v25 }
  0x12   :  { %882 = vrot.lane.b32.xlu1 %v1455_v27, %s1781_s23  ;;  %788 = vrot.lane.b32.xlu0 %v1449_v28, %s1782_s24  ;;  %s1794_s23 = smov 111   ;;  %s1796_s24 = smov 110  }
  0x7c   :  { %v59_v36 = vpop.permute.xlu0 %58  ;;  %v213_v55 = vpop.permute.xlu1 %212 }
  0x7d   :  { %v60_v39 = vrot.slane %v59_v36, 4  ;;  %v214_v57 = vrot.slane %v213_v55, 4 }
  0x7f   :  { %v62_v42 = vsel %vm61_vm0, %v60_v39, %v59_v36  ;;  %v216_v62 = vsel %vm215_vm2, %v214_v57, %v213_v55  ;;  %vm1161_vm0 = vcmask 900096  }
  0x80   :  { %v64_v43 = vmul.bf16 %v62_v42, %v1840_v37  ;;  %v65_v44 = vmul.bf16 %v62_v42, %v1845_v38  ;;  %v396_v45 = vpop.permute.xlu0 %395  ;;  %v66_v47 = vmul.bf16 %v62_v42, %v1850_v40  ;;  %v67_v48 = vmul.bf16 %v62_v42, %v1855_v41  ;;  %v587_v11 = vpop.permute.xlu1 %586 }
  0x81   :  { %v397_v46 = vrot.slane %v396_v45, 4  ;;  %v218_v1 = vmul.bf16 %v216_v62, %v1840_v37  ;;  %v219_v2 = vmul.bf16 %v216_v62, %v1845_v38  ;;  %v220_v7 = vmul.bf16 %v216_v62, %v1850_v40 }
  0x82   :  { %v1407_v49 = vcombine.high %v64_v43, %v65_v44  ;;  %v1406_v50 = vcombine.low %v64_v43, %v65_v44  ;;  %v1408_v54 = vcombine.low %v66_v47, %v67_v48  ;;  %v1409_v56 = vcombine.high %v66_v47, %v67_v48  ;;  %v1923_v44 = vld [vmem:[%s2108_s2 + $0x18] sm:$0xff]   ;;  %s1795_s2 = smov 112  }
  0x83   :  { %v399_v51 = vsel %vm398_vm1, %v397_v46, %v396_v45  ;;  %v1415_v5 = vcombine.low %v218_v1, %v219_v2  ;;  %v221_v8 = vmul.bf16 %v216_v62, %v1855_v41  ;;  %v1416_v10 = vcombine.high %v218_v1, %v219_v2 }
  0x84   :  { %93 = vrot.lane.b32.xlu1 %v1407_v49, %s1784_s8  ;;  %91 = vrot.lane.b32.xlu0 %v1406_v50, %s1784_s8  ;;  %v401_v52 = vmul.bf16 %v399_v51, %v1840_v37  ;;  %v402_v53 = vmul.bf16 %v399_v51, %v1845_v38  ;;  %v403_v58 = vmul.bf16 %v399_v51, %v1850_v40  ;;  %v588_v14 = vrot.slane %v587_v11, 4  ;;  %v883_v24 = vpop.permute.xlu1 %882  ;;  %v789_v30 = vpop.permute.xlu0 %788 }
  0x85   :  { %v404_v59 = vmul.bf16 %v399_v51, %v1855_v41  ;;  %v1417_v12 = vcombine.low %v220_v7, %v221_v8  ;;  %v1418_v16 = vcombine.high %v220_v7, %v221_v8  ;;  %v884_v27 = vrot.slane %v883_v24, 4 }
  0x86   :  { %v1431_v60 = vcombine.high %v401_v52, %v402_v53  ;;  %v1430_v61 = vcombine.low %v401_v52, %v402_v53  ;;  %v590_v17 = vsel %vm589_vm4, %v588_v14, %v587_v11  ;;  %v790_v36 = vrot.slane %v789_v30, 4 }
  0x87   :  { %v1433_v63 = vcombine.high %v403_v58, %v404_v59  ;;  %v1432_v0 = vcombine.low %v403_v58, %v404_v59  ;;  %v592_v18 = vmul.bf16 %v590_v17, %v1840_v37  ;;  %v593_v19 = vmul.bf16 %v590_v17, %v1845_v38 }
  0x88   :  { %95 = vrot.lane.b32.xlu1 %v1408_v54, %s1784_s8  ;;  %97 = vrot.lane.b32.xlu0 %v1409_v56, %s1784_s8  ;;  %v594_v21 = vmul.bf16 %v590_v17, %v1850_v40  ;;  %v595_v22 = vmul.bf16 %v590_v17, %v1855_v41  ;;  %v886_v29 = vsel %vm885_vm5, %v884_v27, %v883_v24 }
  0x89   :  { %v1438_v23 = vcombine.low %v592_v18, %v593_v19  ;;  %v1439_v26 = vcombine.high %v592_v18, %v593_v19  ;;  %v888_v32 = vmul.bf16 %v886_v29, %v1840_v37  ;;  %v889_v33 = vmul.bf16 %v886_v29, %v1845_v38 }
  0x8a   :  { %v1440_v25 = vcombine.low %v594_v21, %v595_v22  ;;  %v1441_v28 = vcombine.high %v594_v21, %v595_v22  ;;  %v890_v39 = vmul.bf16 %v886_v29, %v1850_v40  ;;  %v891_v42 = vmul.bf16 %v886_v29, %v1855_v41 }
  0x8b   :  { %v1456_v43 = vcombine.low %v888_v32, %v889_v33  ;;  %v792_v45 = vsel %vm791_vm6, %v790_v36, %v789_v30  ;;  %v1457_v49 = vcombine.high %v888_v32, %v889_v33 }
  0x8c   :  { %430 = vrot.lane.b32.xlu1 %v1431_v60, %s1786_s0  ;;  %428 = vrot.lane.b32.xlu0 %v1430_v61, %s1786_s0  ;;  %v794_v46 = vmul.bf16 %v792_v45, %v1840_v37  ;;  %v795_v47 = vmul.bf16 %v792_v45, %v1845_v38  ;;  %v1458_v48 = vcombine.low %v890_v39, %v891_v42 }
  0x8d   :  { %v796_v50 = vmul.bf16 %v792_v45, %v1850_v40  ;;  %v797_v51 = vmul.bf16 %v792_v45, %v1855_v41  ;;  %v1459_v56 = vcombine.high %v890_v39, %v891_v42 }
  0x8e   :  { %v1450_v52 = vcombine.low %v794_v46, %v795_v47  ;;  %v1451_v53 = vcombine.high %v794_v46, %v795_v47 }
  0x8f   :  { %v1452_v54 = vcombine.low %v796_v50, %v797_v51  ;;  %v1453_v55 = vcombine.high %v796_v50, %v797_v51 }
  0x90   :  { %434 = vrot.lane.b32.xlu1 %v1433_v63, %s1786_s0  ;;  %432 = vrot.lane.b32.xlu0 %v1432_v0, %s1786_s0  ;;  %v1403_v63 = vcombine.low %v1833_v34, %v1833_v34 }
  0x92   :  { %v47_v11 = vmul.bf16 %v1403_v63, %v1855_v41 }
  0x94   :  { %410 = vrot.lane.b32.xlu1 %v1874_v3, %s1787_s13  ;;  %73 = vrot.lane.b32.xlu0 %v1879_v4, %s1787_s13 }
  0x98   :  { %240 = vrot.lane.b32.xlu1 %v1415_v5, %s1788_s14  ;;  %1125 = vrot.lane.b32.xlu0 %v1467_v6, %s1789_s15  ;;  %v44_v5 = vmul.bf16 %v1403_v63, %v1840_v37  ;;  %v45_v6 = vmul.bf16 %v1403_v63, %v1845_v38 }
  0x9a   :  { %v1411_v34 = vcombine.low %v44_v5, %v45_v6 }
  0x9c   :  { %317 = vrot.lane.b32.xlu1 %v1420_v9, %s1790_s16  ;;  %242 = vrot.lane.b32.xlu0 %v1416_v10, %s1788_s14  ;;  %v46_v10 = vmul.bf16 %v1403_v63, %v1850_v40 }
  0x9e   :  { %v1412_v14 = vcombine.low %v46_v10, %v47_v11 }
  0xa0   :  { %244 = vrot.lane.b32.xlu1 %v1417_v12, %s1788_s14  ;;  %319 = vrot.lane.b32.xlu0 %v1421_v13, %s1790_s16 }
  0xa4   :  { %321 = vrot.lane.b32.xlu1 %v1422_v15, %s1790_s16  ;;  %246 = vrot.lane.b32.xlu0 %v1418_v16, %s1788_s14 }
  0xa8   :  { %222 = vrot.lane.b32.xlu1 %v1879_v4, %s1791_s17  ;;  %323 = vrot.lane.b32.xlu0 %v1423_v20, %s1790_s16 }
  0xac   :  { %614 = vrot.lane.b32.xlu1 %v1438_v23, %s1792_s18  ;;  %529 = vrot.lane.b32.xlu0 %v1874_v3, %s1791_s17 }
  0xb0   :  { %618 = vrot.lane.b32.xlu1 %v1440_v25, %s1792_s18  ;;  %616 = vrot.lane.b32.xlu0 %v1439_v26, %s1792_s18 }
  0xb4   :  { %299 = vrot.lane.b32.xlu1 %v1879_v4, %s1793_s19  ;;  %620 = vrot.lane.b32.xlu0 %v1441_v28, %s1792_s18 }
  0xb8   :  { %681 = vrot.lane.b32.xlu1 %v1910_v31, %s1787_s13  ;;  %596 = vrot.lane.b32.xlu0 %v1874_v3, %s1793_s19 }
  0xbc   :  { %910 = vrot.lane.b32.xlu1 %v1456_v43, %s1794_s23  ;;  %977 = vrot.lane.b32.xlu0 %v1923_v44, %s1787_s13 }
  0xc0   :  { %914 = vrot.lane.b32.xlu1 %v1458_v48, %s1794_s23  ;;  %912 = vrot.lane.b32.xlu0 %v1457_v49, %s1794_s23 }
  0xc4   :  { %816 = vrot.lane.b32.xlu1 %v1450_v52, %s1795_s2  ;;  %818 = vrot.lane.b32.xlu0 %v1451_v53, %s1795_s2 }
  0xc8   :  { %820 = vrot.lane.b32.xlu1 %v1452_v54, %s1795_s2  ;;  %822 = vrot.lane.b32.xlu0 %v1453_v55, %s1795_s2 }
  0xcc   :  { %798 = vrot.lane.b32.xlu1 %v1910_v31, %s1791_s17  ;;  %916 = vrot.lane.b32.xlu0 %v1459_v56, %s1794_s23 }
  0xd0   :  { %1067 = vrot.lane.b32.xlu0 %v1923_v44, %s1791_s17 }
  0xf6   :  { %v94_v57 = vpop.permute.xlu1 %93  ;;  %v92_v58 = vpop.permute.xlu0 %91 }
  0xf7   :  { %v100_v59 = vsel %vm99_vm7, %v92_v58, %v94_v57 }
  0xf8   :  { %1567 = vmatpush3.bf16.msra.mxu0 %v100_v59 }
  0xf9   :  { %1568 = vmatprep.subr.bf16.mxu0 %v1783_v35 }
  0xfa   :  { %v96_v60 = vpop.permute.xlu1 %95  ;;  %v98_v61 = vpop.permute.xlu0 %97 }
  0xfb   :  { %v101_v62 = vsel %vm99_vm7, %v96_v60, %v98_v61 }
  0xfc   :  { %1569 = vmatpush3.bf16.msra.mxu0 %v101_v62 }
  0xfd   :  { %1574 = vmatprep.subr.bf16.mxu0 %v1783_v35 }
  0xfe   :  { %v431_v0 = vpop.permute.xlu1 %430  ;;  %v429_v1 = vpop.permute.xlu0 %428 }
  0xff   :  { %v437_v2 = vsel %vm436_vm8, %v429_v1, %v431_v0 }
 0x100   :  { %1599 = vmatpush3.bf16.msra.mxu1 %v437_v2 }
 0x101   :  { %1600 = vmatprep.subr.bf16.mxu1 %v1783_v35 }
 0x102   :  { %v435_v7 = vpop.permute.xlu1 %434  ;;  %v433_v8 = vpop.permute.xlu0 %432 }
 0x103   :  { %v438_v9 = vsel %vm436_vm8, %v433_v8, %v435_v7 }
 0x104   :  { %1601 = vmatpush3.bf16.msra.mxu1 %v438_v9 }
 0x105   :  { %1606 = vmatprep.subr.bf16.mxu1 %v1783_v35 }
 0x106   :  { %v411_v12 = vpop.permute.xlu1 %410  ;;  %v74_v13 = vpop.permute.xlu0 %73 }
 0x107   :  { %1571 = vmatmul.mubr.msk.bf16.vlgmr.msra.gmra.mrb[0].mxu0 %vm104_vm9, %v74_v13  ;;  %1603 = vmatmul.mubr.msk.bf16.vlgmr.msra.gmra.mrb[0].mxu1 %vm104_vm9, %v411_v12 }
 0x108   :  { %1607 = vmatpush3.bf16.msra.mxu1 %v100_v59  ;;  %1575 = vmatpush3.bf16.msra.mxu0 %v1411_v34 }
 0x109   :  { %1608 = vmatprep.subr.bf16.mxu1 %v1783_v35  ;;  %1576 = vmatprep.subr.bf16.mxu0 %v1783_v35 }
 0x10a   :  { %v241_v15 = vpop.permute.xlu1 %240  ;;  %v1126_v16 = vpop.permute.xlu0 %1125  ;;  %1578 = vmatprep.mubr.msk.bf16.mxu0 %vm1785_vm3, %v1783_v35  ;;  %1610 = vmatprep.mubr.msk.bf16.mxu1 %vm1785_vm3, %v1783_v35 }
 0x10b   :  { %v1127_v17 = vrot.slane %v1126_v16, 4 }
 0x10c   :  { %1609 = vmatpush3.bf16.msra.mxu1 %v101_v62  ;;  %1577 = vmatpush3.bf16.msra.mxu0 %v1412_v14 }
 0x10d   :  { %v1129_v18 = vsel %vm1128_vm10, %v1127_v17, %v1126_v16  ;;  %1582 = vmatprep.subr.bf16.mxu0 %v1783_v35  ;;  %1614 = vmatprep.subr.bf16.mxu1 %v1783_v35 }
 0x10e   :  { %v318_v19 = vpop.permute.xlu1 %317  ;;  %v1131_v20 = vmul.bf16 %v1129_v18, %v1840_v37  ;;  %v1132_v21 = vmul.bf16 %v1129_v18, %v1845_v38  ;;  %v243_v22 = vpop.permute.xlu0 %242  ;;  %v1133_v23 = vmul.bf16 %v1129_v18, %v1850_v40  ;;  %v1134_v24 = vmul.bf16 %v1129_v18, %v1855_v41 }
 0x10f   :  { %v1960_v27 = vsel %vm248_vm11, %v241_v15, %v243_v22 }
 0x110   :  { %v1469_v25 = vcombine.high %v1131_v20, %v1132_v21  ;;  %v1468_v26 = vcombine.low %v1131_v20, %v1132_v21  ;;  %v1471_v38 = vcombine.high %v1133_v23, %v1134_v24  ;;  %v1470_v40 = vcombine.low %v1133_v23, %v1134_v24 }
 0x112   :  { %v245_v28 = vpop.permute.xlu1 %244  ;;  %1155 = vrot.lane.b32.xlu0 %v1469_v25, %s1796_s24  ;;  %1153 = vrot.lane.b32.xlu1 %v1468_v26, %s1796_s24  ;;  %v320_v29 = vpop.permute.xlu0 %319 }
 0x113   :  { %1579 = vmatmul.mubr.msk.bf16.vlgmr.msra.gmra.mrb[0].mxu0 %vm104_vm9, %v1879_v4  ;;  %v1965_v37 = vsel %vm325_vm12, %v318_v19, %v320_v29  ;;  %1611 = vmatmul.mubr.msk.bf16.vlgmr.msra.gmra.mrb[0].mxu1 %vm104_vm9, %v1874_v3 }
 0x114   :  { %1583 = vmatpush3.bf16.msra.mxu0 %v1960_v27  ;;  %1615 = vmatpush3.bf16.msra.mxu1 %v1965_v37 }
 0x115   :  { %1584 = vmatprep.subr.bf16.mxu0 %v1783_v35  ;;  %1616 = vmatprep.subr.bf16.mxu1 %v1783_v35 }
 0x116   :  { %v322_v41 = vpop.permute.xlu1 %321  ;;  %1159 = vrot.lane.b32.xlu0 %v1471_v38, %s1796_s24  ;;  %1157 = vrot.lane.b32.xlu1 %v1470_v40, %s1796_s24  ;;  %v247_v4 = vpop.permute.xlu0 %246 }
 0x117   :  { %v250_v30 = vsel %vm248_vm11, %v245_v28, %v247_v4  ;;  %1586 = vmatprep.mubr.msk.bf16.mxu0 %vm1785_vm3, %v1783_v35  ;;  %1618 = vmatprep.mubr.msk.bf16.mxu1 %vm1785_vm3, %v1783_v35 }
 0x118   :  { %1585 = vmatpush3.bf16.msra.mxu0 %v250_v30 }
 0x119   :  { %1590 = vmatprep.subr.bf16.mxu0 %v1783_v35 }
 0x11a   :  { %v223_v3 = vpop.permute.xlu1 %222  ;;  %1135 = vrot.lane.b32.xlu0 %v1923_v44, %s1793_s19  ;;  %892 = vrot.lane.b32.xlu1 %v1910_v31, %s1793_s19  ;;  %v324_v32 = vpop.permute.xlu0 %323 }
 0x11b   :  { %v327_v33 = vsel %vm325_vm12, %v322_v41, %v324_v32 }
 0x11c   :  { %1617 = vmatpush3.bf16.msra.mxu1 %v327_v33 }
 0x11d   :  { %1622 = vmatprep.subr.bf16.mxu1 %v1783_v35 }
 0x11e   :  { %v615_v36 = vpop.permute.xlu1 %614  ;;  %v530_v39 = vpop.permute.xlu0 %529 }
 0x11f   :  { %1587 = vmatmul.mubr.msk.bf16.vlgmr.msra.gmra.mrb[0].mxu0 %vm104_vm9, %v223_v3  ;;  %1619 = vmatmul.mubr.msk.bf16.vlgmr.msra.gmra.mrb[0].mxu1 %vm104_vm9, %v530_v39 }
 0x120   :  { %1591 = vmatpush3.bf16.msra.mxu0 %v1965_v37  ;;  %1594 = vmatprep.mubr.msk.bf16.mxu0 %vm1785_vm3, %v1783_v35 }
 0x121   :  { %1592 = vmatprep.subr.bf16.mxu0 %v1783_v35  ;;  %1626 = vmatprep.mubr.msk.bf16.mxu1 %vm1785_vm3, %v1783_v35 }
 0x122   :  { %v619_v42 = vpop.permute.xlu1 %618  ;;  %v617_v43 = vpop.permute.xlu0 %616 }
 0x123   :  { %v623_v45 = vsel %vm622_vm13, %v615_v36, %v617_v43 }
 0x124   :  { %1623 = vmatpush3.bf16.msra.mxu1 %v623_v45  ;;  %1593 = vmatpush3.bf16.msra.mxu0 %v327_v33 }
 0x125   :  { %1624 = vmatprep.subr.bf16.mxu1 %v1783_v35  ;;  %1630 = vmatprep.subr.bf16.mxu0 %v1783_v35 }
 0x126   :  { %v300_v46 = vpop.permute.xlu1 %299  ;;  %v621_v47 = vpop.permute.xlu0 %620 }
 0x127   :  { %v624_v48 = vsel %vm622_vm13, %v619_v42, %v621_v47 }
 0x128   :  { %1625 = vmatpush3.bf16.msra.mxu1 %v624_v48 }
 0x129   :  { %1662 = vmatprep.subr.bf16.mxu1 %v1783_v35 }
 0x12a   :  { %v682_v49 = vpop.permute.xlu1 %681  ;;  %v597_v50 = vpop.permute.xlu0 %596 }
 0x12b   :  { %1595 = vmatmul.mubr.msk.bf16.vlgmr.msra.gmra.mrb[0].mxu0 %vm104_vm9, %v300_v46  ;;  %1627 = vmatmul.mubr.msk.bf16.vlgmr.msra.gmra.mrb[0].mxu1 %vm104_vm9, %v597_v50 }
 0x12c   :  { %1631 = vmatpush3.bf16.msra.mxu0 %v1965_v37  ;;  %1634 = vmatprep.mubr.msk.bf16.mxu0 %vm1785_vm3, %v1783_v35 }
 0x12d   :  { %1632 = vmatprep.subr.bf16.mxu0 %v1783_v35  ;;  %1663 = vmatpush3.bf16.msra.mxu1 %v623_v45 }
 0x12e   :  { %v911_v51 = vpop.permute.xlu1 %910  ;;  %1664 = vmatprep.subr.bf16.mxu1 %v1783_v35  ;;  %1666 = vmatprep.mubr.msk.bf16.mxu1 %vm1785_vm3, %v1783_v35  ;;  %v978_v52 = vpop.permute.xlu0 %977 }
 0x130   :  { %1633 = vmatpush3.bf16.msra.mxu0 %v327_v33 }
 0x131   :  { %1638 = vmatprep.subr.bf16.mxu0 %v1783_v35  ;;  %1665 = vmatpush3.bf16.msra.mxu1 %v624_v48 }
 0x132   :  { %1670 = vmatprep.subr.bf16.mxu1 %v1783_v35  ;;  %v915_v53 = vpop.permute.xlu1 %914  ;;  %v913_v54 = vpop.permute.xlu0 %912 }
 0x133   :  { %1635 = vmatmul.mubr.msk.bf16.vlgmr.msra.gmra.mrb[4].mxu0 %vm104_vm9, %v682_v49  ;;  %v919_v60 = vsel %vm918_vm15, %v911_v51, %v913_v54 }
 0x134   :  { %1639 = vmatpush3.bf16.msra.mxu0 %v1960_v27  ;;  %1667 = vmatmul.mubr.msk.bf16.vlgmr.msra.gmra.mrb[4].mxu1 %vm104_vm9, %v978_v52 }
 0x135   :  { %1640 = vmatprep.subr.bf16.mxu0 %v1783_v35  ;;  %1671 = vmatpush3.bf16.msra.mxu1 %v1965_v37 }
 0x136   :  { %1672 = vmatprep.subr.bf16.mxu1 %v1783_v35  ;;  %1642 = vmatprep.mubr.msk.bf16.mxu0 %vm1785_vm3, %v1783_v35  ;;  %v819_v55 = vpop.permute.xlu0 %818  ;;  %v817_v56 = vpop.permute.xlu1 %816 }
 0x137   :  { %1674 = vmatprep.mubr.msk.bf16.mxu1 %vm1785_vm3, %v1783_v35  ;;  %v825_v58 = vsel %vm824_vm14, %v817_v56, %v819_v55 }
 0x138   :  { %1641 = vmatpush3.bf16.msra.mxu0 %v250_v30 }
 0x139   :  { %1673 = vmatpush3.bf16.msra.mxu1 %v327_v33  ;;  %1646 = vmatprep.subr.bf16.mxu0 %v1783_v35 }
 0x13a   :  { %1678 = vmatprep.subr.bf16.mxu1 %v1783_v35  ;;  %v823_v57 = vpop.permute.xlu0 %822  ;;  %v821_v59 = vpop.permute.xlu1 %820 }
 0x13b   :  { %v826_v62 = vsel %vm824_vm14, %v821_v59, %v823_v57 }
 0x13e   :  { %v917_v61 = vpop.permute.xlu0 %916 }
 0x13f   :  { %1643 = vmatmul.mubr.msk.bf16.vlgmr.msra.gmra.mrb[4].mxu0 %vm104_vm9, %v1910_v31  ;;  %v920_v63 = vsel %vm918_vm15, %v915_v53, %v917_v61  ;;  %v799_v31 = vpop.permute.xlu1 %798 }
 0x140   :  { %1647 = vmatpush3.bf16.msra.mxu0 %v825_v58  ;;  %1650 = vmatprep.mubr.msk.bf16.mxu0 %vm1785_vm3, %v1783_v35  ;;  %v1797_v58 = vmov 0  }
 0x141   :  { %1648 = vmatprep.subr.bf16.mxu0 %v1783_v35  ;;  %1675 = vmatmul.mubr.msk.bf16.vlgmr.msra.gmra.mrb[4].mxu1 %vm104_vm9, %v1923_v44 }
 0x142   :  { %1679 = vmatpush3.bf16.msra.mxu1 %v919_v60  ;;  %1682 = vmatprep.mubr.msk.bf16.mxu1 %vm1785_vm3, %v1783_v35  ;;  %v1068_v0 = vpop.permute.xlu0 %1067 }
 0x143   :  { %1680 = vmatprep.subr.bf16.mxu1 %v1783_v35  ;;  %1763 = vset.pattern.permute.xlu0 %v1797_v58 }
 0x144   :  { %1649 = vmatpush3.bf16.msra.mxu0 %v826_v62  ;;  %1764 = vset.pattern.permute.xlu1 %v1797_v58 }
 0x145   :  { %1654 = vmatprep.subr.bf16.mxu0 %v1783_v35 }
 0x146   :  { %1681 = vmatpush3.bf16.msra.mxu1 %v920_v63 }
 0x147   :  { %1686 = vmatprep.subr.bf16.mxu1 %v1783_v35 }
 0x14b   :  { %1651 = vmatmul.mubr.msk.bf16.vlgmr.msra.gmra.mrb[4].mxu0 %vm104_vm9, %v799_v31 }
 0x14c   :  { %1655 = vmatpush3.bf16.msra.mxu0 %v919_v60  ;;  %1658 = vmatprep.mubr.msk.bf16.mxu0 %vm1785_vm3, %v1783_v35 }
 0x14d   :  { %1656 = vmatprep.subr.bf16.mxu0 %v1783_v35  ;;  %1683 = vmatmul.mubr.msk.bf16.vlgmr.msra.gmra.mrb[4].mxu1 %vm104_vm9, %v1068_v0 }
 0x14e   :  { %1690 = vmatprep.mubr.msk.bf16.mxu1 %vm1785_vm3, %v1783_v35 }
 0x150   :  { %1657 = vmatpush3.bf16.msra.mxu0 %v920_v63 }
 0x184   :  { %v1154_v44 = vpop.permute.xlu1 %1153  ;;  %v1156_v1 = vpop.permute.xlu0 %1155 }
 0x185   :  { %v1162_v2 = vsel %vm1161_vm0, %v1154_v44, %v1156_v1 }
 0x186   :  { %1687 = vmatpush3.bf16.msra.mxu1 %v1162_v2 }
 0x187   :  { %1688 = vmatprep.subr.bf16.mxu1 %v1783_v35 }
 0x188   :  { %v1158_v5 = vpop.permute.xlu1 %1157  ;;  %v1160_v6 = vpop.permute.xlu0 %1159 }
 0x189   :  { %v1163_v7 = vsel %vm1161_vm0, %v1158_v5, %v1160_v6 }
 0x18a   :  { %1689 = vmatpush3.bf16.msra.mxu1 %v1163_v7 }
 0x18c   :  { %v893_v8 = vpop.permute.xlu1 %892  ;;  %v1136_v9 = vpop.permute.xlu0 %1135 }
 0x18d   :  { %1659 = vmatmul.mubr.msk.bf16.vlgmr.msra.gmra.mrb[4].mxu0 %vm104_vm9, %v893_v8  ;;  %1691 = vmatmul.mubr.msk.bf16.vlgmr.msra.gmra.mrb[4].mxu1 %vm104_vm9, %v1136_v9 }
 0x1fe   :  { %v2041_v34 = vpop.f32.mrb[0].mxu0  ;;  %v2043_v10 = vpop.f32.mrb[0].mxu1 }
 0x1ff   :  { %1212 = vadd.xlane.f32.xlu1 %v2041_v34  ;;  %v1596_v11 = vpop.f32.mrb[1].mxu0  ;;  %v1628_v12 = vpop.f32.mrb[1].mxu1 }
 0x200   :  { %v2046_v13 = vpop.f32.mrb[2].mxu0  ;;  %v2048_v35 = vpop.f32.mrb[2].mxu1 }
 0x201   :  { %1214 = vadd.xlane.f32.xlu0 %v2046_v13  ;;  %v1597_v14 = vpop.f32.mrb[3].mxu0  ;;  %v1629_v15 = vpop.f32.mrb[3].mxu1 }
 0x202   :  { %v1281_v15 = vld [vmem:[%s2110_s3] sm:$0xff] }
 0x203   :  { %1220 = vadd.xlane.f32.xlu1 %v2048_v35 }
 0x205   :  { %1218 = vadd.xlane.f32.xlu0 %v2043_v10 }
 0x260   :  { %v2053_v16 = vpop.f32.mrb[4].mxu0  ;;  %v2055_v17 = vpop.f32.mrb[4].mxu1 }
 0x261   :  { %v1692_v18 = vpop.f32.mrb[5].mxu1  ;;  %1224 = vadd.xlane.f32.xlu0 %v2053_v16  ;;  %v1660_v19 = vpop.f32.mrb[5].mxu0 }
 0x262   :  { %v2058_v20 = vpop.f32.mrb[6].mxu0  ;;  %v2060_v21 = vpop.f32.mrb[6].mxu1  ;;  %v1282_v19 = vld [vmem:[%s2110_s3 + $0x8] sm:$0xff] }
 0x263   :  { %v1693_v22 = vpop.f32.mrb[7].mxu1  ;;  %1226 = vadd.xlane.f32.xlu1 %v2058_v20  ;;  %v1661_v23 = vpop.f32.mrb[7].mxu0 }
 0x265   :  { %1230 = vadd.xlane.f32.xlu0 %v2055_v17 }
 0x267   :  { %1232 = vadd.xlane.f32.xlu1 %v2060_v21 }
 0x28c   :  { %v1213_v25 = vpop.xlane.xlu1 %1212 }
 0x28e   :  { %v1215_v24 = vpop.xlane.xlu0 %1214 }
 0x290   :  { %v1221_v27 = vpop.xlane.xlu1 %1220 }
 0x291   :  { %v1223_v38 = vadd.f32 %v1221_v27, %v1215_v24 }
 0x292   :  { %v1219_v26 = vpop.xlane.xlu0 %1218 }
 0x293   :  { %v1222_v29 = vadd.f32 %v1219_v26, %v1213_v25  ;;  %v1289_v26 = vld [vmem:[%s2111_s4] sm:$0xff] }
 0x2ee   :  { %v1225_v28 = vpop.xlane.xlu0 %1224 }
 0x2ef   :  { %v1228_v40 = vadd.f32 %v1225_v28, %v1222_v29  ;;  %v1290_v29 = vld [vmem:[%s2111_s4 + $0x8] sm:$0xff] }
 0x2f0   :  { %v1227_v37 = vpop.xlane.xlu1 %1226 }
 0x2f1   :  { %v1229_v4 = vadd.f32 %v1227_v37, %v1223_v38 }
 0x2f2   :  { %v1231_v41 = vpop.xlane.xlu0 %1230 }
 0x2f3   :  { %v1234_v30 = vadd.f32 %v1231_v41, %v1228_v40 }
 0x2f4   :  { %v1233_v3 = vpop.xlane.xlu1 %1232 }
 0x2f5   :  { %v1237_v32 = vmul.f32 0.001953125, %v1234_v30  ;;  %v1235_v33 = vadd.f32 %v1233_v3, %v1229_v4 }
 0x2f7   :  { %v1238_v36 = vmul.f32 0.001953125, %v1235_v33  ;;  %v1239_v39 = vsub.f32 %v2041_v34, %v1237_v32  ;;  %v1249_v45 = vsub.f32 %v2043_v10, %v1237_v32  ;;  %v1259_v49 = vsub.f32 %v2053_v16, %v1237_v32 }
 0x2f8   :  { %v1269_v53 = vsub.f32 %v2055_v17, %v1237_v32 }
 0x2f9   :  { %v1241_v42 = vmul.f32 %v1239_v39, %v1239_v39  ;;  %v1240_v43 = vsub.f32 %v2046_v13, %v1238_v36  ;;  %v1250_v47 = vsub.f32 %v2048_v35, %v1238_v36  ;;  %v1251_v48 = vmul.f32 %v1249_v45, %v1249_v45 }
 0x2fa   :  { %v1260_v51 = vsub.f32 %v2058_v20, %v1238_v36  ;;  %v1261_v52 = vmul.f32 %v1259_v49, %v1259_v49  ;;  %v1270_v55 = vsub.f32 %v2060_v21, %v1238_v36  ;;  %v1271_v56 = vmul.f32 %v1269_v53, %v1269_v53 }
 0x2fb   :  { %1243 = vadd.xlane.f32.xlu0 %v1241_v42  ;;  %v1242_v46 = vmul.f32 %v1240_v43, %v1240_v43  ;;  %v1252_v50 = vmul.f32 %v1250_v47, %v1250_v47 }
 0x2fc   :  { %v1262_v54 = vmul.f32 %v1260_v51, %v1260_v51  ;;  %v1272_v57 = vmul.f32 %v1270_v55, %v1270_v55 }
 0x2fd   :  { %1245 = vadd.xlane.f32.xlu1 %v1242_v46 }
 0x2ff   :  { %1253 = vadd.xlane.f32.xlu0 %v1251_v48 }
 0x301   :  { %1255 = vadd.xlane.f32.xlu1 %v1252_v50 }
 0x303   :  { %1263 = vadd.xlane.f32.xlu0 %v1261_v52 }
 0x305   :  { %1265 = vadd.xlane.f32.xlu1 %v1262_v54 }
 0x307   :  { %1273 = vadd.xlane.f32.xlu0 %v1271_v56 }
 0x309   :  { %1275 = vadd.xlane.f32.xlu1 %v1272_v57 }
 0x388   :  { %v1244_v59 = vpop.xlane.xlu0 %1243 }
 0x38a   :  { %v1246_v60 = vpop.xlane.xlu1 %1245 }
 0x38c   :  { %v1254_v61 = vpop.xlane.xlu0 %1253 }
 0x38d   :  { %v1257_v31 = vadd.f32 %v1254_v61, %v1244_v59 }
 0x38e   :  { %v1256_v62 = vpop.xlane.xlu1 %1255 }
 0x38f   :  { %v1258_v44 = vadd.f32 %v1256_v62, %v1246_v60 }
 0x390   :  { %v1264_v63 = vpop.xlane.xlu0 %1263 }
 0x391   :  { %v1267_v1 = vadd.f32 %v1264_v63, %v1257_v31 }
 0x392   :  { %v1266_v0 = vpop.xlane.xlu1 %1265 }
 0x393   :  { %v1268_v5 = vadd.f32 %v1266_v0, %v1258_v44 }
 0x394   :  { %v1274_v2 = vpop.xlane.xlu0 %1273 }
 0x395   :  { %v1277_v6 = vadd.f32 %v1274_v2, %v1267_v1 }
 0x396   :  { %v1276_v7 = vpop.xlane.xlu1 %1275 }
 0x397   :  { %v1279_v8 = vmul.f32 0.001953125, %v1277_v6  ;;  %v1278_v9 = vadd.f32 %v1276_v7, %v1268_v5 }
 0x399   :  { %v1283_v11 = vadd.f32 1e-05, %v1279_v8  ;;  %v1280_v12 = vmul.f32 0.001953125, %v1278_v9 }
 0x39b   :  { %1773 = vrsqrt.f32 %v1283_v11  ;;  %v1284_v14 = vadd.f32 1e-05, %v1280_v12 }
 0x39d   :  { %1775 = vrsqrt.f32 %v1284_v14 }
 0x3a5   :  { %v1774_v18 = vpop.eup %1773 }
 0x3a6   :  { %v1287_v22 = vmul.f32 %v1774_v18, %v1281_v15 }
 0x3a7   :  { %v1776_v23 = vpop.eup %1775 }
 0x3a8   :  { %1297 = vperm.xlu0 %1763, %v1287_v22   ;;  %v1288_v24 = vmul.f32 %v1776_v23, %v1282_v19  ;;  %v1291_v25 = vmul.f32 %v1287_v22, %v1237_v32 }
 0x3aa   :  { %1302 = vperm.xlu1 %1764, %v1288_v24   ;;  %v1293_v27 = vsub.f32 %v1289_v26, %v1291_v25  ;;  %v1292_v28 = vmul.f32 %v1288_v24, %v1238_v36 }
 0x3ac   :  { %v1294_v37 = vsub.f32 %v1290_v29, %v1292_v28 }
 0x3ae   :  { %1309 = vperm.xlu1 %1764, %v1293_v27  }
 0x3b2   :  { %1314 = vperm.xlu1 %1764, %v1294_v37  }
 0x427   :  { %v1298_v38 = vpop.permute.xlu0 %1297 }
 0x428   :  { %v1305_v41 = vmul.f32 %v1298_v38, %v2041_v34  ;;  %v1335_v4 = vmul.f32 %v1298_v38, %v2043_v10  ;;  %v1356_v30 = vmul.f32 %v1298_v38, %v2053_v16  ;;  %v1377_v3 = vmul.f32 %v1298_v38, %v2055_v17 }
 0x429   :  { %v1303_v40 = vpop.permute.xlu1 %1302 }
 0x42a   :  { %v1306_v43 = vmul.f32 %v1303_v40, %v2046_v13  ;;  %v1336_v45 = vmul.f32 %v1303_v40, %v2048_v35  ;;  %v1357_v10 = vmul.f32 %v1303_v40, %v2058_v20  ;;  %v1378_v16 = vmul.f32 %v1303_v40, %v2060_v21 }
 0x42d   :  { %v1310_v32 = vpop.permute.xlu1 %1309 }
 0x42e   :  { %v1317_v33 = vadd.f32 %v1310_v32, %v1305_v41  ;;  %v1337_v36 = vadd.f32 %v1335_v4, %v1310_v32  ;;  %v1358_v39 = vadd.f32 %v1356_v30, %v1310_v32  ;;  %v1379_v42 = vadd.f32 %v1377_v3, %v1310_v32 }
 0x430   :  { %vm1319_vm1 = vcmp.gt.f32.partialorder %v1317_v33, 0.0  ;;  %v1321_v46 = vmul.f32 0.2, %v1317_v33  ;;  %vm1339_vm2 = vcmp.gt.f32.partialorder %v1337_v36, 0.0  ;;  %v1341_v47 = vmul.f32 0.2, %v1337_v36 }
 0x431   :  { %vm1360_vm3 = vcmp.gt.f32.partialorder %v1358_v39, 0.0  ;;  %v1362_v34 = vmul.f32 0.2, %v1358_v39  ;;  %v1315_v17 = vpop.permute.xlu1 %1314  ;;  %vm1381_vm4 = vcmp.gt.f32.partialorder %v1379_v42, 0.0  ;;  %v1383_v48 = vmul.f32 0.2, %v1379_v42 }
 0x432   :  { %v1318_v49 = vadd.f32 %v1315_v17, %v1306_v43  ;;  %v1338_v50 = vadd.f32 %v1336_v45, %v1315_v17  ;;  %v1323_v51 = vsel %vm1319_vm1, %v1317_v33, %v1321_v46  ;;  %v1343_v52 = vsel %vm1339_vm2, %v1337_v36, %v1341_v47 }
 0x433   :  { %v1359_v13 = vadd.f32 %v1357_v10, %v1315_v17  ;;  %v1380_v53 = vadd.f32 %v1378_v16, %v1315_v17  ;;  %v1364_v20 = vsel %vm1360_vm3, %v1358_v39, %v1362_v34  ;;  %v1385_v21 = vsel %vm1381_vm4, %v1379_v42, %v1383_v48 }
 0x434   :  { %vm1320_vm5 = vcmp.gt.f32.partialorder %v1318_v49, 0.0  ;;  %v1322_v35 = vmul.f32 0.2, %v1318_v49  ;;  %vm1340_vm6 = vcmp.gt.f32.partialorder %v1338_v50, 0.0  ;;  %v1342_v54 = vmul.f32 0.2, %v1338_v50 }
 0x435   :  { %vm1361_vm7 = vcmp.gt.f32.partialorder %v1359_v13, 0.0  ;;  %v1363_v55 = vmul.f32 0.2, %v1359_v13  ;;  %vm1382_vm8 = vcmp.gt.f32.partialorder %v1380_v53, 0.0  ;;  %v1384_v56 = vmul.f32 0.2, %v1380_v53 }
 0x436   :  { %v1324_v57 = vsel %vm1320_vm5, %v1318_v49, %v1322_v35  ;;  %v1344_v58 = vsel %vm1340_vm6, %v1338_v50, %v1342_v54 }
 0x437   :  { %v1498_v59 = vpack.c.bf16 %v1324_v57, %v1323_v51  ;;  %v1503_v60 = vpack.c.bf16 %v1344_v58, %v1343_v52  ;;  %v1365_v61 = vsel %vm1361_vm7, %v1359_v13, %v1363_v55  ;;  %v1386_v62 = vsel %vm1382_vm8, %v1380_v53, %v1384_v56 }
 0x438   :  { %v1508_v63 = vpack.c.bf16 %v1365_v61, %v1364_v20  ;;  %v1513_v31 = vpack.c.bf16 %v1386_v62, %v1385_v21 }
 0x439   :  { %1499 = vst [vmem:[%s2112_s5] sm:$0xff] %v1498_v59   ;;  %1515 = vst [vmem:[%s2112_s5 + $0x8] sm:$0xff] %v1503_v60  }
 0x43a   :  { %1516 = vst [vmem:[%s2112_s5 + $0x10] sm:$0xff] %v1508_v63   ;;  %1517 = vst [vmem:[%s2112_s5 + $0x18] sm:$0xff] %v1513_v31  }

// kernel: generator_forward.8
= control target key start
LH: loop header
LB: loop body
LE: loop exit
PB: predicated region body
PF: predicated region fallthrough
CT: control target
= control target key end

     0   :  { %v39_v0 = vlaneseq  ;;  %v2828_v2 = vmov 1983009808   ;;  %s2830_s20 = smov 16   ;;  %s2831_s21 = smov 2   ;;  %vm157_vm0 = vcmask 7168   ;;  %vm159_vm1 = vcmask 1043456   ;;  %s3440_s1 = inlined_call_operand.vmem [shape: bf16[4,512], index: 1, kind: input, shape index: {}]   ;;  %s3441_s0 = inlined_call_operand.vmem [shape: bf16[16,546], index: 0, kind: input, shape index: {}]   ;;  %s3442_s2 = inlined_call_operand.vmem [shape: bf16[4,8,64], index: 2, kind: input, shape index: {}]   ;;  %s3443_s3 = inlined_call_operand.vmem [shape: f32[8,1], index: 3, kind: input, shape index: {}]   ;;  %s3444_s4 = inlined_call_operand.vmem [shape: f32[8,1], index: 4, kind: input, shape index: {}]   ;;  %s3445_s5 = inlined_call_operand.vmem [shape: bf16[4,8,512], index: 5, kind: output, shape index: {}]  }
   0x1   :  { %v2879_v1 = vld [vmem:[%s3440_s1] sm:$0xff]  ;;  %v37_v3 = vunpack.c.l.s4 %v2828_v2  ;;  %s2829_s1 = smov 1   ;;  %s2832_s9 = smov 127   ;;  %vm216_vm2 = vcmask 130048   ;;  %vm785_vm3 = vcmask 15360   ;;  %vm207_vm4 = vcmask 1039360  }
   0x2   :  { %v40_v4 = vshrl.u32 %v39_v0, 7  ;;  %v717_v5 = vshrl.u32 %v2879_v1, 16  ;;  %v96_v7 = vcombine.high %v2879_v1, %v2879_v1  ;;  %s2834_s11 = smov 18   ;;  %s2835_s12 = smov 112   ;;  %vm1148_vm5 = vcmask 146432  }
   0x3   :  { %v38_v6 = vunpack.c.0.s8 %v37_v3  ;;  %s2836_s13 = smov 96   ;;  %s2837_s14 = smov 111   ;;  %vm485_vm6 = vcmask 916480   ;;  %vm616_vm7 = vcmask 908288   ;;  %vm1541_vm8 = vcmask 261120  }
   0x4   :  { %v2612_v8 = vrot.slane %v717_v5, 9  ;;  %v2887_v11 = vsub.s32 0, %v40_v4  ;;  %v409_v14 = vsub.s32 1, %v40_v4  ;;  %s2838_s15 = smov 32   ;;  %s2839_s16 = smov 80   ;;  %vm834_vm9 = vcmask 1031168  }
   0x5   :  { %v2884_v9 = vsub.s32 %v38_v6, %v40_v4  ;;  %v2917_v6 = vld [vmem:[%s3441_s0] sm:$0xff]  ;;  %s2840_s17 = smov 126   ;;  %s2843_s23 = smov 34   ;;  %vm1717_vm10 = vcmask 269312   ;;  %vm1194_vm11 = vcmask 900096   ;;  %vm2173_vm12 = vcmask 277504  }
   0x6   :  { %v722_v10 = vmul.bf16 %v2612_v8, %v2879_v1  ;;  %s2844_s24 = smov 95   ;;  %vm1587_vm13 = vcmask 785408   ;;  %vm1763_vm14 = vcmask 777216   ;;  %vm2219_vm15 = vcmask 769024  }
   0x7   :  { %v103_v12 = vrot.slane %v2879_v1, %v2884_v9  ;;  %v110_v13 = vrot.slane %v96_v7, %v2884_v9  ;;  %v2922_v7 = vld [vmem:[%s3441_s0 + $0x14] sm:$0xff] }
   0x8   :  { %v731_v15 = vrot.slane %v722_v10, %v2884_v9  ;;  %v724_v16 = vcombine.high %v722_v10, %v722_v10 }
   0x9   :  { %v111_v17 = vcombine.high %v103_v12, %v103_v12  ;;  %v114_v18 = vpack.i.b16 %v103_v12, %v103_v12  ;;  %v112_v19 = vcombine.high %v110_v13, %v110_v13  ;;  %v128_v20 = vpack.i.b16 %v110_v13, %v110_v13 }
   0xa   :  { %v739_v21 = vcombine.high %v731_v15, %v731_v15  ;;  %v738_v22 = vrot.slane %v724_v16, %v2884_v9  ;;  %v742_v26 = vpack.i.b16 %v731_v15, %v731_v15  ;;  %v1104_v42 = vshrl.u32 %v103_v12, 16  ;;  %v2930_v16 = vld [vmem:[%s3441_s0 + $0x8] sm:$0xff] }
   0xb   :  { %v119_v23 = vrot.slane %v114_v18, %v2887_v11  ;;  %v121_v24 = vpack.i.b16 %v111_v17, %v111_v17  ;;  %v135_v25 = vpack.i.b16 %v112_v19, %v112_v19  ;;  %v133_v27 = vrot.slane %v128_v20, %v2887_v11 }
   0xc   :  { %v410_v28 = vrot.slane %v114_v18, %v409_v14  ;;  %v418_v29 = vrot.slane %v128_v20, %v409_v14  ;;  %v749_v30 = vpack.i.b16 %v739_v21, %v739_v21  ;;  %v740_v35 = vcombine.high %v738_v22, %v738_v22  ;;  %v2941_v21 = vld [vmem:[%s3441_s0 + $0x10] sm:$0xf] }
   0xd   :  { %v126_v31 = vrot.slane %v121_v24, %v2887_v11  ;;  %v140_v32 = vrot.slane %v135_v25, %v2887_v11  ;;  %v414_v33 = vrot.slane %v121_v24, %v409_v14  ;;  %v422_v34 = vrot.slane %v135_v25, %v409_v14 }
   0xe   :  { %v756_v36 = vpack.i.b16 %v738_v22, %v738_v22  ;;  %v747_v39 = vrot.slane %v742_v26, %v2887_v11  ;;  %v754_v40 = vrot.slane %v749_v30, %v2887_v11  ;;  %v763_v41 = vpack.i.b16 %v740_v35, %v740_v35  ;;  %v2946_v22 = vld [vmem:[%s3441_s0 + $0x24] sm:$0xf]  ;;  %v2958_v35 = vld [vmem:[%s3442_s2] sm:$0xf] }
   0xf   :  { %v2579_v37 = vcombine.low %v119_v23, %v126_v31  ;;  %v2595_v38 = vcombine.low %v410_v28, %v414_v33  ;;  %v2580_v43 = vcombine.low %v133_v27, %v140_v32  ;;  %v2596_v44 = vcombine.low %v418_v29, %v422_v34 }
  0x10   :  { %v761_v45 = vrot.slane %v756_v36, %v2887_v11  ;;  %v1111_v46 = vshrl.u32 %v111_v17, 16  ;;  %v768_v47 = vrot.slane %v763_v41, %v2887_v11  ;;  %v1105_v48 = vpack.i.b16 %v1104_v42, %v1104_v42  ;;  %v2935_v17 = vld [vmem:[%s3441_s0 + $0x1c] sm:$0xff] }
  0x11   :  { %151 = vrot.lane.b32.xlu0 %v2579_v37, %s2829_s1  ;;  %433 = vrot.lane.b32.xlu1 %v2595_v38, %s2830_s20  ;;  %v1118_v51 = vshrl.u32 %v110_v13, 16  ;;  %v1125_v52 = vshrl.u32 %v112_v19, 16  ;;  %v2613_v53 = vcombine.low %v747_v39, %v754_v40  ;;  %v1469_v24 = vshll.u32 %v2879_v1, 16 }
  0x12   :  { %v1112_v49 = vpack.i.b16 %v1111_v46, %v1111_v46  ;;  %v1110_v50 = vrot.slane %v1105_v48, %v409_v14  ;;  %v2614_v54 = vcombine.low %v761_v45, %v768_v47  ;;  %v1688_v62 = vrot.slane %v1105_v48, %v2887_v11 }
  0x13   :  { %v1119_v56 = vpack.i.b16 %v1118_v51, %v1118_v51  ;;  %v1126_v57 = vpack.i.b16 %v1125_v52, %v1125_v52  ;;  %v2642_v32 = vrot.slane %v1469_v24, 9  ;;  %v2833_v36 = vmov 0  }
  0x14   :  { %v1117_v55 = vrot.slane %v1112_v49, %v409_v14  ;;  %v1692_v63 = vrot.slane %v1112_v49, %v2887_v11  ;;  %252 = vmatprep.mubr.bf16.mxu0 %v2833_v36  ;;  %293 = vmatprep.mubr.bf16.mxu1 %v2833_v36  ;;  %v2968_v41 = vcombine.low %v2958_v35, %v2958_v35 }
  0x15   :  { %153 = vrot.lane.b32.xlu0 %v2580_v43, %s2829_s1  ;;  %435 = vrot.lane.b32.xlu1 %v2596_v44, %s2830_s20  ;;  %v1124_v59 = vrot.slane %v1119_v56, %v409_v14  ;;  %v1131_v60 = vrot.slane %v1126_v57, %v409_v14  ;;  %v1696_v2 = vrot.slane %v1119_v56, %v2887_v11  ;;  %s2841_s1 = smov 33   ;;  %s2842_s20 = smov 110  }
  0x16   :  { %v2902_v58 = vcombine.low %v1110_v50, %v1117_v55  ;;  %v2908_v0 = vcombine.low %v1688_v62, %v1692_v63  ;;  %v1700_v3 = vrot.slane %v1126_v57, %v2887_v11  ;;  %2814 = vset.pattern.permute.xlu1 %v2833_v36  ;;  %v1474_v40 = vmul.bf16 %v2642_v32, %v2879_v1 }
  0x17   :  { %v2904_v61 = vcombine.low %v1124_v59, %v1131_v60  ;;  %2815 = vset.pattern.permute.xlu0 %v2833_v36  ;;  %v2606_v56 = vcombine.low %v2930_v16, %v2935_v17  ;;  %v2607_v24 = vcombine.high %v2930_v16, %v2935_v17 }
  0x18   :  { %v2912_v4 = vcombine.low %v1696_v2, %v1700_v3  ;;  %v1476_v45 = vcombine.high %v1474_v40, %v1474_v40  ;;  %v1483_v57 = vrot.slane %v1474_v40, %v2884_v9  ;;  %v2604_v2 = vcombine.low %v2917_v6, %v2922_v7 }
  0x19   :  { %779 = vrot.lane.b32.xlu0 %v2613_v53, %s2831_s21  ;;  %781 = vrot.lane.b32.xlu1 %v2614_v54, %s2831_s21 }
  0x1a   :  { %v1490_v50 = vrot.slane %v1476_v45, %v2884_v9  ;;  %v1491_v62 = vcombine.high %v1483_v57, %v1483_v57 }
  0x1c   :  { %v1492_v53 = vcombine.high %v1490_v50, %v1490_v50  ;;  %v1510_v59 = vshrl.u32 %v1490_v50, 16 }
  0x1e   :  { %v1518_v60 = vshrl.u32 %v1492_v53, 16 }
  0x83   :  { %v152_v5 = vpop.permute.xlu0 %151  ;;  %v434_v19 = vpop.permute.xlu1 %433 }
  0x84   :  { %v155_v8 = vrot.slane %v152_v5, 4  ;;  %v437_v27 = vrot.slane %v434_v19, 4 }
  0x86   :  { %v158_v10 = vsel %vm157_vm0, %v155_v8, %v152_v5  ;;  %v440_v33 = vsel %vm216_vm2, %v437_v27, %v434_v19  ;;  %v1511_v5 = vpack.i.b16 %v1510_v59, %v1510_v59 }
  0x87   :  { %v165_v12 = vmul.bf16 %v158_v10, %v2917_v6  ;;  %v168_v13 = vmul.bf16 %v158_v10, %v2922_v7  ;;  %v154_v14 = vpop.permute.xlu0 %153  ;;  %v446_v38 = vmul.bf16 %v440_v33, %v2917_v6  ;;  %v449_v39 = vmul.bf16 %v440_v33, %v2922_v7  ;;  %v436_v42 = vpop.permute.xlu1 %435 }
  0x88   :  { %v156_v15 = vrot.slane %v154_v14, 4  ;;  %v438_v44 = vrot.slane %v436_v42, 4  ;;  %v1516_v19 = vrot.slane %v1511_v5, %v2887_v11 }
  0x89   :  { %v2583_v18 = vcombine.high %v165_v12, %v168_v13  ;;  %v2582_v28 = vcombine.low %v165_v12, %v168_v13  ;;  %v2598_v43 = vcombine.high %v446_v38, %v449_v39  ;;  %v2597_v47 = vcombine.low %v446_v38, %v449_v39 }
  0x8a   :  { %v160_v20 = vsel %vm159_vm1, %v155_v8, %v156_v15  ;;  %v167_v29 = vmul.bf16 %v156_v15, %v2941_v21  ;;  %v170_v30 = vmul.bf16 %v156_v15, %v2946_v22  ;;  %v441_v46 = vsel %vm159_vm1, %v437_v27, %v438_v44 }
  0x8b   :  { %v161_v23 = vsel %vm157_vm0, %v160_v20, %v154_v14  ;;  %199 = vrot.lane.b32.xlu0 %v2583_v18, %s2832_s9  ;;  %v448_v48 = vmul.bf16 %v438_v44, %v2941_v21  ;;  %v451_v49 = vmul.bf16 %v438_v44, %v2946_v22  ;;  %v442_v51 = vsel %vm216_vm2, %v441_v46, %v436_v42  ;;  %v780_v63 = vpop.permute.xlu0 %779  ;;  %v782_v3 = vpop.permute.xlu1 %781 }
  0x8c   :  { %v166_v25 = vmul.bf16 %v161_v23, %v2930_v16  ;;  %v169_v26 = vmul.bf16 %v161_v23, %v2935_v17  ;;  %v2586_v34 = vcombine.low %v167_v29, %v170_v30  ;;  %v447_v54 = vmul.bf16 %v442_v51, %v2930_v16 }
  0x8d   :  { %v2601_v52 = vcombine.low %v448_v48, %v451_v49  ;;  %v450_v55 = vmul.bf16 %v442_v51, %v2935_v17  ;;  %v1519_v8 = vpack.i.b16 %v1518_v60, %v1518_v60  ;;  %v783_v12 = vrot.slane %v780_v63, 4 }
  0x8e   :  { %v2584_v31 = vcombine.low %v166_v25, %v169_v26  ;;  %v2585_v37 = vcombine.high %v166_v25, %v169_v26  ;;  %v1494_v13 = vshrl.u32 %v1483_v57, 16  ;;  %v1502_v14 = vshrl.u32 %v1491_v62, 16 }
  0x8f   :  { %197 = vrot.lane.b32.xlu0 %v2582_v28, %s2832_s9  ;;  %v2600_v10 = vcombine.high %v447_v54, %v450_v55  ;;  %v784_v15 = vrot.slane %v782_v3, 4  ;;  %v2608_v18 = vcombine.low %v2941_v21, %v2946_v22  ;;  %v1524_v20 = vrot.slane %v1519_v8, %v2887_v11 }
  0x90   :  { %201 = vrot.lane.b32.xlu1 %v2584_v31, %s2832_s9  ;;  %v786_v23 = vsel %vm785_vm3, %v783_v12, %v780_v63  ;;  %v1495_v25 = vpack.i.b16 %v1494_v13, %v1494_v13  ;;  %v1503_v26 = vpack.i.b16 %v1502_v14, %v1502_v14  ;;  %v2576_v48 = vrot.slane %v2879_v1, 9 }
  0x91   :  { %v787_v27 = vsel %vm159_vm1, %v783_v12, %v784_v15  ;;  %v792_v28 = vmul.bf16 %v786_v23, %v2917_v6  ;;  %v795_v29 = vmul.bf16 %v786_v23, %v2922_v7  ;;  %v2644_v30 = vcombine.low %v1516_v19, %v1524_v20 }
  0x92   :  { %v1500_v31 = vrot.slane %v1495_v25, %v2887_v11  ;;  %v1508_v32 = vrot.slane %v1503_v26, %v2887_v11  ;;  %v788_v33 = vsel %vm785_vm3, %v787_v27, %v782_v3  ;;  %v794_v42 = vmul.bf16 %v784_v15, %v2941_v21 }
  0x93   :  { %205 = vrot.lane.b32.xlu0 %v2586_v34, %s2832_s9  ;;  %v2617_v34 = vcombine.high %v792_v28, %v795_v29  ;;  %v796_v38 = vmul.bf16 %v788_v33, %v2935_v17  ;;  %v2616_v40 = vcombine.low %v792_v28, %v795_v29  ;;  %v33_v49 = vmul.bf16 %v2576_v48, %v2879_v1 }
  0x94   :  { %203 = vrot.lane.b32.xlu1 %v2585_v37, %s2832_s9  ;;  %v793_v37 = vmul.bf16 %v788_v33, %v2930_v16  ;;  %v2643_v39 = vcombine.low %v1500_v31, %v1508_v32 }
  0x95   :  { %v3038_v50 = vrot.slane %v33_v49, %v2884_v9  ;;  %v35_v51 = vcombine.high %v33_v49, %v33_v49 }
  0x96   :  { %v2618_v44 = vcombine.low %v793_v37, %v796_v38  ;;  %v2619_v46 = vcombine.high %v793_v37, %v796_v38 }
  0x97   :  { %1142 = vrot.lane.b32.xlu0 %v2902_v58, %s2834_s11  ;;  %v2605_v58 = vcombine.high %v2917_v6, %v2922_v7  ;;  %v53_v53 = vpack.i.b16 %v3038_v50, %v3038_v50 }
  0x98   :  { %174 = vrot.lane.b32.xlu1 %v2968_v41, %s2835_s12 }
  0x9b   :  { %477 = vrot.lane.b32.xlu0 %v2598_v43, %s2835_s12  ;;  %v797_v43 = vmul.bf16 %v784_v15, %v2946_v22 }
  0x9c   :  { %1144 = vrot.lane.b32.xlu1 %v2904_v61, %s2834_s11  ;;  %v2599_v61 = vcombine.low %v447_v54, %v450_v55  ;;  %v58_v54 = vrot.slane %v53_v53, %v2887_v11 }
  0x9d   :  { %v2620_v45 = vcombine.low %v794_v42, %v797_v43 }
  0x9f   :  { %475 = vrot.lane.b32.xlu0 %v2597_v47, %s2835_s12  ;;  %v3023_v47 = vld [vmem:[%s3442_s2 + $0x4] sm:$0xf] }
  0xa0   :  { %452 = vrot.lane.b32.xlu1 %v2968_v41, %s2836_s13 }
  0xa3   :  { %483 = vrot.lane.b32.xlu0 %v2601_v52, %s2835_s12  ;;  %v3042_v52 = vcombine.high %v3038_v50, %v3038_v50 }
  0xa4   :  { %610 = vrot.lane.b32.xlu1 %v2606_v56, %s2837_s14 }
  0xa7   :  { %608 = vrot.lane.b32.xlu0 %v2605_v58, %s2837_s14 }
  0xa8   :  { %479 = vrot.lane.b32.xlu1 %v2599_v61, %s2835_s12 }
  0xab   :  { %606 = vrot.lane.b32.xlu0 %v2604_v2, %s2837_s14 }
  0xac   :  { %481 = vrot.lane.b32.xlu1 %v2600_v10, %s2835_s12 }
  0xaf   :  { %614 = vrot.lane.b32.xlu0 %v2608_v18, %s2837_s14 }
  0xb0   :  { %612 = vrot.lane.b32.xlu1 %v2607_v24, %s2837_s14 }
  0xb3   :  { %1537 = vrot.lane.b32.xlu0 %v2644_v30, %s2838_s15 }
  0xb4   :  { %583 = vrot.lane.b32.xlu1 %v2968_v41, %s2839_s16  ;;  %v3027_v41 = vcombine.low %v3023_v47, %v3023_v47 }
  0xb7   :  { %826 = vrot.lane.b32.xlu0 %v2617_v34, %s2840_s17 }
  0xb8   :  { %1535 = vrot.lane.b32.xlu1 %v2643_v39, %s2838_s15 }
  0xbb   :  { %824 = vrot.lane.b32.xlu0 %v2616_v40, %s2840_s17 }
  0xbc   :  { %828 = vrot.lane.b32.xlu1 %v2618_v44, %s2840_s17 }
  0xbf   :  { %832 = vrot.lane.b32.xlu0 %v2620_v45, %s2840_s17  ;;  %v2129_v45 = vshrl.u32 %v3038_v50, 16 }
  0xc0   :  { %830 = vrot.lane.b32.xlu1 %v2619_v46, %s2840_s17  ;;  %v2136_v46 = vshrl.u32 %v3042_v52, 16 }
  0xc3   :  { %1711 = vrot.lane.b32.xlu0 %v2908_v0, %s2841_s1  ;;  %v3045_v0 = vrot.slane %v35_v51, %v2884_v9 }
  0xc4   :  { %801 = vrot.lane.b32.xlu1 %v3027_v41, %s2835_s12 }
  0xc5   :  { %v3053_v1 = vcombine.high %v3045_v0, %v3045_v0  ;;  %v67_v56 = vpack.i.b16 %v3045_v0, %v3045_v0  ;;  %v2143_v39 = vshrl.u32 %v3045_v0, 16 }
  0xc7   :  { %1013 = vrot.lane.b32.xlu0 %v3027_v41, %s2836_s13  ;;  %v74_v9 = vpack.i.b16 %v3053_v1, %v3053_v1  ;;  %v72_v58 = vrot.slane %v67_v56, %v2887_v11  ;;  %v2150_v40 = vshrl.u32 %v3053_v1, 16  ;;  %v3101_v1 = vld [vmem:[%s3442_s2 + $0x8] sm:$0xf]  ;;  %v2144_v50 = vpack.i.b16 %v2143_v39, %v2143_v39 }
  0xc8   :  { %1713 = vrot.lane.b32.xlu1 %v2912_v4, %s2841_s1  ;;  %v60_v4 = vpack.i.b16 %v3042_v52, %v3042_v52  ;;  %v2130_v56 = vpack.i.b16 %v2129_v45, %v2129_v45 }
  0xc9   :  { %v79_v59 = vrot.slane %v74_v9, %v2887_v11  ;;  %v2137_v9 = vpack.i.b16 %v2136_v46, %v2136_v46 }
  0xca   :  { %v65_v55 = vrot.slane %v60_v4, %v2887_v11 }
  0xcb   :  { %v2578_v63 = vcombine.low %v72_v58, %v79_v59 }
  0xcc   :  { %v2577_v57 = vcombine.low %v58_v54, %v65_v55  ;;  %v2151_v54 = vpack.i.b16 %v2150_v40, %v2150_v40 }
  0xcd   :  { %v93_v8 = vmul.bf16 %v2578_v63, %v2930_v16  ;;  %v95_v10 = vmul.bf16 %v2578_v63, %v2935_v17 }
  0xce   :  { %v92_v61 = vmul.bf16 %v2577_v57, %v2917_v6  ;;  %v94_v62 = vmul.bf16 %v2577_v57, %v2922_v7  ;;  %v3110_v57 = vcombine.low %v3101_v1, %v3101_v1 }
  0xcf   :  { %v2592_v18 = vcombine.high %v93_v8, %v95_v10  ;;  %v2591_v25 = vcombine.low %v93_v8, %v95_v10 }
  0xd0   :  { %v2590_v5 = vcombine.high %v92_v61, %v94_v62  ;;  %v2589_v23 = vcombine.low %v92_v61, %v94_v62  ;;  %v2156_v61 = vrot.slane %v2151_v54, %v2887_v11 }
  0xfd   :  { %v200_v60 = vpop.permute.xlu0 %199 }
 0x101   :  { %v198_v2 = vpop.permute.xlu0 %197 }
 0x102   :  { %v202_v3 = vpop.permute.xlu1 %201  ;;  %v3070_v13 = vsel %vm207_vm4, %v198_v2, %v200_v60 }
 0x103   :  { %v3067_v12 = vsel %vm207_vm4, %v200_v60, %v202_v3  ;;  %v2149_v60 = vrot.slane %v2144_v50, %v2887_v11 }
 0x104   :  { %220 = vmatprep.subr.bf16.mxu0 %v3067_v12 }
 0x105   :  { %221 = vmatpush1.bf16.msra.mxu0 %v3070_v13  ;;  %v206_v14 = vpop.permute.xlu0 %205  ;;  %v2670_v10 = vcombine.low %v2149_v60, %v2156_v61 }
 0x106   :  { %v204_v15 = vpop.permute.xlu1 %203  ;;  %325 = vmatprep.subr.bf16.mxu0 %v2590_v5  ;;  %v2142_v5 = vrot.slane %v2137_v9, %v2887_v11 }
 0x107   :  { %v3073_v19 = vsel %vm207_vm4, %v204_v15, %v206_v14  ;;  %v3075_v20 = vsel %vm207_vm4, %v202_v3, %v204_v15  ;;  %v2135_v3 = vrot.slane %v2130_v56, %v2887_v11 }
 0x108   :  { %261 = vmatprep.subr.bf16.mxu1 %v3073_v19 }
 0x109   :  { %262 = vmatpush1.bf16.msra.mxu1 %v3075_v20  ;;  %v1143_v24 = vpop.permute.xlu0 %1142 }
 0x10a   :  { %v1146_v26 = vrot.slane %v1143_v24, 4  ;;  %v175_v27 = vpop.permute.xlu1 %174  ;;  %366 = vmatprep.subr.bf16.mxu1 %v2592_v18  ;;  %v2669_v18 = vcombine.low %v2135_v3, %v2142_v5 }
 0x10b   :  { %2587 = vmatmul.mubr.msk.bf16.vlgmr.msra.gmra.mrb[0].mxu0 %vm216_vm2, %v175_v27 }
 0x10c   :  { %v1149_v28 = vsel %vm1148_vm5, %v1146_v26, %v1143_v24  ;;  %2588 = vmatmul.mubr.msk.bf16.vlgmr.msra.gmra.mrb[0].mxu1 %vm216_vm2, %v175_v27  ;;  %326 = vmatpush1.bf16.msra.mxu0 %v2589_v23 }
 0x10d   :  { %v1155_v29 = vmul.bf16 %v1149_v28, %v2917_v6  ;;  %v1158_v30 = vmul.bf16 %v1149_v28, %v2922_v7  ;;  %v478_v31 = vpop.permute.xlu0 %477  ;;  %367 = vmatpush1.bf16.msra.mxu1 %v2591_v25  ;;  %357 = vmatprep.mubr.bf16.mxu0 %v2833_v36 }
 0x10e   :  { %v1145_v32 = vpop.permute.xlu1 %1144  ;;  %398 = vmatprep.mubr.bf16.mxu1 %v2833_v36 }
 0x10f   :  { %v1147_v33 = vrot.slane %v1145_v32, 4  ;;  %v2630_v34 = vcombine.high %v1155_v29, %v1158_v30  ;;  %v2629_v44 = vcombine.low %v1155_v29, %v1158_v30 }
 0x111   :  { %v1150_v37 = vsel %vm159_vm1, %v1146_v26, %v1147_v33  ;;  %1186 = vrot.lane.b32.xlu1 %v2630_v34, %s2842_s20  ;;  %v476_v38 = vpop.permute.xlu0 %475  ;;  %v1157_v51 = vmul.bf16 %v1147_v33, %v2941_v21  ;;  %v1160_v53 = vmul.bf16 %v1147_v33, %v2946_v22 }
 0x112   :  { %v1151_v42 = vsel %vm1148_vm5, %v1150_v37, %v1145_v32  ;;  %v453_v43 = vpop.permute.xlu1 %452  ;;  %v3118_v62 = vsel %vm485_vm6, %v476_v38, %v478_v31 }
 0x113   :  { %v1156_v48 = vmul.bf16 %v1151_v42, %v2930_v16  ;;  %v1159_v49 = vmul.bf16 %v1151_v42, %v2935_v17  ;;  %v2633_v55 = vcombine.low %v1157_v51, %v1160_v53 }
 0x115   :  { %1184 = vrot.lane.b32.xlu1 %v2629_v44, %s2842_s20  ;;  %v484_v0 = vpop.permute.xlu0 %483  ;;  %v2631_v4 = vcombine.low %v1156_v48, %v1159_v49  ;;  %v2632_v59 = vcombine.high %v1156_v48, %v1159_v49 }
 0x116   :  { %v611_v52 = vpop.permute.xlu1 %610 }
 0x117   :  { %1188 = vrot.lane.b32.xlu0 %v2631_v4, %s2842_s20  ;;  %2593 = vmatmul.mubr.msk.bf16.vlgmr.msra.gmra.mrb[0].mxu0 %vm216_vm2, %v2958_v35 }
 0x118   :  { %2594 = vmatmul.mubr.msk.bf16.vlgmr.msra.gmra.mrb[0].mxu1 %vm216_vm2, %v2958_v35  ;;  %529 = vmatprep.mubr.bf16.mxu0 %v2833_v36 }
 0x119   :  { %1192 = vrot.lane.b32.xlu1 %v2633_v55, %s2842_s20  ;;  %v609_v58 = vpop.permute.xlu0 %608  ;;  %570 = vmatprep.mubr.bf16.mxu1 %v2833_v36 }
 0x11a   :  { %v480_v35 = vpop.permute.xlu1 %479  ;;  %v3121_v63 = vsel %vm616_vm7, %v609_v58, %v611_v52 }
 0x11b   :  { %1190 = vrot.lane.b32.xlu0 %v2632_v59, %s2842_s20  ;;  %v3125_v2 = vsel %vm485_vm6, %v478_v31, %v480_v35 }
 0x11c   :  { %497 = vmatprep.subr.bf16.mxu0 %v3125_v2 }
 0x11d   :  { %v607_v8 = vpop.permute.xlu0 %606  ;;  %1297 = vrot.lane.b32.xlu1 %v3110_v57, %s2835_s12  ;;  %498 = vmatpush1.bf16.msra.mxu0 %v3118_v62 }
 0x11e   :  { %v482_v14 = vpop.permute.xlu1 %481  ;;  %628 = vmatprep.subr.bf16.mxu0 %v3121_v63  ;;  %v3144_v23 = vsel %vm616_vm7, %v607_v8, %v609_v58 }
 0x11f   :  { %v3135_v15 = vsel %vm485_vm6, %v480_v35, %v482_v14  ;;  %1161 = vrot.lane.b32.xlu0 %v3027_v41, %s2839_s16  ;;  %v3140_v11 = vsel %vm485_vm6, %v482_v14, %v484_v0 }
 0x120   :  { %538 = vmatprep.subr.bf16.mxu1 %v3140_v11 }
 0x121   :  { %539 = vmatpush1.bf16.msra.mxu1 %v3135_v15  ;;  %v615_v24 = vpop.permute.xlu0 %614  ;;  %2169 = vrot.lane.b32.xlu1 %v2670_v10, %s2843_s23 }
 0x122   :  { %v613_v25 = vpop.permute.xlu1 %612 }
 0x123   :  { %v3148_v26 = vsel %vm616_vm7, %v611_v52, %v613_v25  ;;  %v3151_v41 = vsel %vm616_vm7, %v613_v25, %v615_v24  ;;  %2167 = vrot.lane.b32.xlu0 %v2669_v18, %s2843_s23  ;;  %2602 = vmatmul.mubr.msk.bf16.vlgmr.msra.gmra.mrb[0].mxu0 %vm216_vm2, %v453_v43 }
 0x124   :  { %2603 = vmatmul.mubr.msk.bf16.vlgmr.msra.gmra.mrb[0].mxu1 %vm216_vm2, %v453_v43  ;;  %629 = vmatpush1.bf16.msra.mxu0 %v3144_v23 }
 0x125   :  { %v1538_v27 = vpop.permute.xlu0 %1537  ;;  %669 = vmatprep.subr.bf16.mxu1 %v3151_v41  ;;  %660 = vmatprep.mubr.bf16.mxu0 %v2833_v36 }
 0x126   :  { %v584_v28 = vpop.permute.xlu1 %583  ;;  %670 = vmatpush1.bf16.msra.mxu1 %v3148_v26  ;;  %701 = vmatprep.mubr.bf16.mxu1 %v2833_v36  ;;  %v1540_v29 = vrot.slane %v1538_v27, 4 }
 0x128   :  { %v1550_v4 = vmul.bf16 %v1540_v29, %v2941_v21  ;;  %v1553_v50 = vmul.bf16 %v1540_v29, %v2946_v22 }
 0x129   :  { %v827_v30 = vpop.permute.xlu0 %826 }
 0x12a   :  { %v1536_v31 = vpop.permute.xlu1 %1535  ;;  %v2649_v58 = vcombine.low %v1550_v4, %v1553_v50 }
 0x12b   :  { %v1539_v32 = vrot.slane %v1536_v31, 4 }
 0x12d   :  { %v1542_v33 = vsel %vm1541_vm8, %v1539_v32, %v1536_v31  ;;  %v1543_v34 = vsel %vm159_vm1, %v1539_v32, %v1540_v29  ;;  %v825_v37 = vpop.permute.xlu0 %824 }
 0x12e   :  { %v1544_v38 = vsel %vm1541_vm8, %v1543_v34, %v1538_v27  ;;  %v1548_v39 = vmul.bf16 %v1542_v33, %v2917_v6  ;;  %v1551_v40 = vmul.bf16 %v1542_v33, %v2922_v7  ;;  %v829_v42 = vpop.permute.xlu1 %828  ;;  %v835_v43 = vsel %vm834_vm9, %v825_v37, %v827_v30 }
 0x12f   :  { %2609 = vmatmul.mubr.msk.bf16.vlgmr.msra.gmra.mrb[0].mxu0 %vm216_vm2, %v584_v28  ;;  %v836_v44 = vsel %vm834_vm9, %v827_v30, %v829_v42  ;;  %v1549_v45 = vmul.bf16 %v1544_v38, %v2930_v16  ;;  %v1552_v46 = vmul.bf16 %v1544_v38, %v2935_v17 }
 0x130   :  { %2610 = vmatmul.mubr.msk.bf16.vlgmr.msra.gmra.mrb[0].mxu1 %vm216_vm2, %v584_v28  ;;  %846 = vmatprep.subr.bf16.mxu0 %v836_v44  ;;  %v2646_v48 = vcombine.high %v1548_v39, %v1551_v40  ;;  %v2645_v0 = vcombine.low %v1548_v39, %v1551_v40  ;;  %v3206_v28 = vld [vmem:[%s3442_s2 + $0xc] sm:$0xf]  ;;  %s2845_s2 = smov 94  }
 0x131   :  { %847 = vmatpush1.bf16.msra.mxu0 %v835_v43  ;;  %v833_v49 = vpop.permute.xlu0 %832  ;;  %878 = vmatprep.mubr.bf16.mxu0 %v2833_v36  ;;  %v2647_v51 = vcombine.low %v1549_v45, %v1552_v46  ;;  %v2648_v55 = vcombine.high %v1549_v45, %v1552_v46  ;;  %v3215_v29 = vcombine.low %v3206_v28, %v3206_v28 }
 0x132   :  { %v831_v53 = vpop.permute.xlu1 %830  ;;  %931 = vmatprep.subr.bf16.mxu0 %v3067_v12  ;;  %1579 = vrot.lane.b32.xlu0 %v2646_v48, %s2836_s13 }
 0x133   :  { %v837_v54 = vsel %vm834_vm9, %v829_v42, %v831_v53  ;;  %v838_v52 = vsel %vm834_vm9, %v831_v53, %v833_v49  ;;  %1581 = vrot.lane.b32.xlu1 %v2647_v51, %s2836_s13  ;;  %919 = vmatprep.mubr.bf16.mxu1 %v2833_v36 }
 0x134   :  { %887 = vmatprep.subr.bf16.mxu1 %v838_v52 }
 0x135   :  { %888 = vmatpush1.bf16.msra.mxu1 %v837_v54  ;;  %v1712_v12 = vpop.permute.xlu0 %1711 }
 0x136   :  { %v802_v56 = vpop.permute.xlu1 %801  ;;  %972 = vmatprep.subr.bf16.mxu1 %v3073_v19  ;;  %1577 = vrot.lane.b32.xlu0 %v2645_v0, %s2836_s13  ;;  %v1715_v9 = vrot.slane %v1712_v12, 4 }
 0x137   :  { %2621 = vmatmul.mubr.msk.bf16.vlgmr.msra.gmra.mrb[4].mxu0 %vm216_vm2, %v802_v56  ;;  %1583 = vrot.lane.b32.xlu1 %v2648_v55, %s2836_s13 }
 0x138   :  { %v1718_v59 = vsel %vm1717_vm10, %v1715_v9, %v1712_v12  ;;  %932 = vmatpush1.bf16.msra.mxu0 %v3070_v13  ;;  %2622 = vmatmul.mubr.msk.bf16.vlgmr.msra.gmra.mrb[4].mxu1 %vm216_vm2, %v802_v56 }
 0x139   :  { %v1724_v60 = vmul.bf16 %v1718_v59, %v2917_v6  ;;  %v1727_v61 = vmul.bf16 %v1718_v59, %v2922_v7  ;;  %973 = vmatpush1.bf16.msra.mxu1 %v3075_v20  ;;  %1004 = vmatprep.mubr.bf16.mxu1 %v2833_v36 }
 0x13a   :  { %v1714_v19 = vpop.permute.xlu1 %1713  ;;  %1585 = vrot.lane.b32.xlu0 %v2649_v58, %s2836_s13  ;;  %1059 = vmatprep.subr.bf16.mxu1 %v3151_v41 }
 0x13b   :  { %v1716_v35 = vrot.slane %v1714_v19, 4  ;;  %1554 = vrot.lane.b32.xlu1 %v3110_v57, %s2836_s13  ;;  %v2655_v13 = vcombine.high %v1724_v60, %v1727_v61  ;;  %1018 = vmatprep.subr.bf16.mxu0 %v3121_v63  ;;  %v2654_v5 = vcombine.low %v1724_v60, %v1727_v61 }
 0x13c   :  { %963 = vmatprep.mubr.bf16.mxu0 %v2833_v36 }
 0x13d   :  { %v1719_v3 = vsel %vm159_vm1, %v1715_v9, %v1716_v35  ;;  %v1726_v8 = vmul.bf16 %v1716_v35, %v2941_v21  ;;  %v1729_v10 = vmul.bf16 %v1716_v35, %v2946_v22 }
 0x13e   :  { %v1720_v20 = vsel %vm1717_vm10, %v1719_v3, %v1714_v19  ;;  %1755 = vrot.lane.b32.xlu0 %v2655_v13, %s2844_s24 }
 0x13f   :  { %v1725_v14 = vmul.bf16 %v1720_v20, %v2930_v16  ;;  %v1728_v18 = vmul.bf16 %v1720_v20, %v2935_v17  ;;  %v2658_v25 = vcombine.low %v1726_v8, %v1729_v10 }
 0x141   :  { %v2656_v24 = vcombine.low %v1725_v14, %v1728_v18  ;;  %v2657_v27 = vcombine.high %v1725_v14, %v1728_v18 }
 0x142   :  { %1753 = vrot.lane.b32.xlu0 %v2654_v5, %s2844_s24 }
 0x143   :  { %1757 = vrot.lane.b32.xlu1 %v2656_v24, %s2844_s24  ;;  %2623 = vmatmul.mubr.msk.bf16.vlgmr.msra.gmra.mrb[4].mxu0 %vm216_vm2, %v3023_v47 }
 0x144   :  { %2624 = vmatmul.mubr.msk.bf16.vlgmr.msra.gmra.mrb[4].mxu1 %vm216_vm2, %v3023_v47  ;;  %1019 = vmatpush1.bf16.msra.mxu0 %v3144_v23  ;;  %v1014_v47 = vpop.permute.xlu0 %1013 }
 0x145   :  { %1060 = vmatpush1.bf16.msra.mxu1 %v3148_v26  ;;  %1091 = vmatprep.mubr.bf16.mxu1 %v2833_v36 }
 0x146   :  { %1761 = vrot.lane.b32.xlu0 %v2658_v25, %s2844_s24  ;;  %1050 = vmatprep.mubr.bf16.mxu0 %v2833_v36 }
 0x147   :  { %1759 = vrot.lane.b32.xlu1 %v2657_v27, %s2844_s24 }
 0x14a   :  { %1866 = vrot.lane.b32.xlu0 %v3215_v29, %s2835_s12 }
 0x14b   :  { %1730 = vrot.lane.b32.xlu1 %v3110_v57, %s2839_s16 }
 0x14f   :  { %2625 = vmatmul.mubr.msk.bf16.vlgmr.msra.gmra.mrb[4].mxu0 %vm216_vm2, %v1014_v47  ;;  %2038 = vrot.lane.b32.xlu1 %v3215_v29, %s2836_s13 }
 0x150   :  { %2626 = vmatmul.mubr.msk.bf16.vlgmr.msra.gmra.mrb[4].mxu1 %vm216_vm2, %v1014_v47  ;;  %1238 = vmatprep.mubr.bf16.mxu0 %v2833_v36 }
 0x151   :  { %1279 = vmatprep.mubr.bf16.mxu1 %v2833_v36 }
 0x183   :  { %v1187_v30 = vpop.permute.xlu1 %1186 }
 0x187   :  { %v1185_v31 = vpop.permute.xlu1 %1184 }
 0x188   :  { %v3230_v34 = vsel %vm1194_vm11, %v1185_v31, %v1187_v30 }
 0x189   :  { %v1189_v32 = vpop.permute.xlu0 %1188 }
 0x18a   :  { %v3228_v33 = vsel %vm1194_vm11, %v1187_v30, %v1189_v32 }
 0x18b   :  { %v1193_v57 = vpop.permute.xlu1 %1192  ;;  %1206 = vmatprep.subr.bf16.mxu0 %v3228_v33 }
 0x18c   :  { %1207 = vmatpush1.bf16.msra.mxu0 %v3230_v34 }
 0x18d   :  { %v1191_v37 = vpop.permute.xlu0 %1190  ;;  %1302 = vmatprep.subr.bf16.mxu0 %v3121_v63 }
 0x18e   :  { %v3235_v38 = vsel %vm1194_vm11, %v1189_v32, %v1191_v37  ;;  %v3237_v39 = vsel %vm1194_vm11, %v1191_v37, %v1193_v57 }
 0x18f   :  { %1247 = vmatprep.subr.bf16.mxu1 %v3237_v39  ;;  %v1298_v40 = vpop.permute.xlu1 %1297 }
 0x190   :  { %1248 = vmatpush1.bf16.msra.mxu1 %v3235_v38 }
 0x191   :  { %1343 = vmatprep.subr.bf16.mxu1 %v3151_v41  ;;  %v1162_v42 = vpop.permute.xlu0 %1161 }
 0x192   :  { %2634 = vmatmul.mubr.msk.bf16.vlgmr.msra.gmra.mrb[4].mxu0 %vm216_vm2, %v1162_v42 }
 0x193   :  { %1303 = vmatpush1.bf16.msra.mxu0 %v3144_v23  ;;  %2635 = vmatmul.mubr.msk.bf16.vlgmr.msra.gmra.mrb[4].mxu1 %vm216_vm2, %v1162_v42  ;;  %v2170_v43 = vpop.permute.xlu1 %2169 }
 0x194   :  { %1387 = vmatprep.subr.bf16.mxu0 %v3125_v2  ;;  %1344 = vmatpush1.bf16.msra.mxu1 %v3148_v26  ;;  %v2172_v44 = vrot.slane %v2170_v43, 4 }
 0x195   :  { %1428 = vmatprep.subr.bf16.mxu1 %v3140_v11  ;;  %v2168_v45 = vpop.permute.xlu0 %2167  ;;  %1334 = vmatprep.mubr.bf16.mxu0 %v2833_v36 }
 0x196   :  { %v2171_v46 = vrot.slane %v2168_v45, 4  ;;  %1375 = vmatprep.mubr.bf16.mxu1 %v2833_v36 }
 0x198   :  { %v2174_v48 = vsel %vm2173_vm12, %v2171_v46, %v2168_v45  ;;  %v2175_v49 = vsel %vm159_vm1, %v2171_v46, %v2172_v44 }
 0x199   :  { %v2176_v51 = vsel %vm2173_vm12, %v2175_v49, %v2170_v43  ;;  %v2180_v53 = vmul.bf16 %v2174_v48, %v2917_v6  ;;  %v2183_v2 = vmul.bf16 %v2174_v48, %v2922_v7  ;;  %v2182_v7 = vmul.bf16 %v2172_v44, %v2941_v21 }
 0x19a   :  { %2638 = vmatmul.mubr.msk.bf16.vlgmr.msra.gmra.mrb[8].mxu0 %vm216_vm2, %v1298_v40  ;;  %v2181_v0 = vmul.bf16 %v2176_v51, %v2930_v16  ;;  %v2184_v11 = vmul.bf16 %v2176_v51, %v2935_v17  ;;  %v2185_v16 = vmul.bf16 %v2172_v44, %v2946_v22 }
 0x19b   :  { %1388 = vmatpush1.bf16.msra.mxu0 %v3118_v62  ;;  %2639 = vmatmul.mubr.msk.bf16.vlgmr.msra.gmra.mrb[8].mxu1 %vm216_vm2, %v1298_v40  ;;  %v2672_v4 = vcombine.high %v2180_v53, %v2183_v2  ;;  %v2671_v6 = vcombine.low %v2180_v53, %v2183_v2 }
 0x19c   :  { %1429 = vmatpush1.bf16.msra.mxu1 %v3135_v15  ;;  %v2673_v50 = vcombine.low %v2181_v0, %v2184_v11  ;;  %1419 = vmatprep.mubr.bf16.mxu0 %v2833_v36  ;;  %v2674_v17 = vcombine.high %v2181_v0, %v2184_v11  ;;  %v2675_v62 = vcombine.low %v2182_v7, %v2185_v16 }
 0x19d   :  { %2211 = vrot.lane.b32.xlu0 %v2672_v4, %s2845_s2  ;;  %1460 = vmatprep.mubr.bf16.mxu1 %v2833_v36 }
 0x19e   :  { %2213 = vrot.lane.b32.xlu1 %v2673_v50, %s2845_s2 }
 0x1a1   :  { %2209 = vrot.lane.b32.xlu0 %v2671_v6, %s2845_s2 }
 0x1a2   :  { %2215 = vrot.lane.b32.xlu1 %v2674_v17, %s2845_s2 }
 0x1a4   :  { %v1580_v54 = vpop.permute.xlu0 %1579 }
 0x1a5   :  { %2217 = vrot.lane.b32.xlu0 %v2675_v62, %s2845_s2  ;;  %v1582_v15 = vpop.permute.xlu1 %1581 }
 0x1a6   :  { %2186 = vrot.lane.b32.xlu1 %v3215_v29, %s2839_s16  ;;  %2640 = vmatmul.mubr.msk.bf16.vlgmr.msra.gmra.mrb[8].mxu0 %vm216_vm2, %v3101_v1  ;;  %v1589_v52 = vsel %vm1587_vm13, %v1580_v54, %v1582_v15 }
 0x1a7   :  { %2641 = vmatmul.mubr.msk.bf16.vlgmr.msra.gmra.mrb[8].mxu1 %vm216_vm2, %v3101_v1  ;;  %1599 = vmatprep.subr.bf16.mxu0 %v1589_v52 }
 0x1a8   :  { %v1578_v21 = vpop.permute.xlu0 %1577  ;;  %1631 = vmatprep.mubr.bf16.mxu0 %v2833_v36  ;;  %1672 = vmatprep.mubr.bf16.mxu1 %v2833_v36 }
 0x1a9   :  { %v1588_v22 = vsel %vm1587_vm13, %v1578_v21, %v1580_v54  ;;  %v1584_v55 = vpop.permute.xlu1 %1583 }
 0x1aa   :  { %1600 = vmatpush1.bf16.msra.mxu0 %v1588_v22  ;;  %v1590_v12 = vsel %vm1587_vm13, %v1582_v15, %v1584_v55 }
 0x1ac   :  { %v1586_v56 = vpop.permute.xlu0 %1585 }
 0x1ad   :  { %v1591_v9 = vsel %vm1587_vm13, %v1584_v55, %v1586_v56  ;;  %v1555_v58 = vpop.permute.xlu1 %1554 }
 0x1ae   :  { %1640 = vmatprep.subr.bf16.mxu1 %v1591_v9 }
 0x1af   :  { %1641 = vmatpush1.bf16.msra.mxu1 %v1590_v12 }
 0x1b0   :  { %v1756_v59 = vpop.permute.xlu0 %1755 }
 0x1b2   :  { %2650 = vmatmul.mubr.msk.bf16.vlgmr.msra.gmra.mrb[8].mxu0 %vm216_vm2, %v1555_v58 }
 0x1b3   :  { %2651 = vmatmul.mubr.msk.bf16.vlgmr.msra.gmra.mrb[8].mxu1 %vm216_vm2, %v1555_v58  ;;  %1807 = vmatprep.mubr.bf16.mxu0 %v2833_v36 }
 0x1b4   :  { %v1754_v1 = vpop.permute.xlu0 %1753  ;;  %1848 = vmatprep.mubr.bf16.mxu1 %v2833_v36 }
 0x1b5   :  { %v1758_v60 = vpop.permute.xlu1 %1757  ;;  %v1764_v61 = vsel %vm1763_vm14, %v1754_v1, %v1756_v59 }
 0x1b6   :  { %v1765_v19 = vsel %vm1763_vm14, %v1756_v59, %v1758_v60 }
 0x1b7   :  { %1775 = vmatprep.subr.bf16.mxu0 %v1765_v19 }
 0x1b8   :  { %1776 = vmatpush1.bf16.msra.mxu0 %v1764_v61  ;;  %v1762_v35 = vpop.permute.xlu0 %1761 }
 0x1b9   :  { %v1760_v13 = vpop.permute.xlu1 %1759  ;;  %1871 = vmatprep.subr.bf16.mxu0 %v3228_v33 }
 0x1ba   :  { %v1766_v3 = vsel %vm1763_vm14, %v1758_v60, %v1760_v13  ;;  %v1767_v20 = vsel %vm1763_vm14, %v1760_v13, %v1762_v35 }
 0x1bb   :  { %1816 = vmatprep.subr.bf16.mxu1 %v1767_v20 }
 0x1bc   :  { %1817 = vmatpush1.bf16.msra.mxu1 %v1766_v3  ;;  %v1867_v8 = vpop.permute.xlu0 %1866 }
 0x1bd   :  { %v1731_v5 = vpop.permute.xlu1 %1730  ;;  %1912 = vmatprep.subr.bf16.mxu1 %v3237_v39 }
 0x1be   :  { %2659 = vmatmul.mubr.msk.bf16.vlgmr.msra.gmra.mrb[8].mxu0 %vm216_vm2, %v1731_v5 }
 0x1bf   :  { %1872 = vmatpush1.bf16.msra.mxu0 %v3230_v34  ;;  %2660 = vmatmul.mubr.msk.bf16.vlgmr.msra.gmra.mrb[8].mxu1 %vm216_vm2, %v1731_v5 }
 0x1c0   :  { %1956 = vmatprep.subr.bf16.mxu0 %v3121_v63  ;;  %1913 = vmatpush1.bf16.msra.mxu1 %v3235_v38 }
 0x1c1   :  { %1997 = vmatprep.subr.bf16.mxu1 %v3151_v41  ;;  %1903 = vmatprep.mubr.bf16.mxu0 %v2833_v36  ;;  %v2039_v63 = vpop.permute.xlu1 %2038 }
 0x1c2   :  { %1944 = vmatprep.mubr.bf16.mxu1 %v2833_v36 }
 0x1c6   :  { %2663 = vmatmul.mubr.msk.bf16.vlgmr.msra.gmra.mrb[12].mxu0 %vm216_vm2, %v1867_v8 }
 0x1c7   :  { %1957 = vmatpush1.bf16.msra.mxu0 %v3144_v23  ;;  %2664 = vmatmul.mubr.msk.bf16.vlgmr.msra.gmra.mrb[12].mxu1 %vm216_vm2, %v1867_v8 }
 0x1c8   :  { %1998 = vmatpush1.bf16.msra.mxu1 %v3148_v26  ;;  %1988 = vmatprep.mubr.bf16.mxu0 %v2833_v36 }
 0x1c9   :  { %2043 = vmatprep.subr.bf16.mxu0 %v1765_v19  ;;  %2029 = vmatprep.mubr.bf16.mxu1 %v2833_v36 }
 0x1ca   :  { %2084 = vmatprep.subr.bf16.mxu1 %v1767_v20 }
 0x1d2   :  { %2665 = vmatmul.mubr.msk.bf16.vlgmr.msra.gmra.mrb[12].mxu0 %vm216_vm2, %v3206_v28 }
 0x1d3   :  { %2044 = vmatpush1.bf16.msra.mxu0 %v1764_v61  ;;  %2666 = vmatmul.mubr.msk.bf16.vlgmr.msra.gmra.mrb[12].mxu1 %vm216_vm2, %v3206_v28 }
 0x1d4   :  { %2085 = vmatpush1.bf16.msra.mxu1 %v1766_v3  ;;  %2075 = vmatprep.mubr.bf16.mxu0 %v2833_v36 }
 0x1d5   :  { %2116 = vmatprep.mubr.bf16.mxu1 %v2833_v36 }
 0x1de   :  { %2667 = vmatmul.mubr.msk.bf16.vlgmr.msra.gmra.mrb[12].mxu0 %vm216_vm2, %v2039_v63 }
 0x1df   :  { %2668 = vmatmul.mubr.msk.bf16.vlgmr.msra.gmra.mrb[12].mxu1 %vm216_vm2, %v2039_v63  ;;  %2263 = vmatprep.mubr.bf16.mxu0 %v2833_v36 }
 0x1e0   :  { %2304 = vmatprep.mubr.bf16.mxu1 %v2833_v36 }
 0x202   :  { %v3305_v23 = vpop.f32.mrb[0].mxu0 }
 0x203   :  { %v3307_v26 = vpop.f32.mrb[1].mxu0  ;;  %v3309_v41 = vpop.f32.mrb[0].mxu1 }
 0x204   :  { %v2317_v10 = vadd.f32 %v3307_v26, %v3305_v23  ;;  %v666_v14 = vpop.f32.mrb[2].mxu0  ;;  %v3313_v18 = vpop.f32.mrb[1].mxu1 }
 0x205   :  { %v667_v24 = vpop.f32.mrb[3].mxu0  ;;  %v707_v25 = vpop.f32.mrb[2].mxu1 }
 0x206   :  { %v708_v27 = vpop.f32.mrb[3].mxu1  ;;  %v2318_v28 = vadd.f32 %v2317_v10, %v3309_v41 }
 0x208   :  { %v2319_v29 = vadd.f32 %v2318_v28, %v3313_v18 }
 0x20a   :  { %2320 = vadd.xlane.f32.xlu0 %v2319_v29 }
 0x20f   :  { %v2212_v36 = vpop.permute.xlu0 %2211 }
 0x210   :  { %v2214_v47 = vpop.permute.xlu1 %2213 }
 0x211   :  { %v2221_v30 = vsel %vm2219_vm15, %v2212_v36, %v2214_v47 }
 0x212   :  { %2231 = vmatprep.subr.bf16.mxu0 %v2221_v30 }
 0x213   :  { %v2210_v31 = vpop.permute.xlu0 %2209 }
 0x214   :  { %v2220_v32 = vsel %vm2219_vm15, %v2210_v31, %v2212_v36  ;;  %v2216_v33 = vpop.permute.xlu1 %2215 }
 0x215   :  { %2232 = vmatpush1.bf16.msra.mxu0 %v2220_v32  ;;  %v2222_v38 = vsel %vm2219_vm15, %v2214_v47, %v2216_v33 }
 0x217   :  { %v2218_v34 = vpop.permute.xlu0 %2217 }
 0x218   :  { %v2187_v57 = vpop.permute.xlu1 %2186  ;;  %v2223_v37 = vsel %vm2219_vm15, %v2216_v33, %v2218_v34 }
 0x219   :  { %2676 = vmatmul.mubr.msk.bf16.vlgmr.msra.gmra.mrb[12].mxu0 %vm216_vm2, %v2187_v57  ;;  %2272 = vmatprep.subr.bf16.mxu1 %v2223_v37 }
 0x21a   :  { %2273 = vmatpush1.bf16.msra.mxu1 %v2222_v38 }
 0x21d   :  { %2677 = vmatmul.mubr.msk.bf16.vlgmr.msra.gmra.mrb[12].mxu1 %vm216_vm2, %v2187_v57 }
 0x265   :  { %v3319_v39 = vpop.f32.mrb[4].mxu0 }
 0x266   :  { %v3321_v40 = vpop.f32.mrb[5].mxu0  ;;  %v3323_v42 = vpop.f32.mrb[4].mxu1 }
 0x267   :  { %v2323_v43 = vadd.f32 %v3321_v40, %v3319_v39  ;;  %v1244_v44 = vpop.f32.mrb[6].mxu0  ;;  %v3327_v45 = vpop.f32.mrb[5].mxu1 }
 0x268   :  { %v1245_v46 = vpop.f32.mrb[7].mxu0  ;;  %v1285_v48 = vpop.f32.mrb[6].mxu1 }
 0x269   :  { %v1286_v49 = vpop.f32.mrb[7].mxu1  ;;  %v2324_v51 = vadd.f32 %v2323_v43, %v3323_v42 }
 0x26b   :  { %v2325_v53 = vadd.f32 %v2324_v51, %v3327_v45 }
 0x26d   :  { %2326 = vadd.xlane.f32.xlu1 %v2325_v53 }
 0x291   :  { %v3331_v2 = vpop.f32.mrb[8].mxu0 }
 0x292   :  { %v3333_v0 = vpop.f32.mrb[9].mxu0  ;;  %v3335_v11 = vpop.f32.mrb[8].mxu1 }
 0x293   :  { %v2329_v4 = vadd.f32 %v3333_v0, %v3331_v2  ;;  %v1813_v50 = vpop.f32.mrb[10].mxu0  ;;  %v3339_v6 = vpop.f32.mrb[9].mxu1 }
 0x294   :  { %v1814_v7 = vpop.f32.mrb[11].mxu0  ;;  %v1854_v16 = vpop.f32.mrb[10].mxu1 }
 0x295   :  { %v1855_v17 = vpop.f32.mrb[11].mxu1  ;;  %v2330_v62 = vadd.f32 %v2329_v4, %v3335_v11 }
 0x297   :  { %v2331_v54 = vadd.f32 %v2330_v62, %v3339_v6  ;;  %v2321_v60 = vpop.xlane.xlu0 %2320 }
 0x299   :  { %2332 = vadd.xlane.f32.xlu0 %v2331_v54 }
 0x2ec   :  { %v3343_v15 = vpop.f32.mrb[12].mxu0 }
 0x2ed   :  { %v3345_v52 = vpop.f32.mrb[13].mxu0 }
 0x2ee   :  { %v2335_v21 = vadd.f32 %v3345_v52, %v3343_v15  ;;  %v2269_v22 = vpop.f32.mrb[14].mxu0 }
 0x2ef   :  { %v2270_v55 = vpop.f32.mrb[15].mxu0 }
 0x2f0   :  { %v3349_v12 = vpop.f32.mrb[12].mxu1 }
 0x2f1   :  { %v3351_v56 = vpop.f32.mrb[13].mxu1  ;;  %v2336_v9 = vadd.f32 %v2335_v21, %v3349_v12 }
 0x2f2   :  { %v2310_v58 = vpop.f32.mrb[14].mxu1 }
 0x2f3   :  { %v2311_v59 = vpop.f32.mrb[15].mxu1  ;;  %v2337_v1 = vadd.f32 %v2336_v9, %v3351_v56 }
 0x2f5   :  { %2338 = vadd.xlane.f32.xlu0 %v2337_v1 }
 0x2fa   :  { %v2327_v61 = vpop.xlane.xlu1 %2326 }
 0x2fb   :  { %v2328_v35 = vadd.f32 %v2327_v61, %v2321_v60 }
 0x326   :  { %v2333_v19 = vpop.xlane.xlu0 %2332 }
 0x327   :  { %v2334_v13 = vadd.f32 %v2333_v19, %v2328_v35 }
 0x382   :  { %v2339_v3 = vpop.xlane.xlu0 %2338 }
 0x383   :  { %v2340_v20 = vadd.f32 %v2339_v3, %v2334_v13 }
 0x385   :  { %v3355_v5 = vmul.f32 0.00048828125, %v2340_v20 }
 0x387   :  { %v2357_v8 = vsub.f32 %v3319_v39, %v3355_v5  ;;  %v2358_v63 = vsub.f32 %v3321_v40, %v3355_v5  ;;  %v2359_v10 = vsub.f32 %v3323_v42, %v3355_v5  ;;  %v2360_v14 = vsub.f32 %v3327_v45, %v3355_v5 }
 0x388   :  { %v2343_v24 = vsub.f32 %v3305_v23, %v3355_v5  ;;  %v2344_v25 = vsub.f32 %v3307_v26, %v3355_v5  ;;  %v2345_v27 = vsub.f32 %v3309_v41, %v3355_v5  ;;  %v2346_v28 = vsub.f32 %v3313_v18, %v3355_v5 }
 0x389   :  { %v2361_v29 = vmul.f32 %v2357_v8, %v2357_v8  ;;  %v2362_v36 = vmul.f32 %v2358_v63, %v2358_v63  ;;  %v2363_v47 = vmul.f32 %v2359_v10, %v2359_v10  ;;  %v2364_v30 = vmul.f32 %v2360_v14, %v2360_v14 }
 0x38a   :  { %v2347_v31 = vmul.f32 %v2343_v24, %v2343_v24  ;;  %v2348_v32 = vmul.f32 %v2344_v25, %v2344_v25  ;;  %v2349_v33 = vmul.f32 %v2345_v27, %v2345_v27  ;;  %v2385_v57 = vsub.f32 %v3343_v15, %v3355_v5  ;;  %v2400_v27 = vld [vmem:[%s3443_s3] sm:$0xff] }
 0x38b   :  { %v2365_v34 = vadd.f32 %v2362_v36, %v2361_v29  ;;  %v2386_v37 = vsub.f32 %v3345_v52, %v3355_v5  ;;  %v2387_v38 = vsub.f32 %v3349_v12, %v3355_v5  ;;  %v2350_v43 = vmul.f32 %v2346_v28, %v2346_v28  ;;  %v2404_v36 = vld [vmem:[%s3444_s4] sm:$0xff] }
 0x38c   :  { %v2351_v44 = vadd.f32 %v2348_v32, %v2347_v31  ;;  %v2371_v46 = vsub.f32 %v3331_v2, %v3355_v5  ;;  %v2372_v48 = vsub.f32 %v3333_v0, %v3355_v5  ;;  %v2388_v51 = vsub.f32 %v3351_v56, %v3355_v5 }
 0x38d   :  { %v2366_v49 = vadd.f32 %v2365_v34, %v2363_v47  ;;  %v2389_v53 = vmul.f32 %v2385_v57, %v2385_v57  ;;  %v2390_v4 = vmul.f32 %v2386_v37, %v2386_v37  ;;  %v2391_v7 = vmul.f32 %v2387_v38, %v2387_v38 }
 0x38e   :  { %v2352_v50 = vadd.f32 %v2351_v44, %v2349_v33  ;;  %v2373_v16 = vsub.f32 %v3335_v11, %v3355_v5  ;;  %v2374_v17 = vsub.f32 %v3339_v6, %v3355_v5  ;;  %v2375_v21 = vmul.f32 %v2371_v46, %v2371_v46 }
 0x38f   :  { %v2367_v62 = vadd.f32 %v2366_v49, %v2364_v30  ;;  %v2393_v54 = vadd.f32 %v2390_v4, %v2389_v53  ;;  %v2376_v22 = vmul.f32 %v2372_v48, %v2372_v48  ;;  %v2392_v9 = vmul.f32 %v2388_v51, %v2388_v51 }
 0x390   :  { %v2353_v55 = vadd.f32 %v2352_v50, %v2350_v43  ;;  %v2377_v59 = vmul.f32 %v2373_v16, %v2373_v16  ;;  %v2378_v61 = vmul.f32 %v2374_v17, %v2374_v17 }
 0x391   :  { %2368 = vadd.xlane.f32.xlu0 %v2367_v62  ;;  %v2394_v58 = vadd.f32 %v2393_v54, %v2391_v7  ;;  %v2379_v1 = vadd.f32 %v2376_v22, %v2375_v21 }
 0x392   :  { %2354 = vadd.xlane.f32.xlu1 %v2353_v55 }
 0x393   :  { %v2395_v60 = vadd.f32 %v2394_v58, %v2392_v9  ;;  %v2380_v19 = vadd.f32 %v2379_v1, %v2377_v59 }
 0x395   :  { %2396 = vadd.xlane.f32.xlu0 %v2395_v60  ;;  %v2381_v35 = vadd.f32 %v2380_v19, %v2378_v61 }
 0x397   :  { %2382 = vadd.xlane.f32.xlu1 %v2381_v35 }
 0x41e   :  { %v2369_v3 = vpop.xlane.xlu0 %2368 }
 0x41f   :  { %v2355_v13 = vpop.xlane.xlu1 %2354 }
 0x420   :  { %v2370_v20 = vadd.f32 %v2369_v3, %v2355_v13 }
 0x422   :  { %v2397_v10 = vpop.xlane.xlu0 %2396 }
 0x424   :  { %v2383_v8 = vpop.xlane.xlu1 %2382 }
 0x425   :  { %v2384_v63 = vadd.f32 %v2383_v8, %v2370_v20 }
 0x427   :  { %v2398_v14 = vadd.f32 %v2397_v10, %v2384_v63 }
 0x429   :  { %v2399_v24 = vmul.f32 0.00048828125, %v2398_v14 }
 0x42b   :  { %v2401_v25 = vadd.f32 1e-05, %v2399_v24 }
 0x42d   :  { %2826 = vrsqrt.f32 %v2401_v25 }
 0x437   :  { %v2827_v28 = vpop.eup %2826 }
 0x438   :  { %v2403_v29 = vmul.f32 %v2827_v28, %v2400_v27 }
 0x43a   :  { %2409 = vperm.xlu1 %2814, %v2403_v29   ;;  %v2405_v47 = vmul.f32 %v2403_v29, %v3355_v5 }
 0x43c   :  { %v2406_v30 = vsub.f32 %v2404_v36, %v2405_v47 }
 0x43e   :  { %2418 = vperm.xlu0 %2815, %v2406_v30  }
 0x4b9   :  { %v2410_v31 = vpop.permute.xlu1 %2409 }
 0x4ba   :  { %v2412_v32 = vmul.f32 %v2410_v31, %v3305_v23  ;;  %v2413_v33 = vmul.f32 %v2410_v31, %v3307_v26  ;;  %v2414_v34 = vmul.f32 %v2410_v31, %v3309_v41  ;;  %v2415_v57 = vmul.f32 %v2410_v31, %v3313_v18 }
 0x4bb   :  { %v2455_v37 = vmul.f32 %v2410_v31, %v3319_v39  ;;  %v2456_v38 = vmul.f32 %v2410_v31, %v3321_v40  ;;  %v2457_v43 = vmul.f32 %v2410_v31, %v3323_v42  ;;  %v2458_v44 = vmul.f32 %v2410_v31, %v3327_v45 }
 0x4bc   :  { %v2494_v5 = vmul.f32 %v2410_v31, %v3331_v2  ;;  %v2495_v46 = vmul.f32 %v2410_v31, %v3333_v0  ;;  %v2496_v23 = vmul.f32 %v2410_v31, %v3335_v11  ;;  %v2497_v26 = vmul.f32 %v2410_v31, %v3339_v6 }
 0x4bd   :  { %v2533_v41 = vmul.f32 %v2410_v31, %v3343_v15  ;;  %v2534_v18 = vmul.f32 %v2410_v31, %v3345_v52  ;;  %v2535_v39 = vmul.f32 %v2410_v31, %v3349_v12  ;;  %v2536_v40 = vmul.f32 %v2410_v31, %v3351_v56  ;;  %v2419_v48 = vpop.permute.xlu0 %2418 }
 0x4be   :  { %v2421_v42 = vadd.f32 %v2419_v48, %v2412_v32  ;;  %v2422_v49 = vadd.f32 %v2419_v48, %v2413_v33  ;;  %v2423_v45 = vadd.f32 %v2419_v48, %v2414_v34  ;;  %v2424_v51 = vadd.f32 %v2419_v48, %v2415_v57 }
 0x4bf   :  { %v2459_v2 = vadd.f32 %v2455_v37, %v2419_v48  ;;  %v2460_v53 = vadd.f32 %v2456_v38, %v2419_v48  ;;  %v2461_v0 = vadd.f32 %v2457_v43, %v2419_v48  ;;  %v2462_v4 = vadd.f32 %v2458_v44, %v2419_v48 }
 0x4c0   :  { %vm2425_vm0 = vcmp.gt.f32.partialorder %v2421_v42, 0.0  ;;  %vm2426_vm1 = vcmp.gt.f32.partialorder %v2422_v49, 0.0  ;;  %vm2427_vm2 = vcmp.gt.f32.partialorder %v2423_v45, 0.0  ;;  %vm2428_vm3 = vcmp.gt.f32.partialorder %v2424_v51, 0.0 }
 0x4c1   :  { %v2429_v11 = vmul.f32 0.2, %v2421_v42  ;;  %v2430_v6 = vmul.f32 0.2, %v2422_v49  ;;  %v2431_v15 = vmul.f32 0.2, %v2423_v45  ;;  %v2498_v52 = vadd.f32 %v2494_v5, %v2419_v48 }
 0x4c2   :  { %v2432_v12 = vmul.f32 0.2, %v2424_v51  ;;  %vm2463_vm4 = vcmp.gt.f32.partialorder %v2459_v2, 0.0  ;;  %vm2464_vm5 = vcmp.gt.f32.partialorder %v2460_v53, 0.0  ;;  %vm2465_vm6 = vcmp.gt.f32.partialorder %v2461_v0, 0.0 }
 0x4c3   :  { %v2433_v56 = vsel %vm2425_vm0, %v2421_v42, %v2429_v11  ;;  %v2434_v50 = vsel %vm2426_vm1, %v2422_v49, %v2430_v6  ;;  %v2435_v7 = vsel %vm2427_vm2, %v2423_v45, %v2431_v15  ;;  %vm2466_vm7 = vcmp.gt.f32.partialorder %v2462_v4, 0.0 }
 0x4c4   :  { %v2436_v16 = vsel %vm2428_vm3, %v2424_v51, %v2432_v12  ;;  %v2692_v17 = vpack.c.bf16 %v2434_v50, %v2433_v56  ;;  %v2467_v62 = vmul.f32 0.2, %v2459_v2  ;;  %v2468_v54 = vmul.f32 0.2, %v2460_v53 }
 0x4c5   :  { %v2693_v21 = vpack.c.bf16 %v2436_v16, %v2435_v7  ;;  %v2469_v22 = vmul.f32 0.2, %v2461_v0  ;;  %v2470_v55 = vmul.f32 0.2, %v2462_v4  ;;  %v2499_v9 = vadd.f32 %v2495_v46, %v2419_v48 }
 0x4c6   :  { %2453 = vst [vmem:[%s3445_s5] sm:$0xff] %v2692_v17  ;;  %v2471_v58 = vsel %vm2463_vm4, %v2459_v2, %v2467_v62  ;;  %v2472_v59 = vsel %vm2464_vm5, %v2460_v53, %v2468_v54  ;;  %v2500_v1 = vadd.f32 %v2496_v23, %v2419_v48  ;;  %v2501_v60 = vadd.f32 %v2497_v26, %v2419_v48 }
 0x4c7   :  { %2454 = vst [vmem:[%s3445_s5 + $0x8] sm:$0xff] %v2693_v21  ;;  %v2473_v61 = vsel %vm2465_vm6, %v2461_v0, %v2469_v22  ;;  %v2474_v19 = vsel %vm2466_vm7, %v2462_v4, %v2470_v55  ;;  %v2694_v35 = vpack.c.bf16 %v2472_v59, %v2471_v58  ;;  %vm2502_vm8 = vcmp.gt.f32.partialorder %v2498_v52, 0.0 }
 0x4c8   :  { %v2695_v13 = vpack.c.bf16 %v2474_v19, %v2473_v61  ;;  %vm2503_vm9 = vcmp.gt.f32.partialorder %v2499_v9, 0.0  ;;  %vm2504_vm10 = vcmp.gt.f32.partialorder %v2500_v1, 0.0  ;;  %vm2505_vm11 = vcmp.gt.f32.partialorder %v2501_v60, 0.0 }
 0x4c9   :  { %2682 = vst [vmem:[%s3445_s5 + $0x10] sm:$0xff] %v2694_v35  ;;  %v2506_v3 = vmul.f32 0.2, %v2498_v52  ;;  %v2507_v20 = vmul.f32 0.2, %v2499_v9  ;;  %v2537_v63 = vadd.f32 %v2533_v41, %v2419_v48  ;;  %v2538_v14 = vadd.f32 %v2534_v18, %v2419_v48 }
 0x4ca   :  { %v2508_v8 = vmul.f32 0.2, %v2500_v1  ;;  %2683 = vst [vmem:[%s3445_s5 + $0x18] sm:$0xff] %v2695_v13  ;;  %v2509_v10 = vmul.f32 0.2, %v2501_v60  ;;  %v2539_v24 = vadd.f32 %v2535_v39, %v2419_v48  ;;  %v2540_v25 = vadd.f32 %v2536_v40, %v2419_v48 }
 0x4cb   :  { %v2510_v27 = vsel %vm2502_vm8, %v2498_v52, %v2506_v3  ;;  %v2511_v28 = vsel %vm2503_vm9, %v2499_v9, %v2507_v20  ;;  %vm2541_vm12 = vcmp.gt.f32.partialorder %v2537_v63, 0.0  ;;  %vm2542_vm13 = vcmp.gt.f32.partialorder %v2538_v14, 0.0 }
 0x4cc   :  { %v2512_v29 = vsel %vm2504_vm10, %v2500_v1, %v2508_v8  ;;  %v2513_v36 = vsel %vm2505_vm11, %v2501_v60, %v2509_v10  ;;  %v2696_v47 = vpack.c.bf16 %v2511_v28, %v2510_v27  ;;  %vm2543_vm14 = vcmp.gt.f32.partialorder %v2539_v24, 0.0 }
 0x4cd   :  { %v2697_v30 = vpack.c.bf16 %v2513_v36, %v2512_v29  ;;  %vm2544_vm15 = vcmp.gt.f32.partialorder %v2540_v25, 0.0  ;;  %v2545_v31 = vmul.f32 0.2, %v2537_v63  ;;  %v2546_v32 = vmul.f32 0.2, %v2538_v14 }
 0x4ce   :  { %2686 = vst [vmem:[%s3445_s5 + $0x20] sm:$0xff] %v2696_v47  ;;  %v2547_v33 = vmul.f32 0.2, %v2539_v24  ;;  %v2548_v34 = vmul.f32 0.2, %v2540_v25 }
 0x4cf   :  { %2687 = vst [vmem:[%s3445_s5 + $0x28] sm:$0xff] %v2697_v30  ;;  %v2549_v57 = vsel %vm2541_vm12, %v2537_v63, %v2545_v31  ;;  %v2550_v37 = vsel %vm2542_vm13, %v2538_v14, %v2546_v32 }
 0x4d0   :  { %v2551_v38 = vsel %vm2543_vm14, %v2539_v24, %v2547_v33  ;;  %v2552_v43 = vsel %vm2544_vm15, %v2540_v25, %v2548_v34  ;;  %v2698_v44 = vpack.c.bf16 %v2550_v37, %v2549_v57 }
 0x4d1   :  { %v2699_v5 = vpack.c.bf16 %v2552_v43, %v2551_v38 }
 0x4d2   :  { %2690 = vst [vmem:[%s3445_s5 + $0x30] sm:$0xff] %v2698_v44 }
 0x4d3   :  { %2691 = vst [vmem:[%s3445_s5 + $0x38] sm:$0xff] %v2699_v5 }

// kernel: generator_forward.9
= control target key start
LH: loop header
LB: loop body
LE: loop exit
PB: predicated region body
PF: predicated region fallthrough
CT: control target
= control target key end

     0   :  { %v62_v0 = vlaneseq  ;;  %v7051_v2 = vmov 1983009808   ;;  %v7052_v9 = vmov 1966171168   ;;  %s7053_s23 = smov 1   ;;  %s7054_s26 = smov 2   ;;  %s9428_s1 = inlined_call_operand.vmem [shape: bf16[4,2048], index: 1, kind: input, shape index: {}]   ;;  %s9429_s2 = inlined_call_operand.vmem [shape: bf16[1,72], index: 2, kind: input, shape index: {}]   ;;  %s9430_s0 = inlined_call_operand.vmem [shape: bf16[8,2114], index: 0, kind: input, shape index: {}]   ;;  %s9431_s3 = inlined_call_operand.<no memory space> [shape: f32[1,1], index: 3, kind: input, shape index: {}]   ;;  %s9432_s4 = inlined_call_operand.vmem [shape: f32[1,2048], index: 4, kind: output, shape index: {}]  }
   0x1   :  { %v7102_v1 = vld [vmem:[%s9428_s1 + $0x8] sm:$0xff]  ;;  %v60_v3 = vunpack.c.l.s4 %v7051_v2  ;;  %v7107_v4 = vld [vmem:[%s9428_s1 + $0x10] sm:$0xff]  ;;  %v7114_v6 = vld [vmem:[%s9428_s1] sm:$0xff]  ;;  %v7123_v10 = vunpack.c.l.s4 %v7052_v9  ;;  %s7055_s27 = smov 120   ;;  %s7056_s28 = smov 32   ;;  %vm538_vm0 = vcmask 7168  }
   0x2   :  { %v7109_v5 = vshrl.u32 %v62_v0, 7  ;;  %v311_v7 = vcombine.high %v7102_v1, %v7102_v1  ;;  %v7121_v8 = vld [vmem:[%s9428_s1 + $0x18] sm:$0xff]  ;;  %v294_v12 = vcombine.high %v7114_v6, %v7114_v6  ;;  %v1486_v13 = vshrl.u32 %v7114_v6, 16  ;;  %s7057_s5 = smov 112   ;;  %s7058_s6 = smov 34  }
   0x3   :  { %v61_v11 = vunpack.c.0.s8 %v60_v3  ;;  %v1491_v14 = vshrl.u32 %v7102_v1, 16  ;;  %v328_v15 = vcombine.high %v7107_v4, %v7107_v4  ;;  %v345_v16 = vcombine.high %v7121_v8, %v7121_v8  ;;  %s7059_s7 = smov 104   ;;  %s7060_s10 = smov 127  }
   0x4   :  { %v7137_v18 = vsub.s32 0, %v7109_v5  ;;  %v6657_v19 = vrot.slane %v1486_v13, 9  ;;  %v1496_v2 = vshrl.u32 %v7107_v4, 16  ;;  %vm540_vm1 = vcmask 1043456   ;;  %s7061_s19 = smov 96   ;;  %s7066_s14 = smov 65  }
   0x5   :  { %v7134_v17 = vsub.s32 %v61_v11, %v7109_v5  ;;  %v6658_v20 = vrot.slane %v1491_v14, 9  ;;  %vm2430_vm2 = vcmask 261120   ;;  %vm1761_vm3 = vcmask 15360   ;;  %s7071_s11 = smov 63   ;;  %s7072_s12 = smov 72  }
   0x6   :  { %v1509_v11 = vmul.bf16 %v6657_v19, %v7114_v6  ;;  %vm3654_vm4 = vcmask 277504   ;;  %vm667_vm5 = vcmask 1039360   ;;  %vm684_vm6 = vcmask 64512  }
   0x7   :  { %v7142_v22 = vrot.slane %v7102_v1, %v7134_v17  ;;  %v7146_v23 = vrot.slane %v7114_v6, %v7134_v17  ;;  %v7149_v24 = vrot.slane %v311_v7, %v7134_v17  ;;  %v7152_v25 = vrot.slane %v294_v12, %v7134_v17 }
   0x8   :  { %v7155_v26 = vrot.slane %v328_v15, %v7134_v17  ;;  %v7159_v27 = vrot.slane %v7107_v4, %v7134_v17  ;;  %v7162_v28 = vrot.slane %v345_v16, %v7134_v17  ;;  %v7166_v29 = vrot.slane %v7121_v8, %v7134_v17 }
   0x9   :  { %v7170_v30 = vcombine.high %v7142_v22, %v7142_v22  ;;  %v7174_v31 = vpack.i.b16 %v7142_v22, %v7142_v22  ;;  %v7178_v32 = vcombine.high %v7146_v23, %v7146_v23  ;;  %v7182_v33 = vpack.i.b16 %v7146_v23, %v7146_v23 }
   0xa   :  { %9447 = vst [vmem:[#allocation3_spill] sm:$0xff] %v7162_v28  ;;  %v7186_v34 = vcombine.high %v7149_v24, %v7149_v24  ;;  %v7190_v35 = vpack.i.b16 %v7149_v24, %v7149_v24  ;;  %v7194_v36 = vcombine.high %v7152_v25, %v7152_v25  ;;  %v7198_v37 = vpack.i.b16 %v7152_v25, %v7152_v25 }
   0xb   :  { %v396_v38 = vrot.slane %v7174_v31, %v7137_v18  ;;  %v7204_v39 = vpack.i.b16 %v7170_v30, %v7170_v30  ;;  %v368_v40 = vrot.slane %v7182_v33, %v7137_v18  ;;  %v7210_v41 = vpack.i.b16 %v7178_v32, %v7178_v32 }
   0xc   :  { %v410_v42 = vrot.slane %v7190_v35, %v7137_v18  ;;  %v7216_v43 = vpack.i.b16 %v7186_v34, %v7186_v34  ;;  %v382_v44 = vrot.slane %v7198_v37, %v7137_v18  ;;  %v7222_v45 = vpack.i.b16 %v7194_v36, %v7194_v36 }
   0xd   :  { %v403_v46 = vrot.slane %v7204_v39, %v7137_v18  ;;  %v375_v47 = vrot.slane %v7210_v41, %v7137_v18  ;;  %v7230_v48 = vcombine.high %v7155_v26, %v7155_v26  ;;  %v7234_v49 = vpack.i.b16 %v7155_v26, %v7155_v26 }
   0xe   :  { %v417_v50 = vrot.slane %v7216_v43, %v7137_v18  ;;  %v389_v51 = vrot.slane %v7222_v45, %v7137_v18  ;;  %v7242_v52 = vcombine.high %v7159_v27, %v7159_v27  ;;  %v7246_v53 = vpack.i.b16 %v7159_v27, %v7159_v27 }
   0xf   :  { %v6586_v54 = vcombine.low %v396_v38, %v403_v46  ;;  %v6584_v55 = vcombine.low %v368_v40, %v375_v47  ;;  %v438_v56 = vrot.slane %v7234_v49, %v7137_v18  ;;  %v7252_v57 = vpack.i.b16 %v7230_v48, %v7230_v48 }
  0x10   :  { %v6587_v58 = vcombine.low %v410_v42, %v417_v50  ;;  %v6585_v59 = vcombine.low %v382_v44, %v389_v51  ;;  %v424_v60 = vrot.slane %v7246_v53, %v7137_v18  ;;  %v7258_v61 = vpack.i.b16 %v7242_v52, %v7242_v52 }
  0x11   :  { %518 = vrot.lane.b32.xlu1 %v6586_v54, %s7053_s23  ;;  %514 = vrot.lane.b32.xlu0 %v6584_v55, %s7053_s23  ;;  %v445_v62 = vrot.slane %v7252_v57, %v7137_v18  ;;  %v7266_v63 = vcombine.high %v7162_v28, %v7162_v28  ;;  %v7270_v0 = vpack.i.b16 %v7162_v28, %v7162_v28  ;;  %v6659_v54 = vrot.slane %v1496_v2, 9 }
  0x12   :  { %v431_v3 = vrot.slane %v7258_v61, %v7137_v18  ;;  %v7277_v7 = vcombine.high %v7166_v29, %v7166_v29  ;;  %v7281_v9 = vpack.i.b16 %v7166_v29, %v7166_v29  ;;  %v1510_v15 = vmul.bf16 %v6658_v20, %v7102_v1 }
  0x13   :  { %9448 = vst [vmem:[#allocation4_spill] sm:$0xff] %v7266_v63  ;;  %v6589_v12 = vcombine.low %v438_v56, %v445_v62  ;;  %v466_v13 = vrot.slane %v7270_v0, %v7137_v18  ;;  %v7288_v14 = vpack.i.b16 %v7266_v63, %v7266_v63  ;;  %v1517_v42 = vcombine.high %v1509_v11, %v1509_v11 }
  0x14   :  { %v6588_v16 = vcombine.low %v424_v60, %v431_v3  ;;  %v452_v38 = vrot.slane %v7281_v9, %v7137_v18  ;;  %v7295_v40 = vpack.i.b16 %v7277_v7, %v7277_v7  ;;  %v1524_v44 = vrot.slane %v1509_v11, %v7134_v17 }
  0x15   :  { %520 = vrot.lane.b32.xlu1 %v6587_v58, %s7053_s23  ;;  %516 = vrot.lane.b32.xlu0 %v6585_v59, %s7053_s23  ;;  %v473_v19 = vrot.slane %v7288_v14, %v7137_v18  ;;  %v1534_v46 = vcombine.high %v1510_v15, %v1510_v15  ;;  %v1501_v20 = vshrl.u32 %v7121_v8, 16  ;;  %v1531_v50 = vrot.slane %v1517_v42, %v7134_v17 }
  0x16   :  { %v459_v47 = vrot.slane %v7295_v40, %v7137_v18  ;;  %v1541_v51 = vrot.slane %v1510_v15, %v7134_v17  ;;  %v1532_v56 = vcombine.high %v1524_v44, %v1524_v44  ;;  %v1586_v58 = vpack.i.b16 %v1524_v44, %v1524_v44 }
  0x17   :  { %v6591_v55 = vcombine.low %v466_v13, %v473_v19  ;;  %v1548_v59 = vrot.slane %v1534_v46, %v7134_v17  ;;  %v1533_v62 = vcombine.high %v1531_v50, %v1531_v50  ;;  %v1600_v3 = vpack.i.b16 %v1531_v50, %v1531_v50 }
  0x18   :  { %v6590_v60 = vcombine.low %v452_v38, %v459_v47  ;;  %v1549_v11 = vcombine.high %v1541_v51, %v1541_v51  ;;  %v1591_v21 = vrot.slane %v1586_v58, %v7137_v18  ;;  %v1593_v63 = vpack.i.b16 %v1532_v56, %v1532_v56  ;;  %v7050_v56 = vld.sshfl [vmem:[%s9429_s2] sm:$0x1 pattern:$0x75316420] }
  0x19   :  { %524 = vrot.lane.b32.xlu1 %v6589_v12, %s7053_s23  ;;  %522 = vrot.lane.b32.xlu0 %v6588_v16, %s7053_s23  ;;  %v1550_v42 = vcombine.high %v1548_v59, %v1548_v59  ;;  %v6660_v28 = vrot.slane %v1501_v20, 9  ;;  %v1605_v2 = vrot.slane %v1600_v3, %v7137_v18  ;;  %v1607_v13 = vpack.i.b16 %v1533_v62, %v1533_v62 }
  0x1a   :  { %v1628_v15 = vpack.i.b16 %v1548_v59, %v1548_v59  ;;  %v1614_v19 = vpack.i.b16 %v1541_v51, %v1541_v51  ;;  %v1598_v44 = vrot.slane %v1593_v63, %v7137_v18  ;;  %v1621_v46 = vpack.i.b16 %v1549_v11, %v1549_v11 }
  0x1b   :  { %v1635_v38 = vpack.i.b16 %v1550_v42, %v1550_v42  ;;  %v9449_v47 = vunpack.c.0.s8 %v7123_v10  ;;  %v1612_v16 = vrot.slane %v1607_v13, %v7137_v18  ;;  %v1511_v51 = vmul.bf16 %v6659_v54, %v7107_v4 }
  0x1c   :  { %v1633_v50 = vrot.slane %v1628_v15, %v7137_v18  ;;  %v1619_v20 = vrot.slane %v1614_v19, %v7137_v18  ;;  %v6661_v63 = vcombine.low %v1591_v21, %v1598_v44  ;;  %v1626_v58 = vrot.slane %v1621_v46, %v7137_v18 }
  0x1d   :  { %v7316_v12 = vsub.s32 %v9449_v47, %v7109_v5  ;;  %528 = vrot.lane.b32.xlu1 %v6591_v55, %s7053_s23  ;;  %526 = vrot.lane.b32.xlu0 %v6590_v60, %s7053_s23  ;;  %v1640_v10 = vrot.slane %v1635_v38, %v7137_v18  ;;  %v6662_v59 = vcombine.low %v1605_v2, %v1612_v16  ;;  %vm1889_vm7 = vcmask 1031168  }
  0x1e   :  { %v1551_v62 = vcombine.high %v1511_v51, %v1511_v51  ;;  %v1558_v3 = vrot.slane %v1511_v51, %v7134_v17  ;;  %v1512_v11 = vmul.bf16 %v6660_v28, %v7121_v8  ;;  %v6663_v54 = vcombine.low %v1619_v20, %v1626_v58 }
  0x1f   :  { %v6664_v21 = vcombine.low %v1633_v50, %v1640_v10  ;;  %v587_v44 = vrot.slane %v7050_v56, %v7316_v12  ;;  %v7344_v10 = vsub.s32 1, %v7109_v5  ;;  %vm2558_vm8 = vcmask 785408  }
  0x20   :  { %v1565_v42 = vrot.slane %v1551_v62, %v7134_v17  ;;  %v1566_v13 = vcombine.high %v1558_v3, %v1558_v3  ;;  %v1642_v15 = vpack.i.b16 %v1558_v3, %v1558_v3  ;;  %v1568_v4 = vcombine.high %v1512_v11, %v1512_v11 }
  0x21   :  { %1739 = vrot.lane.b32.xlu1 %v6662_v59, %s7054_s26  ;;  %1737 = vrot.lane.b32.xlu0 %v6661_v63, %s7054_s26  ;;  %v1575_v55 = vrot.slane %v1512_v11, %v7134_v17  ;;  %v2317_v5 = vrot.slane %v7222_v45, %v7344_v10  ;;  %vm4483_vm9 = vcmask 523264   ;;  %vm3065_vm10 = vcmask 777216  }
  0x22   :  { %v1567_v60 = vcombine.high %v1565_v42, %v1565_v42  ;;  %v1656_v2 = vpack.i.b16 %v1565_v42, %v1565_v42  ;;  %v1649_v19 = vpack.i.b16 %v1566_v13, %v1566_v13  ;;  %v1582_v8 = vrot.slane %v1568_v4, %v7134_v17 }
  0x23   :  { %v1583_v28 = vcombine.high %v1575_v55, %v1575_v55  ;;  %v1647_v47 = vrot.slane %v1642_v15, %v7137_v18  ;;  %v1670_v16 = vpack.i.b16 %v1575_v55, %v1575_v55  ;;  %v2313_v15 = vrot.slane %v7198_v37, %v7344_v10 }
  0x24   :  { %v1661_v38 = vrot.slane %v1656_v2, %v7137_v18  ;;  %v1663_v46 = vpack.i.b16 %v1567_v60, %v1567_v60  ;;  %v1654_v50 = vrot.slane %v1649_v19, %v7137_v18  ;;  %v1584_v20 = vcombine.high %v1582_v8, %v1582_v8 }
  0x25   :  { %1743 = vrot.lane.b32.xlu1 %v6664_v21, %s7054_s26  ;;  %1741 = vrot.lane.b32.xlu0 %v6663_v54, %s7054_s26  ;;  %v1684_v51 = vpack.i.b16 %v1582_v8, %v1582_v8  ;;  %v1677_v56 = vpack.i.b16 %v1583_v28, %v1583_v28  ;;  %v1675_v42 = vrot.slane %v1670_v16, %v7137_v18  ;;  %v3478_v8 = vshrl.u32 %v7146_v23, 16 }
  0x26   :  { %v1668_v63 = vrot.slane %v1663_v46, %v7137_v18  ;;  %v1691_v59 = vpack.i.b16 %v1584_v20, %v1584_v20  ;;  %v6665_v3 = vcombine.low %v1647_v47, %v1654_v50  ;;  %v2305_v54 = vrot.slane %v7182_v33, %v7344_v10 }
  0x27   :  { %v1689_v58 = vrot.slane %v1684_v51, %v7137_v18  ;;  %v1682_v13 = vrot.slane %v1677_v56, %v7137_v18  ;;  %v2309_v55 = vrot.slane %v7210_v41, %v7344_v10  ;;  %v6704_v60 = vcombine.low %v2313_v15, %v2317_v5  ;;  %v6711_v56 = vld.sshfl [vmem:[%s9429_s2] sm:$0x1 pattern:$0x75316420] }
  0x28   :  { %v6666_v62 = vcombine.low %v1661_v38, %v1668_v63  ;;  %v1696_v11 = vrot.slane %v1691_v59, %v7137_v18  ;;  %v2329_v2 = vrot.slane %v7190_v35, %v7344_v10  ;;  %v2333_v37 = vrot.slane %v7216_v43, %v7344_v10 }
  0x29   :  { %588 = vrot.lane.b32.xlu0 %v587_v44, %s7055_s27  ;;  %v6667_v21 = vcombine.low %v1675_v42, %v1682_v13  ;;  %v6703_v45 = vcombine.low %v2305_v54, %v2309_v55  ;;  %v2321_v19 = vrot.slane %v7174_v31, %v7344_v10  ;;  %v2325_v33 = vrot.slane %v7204_v39, %v7344_v10  ;;  %s7067_s27 = smov 94  }
  0x2a   :  { %1747 = vrot.lane.b32.xlu1 %v6666_v62, %s7054_s26  ;;  %v6668_v4 = vcombine.low %v1689_v58, %v1696_v11  ;;  %v6706_v41 = vcombine.low %v2329_v2, %v2333_v37  ;;  %v2345_v44 = vrot.slane %v7234_v49, %v7344_v10  ;;  %v2349_v35 = vrot.slane %v7252_v57, %v7344_v10 }
  0x2b   :  { %v2337_v43 = vrot.slane %v7246_v53, %v7344_v10  ;;  %v3485_v31 = vshrl.u32 %v7178_v32, 16  ;;  %v6705_v39 = vcombine.low %v2321_v19, %v2325_v33  ;;  %v2341_v28 = vrot.slane %v7258_v61, %v7344_v10  ;;  %v7460_v33 = vld [vmem:[%s9430_s0] sm:$0xff] }
  0x2c   :  { %v2361_v38 = vrot.slane %v7270_v0, %v7344_v10  ;;  %v2365_v49 = vrot.slane %v7288_v14, %v7344_v10  ;;  %v6708_v57 = vcombine.low %v2345_v44, %v2349_v35  ;;  %v3492_v53 = vshrl.u32 %v7152_v25, 16 }
  0x2d   :  { %1745 = vrot.lane.b32.xlu0 %v6665_v3, %s7054_s26  ;;  %v3499_v23 = vshrl.u32 %v7194_v36, 16  ;;  %v2353_v32 = vrot.slane %v7281_v9, %v7344_v10  ;;  %v2357_v46 = vrot.slane %v7295_v40, %v7344_v10  ;;  %v3506_v61 = vshrl.u32 %v7142_v22, 16 }
  0x2e   :  { %1751 = vrot.lane.b32.xlu1 %v6668_v4, %s7054_s26  ;;  %v3513_v0 = vshrl.u32 %v7170_v30, 16  ;;  %v6707_v14 = vcombine.low %v2337_v43, %v2341_v28  ;;  %v7396_v47 = vpack.i.b16 %v3478_v8, %v3478_v8  ;;  %v7398_v16 = vpack.i.b16 %v3485_v31, %v3485_v31 }
  0x2f   :  { %v6710_v25 = vcombine.low %v2361_v38, %v2365_v49  ;;  %v7401_v36 = vpack.i.b16 %v3492_v53, %v3492_v53  ;;  %v7403_v9 = vpack.i.b16 %v3499_v23, %v3499_v23  ;;  %v3520_v40 = vshrl.u32 %v7149_v24, 16 }
  0x30   :  { %v3527_v22 = vshrl.u32 %v7186_v34, 16  ;;  %v7407_v50 = vpack.i.b16 %v3506_v61, %v3506_v61  ;;  %v6709_v30 = vcombine.low %v2353_v32, %v2357_v46  ;;  %v3484_v20 = vrot.slane %v7396_v47, %v7344_v10 }
  0x31   :  { %1749 = vrot.lane.b32.xlu0 %v6667_v21, %s7054_s26  ;;  %v3491_v51 = vrot.slane %v7398_v16, %v7344_v10  ;;  %v7414_v63 = vpack.i.b16 %v3513_v0, %v3513_v0  ;;  %v3498_v24 = vrot.slane %v7401_v36, %v7344_v10  ;;  %v3505_v34 = vrot.slane %v7403_v9, %v7344_v10 }
  0x32   :  { %2408 = vrot.lane.b32.xlu1 %v6704_v60, %s7056_s28  ;;  %v7424_v58 = vpack.i.b16 %v3520_v40, %v3520_v40  ;;  %v7426_v59 = vpack.i.b16 %v3527_v22, %v3527_v22  ;;  %v7429_v62 = vrot.slane %v6711_v56, %v7316_v12  ;;  %v3534_v3 = vshrl.u32 %v7159_v27, 16 }
  0x33   :  { %v6779_v11 = vcombine.low %v3484_v20, %v3491_v51  ;;  %v3512_v42 = vrot.slane %v7407_v50, %v7344_v10  ;;  %v3519_v13 = vrot.slane %v7414_v63, %v7344_v10  ;;  %v3541_v15 = vshrl.u32 %v7242_v52, 16 }
  0x34   :  { %v6780_v5 = vcombine.low %v3498_v24, %v3505_v34  ;;  %v3526_v4 = vrot.slane %v7424_v58, %v7344_v10  ;;  %v3533_v27 = vrot.slane %v7426_v59, %v7344_v10  ;;  %v7444_v54 = vpack.i.b16 %v3534_v3, %v3534_v3  ;;  %v7500_v3 = vld [vmem:[%s9430_s0 + $0x8] sm:$0xff] }
  0x35   :  { %2406 = vrot.lane.b32.xlu0 %v6703_v45, %s7056_s28  ;;  %v6781_v21 = vcombine.low %v3512_v42, %v3519_v13  ;;  %v7446_v55 = vpack.i.b16 %v3541_v15, %v3541_v15  ;;  %vm5151_vm11 = vcmask 531456   ;;  %vm3782_vm12 = vcmask 769024  }
  0x36   :  { %2412 = vrot.lane.b32.xlu1 %v6706_v41, %s7056_s28  ;;  %v6782_v52 = vcombine.low %v3526_v4, %v3533_v27  ;;  %v3540_v60 = vrot.slane %v7444_v54, %v7344_v10  ;;  %v7514_v27 = vld [vmem:[%s9430_s0 + $0x18] sm:$0xff]  ;;  %vm5868_vm13 = vcmask 539648   ;;  %vm5279_vm14 = vcmask 515072  }
  0x37   :  { %v3547_v2 = vrot.slane %v7446_v55, %v7344_v10  ;;  %vm5996_vm15 = vcmask 506880  }
  0x39   :  { %2410 = vrot.lane.b32.xlu0 %v6705_v39, %s7056_s28  ;;  %v6783_v37 = vcombine.low %v3540_v60, %v3547_v2 }
  0x3a   :  { %2416 = vrot.lane.b32.xlu1 %v6708_v57, %s7056_s28  ;;  %v7474_v57 = vld [vmem:[%s9430_s0 + $0x40] sm:$0xf] }
  0x3d   :  { %2414 = vrot.lane.b32.xlu0 %v6707_v14, %s7056_s28 }
  0x3e   :  { %2420 = vrot.lane.b32.xlu1 %v6710_v25, %s7056_s28 }
  0x41   :  { %2418 = vrot.lane.b32.xlu0 %v6709_v30, %s7056_s28  ;;  %s7063_s28 = smov 126  }
  0x42   :  { %1810 = vrot.lane.b32.xlu1 %v7429_v62, %s7057_s5 }
  0x45   :  { %3630 = vrot.lane.b32.xlu0 %v6779_v11, %s7058_s6 }
  0x46   :  { %3632 = vrot.lane.b32.xlu1 %v6780_v5, %s7058_s6 }
  0x49   :  { %3634 = vrot.lane.b32.xlu0 %v6781_v21, %s7058_s6 }
  0x4a   :  { %3636 = vrot.lane.b32.xlu1 %v6782_v52, %s7058_s6 }
  0x4d   :  { %2479 = vrot.lane.b32.xlu0 %v7429_v62, %s7059_s7  ;;  %s7068_s7 = smov 88  }
  0x51   :  { %3638 = vrot.lane.b32.xlu0 %v6783_v37, %s7058_s6  ;;  %v7521_v37 = vld [vmem:[%s9430_s0 + $0x10] sm:$0xff] }
  0x83   :  { %v519_v45 = vpop.permute.xlu1 %518  ;;  %v515_v19 = vpop.permute.xlu0 %514 }
  0x84   :  { %v530_v41 = vrot.slane %v515_v19, 4  ;;  %v532_v30 = vrot.slane %v519_v45, 4 }
  0x86   :  { %v539_v44 = vsel %vm538_vm0, %v530_v41, %v515_v19 }
  0x87   :  { %v564_v35 = vmul.bf16 %v539_v44, %v7460_v33  ;;  %v521_v43 = vpop.permute.xlu1 %520  ;;  %v517_v8 = vpop.permute.xlu0 %516 }
  0x88   :  { %v531_v40 = vrot.slane %v517_v8, 4  ;;  %v533_v56 = vrot.slane %v521_v43, 4 }
  0x89   :  { %v6593_v31 = vcombine.high %v564_v35, %v564_v35  ;;  %v6592_v0 = vcombine.low %v564_v35, %v564_v35 }
  0x8a   :  { %v541_v20 = vsel %vm540_vm1, %v530_v41, %v531_v40  ;;  %v545_v34 = vsel %vm540_vm1, %v532_v30, %v533_v56  ;;  %v543_v15 = vsel %vm540_vm1, %v531_v40, %v532_v30 }
  0x8b   :  { %v7464_v39 = vpop.permute.xlu1 %524  ;;  %v523_v28 = vpop.permute.xlu0 %522  ;;  %635 = vrot.lane.b32.xlu0 %v6593_v31, %s7060_s10  ;;  %v542_v11 = vsel %vm538_vm0, %v541_v20, %v517_v8  ;;  %v546_v21 = vsel %vm538_vm0, %v545_v34, %v521_v43  ;;  %v544_v19 = vsel %vm538_vm0, %v543_v15, %v519_v45  ;;  %v7535_v45 = vld [vmem:[%s9430_s0 + $0x20] sm:$0xff] }
  0x8c   :  { %v534_v5 = vrot.slane %v523_v28, 4  ;;  %v565_v52 = vmul.bf16 %v542_v11, %v7500_v3  ;;  %v535_v41 = vrot.slane %v7464_v39, 4  ;;  %v567_v35 = vmul.bf16 %v546_v21, %v7514_v27  ;;  %v7551_v11 = vld [vmem:[%s9430_s0 + $0x28] sm:$0xff] }
  0x8e   :  { %v547_v44 = vsel %vm540_vm1, %v533_v56, %v534_v5  ;;  %v6595_v8 = vcombine.high %v565_v52, %v565_v52  ;;  %v6594_v31 = vcombine.low %v565_v52, %v565_v52  ;;  %v549_v40 = vsel %vm540_vm1, %v534_v5, %v535_v41  ;;  %v7562_v52 = vld [vmem:[%s9430_s0 + $0x30] sm:$0xff] }
  0x8f   :  { %v7467_v38 = vpop.permute.xlu1 %528  ;;  %v7469_v49 = vpop.permute.xlu0 %526 }
  0x90   :  { %v537_v53 = vrot.slane %v7467_v38, 4  ;;  %v536_v30 = vrot.slane %v7469_v49, 4 }
  0x92   :  { %v572_v23 = vmul.bf16 %v537_v53, %v7474_v57  ;;  %v551_v15 = vsel %vm540_vm1, %v535_v41, %v536_v30  ;;  %v6599_v41 = vcombine.high %v567_v35, %v567_v35 }
  0x93   :  { %v7480_v32 = vpop.permute.xlu0 %1737  ;;  %v7503_v42 = vpop.permute.xlu1 %1739 }
  0x94   :  { %v6608_v46 = vcombine.low %v572_v23, %v572_v23  ;;  %v566_v23 = vmul.bf16 %v544_v19, %v7521_v37 }
  0x96   :  { %665 = vrot.lane.b32.xlu1 %v6608_v46, %s7060_s10  ;;  %v548_v46 = vsel %vm538_vm0, %v547_v44, %v523_v28  ;;  %v6598_v28 = vcombine.low %v567_v35, %v567_v35  ;;  %v6596_v34 = vcombine.low %v566_v23, %v566_v23  ;;  %v553_v44 = vsel %vm540_vm1, %v536_v30, %v537_v53 }
  0x97   :  { %v7483_v61 = vpop.permute.xlu0 %1741  ;;  %v7529_v43 = vpop.permute.xlu1 %1743  ;;  %v568_v56 = vmul.bf16 %v548_v46, %v7535_v45  ;;  %v7580_v46 = vld [vmem:[%s9430_s0 + $0x38] sm:$0xff]  ;;  %v554_v35 = vsel %vm538_vm0, %v553_v44, %v7467_v38 }
  0x99   :  { %v6600_v5 = vcombine.low %v568_v56, %v568_v56 }
  0x9a   :  { %633 = vrot.lane.b32.xlu1 %v6592_v0, %s7060_s10  ;;  %v9435_v0 = vmov 0  }
  0x9b   :  { %v7486_v14 = vpop.permute.xlu0 %588  ;;  %769 = vmatprep.mubr.bf16.mxu0 %v9435_v0  ;;  %810 = vmatprep.mubr.bf16.mxu1 %v9435_v0 }
  0x9c   :  { %v7543_v20 = vpop.permute.xlu1 %1747  ;;  %6974 = vset.pattern.permute.xlu0 %v9435_v0 }
  0x9f   :  { %v7488_v25 = vpop.permute.xlu0 %1745 }
  0xa3   :  { %v7490_v22 = vpop.permute.xlu0 %1749 }
  0xa7   :  { %v7493_v51 = vpop.permute.xlu0 %2406 }
  0xa8   :  { %v2422_v24 = vrot.slane %v7493_v51, 4 }
  0xaa   :  { %v2431_v13 = vsel %vm2430_vm2, %v2422_v24, %v7493_v51 }
  0xab   :  { %v2455_v4 = vmul.bf16 %v2431_v13, %v7460_v33  ;;  %v550_v13 = vsel %vm538_vm0, %v549_v40, %v7464_v39  ;;  %v7586_v53 = vpop.permute.xlu0 %2410 }
  0xac   :  { %v569_v21 = vmul.bf16 %v550_v13, %v7551_v11  ;;  %v1754_v13 = vrot.slane %v7503_v42, 4 }
  0xad   :  { %v6713_v60 = vcombine.high %v2455_v4, %v2455_v4  ;;  %v6712_v2 = vcombine.low %v2455_v4, %v2455_v4  ;;  %v6597_v4 = vcombine.high %v566_v23, %v566_v23  ;;  %v1753_v23 = vrot.slane %v7480_v32, 4 }
  0xae   :  { %v6602_v19 = vcombine.low %v569_v21, %v569_v21 }
  0xaf   :  { %2526 = vrot.lane.b32.xlu0 %v6713_v60, %s7061_s19  ;;  %2524 = vrot.lane.b32.xlu1 %v6712_v2, %s7061_s19  ;;  %v552_v60 = vsel %vm538_vm0, %v551_v15, %v7469_v49  ;;  %v7566_v2 = vpop.permute.xlu1 %1751  ;;  %v2424_v15 = vrot.slane %v7586_v53, 4 }
  0xb0   :  { %v570_v39 = vmul.bf16 %v552_v60, %v7562_v52 }
  0xb2   :  { %v6604_v49 = vcombine.low %v570_v39, %v570_v39  ;;  %v6605_v30 = vcombine.high %v570_v39, %v570_v39  ;;  %v1755_v39 = vrot.slane %v7483_v61, 4 }
  0xb3   :  { %639 = vrot.lane.b32.xlu0 %v6595_v8, %s7060_s10  ;;  %637 = vrot.lane.b32.xlu1 %v6594_v31, %s7060_s10  ;;  %v2409_v8 = vpop.permute.xlu1 %2408  ;;  %v6601_v31 = vcombine.high %v568_v56, %v568_v56  ;;  %v6603_v56 = vcombine.high %v569_v21, %v569_v21 }
  0xb4   :  { %v2423_v40 = vrot.slane %v2409_v8, 4 }
  0xb6   :  { %v2432_v38 = vsel %vm540_vm1, %v2422_v24, %v2423_v40  ;;  %v2434_v51 = vsel %vm540_vm1, %v2423_v40, %v2424_v15 }
  0xb7   :  { %645 = vrot.lane.b32.xlu0 %v6598_v28, %s7060_s10  ;;  %641 = vrot.lane.b32.xlu1 %v6596_v34, %s7060_s10  ;;  %v571_v28 = vmul.bf16 %v554_v35, %v7580_v46  ;;  %v1762_v34 = vsel %vm1761_vm3, %v1753_v23, %v7480_v32  ;;  %v2433_v60 = vsel %vm2430_vm2, %v2432_v38, %v2409_v8  ;;  %v1757_v38 = vrot.slane %v7488_v25, 4 }
  0xb8   :  { %v1763_v32 = vsel %vm540_vm1, %v1753_v23, %v1754_v13  ;;  %v2435_v44 = vsel %vm2430_vm2, %v2434_v51, %v7586_v53 }
  0xb9   :  { %v6606_v21 = vcombine.low %v571_v28, %v571_v28  ;;  %v1764_v8 = vsel %vm1761_vm3, %v1763_v32, %v7503_v42  ;;  %v1758_v32 = vrot.slane %v7543_v20, 4 }
  0xba   :  { %v1787_v40 = vmul.bf16 %v1764_v8, %v7500_v3  ;;  %v1759_v8 = vrot.slane %v7490_v22, 4 }
  0xbb   :  { %649 = vrot.lane.b32.xlu0 %v6600_v5, %s7060_s10  ;;  %643 = vrot.lane.b32.xlu1 %v6597_v4, %s7060_s10  ;;  %v1786_v5 = vmul.bf16 %v1762_v34, %v7460_v33  ;;  %v6607_v4 = vcombine.high %v571_v28, %v571_v28 }
  0xbc   :  { %v6672_v28 = vcombine.low %v1787_v40, %v1787_v40 }
  0xbd   :  { %v6670_v24 = vcombine.low %v1786_v5, %v1786_v5 }
  0xbf   :  { %653 = vrot.lane.b32.xlu0 %v6602_v19, %s7060_s10  ;;  %647 = vrot.lane.b32.xlu1 %v6599_v41, %s7060_s10  ;;  %v6671_v19 = vcombine.high %v1786_v5, %v1786_v5  ;;  %v2456_v41 = vmul.bf16 %v2433_v60, %v7500_v3  ;;  %v1760_v5 = vrot.slane %v7566_v2, 4 }
  0xc1   :  { %v6715_v23 = vcombine.high %v2456_v41, %v2456_v41  ;;  %v6714_v35 = vcombine.low %v2456_v41, %v2456_v41 }
  0xc3   :  { %657 = vrot.lane.b32.xlu0 %v6604_v49, %s7060_s10  ;;  %651 = vrot.lane.b32.xlu1 %v6601_v31, %s7060_s10  ;;  %v1765_v49 = vsel %vm540_vm1, %v1754_v13, %v1755_v39  ;;  %v2457_v31 = vmul.bf16 %v2435_v44, %v7521_v37  ;;  %v1771_v44 = vsel %vm540_vm1, %v1757_v38, %v1758_v32 }
  0xc5   :  { %v6716_v34 = vcombine.low %v2457_v31, %v2457_v31 }
  0xc7   :  { %659 = vrot.lane.b32.xlu0 %v6605_v30, %s7060_s10  ;;  %655 = vrot.lane.b32.xlu1 %v6603_v56, %s7060_s10  ;;  %v1766_v30 = vsel %vm1761_vm3, %v1765_v49, %v7483_v61  ;;  %v1756_v56 = vrot.slane %v7529_v43, 4 }
  0xc8   :  { %v1788_v42 = vmul.bf16 %v1766_v30, %v7521_v37  ;;  %v4195_v30 = vshll.u32 %v7114_v6, 16 }
  0xc9   :  { %v1767_v13 = vsel %vm540_vm1, %v1755_v39, %v1756_v56  ;;  %v1769_v51 = vsel %vm540_vm1, %v1756_v56, %v1757_v38 }
  0xca   :  { %v6674_v61 = vcombine.low %v1788_v42, %v1788_v42  ;;  %v1768_v60 = vsel %vm1761_vm3, %v1767_v13, %v7529_v43  ;;  %v6675_v39 = vcombine.high %v1788_v42, %v1788_v42  ;;  %v1770_v41 = vsel %vm1761_vm3, %v1769_v51, %v7488_v25  ;;  %v2413_v25 = vpop.permute.xlu1 %2412 }
  0xcb   :  { %663 = vrot.lane.b32.xlu0 %v6607_v4, %s7060_s10  ;;  %661 = vrot.lane.b32.xlu1 %v6606_v21, %s7060_s10  ;;  %v6717_v4 = vcombine.high %v2457_v31, %v2457_v31  ;;  %v1794_v21 = vmul.bf16 %v1760_v5, %v7474_v57  ;;  %v1790_v43 = vmul.bf16 %v1770_v41, %v7535_v45  ;;  %v2425_v13 = vrot.slane %v2413_v25, 4  ;;  %s7070_s10 = smov 80  }
  0xcc   :  { %v6673_v31 = vcombine.high %v1787_v40, %v1787_v40  ;;  %v1775_v40 = vsel %vm540_vm1, %v1759_v8, %v1760_v5  ;;  %v6821_v38 = vrot.slane %v4195_v30, 9  ;;  %v4199_v51 = vshll.u32 %v7102_v1, 16 }
  0xcd   :  { %v6679_v56 = vcombine.high %v1790_v43, %v1790_v43  ;;  %v3562_v5 = vshrl.u32 %v7166_v29, 16  ;;  %v3555_v29 = vshrl.u32 %v7230_v48, 16 }
  0xcf   :  { %1855 = vrot.lane.b32.xlu0 %v6670_v24, %s7063_s28  ;;  %1857 = vrot.lane.b32.xlu1 %v6671_v19, %s7063_s28  ;;  %v6686_v24 = vcombine.low %v1794_v21, %v1794_v21  ;;  %v1789_v19 = vmul.bf16 %v1768_v60, %v7514_v27  ;;  %v6678_v60 = vcombine.low %v1790_v43, %v1790_v43 }
  0xd0   :  { %v7675_v43 = vpack.i.b16 %v3562_v5, %v3562_v5 }
  0xd1   :  { %v6677_v49 = vcombine.high %v1789_v19, %v1789_v19  ;;  %v6676_v42 = vcombine.low %v1789_v19, %v1789_v19 }
  0xd2   :  { %9450 = vst [vmem:[#allocation5_spill] sm:$0xff] %v7675_v43 }
  0xd3   :  { %2530 = vrot.lane.b32.xlu0 %v6715_v23, %s7061_s19  ;;  %2528 = vrot.lane.b32.xlu1 %v6714_v35, %s7061_s19  ;;  %v1772_v23 = vsel %vm1761_vm3, %v1771_v44, %v7543_v20  ;;  %v1773_v35 = vsel %vm540_vm1, %v1758_v32, %v1759_v8  ;;  %v2415_v20 = vpop.permute.xlu0 %2414  ;;  %v1776_v32 = vsel %vm1761_vm3, %v1775_v40, %v7566_v2  ;;  %v6822_v8 = vrot.slane %v4199_v51, 9 }
  0xd4   :  { %v1793_v44 = vmul.bf16 %v1776_v32, %v7580_v46  ;;  %v3568_v40 = vrot.slane %v7675_v43, %v7344_v10  ;;  %v9454_v32 = vld [vmem:[#allocation3_spill] sm:$0xff]  ;;  %v7815_v43 = vld [vmem:[%s9428_s1 + $0x18] sm:$0xff] }
  0xd5   :  { %v3576_v51 = vshrl.u32 %v9454_v32, 16 }
  0xd7   :  { %1859 = vrot.lane.b32.xlu0 %v6672_v28, %s7063_s28  ;;  %2532 = vrot.lane.b32.xlu1 %v6716_v34, %s7061_s19  ;;  %v1791_v28 = vmul.bf16 %v1772_v23, %v7551_v11  ;;  %v1774_v34 = vsel %vm1761_vm3, %v1773_v35, %v7490_v22  ;;  %v2436_v22 = vsel %vm540_vm1, %v2424_v15, %v2425_v13  ;;  %v3548_v15 = vshrl.u32 %v7155_v26, 16  ;;  %v2417_v26 = vpop.permute.xlu1 %2416 }
  0xd8   :  { %v2437_v53 = vsel %vm2430_vm2, %v2436_v22, %v2413_v25  ;;  %v6685_v23 = vcombine.high %v1793_v44, %v1793_v44  ;;  %v9455_v22 = vld [vmem:[#allocation4_spill] sm:$0xff] }
  0xd9   :  { %v6681_v21 = vcombine.high %v1791_v28, %v1791_v28  ;;  %v6680_v2 = vcombine.low %v1791_v28, %v1791_v28  ;;  %v7681_v30 = vpack.i.b16 %v3548_v15, %v3548_v15  ;;  %v7691_v28 = vpack.i.b16 %v3555_v29, %v3555_v29 }
  0xda   :  { %v3583_v5 = vshrl.u32 %v9455_v22, 16 }
  0xdb   :  { %1863 = vrot.lane.b32.xlu0 %v6674_v61, %s7063_s28  ;;  %2534 = vrot.lane.b32.xlu1 %v6717_v4, %s7061_s19  ;;  %v1792_v61 = vmul.bf16 %v1774_v34, %v7562_v52  ;;  %v2426_v4 = vrot.slane %v2415_v20, 4  ;;  %9452 = vst [vmem:[#allocation7_spill] sm:$0xff] %v7681_v30  ;;  %9453 = vst [vmem:[#allocation8_spill] sm:$0xff] %v7691_v28  ;;  %v2419_v34 = vpop.permute.xlu0 %2418  ;;  %v7724_v22 = vpop.permute.xlu1 %2420 }
  0xdd   :  { %v2438_v19 = vsel %vm540_vm1, %v2425_v13, %v2426_v4  ;;  %v6683_v41 = vcombine.high %v1792_v61, %v1792_v61  ;;  %v6682_v35 = vcombine.low %v1792_v61, %v1792_v61  ;;  %v6684_v61 = vcombine.low %v1793_v44, %v1793_v44 }
  0xde   :  { %v6572_v44 = vrot.slane %v7114_v6, 9 }
  0xdf   :  { %1865 = vrot.lane.b32.xlu0 %v6675_v39, %s7063_s28  ;;  %1887 = vrot.lane.b32.xlu1 %v6686_v24, %s7063_s28  ;;  %v3569_v39 = vshrl.u32 %v7277_v7, 16  ;;  %v4215_v24 = vmul.bf16 %v6821_v38, %v7114_v6  ;;  %v2439_v7 = vsel %vm2430_vm2, %v2438_v19, %v2415_v20  ;;  %v2428_v20 = vrot.slane %v2419_v34, 4 }
  0xe0   :  { %v7687_v48 = vmul.bf16 %v2439_v7, %v7535_v45 }
  0xe1   :  { %v7679_v25 = vpack.i.b16 %v3569_v39, %v3569_v39 }
  0xe3   :  { %1869 = vrot.lane.b32.xlu0 %v6677_v49, %s7063_s28  ;;  %1861 = vrot.lane.b32.xlu1 %v6673_v31, %s7063_s28  ;;  %v4230_v49 = vrot.slane %v4215_v24, %v7134_v17  ;;  %v2458_v31 = vmul.bf16 %v2437_v53, %v7514_v27  ;;  %9451 = vst [vmem:[#allocation6_spill] sm:$0xff] %v7679_v25 }
  0xe5   :  { %v4238_v13 = vcombine.high %v4230_v49, %v4230_v49  ;;  %v6718_v38 = vcombine.low %v2458_v31, %v2458_v31  ;;  %v4292_v53 = vshrl.u32 %v4230_v49, 16  ;;  %v6719_v7 = vcombine.high %v2458_v31, %v2458_v31 }
  0xe6   :  { %v50_v49 = vmul.bf16 %v6572_v44, %v7114_v6 }
  0xe7   :  { %1873 = vrot.lane.b32.xlu0 %v6679_v56, %s7063_s28  ;;  %1867 = vrot.lane.b32.xlu1 %v6676_v42, %s7063_s28  ;;  %v7684_v56 = vmul.bf16 %v6822_v8, %v7102_v1  ;;  %v2427_v42 = vrot.slane %v2417_v26, 4  ;;  %v4300_v15 = vshrl.u32 %v4238_v13, 16  ;;  %v4223_v8 = vcombine.high %v4215_v24, %v4215_v24 }
  0xe8   :  { %v6573_v24 = vrot.slane %v7102_v1, 9  ;;  %v4293_v31 = vpack.i.b16 %v4292_v53, %v4292_v53  ;;  %v58_v44 = vcombine.high %v50_v49, %v50_v49 }
  0xe9   :  { %v4247_v39 = vrot.slane %v7684_v56, %v7134_v17  ;;  %v2440_v19 = vsel %vm540_vm1, %v2426_v4, %v2427_v42  ;;  %v2442_v29 = vsel %vm540_vm1, %v2427_v42, %v2428_v20  ;;  %v4301_v13 = vpack.i.b16 %v4300_v15, %v4300_v15 }
  0xea   :  { %v2441_v4 = vsel %vm2430_vm2, %v2440_v19, %v2417_v26  ;;  %v2443_v42 = vsel %vm2430_vm2, %v2442_v29, %v2419_v34  ;;  %v4237_v26 = vrot.slane %v4223_v8, %v7134_v17  ;;  %v9437_v19 = vrot.slane %v7724_v22, 4 }
  0xeb   :  { %1877 = vrot.lane.b32.xlu0 %v6681_v21, %s7063_s28  ;;  %1871 = vrot.lane.b32.xlu1 %v6678_v60, %s7063_s28  ;;  %v3575_v21 = vrot.slane %v7679_v25, %v7344_v10  ;;  %v3554_v60 = vrot.slane %v7681_v30, %v7344_v10  ;;  %v2461_v34 = vmul.bf16 %v2443_v42, %v7562_v52 }
  0xec   :  { %v6721_v15 = vcombine.high %v7687_v48, %v7687_v48  ;;  %v2444_v29 = vsel %vm540_vm1, %v2428_v20, %v9437_v19 }
  0xef   :  { %1881 = vrot.lane.b32.xlu0 %v6683_v41, %s7063_s28  ;;  %1875 = vrot.lane.b32.xlu1 %v6680_v2, %s7063_s28  ;;  %v6720_v41 = vcombine.low %v7687_v48, %v7687_v48  ;;  %v3561_v2 = vrot.slane %v7691_v28, %v7344_v10  ;;  %v6724_v48 = vcombine.low %v2461_v34, %v2461_v34 }
  0xf1   :  { %v6784_v32 = vcombine.low %v3554_v60, %v3561_v2  ;;  %v7028_v60 = vld [vmem:[%s9428_s1 + $0x8] sm:$0xff]  ;;  %v4239_v2 = vcombine.high %v4237_v26, %v4237_v26 }
  0xf3   :  { %1885 = vrot.lane.b32.xlu0 %v6685_v23, %s7063_s28  ;;  %1879 = vrot.lane.b32.xlu1 %v6682_v35, %s7063_s28  ;;  %v7713_v23 = vpack.i.b16 %v3576_v51, %v3576_v51  ;;  %v7715_v35 = vpack.i.b16 %v3583_v5, %v3583_v5  ;;  %v2460_v51 = vmul.bf16 %v2441_v4, %v7551_v11  ;;  %v4324_v5 = vshrl.u32 %v4247_v39, 16 }
  0xf4   :  { %v4308_v4 = vshrl.u32 %v4237_v26, 16  ;;  %v4316_v42 = vshrl.u32 %v4239_v2, 16  ;;  %v2445_v26 = vsel %vm2430_vm2, %v2444_v29, %v7724_v22  ;;  %v6725_v29 = vcombine.high %v2461_v34, %v2461_v34 }
  0xf5   :  { %9456 = vst [vmem:[#allocation3_spill] sm:$0xff] %v7713_v23  ;;  %9457 = vst [vmem:[#allocation4_spill] sm:$0xff] %v7715_v35  ;;  %v3589_v6 = vrot.slane %v7715_v35, %v7344_v10  ;;  %v6722_v53 = vcombine.low %v2460_v51, %v2460_v51  ;;  %v7746_v8 = vpack.i.b16 %v4324_v5, %v4324_v5  ;;  %v7774_v5 = vpop.permute.xlu1 %1810 }
  0xf6   :  { %9458 = vst [vmem:[#allocation9_spill] sm:$0xff] %v7774_v5  ;;  %v4317_v0 = vpack.i.b16 %v4316_v42, %v4316_v42 }
  0xf7   :  { %2536 = vrot.lane.b32.xlu0 %v6718_v38, %s7061_s19  ;;  %1883 = vrot.lane.b32.xlu1 %v6684_v61, %s7063_s28  ;;  %v4255_v38 = vcombine.high %v4247_v39, %v4247_v39  ;;  %v6785_v61 = vcombine.low %v3568_v40, %v3575_v21  ;;  %v3582_v40 = vrot.slane %v7713_v23, %v7344_v10 }
  0xf8   :  { %v7735_v21 = vrot.slane %v50_v49, %v7134_v17  ;;  %v7740_v39 = vmul.bf16 %v7028_v60, %v6573_v24  ;;  %v4306_v10 = vrot.slane %v4301_v13, %v7137_v18  ;;  %v7770_v13 = vpop.permute.xlu0 %3630 }
  0xf9   :  { %v4332_v1 = vshrl.u32 %v4255_v38, 16  ;;  %v7754_v38 = vld [vmem:[%s9428_s1 + $0x10] sm:$0xff]  ;;  %v6786_v49 = vcombine.low %v3582_v40, %v3589_v6  ;;  %v4330_v40 = vrot.slane %v7746_v8, %v7137_v18  ;;  %s7064_s1 = smov 64  }
  0xfa   :  { %v7765_v20 = vrot.slane %v7740_v39, %v7134_v17  ;;  %v5692_v60 = vshrl.u32 %v7735_v21, 16 }
  0xfb   :  { %2540 = vrot.lane.b32.xlu0 %v6720_v41, %s7061_s19  ;;  %2538 = vrot.lane.b32.xlu1 %v6719_v7, %s7061_s19  ;;  %v4298_v41 = vrot.slane %v4293_v31, %v7137_v18  ;;  %v4333_v7 = vpack.i.b16 %v4332_v1, %v4332_v1  ;;  %v7768_v31 = vrot.slane %v58_v44, %v7134_v17 }
  0xfc   :  { %v6723_v1 = vcombine.high %v2460_v51, %v2460_v51  ;;  %v7785_v2 = vcombine.high %v7765_v20, %v7765_v20  ;;  %v5693_v51 = vpack.i.b16 %v5692_v60, %v5692_v60  ;;  %v4240_v60 = vcombine.high %v7684_v56, %v7684_v56 }
  0xfd   :  { %v6825_v24 = vcombine.low %v4298_v41, %v4306_v10  ;;  %v4338_v6 = vrot.slane %v4333_v7, %v7137_v18  ;;  %v4309_v41 = vpack.i.b16 %v4308_v4, %v4308_v4  ;;  %v7790_v8 = vcombine.high %v7768_v31, %v7768_v31 }
  0xfe   :  { %v5698_v7 = vrot.slane %v5693_v51, %v7137_v18  ;;  %v5706_v34 = vshrl.u32 %v7768_v31, 16  ;;  %v9460_v56 = vrot.slane %v7724_v22, 4 }
  0xff   :  { %3642 = vrot.lane.b32.xlu0 %v6785_v61, %s7058_s6  ;;  %3640 = vrot.lane.b32.xlu1 %v6784_v32, %s7058_s6  ;;  %v4203_v61 = vshll.u32 %v7754_v38, 16  ;;  %v7761_v32 = vcombine.high %v7735_v21, %v7735_v21  ;;  %v5713_v42 = vshrl.u32 %v7790_v8, 16 }
 0x100   :  { %v2463_v35 = vmul.bf16 %v9460_v56, %v7474_v57  ;;  %v5707_v23 = vpack.i.b16 %v5706_v34, %v5706_v34  ;;  %v4254_v34 = vrot.slane %v4240_v60, %v7134_v17 }
 0x101   :  { %v6823_v10 = vrot.slane %v4203_v61, 9  ;;  %v5720_v61 = vshrl.u32 %v7765_v20, 16  ;;  %v5714_v5 = vpack.i.b16 %v5713_v42, %v5713_v42 }
 0x102   :  { %v5712_v22 = vrot.slane %v5707_v23, %v7137_v18  ;;  %v6728_v56 = vcombine.low %v2463_v35, %v2463_v35  ;;  %v4256_v60 = vcombine.high %v4254_v34, %v4254_v34 }
 0x103   :  { %2544 = vrot.lane.b32.xlu0 %v6722_v53, %s7061_s19  ;;  %2542 = vrot.lane.b32.xlu1 %v6721_v15, %s7061_s19  ;;  %v5699_v53 = vshrl.u32 %v7761_v32, 16  ;;  %v2462_v15 = vmul.bf16 %v2445_v26, %v7580_v46  ;;  %v7801_v26 = vpop.permute.xlu0 %3634 }
 0x105   :  { %v5700_v44 = vpack.i.b16 %v5699_v53, %v5699_v53  ;;  %v7803_v53 = vpop.permute.xlu1 %3632  ;;  %v6726_v25 = vcombine.low %v2462_v15, %v2462_v15 }
 0x107   :  { %2548 = vrot.lane.b32.xlu0 %v6724_v48, %s7061_s19  ;;  %2546 = vrot.lane.b32.xlu1 %v6723_v1, %s7061_s19  ;;  %v5705_v4 = vrot.slane %v5700_v44, %v7137_v18  ;;  %v5727_v48 = vshrl.u32 %v7785_v2, 16  ;;  %v4217_v1 = vmul.bf16 %v7754_v38, %v6823_v10  ;;  %v5721_v44 = vpack.i.b16 %v5720_v61, %v5720_v61 }
 0x108   :  { %v6727_v10 = vcombine.high %v2462_v15, %v2462_v15  ;;  %v4322_v15 = vrot.slane %v4317_v0, %v7137_v18 }
 0x109   :  { %v7807_v51 = vcombine.low %v5698_v7, %v5705_v4  ;;  %v5728_v19 = vpack.i.b16 %v5727_v48, %v5727_v48  ;;  %v4314_v4 = vrot.slane %v4309_v41, %v7137_v18  ;;  %v4264_v61 = vrot.slane %v4217_v1, %v7134_v17  ;;  %v7834_v41 = vpop.permute.xlu1 %3636 }
 0x10a   :  { %v5719_v48 = vrot.slane %v5714_v5, %v7137_v18 }
 0x10b   :  { %2550 = vrot.lane.b32.xlu0 %v6725_v29, %s7061_s19  ;;  %3644 = vrot.lane.b32.xlu1 %v6786_v49, %s7058_s6  ;;  %9459 = vst [vmem:[#allocation10_spill] sm:$0xff] %v7807_v51  ;;  %v4207_v29 = vshll.u32 %v7815_v43, 16  ;;  %v5726_v49 = vrot.slane %v5721_v44, %v7137_v18  ;;  %v5733_v7 = vrot.slane %v5728_v19, %v7137_v18  ;;  %v7832_v19 = vpop.permute.xlu0 %2479  ;;  %s7065_s6 = smov 95  }
 0x10c   :  { %v7830_v44 = vcombine.low %v5712_v22, %v5719_v48  ;;  %9463 = vst [vmem:[#allocation13_spill] sm:$0xff] %v7832_v19  ;;  %v6827_v51 = vcombine.low %v4330_v40, %v4338_v6  ;;  %v4272_v5 = vcombine.high %v4264_v61, %v4264_v61  ;;  %v6826_v0 = vcombine.low %v4314_v4, %v4322_v15 }
 0x10d   :  { %v7828_v42 = vcombine.low %v5726_v49, %v5733_v7  ;;  %v6824_v23 = vrot.slane %v4207_v29, 9  ;;  %v6747_v49 = vcombine.high %v7460_v33, %v7460_v33  ;;  %v4356_v7 = vshrl.u32 %v4264_v61, 16  ;;  %v7843_v35 = vpop.permute.xlu1 %665 }
 0x10e   :  { %9462 = vst [vmem:[#allocation12_spill] sm:$0xff] %v7830_v44  ;;  %v4364_v22 = vshrl.u32 %v4272_v5, 16  ;;  %v4340_v40 = vshrl.u32 %v4254_v34, 16  ;;  %v4348_v6 = vshrl.u32 %v4256_v60, 16  ;;  %v6749_v4 = vcombine.high %v7500_v3, %v7500_v3 }
 0x10f   :  { %2554 = vrot.lane.b32.xlu0 %v6727_v10, %s7061_s19  ;;  %2552 = vrot.lane.b32.xlu1 %v6726_v25, %s7061_s19  ;;  %9461 = vst [vmem:[#allocation11_spill] sm:$0xff] %v7828_v42  ;;  %v4257_v25 = vcombine.high %v4217_v1, %v4217_v1  ;;  %v4218_v10 = vmul.bf16 %v7815_v43, %v6824_v23  ;;  %v7841_v48 = vpop.permute.xlu0 %3638 }
 0x110   :  { %v6748_v61 = vcombine.low %v7500_v3, %v7500_v3  ;;  %v4357_v15 = vpack.i.b16 %v4356_v7, %v4356_v7  ;;  %v4349_v34 = vpack.i.b16 %v4348_v6, %v4348_v6  ;;  %v6750_v60 = vcombine.low %v7521_v37, %v7521_v37 }
 0x111   :  { %v4271_v1 = vrot.slane %v4257_v25, %v7134_v17  ;;  %v4281_v29 = vrot.slane %v4218_v10, %v7134_v17  ;;  %v9446_v6 = vrot.slane %v7770_v13, 4  ;;  %v4274_v44 = vcombine.high %v4218_v10, %v4218_v10 }
 0x112   :  { %v4362_v42 = vrot.slane %v4357_v15, %v7137_v18 }
 0x113   :  { %4459 = vrot.lane.b32.xlu0 %v6825_v24, %s7064_s1  ;;  %2556 = vrot.lane.b32.xlu1 %v6728_v56, %s7061_s19  ;;  %v6746_v24 = vcombine.low %v7460_v33, %v7460_v33  ;;  %v4365_v56 = vpack.i.b16 %v4364_v22, %v4364_v22  ;;  %v4273_v23 = vcombine.high %v4271_v1, %v4271_v1  ;;  %v636_v5 = vpop.permute.xlu0 %635  ;;  %v4388_v15 = vshrl.u32 %v4281_v29, 16 }
 0x114   :  { %v4289_v25 = vcombine.high %v4281_v29, %v4281_v29  ;;  %v4354_v22 = vrot.slane %v4349_v34, %v7137_v18  ;;  %v6752_v29 = vcombine.low %v7514_v27, %v7514_v27  ;;  %v6754_v34 = vcombine.low %v7535_v45, %v7535_v45 }
 0x115   :  { %v4370_v7 = vrot.slane %v4365_v56, %v7137_v18 }
 0x116   :  { %v4396_v30 = vshrl.u32 %v4289_v25, 16 }
 0x117   :  { %4463 = vrot.lane.b32.xlu0 %v6827_v51, %s7064_s1  ;;  %4461 = vrot.lane.b32.xlu1 %v6826_v0, %s7064_s1  ;;  %v4341_v51 = vpack.i.b16 %v4340_v40, %v4340_v40  ;;  %v634_v0 = vpop.permute.xlu1 %633  ;;  %v4380_v40 = vshrl.u32 %v4273_v23, 16 }
 0x119   :  { %v4381_v56 = vpack.i.b16 %v4380_v40, %v4380_v40 }
 0x11b   :  { %3033 = vrot.lane.b32.xlu0 %v6747_v49, %s7065_s6  ;;  %3031 = vrot.lane.b32.xlu1 %v6746_v24, %s7065_s6  ;;  %v4346_v49 = vrot.slane %v4341_v51, %v7137_v18  ;;  %v4372_v24 = vshrl.u32 %v4271_v1, 16  ;;  %v6751_v51 = vcombine.high %v7521_v37, %v7521_v37 }
 0x11d   :  { %v6828_v10 = vcombine.low %v4346_v49, %v4354_v22  ;;  %v4373_v1 = vpack.i.b16 %v4372_v24, %v4372_v24  ;;  %v4397_v49 = vpack.i.b16 %v4396_v30, %v4396_v30  ;;  %v127_v24 = vpack.i.b16 %v7735_v21, %v7735_v21 }
 0x11e   :  { %v5026_v21 = vrot.slane %v7396_v47, %v7137_v18  ;;  %v8095_v47 = vld [vmem:[%s9430_s0 + $0x18] sm:$0xff] }
 0x11f   :  { %3037 = vrot.lane.b32.xlu0 %v6749_v4, %s7065_s6  ;;  %3035 = vrot.lane.b32.xlu1 %v6748_v61, %s7065_s6  ;;  %v7874_v4 = vsel %vm3654_vm4, %v9446_v6, %v7770_v13  ;;  %v6829_v61 = vcombine.low %v4362_v42, %v4370_v7  ;;  %v4288_v42 = vrot.slane %v4274_v44, %v7134_v17 }
 0x120   :  { %v4389_v7 = vpack.i.b16 %v4388_v15, %v4388_v15  ;;  %v4402_v30 = vrot.slane %v4397_v49, %v7137_v18 }
 0x121   :  { %v7866_v19 = vpop.permute.xlu0 %2526  ;;  %v7868_v28 = vpop.permute.xlu1 %2524  ;;  %v4290_v6 = vcombine.high %v4288_v42, %v4288_v42  ;;  %v4404_v40 = vshrl.u32 %v4288_v42, 16  ;;  %v6759_v42 = vcombine.high %v7562_v52, %v7562_v52 }
 0x123   :  { %2986 = vrot.lane.b32.xlu0 %v7429_v62, %s7061_s19  ;;  %3039 = vrot.lane.b32.xlu1 %v6750_v60, %s7065_s6  ;;  %v668_v62 = vsel %vm667_vm5, %v634_v0, %v636_v5  ;;  %v6753_v60 = vcombine.high %v7514_v27, %v7514_v27  ;;  %v4378_v0 = vrot.slane %v4373_v1, %v7137_v18 }
 0x124   :  { %v4386_v27 = vrot.slane %v4381_v56, %v7137_v18  ;;  %v690_v15 = vsel %vm540_vm1, %v668_v62, 0  ;;  %v4394_v56 = vrot.slane %v4389_v7, %v7137_v18  ;;  %v134_v62 = vpack.i.b16 %v7761_v32, %v7761_v32 }
 0x125   :  { %v640_v23 = vpop.permute.xlu0 %639  ;;  %v638_v25 = vpop.permute.xlu1 %637 }
 0x126   :  { %v669_v22 = vsel %vm667_vm5, %v636_v5, %v638_v25  ;;  %v6574_v5 = vrot.slane %v7754_v38, 9  ;;  %v670_v1 = vsel %vm667_vm5, %v638_v25, %v640_v23  ;;  %v6830_v32 = vcombine.low %v4378_v0, %v4386_v27 }
 0x127   :  { %4467 = vrot.lane.b32.xlu0 %v6829_v61, %s7064_s1  ;;  %4465 = vrot.lane.b32.xlu1 %v6828_v10, %s7064_s1  ;;  %v75_v61 = vcombine.high %v7740_v39, %v7740_v39  ;;  %v696_v7 = vsel %vm540_vm1, %v670_v1, 0  ;;  %v9464_v25 = vmov 0   ;;  %v4412_v39 = vshrl.u32 %v4290_v6, 16 }
 0x128   :  { %6609 = vmatprep.subr.msk.bf16.mxu0 %vm540_vm1, %v669_v22  ;;  %v139_v27 = vrot.slane %v134_v62, %v7137_v18  ;;  %v148_v6 = vpack.i.b16 %v7790_v8, %v7790_v8 }
 0x129   :  { %738 = vmatpush1.bf16.msra.mxu0 %v690_v15  ;;  %v646_v10 = vpop.permute.xlu0 %645  ;;  %v642_v44 = vpop.permute.xlu1 %641 }
 0x12a   :  { %v671_v22 = vsel %vm667_vm5, %v640_v23, %v642_v44  ;;  %v52_v23 = vmul.bf16 %v7754_v38, %v6574_v5  ;;  %v6831_v38 = vcombine.low %v4394_v56, %v4402_v30  ;;  %v7936_v5 = vpack.i.b16 %v4404_v40, %v4404_v40 }
 0x12b   :  { %3043 = vrot.lane.b32.xlu0 %v6752_v29, %s7065_s6  ;;  %3041 = vrot.lane.b32.xlu1 %v6751_v51, %s7065_s6  ;;  %v5030_v29 = vrot.slane %v7398_v16, %v7137_v18  ;;  %v7933_v51 = vrot.slane %v75_v61, %v7134_v17  ;;  %v141_v61 = vpack.i.b16 %v7768_v31, %v7768_v31 }
 0x12c   :  { %6610 = vmatmul.mubr.msk.bf16.vlgmr.msra.gmra.mrb[0].mxu0 %vm684_vm6, %v7486_v14  ;;  %6611 = vmatprep.subr.msk.bf16.mxu1 %vm540_vm1, %v671_v22  ;;  %v132_v22 = vrot.slane %v127_v24, %v7137_v18  ;;  %v155_v24 = vpack.i.b16 %v7765_v20, %v7765_v20  ;;  %v7952_v40 = vrot.slane %v52_v23, %v7134_v17 }
 0x12d   :  { %779 = vmatpush1.bf16.msra.mxu1 %v696_v7  ;;  %v650_v49 = vpop.permute.xlu0 %649  ;;  %v644_v15 = vpop.permute.xlu1 %643  ;;  %851 = vmatprep.mubr.bf16.mxu0 %v9464_v25  ;;  %v7963_v8 = vcombine.high %v7933_v51, %v7933_v51  ;;  %v4413_v56 = vpack.i.b16 %v4412_v39, %v4412_v39  ;;  %v92_v62 = vcombine.high %v52_v23, %v52_v23  ;;  %v6575_v7 = vrot.slane %v7815_v43, 9 }
 0x12e   :  { %v672_v1 = vsel %vm667_vm5, %v642_v44, %v644_v15  ;;  %v673_v0 = vsel %vm667_vm5, %v644_v15, %v646_v10  ;;  %v4410_v44 = vrot.slane %v7936_v5, %v7137_v18  ;;  %v153_v31 = vrot.slane %v148_v6, %v7137_v18 }
 0x12f   :  { %3047 = vrot.lane.b32.xlu0 %v6754_v34, %s7065_s6  ;;  %3045 = vrot.lane.b32.xlu1 %v6753_v60, %s7065_s6  ;;  %v702_v30 = vsel %vm540_vm1, %v672_v1, 0  ;;  %v162_v34 = vpack.i.b16 %v7785_v2, %v7785_v2  ;;  %v6576_v1 = vcombine.low %v132_v22, %v139_v27  ;;  %v160_v39 = vrot.slane %v155_v24, %v7137_v18 }
 0x130   :  { %6612 = vmatmul.mubr.msk.bf16.vlgmr.msra.gmra.mrb[0].mxu1 %vm684_vm6, %v7486_v14  ;;  %6613 = vmatprep.subr.msk.bf16.mxu0 %vm540_vm1, %v673_v0  ;;  %v146_v0 = vrot.slane %v141_v61, %v7137_v18  ;;  %v7979_v23 = vcombine.high %v7952_v40, %v7952_v40  ;;  %v4418_v27 = vrot.slane %v4413_v56, %v7137_v18 }
 0x131   :  { %820 = vmatpush1.bf16.msra.mxu0 %v702_v30  ;;  %v654_v20 = vpop.permute.xlu0 %653  ;;  %v648_v60 = vpop.permute.xlu1 %647  ;;  %892 = vmatprep.mubr.bf16.mxu1 %v9464_v25  ;;  %v7992_v61 = vrot.slane %v92_v62, %v7134_v17  ;;  %v53_v6 = vmul.bf16 %v7815_v43, %v6575_v7  ;;  %v9466_v56 = vcombine.high %v7535_v45, %v7535_v45 }
 0x132   :  { %v674_v15 = vsel %vm667_vm5, %v646_v10, %v648_v60  ;;  %v675_v2 = vsel %vm667_vm5, %v648_v60, %v650_v49  ;;  %v167_v10 = vrot.slane %v162_v34, %v7137_v18  ;;  %v5042_v60 = vrot.slane %v7407_v50, %v7137_v18 }
 0x133   :  { %4471 = vrot.lane.b32.xlu0 %v6831_v38, %s7064_s1  ;;  %4469 = vrot.lane.b32.xlu1 %v6830_v32, %s7064_s1  ;;  %v708_v30 = vsel %vm540_vm1, %v674_v15, 0  ;;  %v169_v32 = vpack.i.b16 %v7933_v51, %v7933_v51  ;;  %v176_v38 = vpack.i.b16 %v7963_v8, %v7963_v8  ;;  %v183_v15 = vpack.i.b16 %v7952_v40, %v7952_v40 }
 0x134   :  { %6614 = vmatmul.mubr.msk.bf16.vlgmr.msra.gmra.mrb[4].mxu0 %vm684_vm6, %v7486_v14  ;;  %6615 = vmatprep.subr.msk.bf16.mxu1 %vm540_vm1, %v675_v2  ;;  %v9465_v2 = vcombine.low %v7551_v11, %v7551_v11  ;;  %v6577_v62 = vcombine.low %v146_v0, %v153_v31  ;;  %v190_v7 = vpack.i.b16 %v7979_v23, %v7979_v23 }
 0x135   :  { %861 = vmatpush1.bf16.msra.mxu1 %v708_v30  ;;  %v658_v5 = vpop.permute.xlu0 %657  ;;  %v652_v22 = vpop.permute.xlu1 %651  ;;  %933 = vmatprep.mubr.bf16.mxu0 %v9464_v25  ;;  %v6578_v30 = vcombine.low %v160_v39, %v167_v10  ;;  %v181_v45 = vrot.slane %v176_v38, %v7137_v18  ;;  %v8023_v31 = vcombine.high %v7992_v61, %v7992_v61 }
 0x136   :  { %v676_v24 = vsel %vm667_vm5, %v650_v49, %v652_v22  ;;  %v677_v34 = vsel %vm667_vm5, %v652_v22, %v654_v20  ;;  %v8011_v49 = vmul.bf16 %v6576_v1, %v7460_v33  ;;  %v174_v22 = vrot.slane %v169_v32, %v7137_v18 }
 0x137   :  { %3051 = vrot.lane.b32.xlu0 %v9465_v2, %s7065_s6  ;;  %3049 = vrot.lane.b32.xlu1 %v9466_v56, %s7065_s6  ;;  %v714_v43 = vsel %vm540_vm1, %v676_v24, 0  ;;  %v6832_v33 = vcombine.low %v4410_v44, %v4418_v27  ;;  %v8026_v1 = vrot.slane %v53_v6, %v7134_v17  ;;  %v188_v10 = vrot.slane %v183_v15, %v7137_v18 }
 0x138   :  { %6616 = vmatmul.mubr.msk.bf16.vlgmr.msra.gmra.mrb[4].mxu1 %vm684_vm6, %v7486_v14  ;;  %6617 = vmatprep.subr.msk.bf16.mxu0 %vm540_vm1, %v677_v34  ;;  %v109_v32 = vcombine.high %v53_v6, %v53_v6  ;;  %v9467_v38 = vcombine.low %v7562_v52, %v7562_v52  ;;  %v9468_v44 = vcombine.high %v7551_v11, %v7551_v11 }
 0x139   :  { %902 = vmatpush1.bf16.msra.mxu0 %v714_v43  ;;  %v660_v2 = vpop.permute.xlu0 %659  ;;  %v656_v24 = vpop.permute.xlu1 %655  ;;  %974 = vmatprep.mubr.bf16.mxu1 %v9464_v25  ;;  %v8043_v34 = vmul.bf16 %v6577_v62, %v7500_v3  ;;  %v195_v6 = vrot.slane %v190_v7, %v7137_v18  ;;  %v8050_v15 = vmul.bf16 %v6578_v30, %v7521_v37  ;;  %v3647_v43 = vrot.slane %v7803_v53, 4 }
 0x13a   :  { %v678_v0 = vsel %vm667_vm5, %v654_v20, %v656_v24  ;;  %v679_v39 = vsel %vm667_vm5, %v656_v24, %v658_v5  ;;  %v6625_v20 = vcombine.low %v8011_v49, %v8011_v49  ;;  %v6579_v11 = vcombine.low %v174_v22, %v181_v45 }
 0x13b   :  { %3055 = vrot.lane.b32.xlu0 %v9467_v38, %s7065_s6  ;;  %3053 = vrot.lane.b32.xlu1 %v9468_v44, %s7065_s6  ;;  %v720_v27 = vsel %vm540_vm1, %v678_v0, 0  ;;  %v197_v56 = vpack.i.b16 %v7992_v61, %v7992_v61  ;;  %v680_v24 = vsel %vm667_vm5, %v658_v5, %v660_v2  ;;  %v204_v7 = vpack.i.b16 %v8023_v31, %v8023_v31 }
 0x13c   :  { %6618 = vmatmul.mubr.msk.bf16.vlgmr.msra.gmra.mrb[8].mxu0 %vm684_vm6, %v7486_v14  ;;  %6619 = vmatprep.subr.msk.bf16.mxu1 %vm540_vm1, %v679_v39  ;;  %v8061_v37 = vcombine.high %v8026_v1, %v8026_v1  ;;  %v8068_v5 = vrot.slane %v109_v32, %v7134_v17  ;;  %v6626_v17 = vcombine.high %v8011_v49, %v8011_v49  ;;  %v726_v52 = vsel %vm540_vm1, %v680_v24, 0 }
 0x13d   :  { %943 = vmatpush1.bf16.msra.mxu1 %v720_v27  ;;  %v664_v3 = vpop.permute.xlu0 %663  ;;  %v662_v62 = vpop.permute.xlu1 %661  ;;  %1015 = vmatprep.mubr.bf16.mxu0 %v9464_v25  ;;  %v6627_v16 = vcombine.low %v8043_v34, %v8043_v34  ;;  %v209_v39 = vrot.slane %v204_v7, %v7137_v18  ;;  %v1109_v32 = vsel %vm540_vm1, %v6625_v20, 0  ;;  %v6630_v38 = vcombine.high %v8050_v15, %v8050_v15 }
 0x13e   :  { %v682_v30 = vsel %vm667_vm5, %v662_v62, %v664_v3  ;;  %v681_v22 = vsel %vm667_vm5, %v660_v2, %v662_v62  ;;  %v683_v45 = vsel %vm667_vm5, %v664_v3, %v7843_v35  ;;  %v6867_v2 = vcombine.low %v5026_v21, %v5030_v29 }
 0x13f   :  { %3057 = vrot.lane.b32.xlu0 %v6759_v42, %s7065_s6  ;;  %4473 = vrot.lane.b32.xlu1 %v6832_v33, %s7064_s1  ;;  %v732_v0 = vsel %vm540_vm1, %v682_v30, 0  ;;  %v6580_v35 = vcombine.low %v188_v10, %v195_v6  ;;  %v6628_v42 = vcombine.high %v8043_v34, %v8043_v34  ;;  %v8098_v21 = vmul.bf16 %v8095_v47, %v6579_v11 }
 0x140   :  { %6620 = vmatmul.mubr.msk.bf16.vlgmr.msra.gmra.mrb[8].mxu1 %vm684_vm6, %v7486_v14  ;;  %6621 = vmatprep.subr.msk.bf16.mxu0 %vm540_vm1, %v681_v22  ;;  %v202_v33 = vrot.slane %v197_v56, %v7137_v18  ;;  %v211_v10 = vpack.i.b16 %v8026_v1, %v8026_v1  ;;  %v218_v44 = vpack.i.b16 %v8061_v37, %v8061_v37  ;;  %v9471_v24 = vrot.slane %v7770_v13, 4 }
 0x141   :  { %6623 = vmatprep.subr.msk.bf16.mxu1 %vm540_vm1, %v683_v45  ;;  %984 = vmatpush1.bf16.msra.mxu0 %v726_v52  ;;  %v8101_v29 = vpop.permute.xlu0 %1855  ;;  %v8103_v49 = vpop.permute.xlu1 %1857  ;;  %v8117_v27 = vcombine.high %v8068_v5, %v8068_v5  ;;  %v9469_v34 = vcombine.high %v7580_v46, %v7580_v46  ;;  %v9470_v6 = vcombine.low %v7580_v46, %v7580_v46  ;;  %v3648_v46 = vrot.slane %v7801_v26, 4 }
 0x142   :  { %1025 = vmatpush1.bf16.msra.mxu1 %v732_v0  ;;  %1056 = vmatprep.mubr.bf16.mxu1 %v9464_v25  ;;  %v5046_v20 = vrot.slane %v7414_v63, %v7137_v18  ;;  %v5034_v11 = vrot.slane %v7401_v36, %v7137_v18  ;;  %v5038_v56 = vrot.slane %v7403_v9, %v7137_v18  ;;  %v8146_v36 = vld [vmem:[%s9430_s0 + $0x20] sm:$0xff]  ;;  %v1115_v22 = vsel %vm540_vm1, %v6627_v16, 0 }
 0x143   :  { %3061 = vrot.lane.b32.xlu0 %v9469_v34, %s7065_s6  ;;  %3059 = vrot.lane.b32.xlu1 %v9470_v6, %s7065_s6  ;;  %v3656_v3 = vsel %vm540_vm1, %v9471_v24, %v3647_v43  ;;  %v6629_v63 = vcombine.low %v8050_v15, %v8050_v15  ;;  %v8149_v9 = vmul.bf16 %v8146_v36, %v6580_v35  ;;  %v8179_v16 = vld [vmem:[%s9430_s0] sm:$0xff]  ;;  %v3649_v6 = vrot.slane %v7834_v41, 4 }
 0x144   :  { %6622 = vmatmul.mubr.msk.bf16.vlgmr.msra.gmra.mrb[12].mxu0 %vm684_vm6, %v7486_v14  ;;  %6641 = vmatprep.subr.msk.bf16.mxu0 %vm540_vm1, %v6626_v17  ;;  %v6632_v15 = vcombine.high %v8098_v21, %v8098_v21  ;;  %v6581_v7 = vcombine.low %v202_v33, %v209_v39  ;;  %v216_v30 = vrot.slane %v211_v10, %v7137_v18 }
 0x145   :  { %v8152_v13 = vpop.permute.xlu0 %2530  ;;  %v8154_v62 = vpop.permute.xlu1 %2528  ;;  %1157 = vmatpush1.bf16.msra.mxu0 %v1109_v32  ;;  %1188 = vmatprep.mubr.bf16.mxu0 %v9464_v25  ;;  %v223_v45 = vrot.slane %v218_v44, %v7137_v18  ;;  %v225_v0 = vpack.i.b16 %v8068_v5, %v8068_v5  ;;  %v232_v17 = vpack.i.b16 %v8117_v27, %v8117_v27  ;;  %v8216_v44 = vld [vmem:[%s9430_s0 + $0x8] sm:$0xff] }
 0x146   :  { %6643 = vmatprep.subr.msk.bf16.mxu1 %vm540_vm1, %v6628_v42  ;;  %6645 = vmatprep.subr.msk.bf16.mxu0 %vm540_vm1, %v6630_v38  ;;  %v9472_v35 = vcombine.low %v7474_v57, %v7474_v57  ;;  %v6869_v52 = vcombine.low %v5042_v60, %v5046_v20  ;;  %v6868_v42 = vcombine.low %v5034_v11, %v5038_v56  ;;  %v8223_v20 = vld [vmem:[%s9429_s2] sm:$0x1] }
 0x147   :  { %5127 = vrot.lane.b32.xlu0 %v6867_v2, %s7066_s14  ;;  %v3679_v33 = vmul.bf16 %v8179_v16, %v7874_v4  ;;  %v3657_v2 = vsel %vm3654_vm4, %v3656_v3, %v7803_v53  ;;  %v3658_v50 = vsel %vm540_vm1, %v3647_v43, %v3648_v46  ;;  %v1121_v4 = vsel %vm540_vm1, %v6629_v63, 0  ;;  %v8206_v53 = vld [vmem:[%s9430_s0 + $0x28] sm:$0xff] }
 0x148   :  { %3063 = vrot.lane.b32.xlu1 %v9472_v35, %s7065_s6  ;;  %6624 = vmatmul.mubr.msk.bf16.vlgmr.msra.gmra.mrb[12].mxu1 %vm684_vm6, %v7486_v14  ;;  %v6631_v39 = vcombine.low %v8098_v21, %v8098_v21  ;;  %v6634_v14 = vcombine.high %v8149_v9, %v8149_v9  ;;  %v291_v43 = vmul.bf16 %v8206_v53, %v6581_v7  ;;  %v6787_v7 = vld.sshfl [vmem:[%s9429_s2] sm:$0x1 pattern:$0x75316420]  ;;  %s7069_s6 = smov 66  }
 0x149   :  { %v8192_v57 = vpop.permute.xlu0 %1859  ;;  %v8194_v60 = vpop.permute.xlu1 %2532  ;;  %1198 = vmatpush1.bf16.msra.mxu1 %v1115_v22  ;;  %1229 = vmatprep.mubr.bf16.mxu1 %v9464_v25  ;;  %v6582_v10 = vcombine.low %v216_v30, %v223_v45  ;;  %v230_v32 = vrot.slane %v225_v0, %v7137_v18  ;;  %v237_v38 = vrot.slane %v232_v17, %v7137_v18  ;;  %v8244_v22 = vld [vmem:[%s9430_s0 + $0x30] sm:$0xff] }
 0x14a   :  { %6647 = vmatprep.subr.msk.bf16.mxu1 %vm540_vm1, %v6632_v15  ;;  %v6788_v21 = vcombine.low %v3679_v33, %v3679_v33  ;;  %v3680_v34 = vmul.bf16 %v8216_v44, %v3657_v2  ;;  %v6789_v11 = vcombine.high %v3679_v33, %v3679_v33  ;;  %v3659_v56 = vsel %vm3654_vm4, %v3658_v50, %v7801_v26  ;;  %v8265_v2 = vld [vmem:[%s9430_s0 + $0x10] sm:$0xff] }
 0x14b   :  { %5131 = vrot.lane.b32.xlu0 %v6869_v52, %s7066_s14  ;;  %v6633_v63 = vcombine.low %v8149_v9, %v8149_v9  ;;  %v1127_v15 = vsel %vm540_vm1, %v6631_v39, 0  ;;  %v6636_v30 = vcombine.high %v291_v43, %v291_v43  ;;  %v292_v45 = vmul.bf16 %v8244_v22, %v6582_v10 }
 0x14c   :  { %5129 = vrot.lane.b32.xlu1 %v6868_v42, %s7066_s14  ;;  %6642 = vmatmul.mubr.msk.bf16.vlgmr.msra.gmra.mrb[16].mxu0 %vm684_vm6, %v8223_v20  ;;  %v6583_v0 = vcombine.low %v230_v32, %v237_v38  ;;  %v6790_v9 = vcombine.low %v3680_v34, %v3680_v34  ;;  %v6791_v17 = vcombine.high %v3680_v34, %v3680_v34  ;;  %v3650_v32 = vrot.slane %v7841_v48, 4 }
 0x14d   :  { %v8229_v24 = vpop.permute.xlu0 %1863  ;;  %v8231_v3 = vpop.permute.xlu1 %2534  ;;  %1239 = vmatpush1.bf16.msra.mxu0 %v1121_v4  ;;  %1270 = vmatprep.mubr.bf16.mxu0 %v9464_v25  ;;  %v3660_v35 = vsel %vm540_vm1, %v3648_v46, %v3649_v6  ;;  %v8260_v33 = vrot.slane %v6787_v7, %v7316_v12  ;;  %v3681_v26 = vmul.bf16 %v8265_v2, %v3659_v56  ;;  %v1133_v50 = vsel %vm540_vm1, %v6633_v63, 0 }
 0x14e   :  { %6649 = vmatprep.subr.msk.bf16.mxu0 %vm540_vm1, %v6634_v14  ;;  %v5058_v46 = vrot.slane %v7444_v54, %v7137_v18  ;;  %v6638_v4 = vcombine.high %v292_v45, %v292_v45  ;;  %v6635_v39 = vcombine.low %v291_v43, %v291_v43  ;;  %v8275_v14 = vld [vmem:[%s9430_s0 + $0x38] sm:$0xff]  ;;  %v5062_v54 = vrot.slane %v7446_v55, %v7137_v18 }
 0x14f   :  { %3750 = vrot.lane.b32.xlu0 %v6789_v11, %s7067_s27  ;;  %v293_v10 = vmul.bf16 %v8275_v14, %v6583_v0  ;;  %v5050_v38 = vrot.slane %v7424_v58, %v7137_v18  ;;  %v5054_v43 = vrot.slane %v7426_v59, %v7137_v18  ;;  %v6792_v56 = vcombine.low %v3681_v26, %v3681_v26 }
 0x150   :  { %3748 = vrot.lane.b32.xlu1 %v6788_v21, %s7067_s27  ;;  %6644 = vmatmul.mubr.msk.bf16.vlgmr.msra.gmra.mrb[16].mxu1 %vm684_vm6, %v8223_v20  ;;  %v3661_v21 = vsel %vm3654_vm4, %v3660_v35, %v7834_v41  ;;  %v1139_v58 = vsel %vm540_vm1, %v6635_v39, 0  ;;  %v6637_v55 = vcombine.low %v292_v45, %v292_v45  ;;  %v3662_v59 = vsel %vm540_vm1, %v3649_v6, %v3650_v32 }
 0x151   :  { %v8254_v52 = vpop.permute.xlu0 %1865  ;;  %v8256_v42 = vpop.permute.xlu1 %1887  ;;  %1280 = vmatpush1.bf16.msra.mxu1 %v1127_v15  ;;  %1311 = vmatprep.mubr.bf16.mxu1 %v9464_v25  ;;  %v6640_v63 = vcombine.high %v293_v10, %v293_v10  ;;  %v6871_v41 = vcombine.low %v5058_v46, %v5062_v54  ;;  %v6870_v15 = vcombine.low %v5050_v38, %v5054_v43  ;;  %v9473_v54 = vld [vmem:[#allocation7_spill] sm:$0xff]  ;;  %v9474_v43 = vld [vmem:[#allocation8_spill] sm:$0xff] }
 0x152   :  { %6651 = vmatprep.subr.msk.bf16.mxu1 %vm540_vm1, %v6636_v30  ;;  %v3682_v7 = vmul.bf16 %v8095_v47, %v3661_v21  ;;  %v3663_v6 = vsel %vm3654_vm4, %v3662_v59, %v7841_v48  ;;  %v1145_v0 = vsel %vm540_vm1, %v6637_v55, 0  ;;  %v1891_v35 = vsel %vm1889_vm7, %v8103_v49, %v8192_v57 }
 0x153   :  { %3754 = vrot.lane.b32.xlu0 %v6791_v17, %s7067_s27  ;;  %v3683_v39 = vmul.bf16 %v8146_v36, %v3663_v6  ;;  %v5066_v38 = vrot.slane %v9473_v54, %v7137_v18  ;;  %v5070_v21 = vrot.slane %v9474_v43, %v7137_v18  ;;  %v1890_v59 = vsel %vm1889_vm7, %v8101_v29, %v8103_v49 }
 0x154   :  { %3752 = vrot.lane.b32.xlu1 %v6790_v9, %s7067_s27  ;;  %6646 = vmatmul.mubr.msk.bf16.vlgmr.msra.gmra.mrb[20].mxu0 %vm684_vm6, %v8223_v20  ;;  %v6639_v9 = vcombine.low %v293_v10, %v293_v10  ;;  %v6794_v17 = vcombine.low %v3682_v7, %v3682_v7  ;;  %v1910_v29 = vsel %vm540_vm1, %v1890_v59, 0 }
 0x155   :  { %v8291_v34 = vpop.permute.xlu0 %1869  ;;  %v1862_v11 = vpop.permute.xlu1 %1861  ;;  %1321 = vmatpush1.bf16.msra.mxu0 %v1133_v50  ;;  %1352 = vmatprep.mubr.bf16.mxu0 %v9464_v25  ;;  %v6797_v43 = vcombine.high %v3683_v39, %v3683_v39 }
 0x156   :  { %6653 = vmatprep.subr.msk.bf16.mxu0 %vm540_vm1, %v6638_v4  ;;  %v6793_v4 = vcombine.high %v3681_v26, %v3681_v26  ;;  %v1151_v10 = vsel %vm540_vm1, %v6639_v9, 0  ;;  %v9475_v26 = vld [vmem:[#allocation5_spill] sm:$0xff]  ;;  %v1892_v49 = vsel %vm1889_vm7, %v8192_v57, %v1862_v11 }
 0x157   :  { %3703 = vrot.lane.b32.xlu0 %v8260_v33, %s7068_s7  ;;  %v1916_v57 = vsel %vm540_vm1, %v1892_v49, 0 }
 0x158   :  { %3756 = vrot.lane.b32.xlu1 %v6792_v56, %s7067_s27  ;;  %6648 = vmatmul.mubr.msk.bf16.vlgmr.msra.gmra.mrb[20].mxu1 %vm684_vm6, %v8223_v20  ;;  %v5074_v56 = vrot.slane %v9475_v26, %v7137_v18 }
 0x159   :  { %v8304_v30 = vpop.permute.xlu0 %1873  ;;  %v8306_v45 = vpop.permute.xlu1 %1867  ;;  %1362 = vmatpush1.bf16.msra.mxu1 %v1139_v58  ;;  %1393 = vmatprep.mubr.bf16.mxu1 %v9464_v25  ;;  %v9476_v58 = vld [vmem:[#allocation6_spill] sm:$0xff] }
 0x15a   :  { %6655 = vmatprep.subr.msk.bf16.mxu1 %vm540_vm1, %v6640_v63  ;;  %v5078_v55 = vrot.slane %v9476_v58, %v7137_v18  ;;  %v6795_v63 = vcombine.high %v3682_v7, %v3682_v7  ;;  %v6872_v7 = vcombine.low %v5066_v38, %v5070_v21 }
 0x15b   :  { %5135 = vrot.lane.b32.xlu0 %v6871_v41, %s7066_s14  ;;  %v1893_v41 = vsel %vm1889_vm7, %v1862_v11, %v8229_v24  ;;  %v1894_v11 = vsel %vm1889_vm7, %v8229_v24, %v8254_v52  ;;  %v1896_v24 = vsel %vm1889_vm7, %v8306_v45, %v8291_v34 }
 0x15c   :  { %5133 = vrot.lane.b32.xlu1 %v6870_v15, %s7066_s14  ;;  %6650 = vmatmul.mubr.msk.bf16.vlgmr.msra.gmra.mrb[24].mxu0 %vm684_vm6, %v8223_v20  ;;  %v6873_v9 = vcombine.low %v5074_v56, %v5078_v55  ;;  %v1922_v21 = vsel %vm540_vm1, %v1894_v11, 0  ;;  %v1928_v56 = vsel %vm540_vm1, %v1896_v24, 0 }
 0x15d   :  { %1403 = vmatpush1.bf16.msra.mxu0 %v1145_v0  ;;  %v8320_v46 = vpop.permute.xlu0 %1877  ;;  %v1872_v50 = vpop.permute.xlu1 %1871  ;;  %1434 = vmatprep.mubr.bf16.mxu0 %v9464_v25  ;;  %v6796_v0 = vcombine.low %v3683_v39, %v3683_v39 }
 0x15e   :  { %6687 = vmatprep.subr.msk.bf16.mxu0 %vm540_vm1, %v1891_v35 }
 0x15f   :  { %3760 = vrot.lane.b32.xlu0 %v6794_v17, %s7067_s27  ;;  %v1895_v17 = vsel %vm1889_vm7, %v8254_v52, %v8306_v45 }
 0x160   :  { %3758 = vrot.lane.b32.xlu1 %v6793_v4, %s7067_s27  ;;  %6652 = vmatmul.mubr.msk.bf16.vlgmr.msra.gmra.mrb[24].mxu1 %vm684_vm6, %v8223_v20 }
 0x161   :  { %1444 = vmatpush1.bf16.msra.mxu1 %v1151_v10  ;;  %v8343_v15 = vpop.permute.xlu0 %1881  ;;  %v1876_v6 = vpop.permute.xlu1 %1875  ;;  %1475 = vmatprep.mubr.bf16.mxu1 %v9464_v25  ;;  %v1897_v10 = vsel %vm1889_vm7, %v8291_v34, %v1872_v50  ;;  %v1898_v34 = vsel %vm1889_vm7, %v1872_v50, %v8304_v30 }
 0x162   :  { %6689 = vmatprep.subr.msk.bf16.mxu1 %vm540_vm1, %v1893_v41  ;;  %v1899_v52 = vsel %vm1889_vm7, %v8304_v30, %v1876_v6  ;;  %v1934_v30 = vsel %vm540_vm1, %v1898_v34, 0  ;;  %v1900_v50 = vsel %vm1889_vm7, %v1876_v6, %v8320_v46 }
 0x163   :  { %3764 = vrot.lane.b32.xlu0 %v6796_v0, %s7067_s27 }
 0x164   :  { %3762 = vrot.lane.b32.xlu1 %v6795_v63, %s7067_s27  ;;  %6654 = vmatmul.mubr.msk.bf16.vlgmr.msra.gmra.mrb[28].mxu0 %vm684_vm6, %v8223_v20 }
 0x165   :  { %1958 = vmatpush1.bf16.msra.mxu0 %v1910_v29  ;;  %v8357_v35 = vpop.permute.xlu0 %1885  ;;  %v1880_v4 = vpop.permute.xlu1 %1879  ;;  %1989 = vmatprep.mubr.bf16.mxu0 %v9464_v25 }
 0x166   :  { %6691 = vmatprep.subr.msk.bf16.mxu0 %vm540_vm1, %v1895_v17  ;;  %v1901_v45 = vsel %vm1889_vm7, %v8320_v46, %v1880_v4  ;;  %v9478_v46 = vld [vmem:[#allocation3_spill] sm:$0xff]  ;;  %v9479_v17 = vld [vmem:[#allocation4_spill] sm:$0xff]  ;;  %v1905_v24 = vsel %vm1889_vm7, %v8357_v35, %v8256_v42 }
 0x167   :  { %5139 = vrot.lane.b32.xlu0 %v6873_v9, %s7066_s14  ;;  %v5082_v6 = vrot.slane %v9478_v46, %v7137_v18 }
 0x168   :  { %5137 = vrot.lane.b32.xlu1 %v6872_v7, %s7066_s14  ;;  %6656 = vmatmul.mubr.msk.bf16.vlgmr.msra.gmra.mrb[28].mxu1 %vm684_vm6, %v8223_v20  ;;  %v9477_v20 = vld [vmem:[#allocation9_spill] sm:$0xff] }
 0x169   :  { %1999 = vmatpush1.bf16.msra.mxu1 %v1916_v57  ;;  %v8371_v54 = vpop.permute.xlu0 %2536  ;;  %v1884_v38 = vpop.permute.xlu1 %1883  ;;  %2030 = vmatprep.mubr.bf16.mxu1 %v9464_v25  ;;  %v5086_v57 = vrot.slane %v9479_v17, %v7137_v18  ;;  %v2561_v17 = vsel %vm2558_vm8, %v8154_v62, %v8152_v13 }
 0x16a   :  { %6693 = vmatprep.subr.msk.bf16.mxu1 %vm540_vm1, %v1897_v10  ;;  %v1903_v9 = vsel %vm1889_vm7, %v8343_v15, %v1884_v38 }
 0x16c   :  { %3766 = vrot.lane.b32.xlu1 %v6797_v43, %s7067_s27  ;;  %6688 = vmatmul.mubr.msk.bf16.vlgmr.msra.gmra.mrb[32].mxu0 %vm684_vm6, %v9477_v20  ;;  %v1940_v43 = vsel %vm540_vm1, %v1900_v50, 0  ;;  %v2562_v50 = vsel %vm2558_vm8, %v8152_v13, %v8194_v60  ;;  %v2585_v13 = vsel %vm540_vm1, %v2561_v17, 0 }
 0x16d   :  { %2040 = vmatpush1.bf16.msra.mxu0 %v1922_v21  ;;  %v8384_v39 = vpop.permute.xlu0 %2540  ;;  %v8386_v26 = vpop.permute.xlu1 %2538  ;;  %2071 = vmatprep.mubr.bf16.mxu0 %v9464_v25  ;;  %v1902_v21 = vsel %vm1889_vm7, %v1880_v4, %v8343_v15  ;;  %v1904_v15 = vsel %vm1889_vm7, %v1884_v38, %v8357_v35  ;;  %v2560_v4 = vsel %vm2558_vm8, %v7866_v19, %v8154_v62 }
 0x16e   :  { %6695 = vmatprep.subr.msk.bf16.mxu0 %vm540_vm1, %v1899_v52  ;;  %v1946_v42 = vsel %vm540_vm1, %v1902_v21, 0  ;;  %v2559_v35 = vsel %vm2558_vm8, %v7868_v28, %v7866_v19  ;;  %v2563_v62 = vsel %vm2558_vm8, %v8194_v60, %v8231_v3  ;;  %v9480_v60 = vld [vmem:[#allocation10_spill] sm:$0xff] }
 0x16f   :  { %v2579_v19 = vsel %vm540_vm1, %v2559_v35, 0  ;;  %v2565_v35 = vsel %vm2558_vm8, %v8371_v54, %v8386_v26 }
 0x170   :  { %6690 = vmatmul.mubr.msk.bf16.vlgmr.msra.gmra.mrb[32].mxu1 %vm684_vm6, %v9477_v20 }
 0x171   :  { %2081 = vmatpush1.bf16.msra.mxu1 %v1928_v56  ;;  %v3643_v58 = vpop.permute.xlu0 %3642  ;;  %v3641_v55 = vpop.permute.xlu1 %3640  ;;  %2112 = vmatprep.mubr.bf16.mxu1 %v9464_v25 }
 0x172   :  { %6697 = vmatprep.subr.msk.bf16.mxu1 %vm540_vm1, %v1901_v45  ;;  %v3652_v63 = vrot.slane %v3643_v58, 4  ;;  %v3651_v59 = vrot.slane %v3641_v55, 4  ;;  %v6874_v45 = vcombine.low %v5082_v6, %v5086_v57  ;;  %v2564_v57 = vsel %vm2558_vm8, %v8231_v3, %v8371_v54  ;;  %v9482_v54 = vld [vmem:[#allocation12_spill] sm:$0xff] }
 0x173   :  { %v5748_v3 = vshrl.u32 %v7952_v40, 16 }
 0x174   :  { %v3664_v41 = vsel %vm540_vm1, %v3650_v32, %v3651_v59  ;;  %v3666_v0 = vsel %vm540_vm1, %v3651_v59, %v3652_v63  ;;  %6692 = vmatmul.mubr.msk.bf16.vlgmr.msra.gmra.mrb[36].mxu0 %vm684_vm6, %v9477_v20 }
 0x175   :  { %v3665_v7 = vsel %vm3654_vm4, %v3664_v41, %v3641_v55  ;;  %2122 = vmatpush1.bf16.msra.mxu0 %v1934_v30  ;;  %v8411_v29 = vpop.permute.xlu0 %2544  ;;  %v8413_v48 = vpop.permute.xlu1 %2542  ;;  %2153 = vmatprep.mubr.bf16.mxu0 %v9464_v25  ;;  %v3667_v32 = vsel %vm3654_vm4, %v3666_v0, %v3643_v58  ;;  %v1952_v0 = vsel %vm540_vm1, %v1904_v15, 0 }
 0x176   :  { %v3684_v49 = vmul.bf16 %v8206_v53, %v3665_v7  ;;  %6699 = vmatprep.subr.msk.bf16.mxu0 %vm540_vm1, %v1903_v9  ;;  %v3685_v34 = vmul.bf16 %v8244_v22, %v3667_v32  ;;  %v2568_v40 = vsel %vm2558_vm8, %v8413_v48, %v8411_v29 }
 0x178   :  { %v6798_v11 = vcombine.low %v3684_v49, %v3684_v49  ;;  %v6799_v10 = vcombine.high %v3684_v49, %v3684_v49  ;;  %6694 = vmatmul.mubr.msk.bf16.vlgmr.msra.gmra.mrb[36].mxu1 %vm684_vm6, %v9477_v20  ;;  %v6800_v59 = vcombine.low %v3685_v34, %v3685_v34  ;;  %v6801_v32 = vcombine.high %v3685_v34, %v3685_v34 }
 0x179   :  { %2163 = vmatpush1.bf16.msra.mxu1 %v1940_v43  ;;  %v8431_v52 = vpop.permute.xlu0 %2548  ;;  %v8433_v56 = vpop.permute.xlu1 %2546  ;;  %2194 = vmatprep.mubr.bf16.mxu1 %v9464_v25  ;;  %v2566_v34 = vsel %vm2558_vm8, %v8386_v26, %v8384_v39  ;;  %v5755_v26 = vshrl.u32 %v7979_v23, 16  ;;  %v2597_v23 = vsel %vm540_vm1, %v2565_v35, 0  ;;  %v5769_v35 = vshrl.u32 %v8023_v31, 16 }
 0x17a   :  { %6701 = vmatprep.subr.msk.bf16.mxu1 %vm540_vm1, %v1905_v24  ;;  %3770 = vrot.lane.b32.xlu1 %v6799_v10, %s7067_s27 }
 0x17b   :  { %3768 = vrot.lane.b32.xlu0 %v6798_v11, %s7067_s27 }
 0x17c   :  { %6696 = vmatmul.mubr.msk.bf16.vlgmr.msra.gmra.mrb[40].mxu0 %vm684_vm6, %v9477_v20 }
 0x17d   :  { %2204 = vmatpush1.bf16.msra.mxu0 %v1946_v42  ;;  %v8448_v58 = vpop.permute.xlu0 %2550  ;;  %v3645_v55 = vpop.permute.xlu1 %3644  ;;  %2235 = vmatprep.mubr.bf16.mxu0 %v9464_v25 }
 0x17e   :  { %6729 = vmatprep.subr.msk.bf16.mxu0 %vm540_vm1, %v2560_v4  ;;  %v3653_v41 = vrot.slane %v3645_v55, 4  ;;  %5141 = vrot.lane.b32.xlu1 %v6874_v45, %s7066_s14 }
 0x17f   :  { %3772 = vrot.lane.b32.xlu0 %v6800_v59, %s7067_s27  ;;  %v9481_v59 = vld [vmem:[#allocation13_spill] sm:$0xff] }
 0x180   :  { %v3668_v38 = vsel %vm540_vm1, %v3652_v63, %v3653_v41  ;;  %6698 = vmatmul.mubr.msk.bf16.vlgmr.msra.gmra.mrb[40].mxu1 %vm684_vm6, %v9477_v20  ;;  %v8477_v63 = vld [vmem:[%s9430_s0 + $0x40] sm:$0xf] }
 0x181   :  { %v3669_v30 = vsel %vm3654_vm4, %v3668_v38, %v3645_v55  ;;  %2245 = vmatpush1.bf16.msra.mxu1 %v1952_v0  ;;  %v8465_v7 = vpop.permute.xlu0 %2554  ;;  %v8467_v9 = vpop.permute.xlu1 %2552  ;;  %2276 = vmatprep.mubr.bf16.mxu1 %v9464_v25  ;;  %v3687_v49 = vmul.bf16 %v8477_v63, %v3653_v41  ;;  %v2591_v41 = vsel %vm540_vm1, %v2563_v62, 0 }
 0x182   :  { %v3686_v28 = vmul.bf16 %v8275_v14, %v3669_v30  ;;  %6731 = vmatprep.subr.msk.bf16.mxu1 %vm540_vm1, %v2562_v50 }
 0x183   :  { %3774 = vrot.lane.b32.xlu0 %v6801_v32, %s7067_s27  ;;  %v6804_v21 = vcombine.low %v3687_v49, %v3687_v49  ;;  %v5734_v32 = vshrl.u32 %v7933_v51, 16  ;;  %v5749_v49 = vpack.i.b16 %v5748_v3, %v5748_v3 }
 0x184   :  { %v6802_v46 = vcombine.low %v3686_v28, %v3686_v28  ;;  %v6803_v6 = vcombine.high %v3686_v28, %v3686_v28  ;;  %6700 = vmatmul.mubr.msk.bf16.vlgmr.msra.gmra.mrb[44].mxu0 %vm684_vm6, %v9477_v20  ;;  %v5741_v28 = vshrl.u32 %v7963_v8, 16  ;;  %v2570_v8 = vsel %vm2558_vm8, %v8433_v56, %v8431_v52 }
 0x185   :  { %2627 = vmatpush1.bf16.msra.mxu0 %v2579_v19  ;;  %v4460_v11 = vpop.permute.xlu0 %4459  ;;  %v8488_v10 = vpop.permute.xlu1 %2556  ;;  %2658 = vmatprep.mubr.bf16.mxu0 %v9464_v25  ;;  %v9483_v19 = vld [vmem:[#allocation11_spill] sm:$0xff] }
 0x186   :  { %6733 = vmatprep.subr.msk.bf16.mxu0 %vm540_vm1, %v2564_v57  ;;  %v4475_v43 = vrot.slane %v4460_v11, 4  ;;  %3776 = vrot.lane.b32.xlu1 %v6802_v46, %s7067_s27  ;;  %v2567_v46 = vsel %vm2558_vm8, %v8384_v39, %v8413_v48  ;;  %v5756_v48 = vpack.i.b16 %v5755_v26, %v5755_v26 }
 0x187   :  { %3778 = vrot.lane.b32.xlu0 %v6803_v6, %s7067_s27  ;;  %v2603_v62 = vsel %vm540_vm1, %v2567_v46, 0  ;;  %v2573_v46 = vsel %vm2558_vm8, %v8467_v9, %v8465_v7 }
 0x188   :  { %6702 = vmatmul.mubr.msk.bf16.vlgmr.msra.gmra.mrb[44].mxu1 %vm684_vm6, %v9477_v20  ;;  %v4484_v24 = vsel %vm4483_vm9, %v4475_v43, %v4460_v11 }
 0x189   :  { %2668 = vmatpush1.bf16.msra.mxu1 %v2585_v13  ;;  %v8504_v45 = vpop.permute.xlu0 %4463  ;;  %v4462_v42 = vpop.permute.xlu1 %4461  ;;  %2699 = vmatprep.mubr.bf16.mxu1 %v9464_v25  ;;  %v4508_v4 = vmul.bf16 %v8179_v16, %v4484_v24 }
 0x18a   :  { %6735 = vmatprep.subr.msk.bf16.mxu1 %vm540_vm1, %v2566_v34  ;;  %v4477_v20 = vrot.slane %v8504_v45, 4  ;;  %v4476_v15 = vrot.slane %v4462_v42, 4  ;;  %3780 = vrot.lane.b32.xlu1 %v6804_v21, %s7067_s27  ;;  %v5742_v21 = vpack.i.b16 %v5741_v28, %v5741_v28  ;;  %v5754_v34 = vrot.slane %v5749_v49, %v7137_v18  ;;  %s7073_s27 = smov 62  }
 0x18b   :  { %5844 = vrot.lane.b32.xlu0 %v9480_v60, %s7069_s6  ;;  %v6834_v6 = vcombine.low %v4508_v4, %v4508_v4  ;;  %v6835_v57 = vcombine.high %v4508_v4, %v4508_v4  ;;  %v2572_v60 = vsel %vm2558_vm8, %v8448_v58, %v8467_v9  ;;  %v5783_v49 = vshrl.u32 %v8061_v37, 16 }
 0x18c   :  { %v4485_v55 = vsel %vm540_vm1, %v4475_v43, %v4476_v15  ;;  %6730 = vmatmul.mubr.msk.bf16.vlgmr.msra.gmra.mrb[48].mxu0 %vm684_vm6, %v9481_v59  ;;  %v4487_v50 = vsel %vm540_vm1, %v4476_v15, %v4477_v20  ;;  %v5735_v43 = vpack.i.b16 %v5734_v32, %v5734_v32 }
 0x18d   :  { %v4486_v38 = vsel %vm4483_vm9, %v4485_v55, %v4462_v42  ;;  %2709 = vmatpush1.bf16.msra.mxu0 %v2591_v41  ;;  %v8525_v0 = vpop.permute.xlu0 %3033  ;;  %v8527_v30 = vpop.permute.xlu1 %3031  ;;  %2740 = vmatprep.mubr.bf16.mxu0 %v9464_v25  ;;  %v4488_v51 = vsel %vm4483_vm9, %v4487_v50, %v8504_v45  ;;  %v2569_v42 = vsel %vm2558_vm8, %v8411_v29, %v8433_v56  ;;  %v5762_v41 = vshrl.u32 %v7992_v61, 16 }
 0x18e   :  { %6737 = vmatprep.subr.msk.bf16.mxu0 %vm540_vm1, %v2568_v40  ;;  %5846 = vrot.lane.b32.xlu1 %v9482_v54, %s7069_s6  ;;  %v4509_v17 = vmul.bf16 %v8216_v44, %v4486_v38  ;;  %v8565_v24 = vmul.bf16 %v8265_v2, %v4488_v51  ;;  %v5761_v55 = vrot.slane %v5756_v48, %v7137_v18  ;;  %v2609_v38 = vsel %vm540_vm1, %v2569_v42, 0 }
 0x18f   :  { %5848 = vrot.lane.b32.xlu0 %v9483_v19, %s7069_s6  ;;  %v5740_v29 = vrot.slane %v5735_v43, %v7137_v18  ;;  %v5747_v56 = vrot.slane %v5742_v21, %v7137_v18  ;;  %v2571_v50 = vsel %vm2558_vm8, %v8431_v52, %v8448_v58  ;;  %v2574_v54 = vsel %vm2558_vm8, %v8465_v7, %v8488_v10 }
 0x190   :  { %6732 = vmatmul.mubr.msk.bf16.vlgmr.msra.gmra.mrb[48].mxu1 %vm684_vm6, %v9481_v59  ;;  %v6836_v13 = vcombine.low %v4509_v17, %v4509_v17  ;;  %v6837_v15 = vcombine.high %v4509_v17, %v4509_v17  ;;  %v6838_v40 = vcombine.low %v8565_v24, %v8565_v24  ;;  %v6913_v28 = vcombine.low %v5754_v34, %v5761_v55 }
 0x191   :  { %2750 = vmatpush1.bf16.msra.mxu1 %v2597_v23  ;;  %v8553_v11 = vpop.permute.xlu0 %3037  ;;  %v8555_v39 = vpop.permute.xlu1 %3035  ;;  %2781 = vmatprep.mubr.bf16.mxu1 %v9464_v25  ;;  %v6912_v52 = vcombine.low %v5740_v29, %v5747_v56  ;;  %v5763_v58 = vpack.i.b16 %v5762_v41, %v5762_v41  ;;  %v5770_v10 = vpack.i.b16 %v5769_v35, %v5769_v35  ;;  %v5776_v19 = vshrl.u32 %v8026_v1, 16 }
 0x192   :  { %6739 = vmatprep.subr.msk.bf16.mxu1 %vm540_vm1, %v2570_v8  ;;  %4577 = vrot.lane.b32.xlu1 %v6834_v6, %s7064_s1  ;;  %v2615_v23 = vsel %vm540_vm1, %v2571_v50, 0  ;;  %v3067_v7 = vsel %vm3065_vm10, %v8525_v0, %v8555_v39  ;;  %v5784_v8 = vpack.i.b16 %v5783_v49, %v5783_v49  ;;  %v2621_v43 = vsel %vm540_vm1, %v2573_v46, 0 }
 0x193   :  { %4579 = vrot.lane.b32.xlu0 %v6835_v57, %s7064_s1  ;;  %v5777_v51 = vpack.i.b16 %v5776_v19, %v5776_v19  ;;  %v5768_v21 = vrot.slane %v5763_v58, %v7137_v18  ;;  %v5775_v42 = vrot.slane %v5770_v10, %v7137_v18  ;;  %v3068_v29 = vsel %vm3065_vm10, %v8555_v39, %v8553_v11 }
 0x194   :  { %6734 = vmatmul.mubr.msk.bf16.vlgmr.msra.gmra.mrb[52].mxu0 %vm684_vm6, %v9481_v59  ;;  %v5790_v50 = vshrl.u32 %v8068_v5, 16 }
 0x195   :  { %2791 = vmatpush1.bf16.msra.mxu0 %v2603_v62  ;;  %v8574_v3 = vpop.permute.xlu0 %2986  ;;  %v8576_v4 = vpop.permute.xlu1 %3039  ;;  %2822 = vmatprep.mubr.bf16.mxu0 %v9464_v25  ;;  %v6914_v35 = vcombine.low %v5768_v21, %v5775_v42 }
 0x196   :  { %6741 = vmatprep.subr.msk.bf16.mxu0 %vm540_vm1, %v2572_v60  ;;  %4581 = vrot.lane.b32.xlu1 %v6836_v13, %s7064_s1  ;;  %v3066_v13 = vsel %vm3065_vm10, %v8527_v30, %v8525_v0 }
 0x197   :  { %4583 = vrot.lane.b32.xlu0 %v6837_v15, %s7064_s1  ;;  %v5789_v15 = vrot.slane %v5784_v8, %v7137_v18  ;;  %v3086_v60 = vsel %vm540_vm1, %v3066_v13, 0 }
 0x198   :  { %6736 = vmatmul.mubr.msk.bf16.vlgmr.msra.gmra.mrb[52].mxu1 %vm684_vm6, %v9481_v59 }
 0x199   :  { %2832 = vmatpush1.bf16.msra.mxu1 %v2609_v38  ;;  %v8598_v61 = vpop.permute.xlu0 %4467  ;;  %v4466_v31 = vpop.permute.xlu1 %4465  ;;  %2863 = vmatprep.mubr.bf16.mxu1 %v9464_v25 }
 0x19a   :  { %6743 = vmatprep.subr.msk.bf16.mxu1 %vm540_vm1, %v2574_v54  ;;  %v4479_v26 = vrot.slane %v8598_v61, 4  ;;  %v4478_v32 = vrot.slane %v4466_v31, 4  ;;  %4585 = vrot.lane.b32.xlu1 %v6838_v40, %s7064_s1  ;;  %v5797_v54 = vshrl.u32 %v8117_v27, 16 }
 0x19b   :  { %4532 = vrot.lane.b32.xlu0 %v8260_v33, %s7070_s10 }
 0x19c   :  { %v4489_v6 = vsel %vm540_vm1, %v4477_v20, %v4478_v32  ;;  %v4491_v17 = vsel %vm540_vm1, %v4478_v32, %v4479_v26  ;;  %6738 = vmatmul.mubr.msk.bf16.vlgmr.msra.gmra.mrb[56].mxu0 %vm684_vm6, %v9481_v59  ;;  %v5798_v10 = vpack.i.b16 %v5797_v54, %v5797_v54 }
 0x19d   :  { %v4490_v1 = vsel %vm4483_vm9, %v4489_v6, %v4466_v31  ;;  %v4492_v37 = vsel %vm4483_vm9, %v4491_v17, %v8598_v61  ;;  %2873 = vmatpush1.bf16.msra.mxu0 %v2615_v23  ;;  %v8625_v9 = vpop.permute.xlu0 %3043  ;;  %v3042_v45 = vpop.permute.xlu1 %3041  ;;  %2904 = vmatprep.mubr.bf16.mxu0 %v9464_v25 }
 0x19e   :  { %v4511_v20 = vmul.bf16 %v8095_v47, %v4490_v1  ;;  %6763 = vmatprep.subr.msk.bf16.mxu0 %vm540_vm1, %v3067_v7  ;;  %5850 = vrot.lane.b32.xlu1 %v6912_v52, %s7069_s6  ;;  %v8633_v57 = vmul.bf16 %v8146_v36, %v4492_v37  ;;  %v6839_v47 = vcombine.high %v8565_v24, %v8565_v24 }
 0x19f   :  { %5852 = vrot.lane.b32.xlu0 %v6913_v28, %s7069_s6  ;;  %v3069_v36 = vsel %vm3065_vm10, %v8553_v11, %v8576_v4  ;;  %v3071_v0 = vsel %vm3065_vm10, %v3042_v45, %v8625_v9  ;;  %v5782_v24 = vrot.slane %v5777_v51, %v7137_v18  ;;  %v3092_v28 = vsel %vm540_vm1, %v3068_v29, 0 }
 0x1a0   :  { %v6840_v48 = vcombine.low %v4511_v20, %v4511_v20  ;;  %6740 = vmatmul.mubr.msk.bf16.vlgmr.msra.gmra.mrb[56].mxu1 %vm684_vm6, %v9481_v59  ;;  %v6842_v30 = vcombine.low %v8633_v57, %v8633_v57  ;;  %v6841_v55 = vcombine.high %v4511_v20, %v4511_v20  ;;  %v3070_v5 = vsel %vm3065_vm10, %v8576_v4, %v3042_v45 }
 0x1a1   :  { %2914 = vmatpush1.bf16.msra.mxu1 %v2621_v43  ;;  %v3048_v62 = vpop.permute.xlu0 %3047  ;;  %v3046_v34 = vpop.permute.xlu1 %3045  ;;  %2945 = vmatprep.mubr.bf16.mxu1 %v9464_v25  ;;  %v6915_v39 = vcombine.low %v5782_v24, %v5789_v15  ;;  %v3098_v46 = vsel %vm540_vm1, %v3070_v5, 0  ;;  %v5803_v1 = vrot.slane %v5798_v10, %v7137_v18 }
 0x1a2   :  { %6765 = vmatprep.subr.msk.bf16.mxu1 %vm540_vm1, %v3069_v36  ;;  %4587 = vrot.lane.b32.xlu1 %v6839_v47, %s7064_s1  ;;  %v3073_v11 = vsel %vm3065_vm10, %v3046_v34, %v3048_v62  ;;  %v3072_v6 = vsel %vm3065_vm10, %v8625_v9, %v3046_v34 }
 0x1a3   :  { %4589 = vrot.lane.b32.xlu0 %v6840_v48, %s7064_s1  ;;  %v3104_v20 = vsel %vm540_vm1, %v3072_v6, 0 }
 0x1a4   :  { %6742 = vmatmul.mubr.msk.bf16.vlgmr.msra.gmra.mrb[60].mxu0 %vm684_vm6, %v9481_v59 }
 0x1a5   :  { %3134 = vmatpush1.bf16.msra.mxu0 %v3086_v60  ;;  %v8664_v56 = vpop.permute.xlu0 %4471  ;;  %v4470_v41 = vpop.permute.xlu1 %4469  ;;  %3165 = vmatprep.mubr.bf16.mxu0 %v9464_v25 }
 0x1a6   :  { %6767 = vmatprep.subr.msk.bf16.mxu0 %vm540_vm1, %v3071_v0  ;;  %v4481_v38 = vrot.slane %v8664_v56, 4  ;;  %v4480_v40 = vrot.slane %v4470_v41, 4  ;;  %4591 = vrot.lane.b32.xlu1 %v6841_v55, %s7064_s1 }
 0x1a7   :  { %4593 = vrot.lane.b32.xlu0 %v6842_v30, %s7064_s1 }
 0x1a8   :  { %v4493_v31 = vsel %vm540_vm1, %v4479_v26, %v4480_v40  ;;  %v4495_v32 = vsel %vm540_vm1, %v4480_v40, %v4481_v38  ;;  %6744 = vmatmul.mubr.msk.bf16.vlgmr.msra.gmra.mrb[60].mxu1 %vm684_vm6, %v9481_v59  ;;  %v5791_v59 = vpack.i.b16 %v5790_v50, %v5790_v50 }
 0x1a9   :  { %v4494_v27 = vsel %vm4483_vm9, %v4493_v31, %v4470_v41  ;;  %v4496_v52 = vsel %vm4483_vm9, %v4495_v32, %v8664_v56  ;;  %3175 = vmatpush1.bf16.msra.mxu1 %v3092_v28  ;;  %v3052_v58 = vpop.permute.xlu0 %3051  ;;  %v3050_v61 = vpop.permute.xlu1 %3049  ;;  %3206 = vmatprep.mubr.bf16.mxu1 %v9464_v25 }
 0x1aa   :  { %v4513_v26 = vmul.bf16 %v8206_v53, %v4494_v27  ;;  %6769 = vmatprep.subr.msk.bf16.mxu1 %vm540_vm1, %v3073_v11  ;;  %5854 = vrot.lane.b32.xlu1 %v6914_v35, %s7069_s6  ;;  %v3075_v4 = vsel %vm3065_vm10, %v3050_v61, %v3052_v58  ;;  %v4514_v19 = vmul.bf16 %v8244_v22, %v4496_v52 }
 0x1ab   :  { %5856 = vrot.lane.b32.xlu0 %v6915_v39, %s7069_s6  ;;  %v6843_v53 = vcombine.high %v8633_v57, %v8633_v57  ;;  %v5796_v22 = vrot.slane %v5791_v59, %v7137_v18  ;;  %v3074_v37 = vsel %vm3065_vm10, %v3048_v62, %v3050_v61 }
 0x1ac   :  { %v6844_v49 = vcombine.low %v4513_v26, %v4513_v26  ;;  %6764 = vmatmul.mubr.msk.bf16.vlgmr.msra.gmra.mrb[64].mxu0 %vm684_vm6, %v8574_v3  ;;  %v6846_v9 = vcombine.low %v4514_v19, %v4514_v19  ;;  %v6845_v45 = vcombine.high %v4513_v26, %v4513_v26  ;;  %v3110_v8 = vsel %vm540_vm1, %v3074_v37, 0 }
 0x1ad   :  { %3216 = vmatpush1.bf16.msra.mxu0 %v3098_v46  ;;  %v3056_v17 = vpop.permute.xlu0 %3055  ;;  %v3054_v23 = vpop.permute.xlu1 %3053  ;;  %3247 = vmatprep.mubr.bf16.mxu0 %v9464_v25  ;;  %v6916_v43 = vcombine.low %v5796_v22, %v5803_v1  ;;  %v6847_v34 = vcombine.high %v4514_v19, %v4514_v19 }
 0x1ae   :  { %4595 = vrot.lane.b32.xlu1 %v6843_v53, %s7064_s1  ;;  %6771 = vmatprep.subr.msk.bf16.mxu0 %vm540_vm1, %v3075_v4  ;;  %v3077_v7 = vsel %vm3065_vm10, %v3054_v23, %v3056_v17  ;;  %v3076_v47 = vsel %vm3065_vm10, %v3052_v58, %v3054_v23 }
 0x1af   :  { %4597 = vrot.lane.b32.xlu0 %v6844_v49, %s7064_s1  ;;  %v3116_v42 = vsel %vm540_vm1, %v3076_v47, 0 }
 0x1b0   :  { %6766 = vmatmul.mubr.msk.bf16.vlgmr.msra.gmra.mrb[64].mxu1 %vm684_vm6, %v8574_v3 }
 0x1b1   :  { %3257 = vmatpush1.bf16.msra.mxu1 %v3104_v20  ;;  %v3058_v57 = vpop.permute.xlu0 %3057  ;;  %v4474_v51 = vpop.permute.xlu1 %4473  ;;  %3288 = vmatprep.mubr.bf16.mxu1 %v9464_v25 }
 0x1b2   :  { %v4482_v48 = vrot.slane %v4474_v51, 4  ;;  %4599 = vrot.lane.b32.xlu1 %v6845_v45, %s7064_s1  ;;  %6773 = vmatprep.subr.msk.bf16.mxu1 %vm540_vm1, %v3077_v7  ;;  %v3078_v15 = vsel %vm3065_vm10, %v3056_v17, %v3058_v57 }
 0x1b3   :  { %4601 = vrot.lane.b32.xlu0 %v6846_v9, %s7064_s1  ;;  %v3122_v56 = vsel %vm540_vm1, %v3078_v15, 0 }
 0x1b4   :  { %v4497_v21 = vsel %vm540_vm1, %v4481_v38, %v4482_v48  ;;  %6768 = vmatmul.mubr.msk.bf16.vlgmr.msra.gmra.mrb[68].mxu0 %vm684_vm6, %v8574_v3  ;;  %v4516_v30 = vmul.bf16 %v8477_v63, %v4482_v48 }
 0x1b5   :  { %v4498_v13 = vsel %vm4483_vm9, %v4497_v21, %v4474_v51  ;;  %v3062_v36 = vpop.permute.xlu0 %3061  ;;  %v3060_v62 = vpop.permute.xlu1 %3059  ;;  %3298 = vmatpush1.bf16.msra.mxu0 %v3110_v8  ;;  %3329 = vmatprep.mubr.bf16.mxu0 %v9464_v25  ;;  %v8791_v21 = vld [vmem:[%s9430_s0 + $0x18] sm:$0xff] }
 0x1b6   :  { %v4515_v0 = vmul.bf16 %v8275_v14, %v4498_v13  ;;  %v3079_v24 = vsel %vm3065_vm10, %v3058_v57, %v3060_v62  ;;  %5858 = vrot.lane.b32.xlu1 %v6916_v43, %s7069_s6  ;;  %v6850_v41 = vcombine.low %v4516_v30, %v4516_v30  ;;  %v3080_v40 = vsel %vm3065_vm10, %v3060_v62, %v3062_v36 }
 0x1b7   :  { %4603 = vrot.lane.b32.xlu0 %v6847_v34, %s7064_s1  ;;  %6775 = vmatprep.subr.msk.bf16.mxu0 %vm540_vm1, %v3079_v24  ;;  %v3128_v31 = vsel %vm540_vm1, %v3080_v40, 0  ;;  %v8799_v34 = vld [vmem:[%s9430_s0 + $0x20] sm:$0xff] }
 0x1b8   :  { %v6848_v60 = vcombine.low %v4515_v0, %v4515_v0  ;;  %v6849_v55 = vcombine.high %v4515_v0, %v4515_v0  ;;  %6770 = vmatmul.mubr.msk.bf16.vlgmr.msra.gmra.mrb[68].mxu1 %vm684_vm6, %v8574_v3 }
 0x1b9   :  { %v5128_v29 = vpop.permute.xlu0 %5127  ;;  %3339 = vmatpush1.bf16.msra.mxu1 %v3116_v42  ;;  %3370 = vmatprep.mubr.bf16.mxu1 %v9464_v25 }
 0x1ba   :  { %v3064_v14 = vpop.permute.xlu1 %3063  ;;  %v5143_v35 = vrot.slane %v5128_v29, 4  ;;  %4605 = vrot.lane.b32.xlu1 %v6848_v60, %s7064_s1 }
 0x1bb   :  { %v3081_v38 = vsel %vm3065_vm10, %v3062_v36, %v3064_v14  ;;  %4607 = vrot.lane.b32.xlu0 %v6849_v55, %s7064_s1 }
 0x1bc   :  { %6777 = vmatprep.subr.msk.bf16.mxu1 %vm540_vm1, %v3081_v38  ;;  %v5152_v50 = vsel %vm5151_vm11, %v5143_v35, %v5128_v29  ;;  %6772 = vmatmul.mubr.msk.bf16.vlgmr.msra.gmra.mrb[72].mxu0 %vm684_vm6, %v8574_v3 }
 0x1bd   :  { %v5176_v54 = vmul.bf16 %v8179_v16, %v5152_v50  ;;  %v5132_v11 = vpop.permute.xlu0 %5131  ;;  %3380 = vmatpush1.bf16.msra.mxu0 %v3122_v56  ;;  %3411 = vmatprep.mubr.bf16.mxu0 %v9464_v25 }
 0x1be   :  { %v5130_v39 = vpop.permute.xlu1 %5129  ;;  %v5145_v32 = vrot.slane %v5132_v11, 4  ;;  %4609 = vrot.lane.b32.xlu1 %v6850_v41, %s7064_s1 }
 0x1bf   :  { %v5144_v28 = vrot.slane %v5130_v39, 4  ;;  %v6876_v5 = vcombine.low %v5176_v54, %v5176_v54  ;;  %v6877_v27 = vcombine.high %v5176_v54, %v5176_v54 }
 0x1c0   :  { %6774 = vmatmul.mubr.msk.bf16.vlgmr.msra.gmra.mrb[72].mxu1 %vm684_vm6, %v8574_v3 }
 0x1c1   :  { %v5153_v52 = vsel %vm540_vm1, %v5143_v35, %v5144_v28  ;;  %v5155_v58 = vsel %vm540_vm1, %v5144_v28, %v5145_v32  ;;  %v3751_v26 = vpop.permute.xlu0 %3750  ;;  %5245 = vrot.lane.b32.xlu0 %v6876_v5, %s7071_s11  ;;  %3421 = vmatpush1.bf16.msra.mxu1 %v3128_v31  ;;  %v8831_v5 = vld [vmem:[%s9430_s0 + $0x30] sm:$0xff] }
 0x1c2   :  { %v5154_v16 = vsel %vm5151_vm11, %v5153_v52, %v5130_v39  ;;  %v5156_v61 = vsel %vm5151_vm11, %v5155_v58, %v5132_v11  ;;  %v3749_v59 = vpop.permute.xlu1 %3748  ;;  %5247 = vrot.lane.b32.xlu1 %v6877_v27, %s7071_s11  ;;  %3452 = vmatprep.mubr.bf16.mxu1 %v9464_v25 }
 0x1c3   :  { %v5177_v10 = vmul.bf16 %v8216_v44, %v5154_v16  ;;  %v5178_v4 = vmul.bf16 %v8265_v2, %v5156_v61  ;;  %v3783_v46 = vsel %vm3782_vm12, %v3749_v59, %v3751_v26 }
 0x1c4   :  { %6776 = vmatmul.mubr.msk.bf16.vlgmr.msra.gmra.mrb[76].mxu0 %vm684_vm6, %v8574_v3  ;;  %v3803_v2 = vsel %vm540_vm1, %v3783_v46, 0 }
 0x1c5   :  { %v6878_v19 = vcombine.low %v5177_v10, %v5177_v10  ;;  %v6879_v49 = vcombine.high %v5177_v10, %v5177_v10  ;;  %v3755_v53 = vpop.permute.xlu0 %3754  ;;  %3882 = vmatprep.mubr.bf16.mxu0 %v9464_v25  ;;  %v6880_v44 = vcombine.low %v5178_v4, %v5178_v4  ;;  %v6881_v7 = vcombine.high %v5178_v4, %v5178_v4 }
 0x1c6   :  { %v3753_v6 = vpop.permute.xlu1 %3752 }
 0x1c7   :  { %v3784_v17 = vsel %vm3782_vm12, %v3751_v26, %v3753_v6  ;;  %5249 = vrot.lane.b32.xlu0 %v6878_v19, %s7071_s11  ;;  %5251 = vrot.lane.b32.xlu1 %v6879_v49, %s7071_s11  ;;  %v3785_v23 = vsel %vm3782_vm12, %v3753_v6, %v3755_v53 }
 0x1c8   :  { %6805 = vmatprep.subr.msk.bf16.mxu0 %vm540_vm1, %v3784_v17  ;;  %6778 = vmatmul.mubr.msk.bf16.vlgmr.msra.gmra.mrb[76].mxu1 %vm684_vm6, %v8574_v3  ;;  %v3809_v9 = vsel %vm540_vm1, %v3785_v23, 0 }
 0x1c9   :  { %3851 = vmatpush1.bf16.msra.mxu0 %v3803_v2  ;;  %v8769_v22 = vpop.permute.xlu0 %3703  ;;  %3923 = vmatprep.mubr.bf16.mxu1 %v9464_v25 }
 0x1ca   :  { %v3757_v1 = vpop.permute.xlu1 %3756 }
 0x1cb   :  { %v3786_v37 = vsel %vm3782_vm12, %v3755_v53, %v3757_v1  ;;  %5253 = vrot.lane.b32.xlu0 %v6880_v44, %s7071_s11  ;;  %5200 = vrot.lane.b32.xlu1 %v8260_v33, %s7072_s12 }
 0x1cc   :  { %6807 = vmatprep.subr.msk.bf16.mxu1 %vm540_vm1, %v3786_v37  ;;  %6806 = vmatmul.mubr.msk.bf16.vlgmr.msra.gmra.mrb[80].mxu0 %vm684_vm6, %v8769_v22  ;;  %v8854_v37 = vld [vmem:[%s9430_s0 + $0x38] sm:$0xff] }
 0x1cd   :  { %3892 = vmatpush1.bf16.msra.mxu1 %v3809_v9  ;;  %v5136_v3 = vpop.permute.xlu0 %5135  ;;  %3964 = vmatprep.mubr.bf16.mxu0 %v9464_v25 }
 0x1ce   :  { %v5134_v45 = vpop.permute.xlu1 %5133  ;;  %v5147_v20 = vrot.slane %v5136_v3, 4 }
 0x1cf   :  { %v5146_v57 = vrot.slane %v5134_v45, 4  ;;  %5255 = vrot.lane.b32.xlu0 %v6881_v7, %s7071_s11 }
 0x1d0   :  { %6808 = vmatmul.mubr.msk.bf16.vlgmr.msra.gmra.mrb[80].mxu1 %vm684_vm6, %v8769_v22 }
 0x1d1   :  { %v5157_v51 = vsel %vm540_vm1, %v5145_v32, %v5146_v57  ;;  %v5159_v33 = vsel %vm540_vm1, %v5146_v57, %v5147_v20  ;;  %v3761_v43 = vpop.permute.xlu0 %3760  ;;  %4005 = vmatprep.mubr.bf16.mxu1 %v9464_v25  ;;  %v8825_v32 = vld [vmem:[%s9430_s0 + $0x28] sm:$0xff] }
 0x1d2   :  { %v5158_v8 = vsel %vm5151_vm11, %v5157_v51, %v5134_v45  ;;  %v5160_v48 = vsel %vm5151_vm11, %v5159_v33, %v5136_v3  ;;  %v3759_v47 = vpop.permute.xlu1 %3758 }
 0x1d3   :  { %v5179_v13 = vmul.bf16 %v8791_v21, %v5158_v8  ;;  %v3787_v36 = vsel %vm3782_vm12, %v3757_v1, %v3759_v47  ;;  %v3788_v62 = vsel %vm3782_vm12, %v3759_v47, %v3761_v43  ;;  %v5180_v42 = vmul.bf16 %v8799_v34, %v5160_v48 }
 0x1d4   :  { %v3815_v0 = vsel %vm540_vm1, %v3787_v36, 0  ;;  %6809 = vmatprep.subr.msk.bf16.mxu0 %vm540_vm1, %v3788_v62 }
 0x1d5   :  { %v6882_v30 = vcombine.low %v5179_v13, %v5179_v13  ;;  %v6883_v24 = vcombine.high %v5179_v13, %v5179_v13  ;;  %3933 = vmatpush1.bf16.msra.mxu0 %v3815_v0  ;;  %v3765_v15 = vpop.permute.xlu0 %3764  ;;  %v6884_v55 = vcombine.low %v5180_v42, %v5180_v42  ;;  %v6885_v56 = vcombine.high %v5180_v42, %v5180_v42 }
 0x1d6   :  { %v3763_v60 = vpop.permute.xlu1 %3762 }
 0x1d7   :  { %v3789_v29 = vsel %vm3782_vm12, %v3761_v43, %v3763_v60  ;;  %v3790_v14 = vsel %vm3782_vm12, %v3763_v60, %v3765_v15  ;;  %5257 = vrot.lane.b32.xlu1 %v6882_v30, %s7071_s11  ;;  %5259 = vrot.lane.b32.xlu0 %v6883_v24, %s7071_s11  ;;  %v7046_v60 = vld [vmem:[%s9430_s0] sm:$0xff] }
 0x1d8   :  { %v3821_v41 = vsel %vm540_vm1, %v3789_v29, 0  ;;  %6810 = vmatmul.mubr.msk.bf16.vlgmr.msra.gmra.mrb[84].mxu0 %vm684_vm6, %v8769_v22  ;;  %6811 = vmatprep.subr.msk.bf16.mxu1 %vm540_vm1, %v3790_v14 }
 0x1d9   :  { %3974 = vmatpush1.bf16.msra.mxu1 %v3821_v41  ;;  %4046 = vmatprep.mubr.bf16.mxu0 %v9464_v25  ;;  %v5140_v38 = vpop.permute.xlu0 %5139 }
 0x1da   :  { %v5138_v35 = vpop.permute.xlu1 %5137  ;;  %v5149_v50 = vrot.slane %v5140_v38, 4 }
 0x1db   :  { %v5148_v40 = vrot.slane %v5138_v35, 4  ;;  %5261 = vrot.lane.b32.xlu1 %v6884_v55, %s7071_s11  ;;  %5263 = vrot.lane.b32.xlu0 %v6885_v56, %s7071_s11 }
 0x1dc   :  { %6812 = vmatmul.mubr.msk.bf16.vlgmr.msra.gmra.mrb[84].mxu1 %vm684_vm6, %v8769_v22 }
 0x1dd   :  { %v5161_v54 = vsel %vm540_vm1, %v5147_v20, %v5148_v40  ;;  %v5163_v11 = vsel %vm540_vm1, %v5148_v40, %v5149_v50  ;;  %4087 = vmatprep.mubr.bf16.mxu1 %v9464_v25 }
 0x1de   :  { %v5162_v39 = vsel %vm5151_vm11, %v5161_v54, %v5138_v35  ;;  %v5164_v31 = vsel %vm5151_vm11, %v5163_v11, %v5140_v38  ;;  %v3767_v26 = vpop.permute.xlu1 %3766 }
 0x1df   :  { %v5181_v28 = vmul.bf16 %v8825_v32, %v5162_v39  ;;  %v5182_v27 = vmul.bf16 %v8831_v5, %v5164_v31  ;;  %v3791_v59 = vsel %vm3782_vm12, %v3765_v15, %v3767_v26 }
 0x1e0   :  { %v3827_v49 = vsel %vm540_vm1, %v3791_v59, 0 }
 0x1e1   :  { %v6886_v52 = vcombine.low %v5181_v28, %v5181_v28  ;;  %v6887_v58 = vcombine.high %v5181_v28, %v5181_v28  ;;  %v6888_v16 = vcombine.low %v5182_v27, %v5182_v27  ;;  %v6889_v61 = vcombine.high %v5182_v27, %v5182_v27  ;;  %v7047_v27 = vld [vmem:[%s9430_s0 + $0x8] sm:$0xff] }
 0x1e3   :  { %5265 = vrot.lane.b32.xlu1 %v6886_v52, %s7071_s11  ;;  %5267 = vrot.lane.b32.xlu0 %v6887_v58, %s7071_s11 }
 0x1e7   :  { %5269 = vrot.lane.b32.xlu1 %v6888_v16, %s7071_s11  ;;  %5271 = vrot.lane.b32.xlu0 %v6889_v61, %s7071_s11 }
 0x1ec   :  { %v3771_v10 = vpop.permute.xlu1 %3770 }
 0x1ed   :  { %v3769_v4 = vpop.permute.xlu0 %3768 }
 0x1ee   :  { %v3792_v19 = vsel %vm3782_vm12, %v3767_v26, %v3769_v4  ;;  %v3793_v46 = vsel %vm3782_vm12, %v3769_v4, %v3771_v10  ;;  %v6917_v26 = vld.sshfl [vmem:[%s9429_s2] sm:$0x1 pattern:$0x75316420] }
 0x1ef   :  { %6813 = vmatprep.subr.msk.bf16.mxu0 %vm540_vm1, %v3792_v19  ;;  %v3833_v2 = vsel %vm540_vm1, %v3793_v46, 0 }
 0x1f0   :  { %4015 = vmatpush1.bf16.msra.mxu0 %v3827_v49  ;;  %v5142_v53 = vpop.permute.xlu1 %5141  ;;  %v7048_v49 = vld [vmem:[%s9430_s0 + $0x10] sm:$0xff] }
 0x1f1   :  { %v3773_v6 = vpop.permute.xlu0 %3772  ;;  %v5150_v17 = vrot.slane %v5142_v53, 4 }
 0x1f2   :  { %v3794_v44 = vsel %vm3782_vm12, %v3771_v10, %v3773_v6 }
 0x1f3   :  { %v5165_v23 = vsel %vm540_vm1, %v5149_v50, %v5150_v17  ;;  %6814 = vmatmul.mubr.msk.bf16.vlgmr.msra.gmra.mrb[88].mxu0 %vm684_vm6, %v8769_v22  ;;  %6815 = vmatprep.subr.msk.bf16.mxu1 %vm540_vm1, %v3794_v44  ;;  %v5184_v3 = vmul.bf16 %v8477_v63, %v5150_v17 }
 0x1f4   :  { %v5166_v1 = vsel %vm5151_vm11, %v5165_v23, %v5142_v53  ;;  %4056 = vmatpush1.bf16.msra.mxu1 %v3833_v2  ;;  %4128 = vmatprep.mubr.bf16.mxu0 %v9464_v25  ;;  %v5916_v23 = vrot.slane %v6917_v26, %v7316_v12 }
 0x1f5   :  { %v5183_v7 = vmul.bf16 %v8854_v37, %v5166_v1  ;;  %v3775_v9 = vpop.permute.xlu0 %3774  ;;  %v6892_v63 = vcombine.low %v5184_v3, %v5184_v3 }
 0x1f6   :  { %v3795_v57 = vsel %vm3782_vm12, %v3773_v6, %v3775_v9 }
 0x1f7   :  { %v6890_v45 = vcombine.low %v5183_v7, %v5183_v7  ;;  %v6891_v20 = vcombine.high %v5183_v7, %v5183_v7  ;;  %6816 = vmatmul.mubr.msk.bf16.vlgmr.msra.gmra.mrb[88].mxu1 %vm684_vm6, %v8769_v22  ;;  %v3839_v48 = vsel %vm540_vm1, %v3795_v57, 0 }
 0x1f8   :  { %v3777_v51 = vpop.permute.xlu1 %3776  ;;  %4169 = vmatprep.mubr.bf16.mxu1 %v9464_v25 }
 0x1f9   :  { %v3779_v33 = vpop.permute.xlu0 %3778  ;;  %v3796_v8 = vsel %vm3782_vm12, %v3775_v9, %v3777_v51  ;;  %5275 = vrot.lane.b32.xlu0 %v6891_v20, %s7071_s11  ;;  %5273 = vrot.lane.b32.xlu1 %v6890_v45, %s7071_s11 }
 0x1fa   :  { %6817 = vmatprep.subr.msk.bf16.mxu0 %vm540_vm1, %v3796_v8  ;;  %v3797_v43 = vsel %vm3782_vm12, %v3777_v51, %v3779_v33 }
 0x1fb   :  { %4097 = vmatpush1.bf16.msra.mxu0 %v3839_v48  ;;  %v3845_v62 = vsel %vm540_vm1, %v3797_v43, 0 }
 0x1fc   :  { %v3781_v47 = vpop.permute.xlu1 %3780 }
 0x1fd   :  { %v5845_v13 = vpop.permute.xlu0 %5844  ;;  %v3798_v36 = vsel %vm3782_vm12, %v3779_v33, %v3781_v47  ;;  %5277 = vrot.lane.b32.xlu1 %v6892_v63, %s7071_s11 }
 0x1fe   :  { %v5860_v42 = vrot.slane %v5845_v13, 4  ;;  %6818 = vmatmul.mubr.msk.bf16.vlgmr.msra.gmra.mrb[92].mxu0 %vm684_vm6, %v8769_v22  ;;  %6819 = vmatprep.subr.msk.bf16.mxu1 %vm540_vm1, %v3798_v36 }
 0x1ff   :  { %v8874_v0 = vpop.f32.mrb[0].mxu0  ;;  %4138 = vmatpush1.bf16.msra.mxu1 %v3845_v62  ;;  %4710 = vmatprep.mubr.bf16.mxu0 %v9464_v25 }
 0x200   :  { %v5869_v30 = vsel %vm5868_vm13, %v5860_v42, %v5845_v13  ;;  %v8878_v24 = vpop.f32.mrb[1].mxu0  ;;  %v5847_v15 = vpop.permute.xlu1 %5846 }
 0x201   :  { %v5893_v55 = vmul.bf16 %v7046_v60, %v5869_v30  ;;  %v775_v29 = vpop.f32.mrb[2].mxu0  ;;  %v8883_v14 = vpop.permute.xlu0 %5848  ;;  %v5861_v56 = vrot.slane %v5847_v15, 4 }
 0x202   :  { %v5862_v41 = vrot.slane %v8883_v14, 4  ;;  %v776_v35 = vpop.f32.mrb[3].mxu0  ;;  %6820 = vmatmul.mubr.msk.bf16.vlgmr.msra.gmra.mrb[92].mxu1 %vm684_vm6, %v8769_v22 }
 0x203   :  { %v6918_v38 = vcombine.low %v5893_v55, %v5893_v55  ;;  %v6919_v40 = vcombine.high %v5893_v55, %v5893_v55  ;;  %v5870_v50 = vsel %vm540_vm1, %v5860_v42, %v5861_v56  ;;  %v8889_v54 = vpop.f32.mrb[0].mxu1  ;;  %4751 = vmatprep.mubr.bf16.mxu1 %v9464_v25 }
 0x204   :  { %v5871_v11 = vsel %vm5868_vm13, %v5870_v50, %v5847_v15  ;;  %v5872_v39 = vsel %vm540_vm1, %v5861_v56, %v5862_v41  ;;  %v8896_v31 = vpop.f32.mrb[1].mxu1  ;;  %v4578_v28 = vpop.permute.xlu1 %4577 }
 0x205   :  { %v5873_v22 = vsel %vm5868_vm13, %v5872_v39, %v8883_v14  ;;  %v5894_v52 = vmul.bf16 %v7047_v27, %v5871_v11  ;;  %v816_v58 = vpop.f32.mrb[2].mxu1  ;;  %v4580_v16 = vpop.permute.xlu0 %4579  ;;  %5962 = vrot.lane.b32.xlu0 %v6918_v38, %s7073_s27  ;;  %5964 = vrot.lane.b32.xlu1 %v6919_v40, %s7073_s27 }
 0x206   :  { %v817_v61 = vpop.f32.mrb[3].mxu1  ;;  %v4611_v4 = vsel %vm4483_vm9, %v4578_v28, %v4580_v16  ;;  %v5895_v46 = vmul.bf16 %v7048_v49, %v5873_v22 }
 0x207   :  { %v6920_v59 = vcombine.low %v5894_v52, %v5894_v52  ;;  %v6921_v10 = vcombine.high %v5894_v52, %v5894_v52  ;;  %v8909_v19 = vpop.f32.mrb[4].mxu0  ;;  %v4631_v1 = vsel %vm540_vm1, %v4611_v4, 0 }
 0x208   :  { %v8914_v53 = vpop.f32.mrb[5].mxu0  ;;  %v4582_v6 = vpop.permute.xlu1 %4581  ;;  %v6922_v45 = vcombine.low %v5895_v46, %v5895_v46  ;;  %v6923_v47 = vcombine.high %v5895_v46, %v5895_v46 }
 0x209   :  { %v857_v17 = vpop.f32.mrb[6].mxu0  ;;  %v4584_v44 = vpop.permute.xlu0 %4583  ;;  %v4612_v2 = vsel %vm4483_vm9, %v4580_v16, %v4582_v6  ;;  %5968 = vrot.lane.b32.xlu1 %v6921_v10, %s7073_s27  ;;  %5966 = vrot.lane.b32.xlu0 %v6920_v59, %s7073_s27 }
 0x20a   :  { %v858_v7 = vpop.f32.mrb[7].mxu0  ;;  %6851 = vmatprep.subr.msk.bf16.mxu0 %vm540_vm1, %v4612_v2  ;;  %v4613_v9 = vsel %vm4483_vm9, %v4582_v6, %v4584_v44 }
 0x20b   :  { %v8923_v3 = vpop.f32.mrb[4].mxu1  ;;  %4679 = vmatpush1.bf16.msra.mxu0 %v4631_v1  ;;  %v4637_v48 = vsel %vm540_vm1, %v4613_v9, 0 }
 0x20c   :  { %v8925_v20 = vpop.f32.mrb[5].mxu1  ;;  %v4586_v57 = vpop.permute.xlu1 %4585 }
 0x20d   :  { %v898_v51 = vpop.f32.mrb[6].mxu1  ;;  %v8927_v33 = vpop.permute.xlu0 %4532  ;;  %v4614_v8 = vsel %vm4483_vm9, %v4584_v44, %v4586_v57  ;;  %5970 = vrot.lane.b32.xlu0 %v6922_v45, %s7073_s27  ;;  %5917 = vrot.lane.b32.xlu1 %v5916_v23, %s7064_s1 }
 0x20e   :  { %v899_v63 = vpop.f32.mrb[7].mxu1  ;;  %6852 = vmatmul.mubr.msk.bf16.vlgmr.msra.gmra.mrb[96].mxu0 %vm684_vm6, %v8927_v33  ;;  %6853 = vmatprep.subr.msk.bf16.mxu1 %vm540_vm1, %v4614_v8 }
 0x20f   :  { %v8936_v43 = vpop.f32.mrb[8].mxu0  ;;  %4720 = vmatpush1.bf16.msra.mxu1 %v4637_v48  ;;  %4792 = vmatprep.mubr.bf16.mxu0 %v9464_v25 }
 0x210   :  { %v8939_v13 = vpop.f32.mrb[9].mxu0  ;;  %v5851_v36 = vpop.permute.xlu1 %5850 }
 0x211   :  { %v939_v62 = vpop.f32.mrb[10].mxu0  ;;  %v5853_v42 = vpop.permute.xlu0 %5852  ;;  %v5863_v30 = vrot.slane %v5851_v36, 4  ;;  %5972 = vrot.lane.b32.xlu0 %v6923_v47, %s7073_s27 }
 0x212   :  { %v5864_v15 = vrot.slane %v5853_v42, 4  ;;  %v940_v60 = vpop.f32.mrb[11].mxu0  ;;  %6854 = vmatmul.mubr.msk.bf16.vlgmr.msra.gmra.mrb[96].mxu1 %vm684_vm6, %v8927_v33 }
 0x213   :  { %v5874_v55 = vsel %vm540_vm1, %v5862_v41, %v5863_v30  ;;  %v8947_v29 = vpop.f32.mrb[8].mxu1  ;;  %4833 = vmatprep.mubr.bf16.mxu1 %v9464_v25 }
 0x214   :  { %v5875_v56 = vsel %vm5868_vm13, %v5874_v55, %v5851_v36  ;;  %v5876_v35 = vsel %vm540_vm1, %v5863_v30, %v5864_v15  ;;  %v8952_v38 = vpop.f32.mrb[9].mxu1  ;;  %v4588_v40 = vpop.permute.xlu1 %4587 }
 0x215   :  { %v5877_v50 = vsel %vm5868_vm13, %v5876_v35, %v5853_v42  ;;  %v5896_v11 = vmul.bf16 %v8791_v21, %v5875_v56  ;;  %v980_v39 = vpop.f32.mrb[10].mxu1  ;;  %v4590_v28 = vpop.permute.xlu0 %4589  ;;  %v4615_v14 = vsel %vm4483_vm9, %v4586_v57, %v4588_v40 }
 0x216   :  { %v4616_v41 = vsel %vm4483_vm9, %v4588_v40, %v4590_v28  ;;  %v4643_v22 = vsel %vm540_vm1, %v4615_v14, 0  ;;  %v981_v27 = vpop.f32.mrb[11].mxu1  ;;  %v5897_v61 = vmul.bf16 %v8799_v34, %v5877_v50 }
 0x217   :  { %v6924_v52 = vcombine.low %v5896_v11, %v5896_v11  ;;  %v6925_v58 = vcombine.high %v5896_v11, %v5896_v11  ;;  %v8959_v16 = vpop.f32.mrb[12].mxu0  ;;  %6855 = vmatprep.subr.msk.bf16.mxu0 %vm540_vm1, %v4616_v41 }
 0x218   :  { %v8963_v26 = vpop.f32.mrb[13].mxu0  ;;  %4761 = vmatpush1.bf16.msra.mxu0 %v4643_v22  ;;  %v4592_v21 = vpop.permute.xlu1 %4591  ;;  %v6927_v34 = vcombine.high %v5897_v61, %v5897_v61  ;;  %v6926_v44 = vcombine.low %v5897_v61, %v5897_v61 }
 0x219   :  { %v1021_v59 = vpop.f32.mrb[14].mxu0  ;;  %v4594_v10 = vpop.permute.xlu0 %4593  ;;  %v4617_v4 = vsel %vm4483_vm9, %v4590_v28, %v4592_v21  ;;  %5976 = vrot.lane.b32.xlu0 %v6925_v58, %s7073_s27  ;;  %5974 = vrot.lane.b32.xlu1 %v6924_v52, %s7073_s27 }
 0x21a   :  { %v4618_v49 = vsel %vm4483_vm9, %v4592_v21, %v4594_v10  ;;  %v4649_v46 = vsel %vm540_vm1, %v4617_v4, 0  ;;  %v1022_v6 = vpop.f32.mrb[15].mxu0 }
 0x21b   :  { %v8970_v17 = vpop.f32.mrb[12].mxu1  ;;  %6856 = vmatmul.mubr.msk.bf16.vlgmr.msra.gmra.mrb[100].mxu0 %vm684_vm6, %v8927_v33  ;;  %6857 = vmatprep.subr.msk.bf16.mxu1 %vm540_vm1, %v4618_v49 }
 0x21c   :  { %v8975_v2 = vpop.f32.mrb[13].mxu1  ;;  %4802 = vmatpush1.bf16.msra.mxu1 %v4649_v46  ;;  %v5855_v23 = vpop.permute.xlu1 %5854  ;;  %4874 = vmatprep.mubr.bf16.mxu0 %v9464_v25 }
 0x21d   :  { %v1062_v1 = vpop.f32.mrb[14].mxu1  ;;  %v5857_v7 = vpop.permute.xlu0 %5856  ;;  %v5865_v9 = vrot.slane %v5855_v23, 4  ;;  %5980 = vrot.lane.b32.xlu0 %v6927_v34, %s7073_s27  ;;  %5978 = vrot.lane.b32.xlu1 %v6926_v44, %s7073_s27 }
 0x21e   :  { %v5866_v45 = vrot.slane %v5857_v7, 4  ;;  %v1063_v57 = vpop.f32.mrb[15].mxu1 }
 0x21f   :  { %v5878_v51 = vsel %vm540_vm1, %v5864_v15, %v5865_v9  ;;  %v1190_v8 = vpop.f32.mrb[16].mxu0  ;;  %6858 = vmatmul.mubr.msk.bf16.vlgmr.msra.gmra.mrb[100].mxu1 %vm684_vm6, %v8927_v33 }
 0x220   :  { %v5879_v48 = vsel %vm5868_vm13, %v5878_v51, %v5855_v23  ;;  %v5880_v63 = vsel %vm540_vm1, %v5865_v9, %v5866_v45  ;;  %v8986_v47 = vadd.f32 %v1190_v8, %v8874_v0  ;;  %v1192_v36 = vpop.f32.mrb[17].mxu0  ;;  %v4596_v62 = vpop.permute.xlu1 %4595  ;;  %4915 = vmatprep.mubr.bf16.mxu1 %v9464_v25 }
 0x221   :  { %v5881_v42 = vsel %vm5868_vm13, %v5880_v63, %v5857_v7  ;;  %v5898_v30 = vmul.bf16 %v8825_v32, %v5879_v48  ;;  %v8992_v15 = vadd.f32 %v1192_v36, %v8878_v24  ;;  %v4598_v60 = vpop.permute.xlu0 %4597  ;;  %v4619_v55 = vsel %vm4483_vm9, %v4594_v10, %v4596_v62  ;;  %v1194_v56 = vpop.f32.mrb[18].mxu0 }
 0x222   :  { %v4620_v35 = vsel %vm4483_vm9, %v4596_v62, %v4598_v60  ;;  %v4655_v0 = vsel %vm540_vm1, %v4619_v55, 0  ;;  %v1195_v40 = vpop.f32.mrb[19].mxu0  ;;  %v5899_v28 = vmul.bf16 %v8831_v5, %v5881_v42  ;;  %v7049_v42 = vld [vmem:[%s9430_s0 + $0x40] sm:$0xf] }
 0x223   :  { %v6928_v50 = vcombine.low %v5898_v30, %v5898_v30  ;;  %v6929_v11 = vcombine.high %v5898_v30, %v5898_v30  ;;  %v1231_v39 = vpop.f32.mrb[16].mxu1  ;;  %6859 = vmatprep.subr.msk.bf16.mxu0 %vm540_vm1, %v4620_v35 }
 0x224   :  { %v9000_v32 = vadd.f32 %v1231_v39, %v8889_v54  ;;  %v1233_v24 = vpop.f32.mrb[17].mxu1  ;;  %4843 = vmatpush1.bf16.msra.mxu0 %v4655_v0  ;;  %v4600_v14 = vpop.permute.xlu1 %4599  ;;  %v6930_v21 = vcombine.low %v5899_v28, %v5899_v28 }
 0x225   :  { %v9003_v41 = vadd.f32 %v1233_v24, %v8896_v31  ;;  %v4602_v22 = vpop.permute.xlu0 %4601  ;;  %v4621_v27 = vsel %vm4483_vm9, %v4598_v60, %v4600_v14  ;;  %5984 = vrot.lane.b32.xlu0 %v6929_v11, %s7073_s27  ;;  %5982 = vrot.lane.b32.xlu1 %v6928_v50, %s7073_s27  ;;  %v1235_v52 = vpop.f32.mrb[18].mxu1  ;;  %v6931_v31 = vcombine.high %v5899_v28, %v5899_v28 }
 0x226   :  { %v4622_v58 = vsel %vm4483_vm9, %v4600_v14, %v4602_v22  ;;  %v4661_v5 = vsel %vm540_vm1, %v4621_v27, 0  ;;  %v1236_v54 = vpop.f32.mrb[19].mxu1 }
 0x227   :  { %v1272_v61 = vpop.f32.mrb[20].mxu0  ;;  %6860 = vmatmul.mubr.msk.bf16.vlgmr.msra.gmra.mrb[104].mxu0 %vm684_vm6, %v8927_v33  ;;  %6861 = vmatprep.subr.msk.bf16.mxu1 %vm540_vm1, %v4622_v58 }
 0x228   :  { %v9014_v59 = vadd.f32 %v1272_v61, %v8909_v19  ;;  %v1274_v10 = vpop.f32.mrb[21].mxu0  ;;  %4884 = vmatpush1.bf16.msra.mxu1 %v4661_v5  ;;  %v5859_v4 = vpop.permute.xlu1 %5858  ;;  %4956 = vmatprep.mubr.bf16.mxu0 %v9464_v25 }
 0x229   :  { %v9018_v49 = vadd.f32 %v1274_v10, %v8914_v53  ;;  %v4604_v46 = vpop.permute.xlu0 %4603  ;;  %v5867_v6 = vrot.slane %v5859_v4, 4  ;;  %5988 = vrot.lane.b32.xlu0 %v6931_v31, %s7073_s27  ;;  %5986 = vrot.lane.b32.xlu1 %v6930_v21, %s7073_s27  ;;  %v1276_v34 = vpop.f32.mrb[22].mxu0 }
 0x22a   :  { %v1277_v44 = vpop.f32.mrb[23].mxu0  ;;  %v4623_v23 = vsel %vm4483_vm9, %v4602_v22, %v4604_v46 }
 0x22b   :  { %v5882_v19 = vsel %vm540_vm1, %v5866_v45, %v5867_v6  ;;  %v1313_v1 = vpop.f32.mrb[20].mxu1  ;;  %6862 = vmatmul.mubr.msk.bf16.vlgmr.msra.gmra.mrb[104].mxu1 %vm684_vm6, %v8927_v33  ;;  %v4667_v36 = vsel %vm540_vm1, %v4623_v23, 0  ;;  %v5901_v30 = vmul.bf16 %v7049_v42, %v5867_v6 }
 0x22c   :  { %v5883_v7 = vsel %vm5868_vm13, %v5882_v19, %v5859_v4  ;;  %v9028_v53 = vadd.f32 %v1313_v1, %v8923_v3  ;;  %v1315_v9 = vpop.f32.mrb[21].mxu1  ;;  %v4606_v57 = vpop.permute.xlu1 %4605  ;;  %4997 = vmatprep.mubr.bf16.mxu1 %v9464_v25 }
 0x22d   :  { %v5900_v51 = vmul.bf16 %v8854_v37, %v5883_v7  ;;  %v9033_v8 = vadd.f32 %v1315_v9, %v8925_v20  ;;  %v4624_v45 = vsel %vm4483_vm9, %v4604_v46, %v4606_v57  ;;  %v1317_v48 = vpop.f32.mrb[22].mxu1  ;;  %v4608_v63 = vpop.permute.xlu0 %4607  ;;  %v6934_v39 = vcombine.low %v5901_v30, %v5901_v30 }
 0x22e   :  { %6863 = vmatprep.subr.msk.bf16.mxu0 %vm540_vm1, %v4624_v45  ;;  %v4625_v3 = vsel %vm4483_vm9, %v4606_v57, %v4608_v63  ;;  %v1318_v62 = vpop.f32.mrb[23].mxu1 }
 0x22f   :  { %v6932_v37 = vcombine.low %v5900_v51, %v5900_v51  ;;  %v6933_v60 = vcombine.high %v5900_v51, %v5900_v51  ;;  %v1354_v20 = vpop.f32.mrb[24].mxu0  ;;  %4925 = vmatpush1.bf16.msra.mxu0 %v4667_v36  ;;  %v4673_v35 = vsel %vm540_vm1, %v4625_v3, 0 }
 0x230   :  { %v9043_v55 = vadd.f32 %v1354_v20, %v8936_v43  ;;  %v1356_v56 = vpop.f32.mrb[25].mxu0  ;;  %v4610_v0 = vpop.permute.xlu1 %4609 }
 0x231   :  { %v9047_v40 = vadd.f32 %v1356_v56, %v8939_v13  ;;  %v4626_v50 = vsel %vm4483_vm9, %v4608_v63, %v4610_v0  ;;  %5992 = vrot.lane.b32.xlu0 %v6933_v60, %s7073_s27  ;;  %5990 = vrot.lane.b32.xlu1 %v6932_v37, %s7073_s27  ;;  %v1358_v11 = vpop.f32.mrb[26].mxu0 }
 0x232   :  { %6864 = vmatmul.mubr.msk.bf16.vlgmr.msra.gmra.mrb[108].mxu0 %vm684_vm6, %v8927_v33  ;;  %6865 = vmatprep.subr.msk.bf16.mxu1 %vm540_vm1, %v4626_v50  ;;  %v1359_v43 = vpop.f32.mrb[27].mxu0 }
 0x233   :  { %v1395_v28 = vpop.f32.mrb[24].mxu1  ;;  %4966 = vmatpush1.bf16.msra.mxu1 %v4673_v35  ;;  %v5246_v24 = vpop.permute.xlu0 %5245  ;;  %5379 = vmatprep.mubr.bf16.mxu0 %v9464_v25 }
 0x234   :  { %v9057_v13 = vadd.f32 %v1395_v28, %v8947_v29  ;;  %v1397_v14 = vpop.f32.mrb[25].mxu1  ;;  %v5248_v22 = vpop.permute.xlu1 %5247 }
 0x235   :  { %v9060_v27 = vadd.f32 %v1397_v14, %v8952_v38  ;;  %5994 = vrot.lane.b32.xlu1 %v6934_v39, %s7073_s27  ;;  %v5280_v52 = vsel %vm5279_vm14, %v5246_v24, %v5248_v22  ;;  %v1399_v58 = vpop.f32.mrb[26].mxu1 }
 0x236   :  { %6866 = vmatmul.mubr.msk.bf16.vlgmr.msra.gmra.mrb[108].mxu1 %vm684_vm6, %v8927_v33  ;;  %v1400_v5 = vpop.f32.mrb[27].mxu1  ;;  %v5300_v29 = vsel %vm540_vm1, %v5280_v52, 0 }
 0x237   :  { %v1436_v54 = vpop.f32.mrb[28].mxu0  ;;  %5420 = vmatprep.mubr.bf16.mxu1 %v9464_v25 }
 0x238   :  { %v9069_v61 = vadd.f32 %v1436_v54, %v8959_v16  ;;  %v1438_v31 = vpop.f32.mrb[29].mxu0 }
 0x239   :  { %v5250_v38 = vpop.permute.xlu0 %5249  ;;  %v9072_v21 = vadd.f32 %v1438_v31, %v8963_v26  ;;  %v5252_v4 = vpop.permute.xlu1 %5251 }
 0x23a   :  { %v5281_v10 = vsel %vm5279_vm14, %v5248_v22, %v5250_v38  ;;  %v1440_v46 = vpop.f32.mrb[30].mxu0  ;;  %v5282_v33 = vsel %vm5279_vm14, %v5250_v38, %v5252_v4 }
 0x23b   :  { %6893 = vmatprep.subr.msk.bf16.mxu0 %vm540_vm1, %v5281_v10  ;;  %v1441_v6 = vpop.f32.mrb[31].mxu0  ;;  %v1477_v34 = vpop.f32.mrb[28].mxu1  ;;  %v5306_v44 = vsel %vm540_vm1, %v5282_v33, 0 }
 0x23c   :  { %5348 = vmatpush1.bf16.msra.mxu0 %v5300_v29  ;;  %v9079_v16 = vadd.f32 %v1477_v34, %v8970_v17  ;;  %v1479_v23 = vpop.f32.mrb[29].mxu1 }
 0x23d   :  { %v5254_v19 = vpop.permute.xlu0 %5253  ;;  %v9082_v26 = vadd.f32 %v1479_v23, %v8975_v2  ;;  %v9085_v7 = vpop.permute.xlu1 %5200 }
 0x23e   :  { %v5283_v1 = vsel %vm5279_vm14, %v5252_v4, %v5254_v19  ;;  %v1481_v9 = vpop.f32.mrb[30].mxu1 }
 0x23f   :  { %6894 = vmatmul.mubr.msk.bf16.vlgmr.msra.gmra.mrb[112].mxu0 %vm684_vm6, %v9085_v7  ;;  %6895 = vmatprep.subr.msk.bf16.mxu1 %vm540_vm1, %v5283_v1  ;;  %v1482_v57 = vpop.f32.mrb[31].mxu1  ;;  %v1991_v51 = vpop.f32.mrb[32].mxu0 }
 0x240   :  { %5389 = vmatpush1.bf16.msra.mxu1 %v5306_v44  ;;  %5461 = vmatprep.mubr.bf16.mxu0 %v9464_v25  ;;  %v9092_v17 = vadd.f32 %v1991_v51, %v8986_v47  ;;  %v1993_v2 = vpop.f32.mrb[33].mxu0 }
 0x241   :  { %v9095_v45 = vadd.f32 %v1993_v2, %v8992_v15  ;;  %v1995_v48 = vpop.f32.mrb[34].mxu0  ;;  %v5256_v36 = vpop.permute.xlu0 %5255 }
 0x242   :  { %v1996_v63 = vpop.f32.mrb[35].mxu0  ;;  %v5284_v15 = vsel %vm5279_vm14, %v5254_v19, %v5256_v36 }
 0x243   :  { %6896 = vmatmul.mubr.msk.bf16.vlgmr.msra.gmra.mrb[112].mxu1 %vm684_vm6, %v9085_v7  ;;  %v2032_v3 = vpop.f32.mrb[32].mxu1  ;;  %v5312_v56 = vsel %vm540_vm1, %v5284_v15, 0 }
 0x244   :  { %5502 = vmatprep.mubr.bf16.mxu1 %v9464_v25  ;;  %v9101_v62 = vadd.f32 %v2032_v3, %v9000_v32  ;;  %v2034_v42 = vpop.f32.mrb[33].mxu1 }
 0x245   :  { %v9104_v47 = vadd.f32 %v2034_v42, %v9003_v41  ;;  %v2036_v30 = vpop.f32.mrb[34].mxu1 }
 0x246   :  { %v2037_v37 = vpop.f32.mrb[35].mxu1 }
 0x247   :  { %v2073_v60 = vpop.f32.mrb[36].mxu0 }
 0x248   :  { %v9108_v20 = vadd.f32 %v2073_v60, %v9014_v59  ;;  %v2075_v35 = vpop.f32.mrb[37].mxu0 }
 0x249   :  { %v5258_v0 = vpop.permute.xlu1 %5257  ;;  %v9112_v50 = vadd.f32 %v2075_v35, %v9018_v49  ;;  %v2077_v11 = vpop.f32.mrb[38].mxu0 }
 0x24a   :  { %v5285_v32 = vsel %vm5279_vm14, %v5256_v36, %v5258_v0  ;;  %v5260_v41 = vpop.permute.xlu0 %5259  ;;  %v2078_v43 = vpop.f32.mrb[39].mxu0 }
 0x24b   :  { %6897 = vmatprep.subr.msk.bf16.mxu0 %vm540_vm1, %v5285_v32  ;;  %v5286_v39 = vsel %vm5279_vm14, %v5258_v0, %v5260_v41  ;;  %v2114_v28 = vpop.f32.mrb[36].mxu1 }
 0x24c   :  { %5430 = vmatpush1.bf16.msra.mxu0 %v5312_v56  ;;  %v9118_v59 = vadd.f32 %v2114_v28, %v9028_v53  ;;  %v2116_v24 = vpop.f32.mrb[37].mxu1  ;;  %v5318_v14 = vsel %vm540_vm1, %v5286_v39, 0  ;;  %v9_v53 = vstv %s9431_s3 }
 0x24d   :  { %v5262_v22 = vpop.permute.xlu1 %5261  ;;  %v9122_v49 = vadd.f32 %v2116_v24, %v9033_v8  ;;  %v2118_v52 = vpop.f32.mrb[38].mxu1  ;;  %10 = vst [vmem:[#allocation2] sm:$0x1] %v9_v53 }
 0x24e   :  { %v5287_v58 = vsel %vm5279_vm14, %v5260_v41, %v5262_v22  ;;  %v2119_v5 = vpop.f32.mrb[39].mxu1  ;;  %v5264_v54 = vpop.permute.xlu0 %5263 }
 0x24f   :  { %6898 = vmatmul.mubr.msk.bf16.vlgmr.msra.gmra.mrb[116].mxu0 %vm684_vm6, %v9085_v7  ;;  %6899 = vmatprep.subr.msk.bf16.mxu1 %vm540_vm1, %v5287_v58  ;;  %v2155_v29 = vpop.f32.mrb[40].mxu0  ;;  %v5288_v4 = vsel %vm5279_vm14, %v5262_v22, %v5264_v54 }
 0x250   :  { %5471 = vmatpush1.bf16.msra.mxu1 %v5318_v14  ;;  %5543 = vmatprep.mubr.bf16.mxu0 %v9464_v25  ;;  %v9133_v8 = vadd.f32 %v2155_v29, %v9043_v55  ;;  %v2157_v31 = vpop.f32.mrb[41].mxu0  ;;  %v5324_v34 = vsel %vm540_vm1, %v5288_v4, 0 }
 0x251   :  { %v9136_v38 = vadd.f32 %v2157_v31, %v9047_v40  ;;  %v2159_v10 = vpop.f32.mrb[42].mxu0 }
 0x252   :  { %v2160_v46 = vpop.f32.mrb[43].mxu0 }
 0x253   :  { %6900 = vmatmul.mubr.msk.bf16.vlgmr.msra.gmra.mrb[116].mxu1 %vm684_vm6, %v9085_v7  ;;  %v2196_v33 = vpop.f32.mrb[40].mxu1 }
 0x254   :  { %5584 = vmatprep.mubr.bf16.mxu1 %v9464_v25  ;;  %v9143_v6 = vadd.f32 %v2196_v33, %v9057_v13  ;;  %v2198_v55 = vpop.f32.mrb[41].mxu1  ;;  %v6408_v13 = vld [vmem:[#allocation2] sm:$0x1] }
 0x255   :  { %v5266_v44 = vpop.permute.xlu1 %5265  ;;  %v9147_v40 = vadd.f32 %v2198_v55, %v9060_v27  ;;  %v2200_v23 = vpop.f32.mrb[42].mxu1  ;;  %6411 = vperm.xlu0 %6974, %v6408_v13  }
 0x256   :  { %v5289_v19 = vsel %vm5279_vm14, %v5264_v54, %v5266_v44  ;;  %v5268_v1 = vpop.permute.xlu0 %5267  ;;  %v2201_v9 = vpop.f32.mrb[43].mxu1 }
 0x257   :  { %6901 = vmatprep.subr.msk.bf16.mxu0 %vm540_vm1, %v5289_v19  ;;  %v5290_v57 = vsel %vm5279_vm14, %v5266_v44, %v5268_v1  ;;  %v2237_v51 = vpop.f32.mrb[44].mxu0 }
 0x258   :  { %5512 = vmatpush1.bf16.msra.mxu0 %v5324_v34  ;;  %v9153_v2 = vadd.f32 %v2237_v51, %v9069_v61  ;;  %v2239_v48 = vpop.f32.mrb[45].mxu0  ;;  %v5330_v63 = vsel %vm540_vm1, %v5290_v57, 0 }
 0x259   :  { %v5270_v27 = vpop.permute.xlu1 %5269  ;;  %v9157_v36 = vadd.f32 %v2239_v48, %v9072_v21  ;;  %v2241_v42 = vpop.f32.mrb[46].mxu0 }
 0x25a   :  { %v5291_v3 = vsel %vm5279_vm14, %v5268_v1, %v5270_v27  ;;  %v2242_v30 = vpop.f32.mrb[47].mxu0  ;;  %v5272_v22 = vpop.permute.xlu0 %5271 }
 0x25b   :  { %6902 = vmatmul.mubr.msk.bf16.vlgmr.msra.gmra.mrb[120].mxu0 %vm684_vm6, %v9085_v7  ;;  %6903 = vmatprep.subr.msk.bf16.mxu1 %vm540_vm1, %v5291_v3  ;;  %v2278_v15 = vpop.f32.mrb[44].mxu1 }
 0x25c   :  { %5553 = vmatpush1.bf16.msra.mxu1 %v5330_v63  ;;  %5625 = vmatprep.mubr.bf16.mxu0 %v9464_v25  ;;  %v9165_v61 = vadd.f32 %v2278_v15, %v9079_v16  ;;  %v2280_v37 = vpop.f32.mrb[45].mxu1 }
 0x25d   :  { %v9168_v21 = vadd.f32 %v2280_v37, %v9082_v26  ;;  %v2282_v60 = vpop.f32.mrb[46].mxu1 }
 0x25e   :  { %v2283_v56 = vpop.f32.mrb[47].mxu1 }
 0x25f   :  { %6904 = vmatmul.mubr.msk.bf16.vlgmr.msra.gmra.mrb[120].mxu1 %vm684_vm6, %v9085_v7  ;;  %v2660_v35 = vpop.f32.mrb[48].mxu0 }
 0x260   :  { %5666 = vmatprep.mubr.bf16.mxu1 %v9464_v25  ;;  %v9174_v0 = vadd.f32 %v2660_v35, %v9092_v17  ;;  %v2662_v32 = vpop.f32.mrb[49].mxu0 }
 0x261   :  { %v9177_v11 = vadd.f32 %v2662_v32, %v9095_v45  ;;  %v2664_v16 = vpop.f32.mrb[50].mxu0 }
 0x262   :  { %v2665_v41 = vpop.f32.mrb[51].mxu0 }
 0x263   :  { %v2701_v43 = vpop.f32.mrb[48].mxu1 }
 0x264   :  { %v9180_v26 = vadd.f32 %v2701_v43, %v9101_v62  ;;  %v2703_v39 = vpop.f32.mrb[49].mxu1  ;;  %v5292_v62 = vsel %vm5279_vm14, %v5270_v27, %v5272_v22 }
 0x265   :  { %v9183_v28 = vadd.f32 %v2703_v39, %v9104_v47  ;;  %v2705_v24 = vpop.f32.mrb[50].mxu1 }
 0x266   :  { %v2706_v14 = vpop.f32.mrb[51].mxu1 }
 0x267   :  { %v2742_v52 = vpop.f32.mrb[52].mxu0 }
 0x268   :  { %v9186_v17 = vadd.f32 %v2742_v52, %v9108_v20  ;;  %v2744_v58 = vpop.f32.mrb[53].mxu0 }
 0x269   :  { %v9189_v45 = vadd.f32 %v2744_v58, %v9112_v50  ;;  %v2746_v5 = vpop.f32.mrb[54].mxu0  ;;  %v5336_v50 = vsel %vm540_vm1, %v5292_v62, 0 }
 0x26a   :  { %v2747_v54 = vpop.f32.mrb[55].mxu0 }
 0x26b   :  { %v2783_v29 = vpop.f32.mrb[52].mxu1  ;;  %v5276_v53 = vpop.permute.xlu0 %5275 }
 0x26c   :  { %v9193_v47 = vadd.f32 %v2783_v29, %v9118_v59  ;;  %v2785_v31 = vpop.f32.mrb[53].mxu1  ;;  %v5274_v10 = vpop.permute.xlu1 %5273 }
 0x26d   :  { %v9196_v4 = vadd.f32 %v2785_v31, %v9122_v49  ;;  %v5293_v20 = vsel %vm5279_vm14, %v5272_v22, %v5274_v10  ;;  %v2787_v46 = vpop.f32.mrb[54].mxu1  ;;  %v5294_v55 = vsel %vm5279_vm14, %v5274_v10, %v5276_v53 }
 0x26e   :  { %v2788_v33 = vpop.f32.mrb[55].mxu1  ;;  %6905 = vmatprep.subr.msk.bf16.mxu0 %vm540_vm1, %v5293_v20  ;;  %v5342_v9 = vsel %vm540_vm1, %v5294_v55, 0 }
 0x26f   :  { %v2824_v34 = vpop.f32.mrb[56].mxu0  ;;  %5594 = vmatpush1.bf16.msra.mxu0 %v5336_v50 }
 0x270   :  { %v9203_v59 = vadd.f32 %v2824_v34, %v9133_v8  ;;  %v5278_v44 = vpop.permute.xlu1 %5277  ;;  %v2826_v23 = vpop.f32.mrb[57].mxu0 }
 0x271   :  { %v5295_v49 = vsel %vm5279_vm14, %v5276_v53, %v5278_v44  ;;  %v9207_v19 = vadd.f32 %v2826_v23, %v9136_v38  ;;  %v2828_v1 = vpop.f32.mrb[58].mxu0 }
 0x272   :  { %v2829_v57 = vpop.f32.mrb[59].mxu0  ;;  %6906 = vmatmul.mubr.msk.bf16.vlgmr.msra.gmra.mrb[124].mxu0 %vm684_vm6, %v9085_v7  ;;  %6907 = vmatprep.subr.msk.bf16.mxu1 %vm540_vm1, %v5295_v49 }
 0x273   :  { %v2865_v51 = vpop.f32.mrb[56].mxu1  ;;  %5635 = vmatpush1.bf16.msra.mxu1 %v5342_v9  ;;  %6096 = vmatprep.mubr.bf16.mxu0 %v9464_v25 }
 0x274   :  { %v9215_v8 = vadd.f32 %v2865_v51, %v9143_v6  ;;  %v2867_v13 = vpop.f32.mrb[57].mxu1 }
 0x275   :  { %v9218_v38 = vadd.f32 %v2867_v13, %v9147_v40  ;;  %v2869_v48 = vpop.f32.mrb[58].mxu1 }
 0x276   :  { %v2870_v63 = vpop.f32.mrb[59].mxu1  ;;  %6908 = vmatmul.mubr.msk.bf16.vlgmr.msra.gmra.mrb[124].mxu1 %vm684_vm6, %v9085_v7 }
 0x277   :  { %v2906_v27 = vpop.f32.mrb[60].mxu0  ;;  %v5963_v3 = vpop.permute.xlu0 %5962  ;;  %6137 = vmatprep.mubr.bf16.mxu1 %v9464_v25 }
 0x278   :  { %v9224_v42 = vadd.f32 %v2906_v27, %v9153_v2  ;;  %v5965_v30 = vpop.permute.xlu1 %5964  ;;  %v2908_v6 = vpop.f32.mrb[61].mxu0 }
 0x279   :  { %v5997_v15 = vsel %vm5996_vm15, %v5963_v3, %v5965_v30  ;;  %v9228_v40 = vadd.f32 %v2908_v6, %v9157_v36  ;;  %v2910_v37 = vpop.f32.mrb[62].mxu0 }
 0x27a   :  { %v2911_v60 = vpop.f32.mrb[63].mxu0  ;;  %v6017_v56 = vsel %vm540_vm1, %v5997_v15, 0 }
 0x27b   :  { %v2947_v7 = vpop.f32.mrb[60].mxu1  ;;  %v5967_v35 = vpop.permute.xlu0 %5966 }
 0x27c   :  { %v9232_v32 = vadd.f32 %v2947_v7, %v9165_v61  ;;  %v2949_v16 = vpop.f32.mrb[61].mxu1  ;;  %v5998_v2 = vsel %vm5996_vm15, %v5965_v30, %v5967_v35  ;;  %v5969_v41 = vpop.permute.xlu1 %5968 }
 0x27d   :  { %v9236_v43 = vadd.f32 %v2949_v16, %v9168_v21  ;;  %v2951_v39 = vpop.f32.mrb[62].mxu1  ;;  %6935 = vmatprep.subr.msk.bf16.mxu0 %vm540_vm1, %v5998_v2  ;;  %v5999_v36 = vsel %vm5996_vm15, %v5967_v35, %v5969_v41 }
 0x27e   :  { %v2952_v24 = vpop.f32.mrb[63].mxu1  ;;  %6065 = vmatpush1.bf16.msra.mxu0 %v6017_v56  ;;  %v6023_v21 = vsel %vm540_vm1, %v5999_v36, 0 }
 0x27f   :  { %v3167_v14 = vpop.f32.mrb[64].mxu0  ;;  %v5971_v22 = vpop.permute.xlu0 %5970 }
 0x280   :  { %v9241_v52 = vadd.f32 %v3167_v14, %v9174_v0  ;;  %v6000_v61 = vsel %vm5996_vm15, %v5969_v41, %v5971_v22  ;;  %v3169_v58 = vpop.f32.mrb[65].mxu0  ;;  %v9244_v5 = vpop.permute.xlu1 %5917 }
 0x281   :  { %v9248_v54 = vadd.f32 %v3169_v58, %v9177_v11  ;;  %v3171_v62 = vpop.f32.mrb[66].mxu0  ;;  %6936 = vmatmul.mubr.msk.bf16.vlgmr.msra.gmra.mrb[128].mxu0 %vm684_vm6, %v9244_v5  ;;  %6937 = vmatprep.subr.msk.bf16.mxu1 %vm540_vm1, %v6000_v61 }
 0x282   :  { %v3172_v29 = vpop.f32.mrb[67].mxu0  ;;  %6106 = vmatpush1.bf16.msra.mxu1 %v6023_v21  ;;  %6178 = vmatprep.mubr.bf16.mxu0 %v9464_v25 }
 0x283   :  { %v3208_v0 = vpop.f32.mrb[64].mxu1  ;;  %v5973_v46 = vpop.permute.xlu0 %5972 }
 0x284   :  { %v9255_v53 = vadd.f32 %v3208_v0, %v9180_v26  ;;  %v3210_v31 = vpop.f32.mrb[65].mxu1 }
 0x285   :  { %v9258_v10 = vadd.f32 %v3210_v31, %v9183_v28  ;;  %v3212_v11 = vpop.f32.mrb[66].mxu1  ;;  %6938 = vmatmul.mubr.msk.bf16.vlgmr.msra.gmra.mrb[128].mxu1 %vm684_vm6, %v9244_v5  ;;  %v6001_v28 = vsel %vm5996_vm15, %v5971_v22, %v5973_v46 }
 0x286   :  { %v3213_v20 = vpop.f32.mrb[67].mxu1  ;;  %6219 = vmatprep.mubr.bf16.mxu1 %v9464_v25 }
 0x287   :  { %v3249_v50 = vpop.f32.mrb[68].mxu0 }
 0x288   :  { %v9264_v33 = vadd.f32 %v3249_v50, %v9186_v17  ;;  %v3251_v55 = vpop.f32.mrb[69].mxu0 }
 0x289   :  { %v9267_v26 = vadd.f32 %v3251_v55, %v9189_v45  ;;  %v3253_v34 = vpop.f32.mrb[70].mxu0  ;;  %v6029_v45 = vsel %vm540_vm1, %v6001_v28, 0 }
 0x28a   :  { %v3254_v44 = vpop.f32.mrb[71].mxu0 }
 0x28b   :  { %v3290_v23 = vpop.f32.mrb[68].mxu1  ;;  %v5977_v49 = vpop.permute.xlu0 %5976 }
 0x28c   :  { %v9271_v1 = vadd.f32 %v3290_v23, %v9193_v47  ;;  %v3292_v9 = vpop.f32.mrb[69].mxu1  ;;  %v5975_v57 = vpop.permute.xlu1 %5974 }
 0x28d   :  { %v9274_v51 = vadd.f32 %v3292_v9, %v9196_v4  ;;  %v6002_v17 = vsel %vm5996_vm15, %v5973_v46, %v5975_v57  ;;  %v3294_v13 = vpop.f32.mrb[70].mxu1  ;;  %v6003_v63 = vsel %vm5996_vm15, %v5975_v57, %v5977_v49 }
 0x28e   :  { %v3295_v48 = vpop.f32.mrb[71].mxu1  ;;  %6939 = vmatprep.subr.msk.bf16.mxu0 %vm540_vm1, %v6002_v17  ;;  %v6035_v37 = vsel %vm540_vm1, %v6003_v63, 0 }
 0x28f   :  { %v3331_v27 = vpop.f32.mrb[72].mxu0  ;;  %6147 = vmatpush1.bf16.msra.mxu0 %v6029_v45  ;;  %v5981_v56 = vpop.permute.xlu0 %5980 }
 0x290   :  { %v9281_v47 = vadd.f32 %v3331_v27, %v9203_v59  ;;  %v5979_v3 = vpop.permute.xlu1 %5978  ;;  %v3333_v30 = vpop.f32.mrb[73].mxu0 }
 0x291   :  { %v6004_v4 = vsel %vm5996_vm15, %v5977_v49, %v5979_v3  ;;  %v9285_v6 = vadd.f32 %v3333_v30, %v9207_v19  ;;  %v3335_v15 = vpop.f32.mrb[74].mxu0  ;;  %v6005_v41 = vsel %vm5996_vm15, %v5979_v3, %v5981_v56 }
 0x292   :  { %v3336_v60 = vpop.f32.mrb[75].mxu0  ;;  %6940 = vmatmul.mubr.msk.bf16.vlgmr.msra.gmra.mrb[132].mxu0 %vm684_vm6, %v9244_v5  ;;  %6941 = vmatprep.subr.msk.bf16.mxu1 %vm540_vm1, %v6004_v4  ;;  %v6041_v58 = vsel %vm540_vm1, %v6005_v41, 0 }
 0x293   :  { %v3372_v7 = vpop.f32.mrb[72].mxu1  ;;  %6188 = vmatpush1.bf16.msra.mxu1 %v6035_v37  ;;  %6260 = vmatprep.mubr.bf16.mxu0 %v9464_v25 }
 0x294   :  { %v9293_v59 = vadd.f32 %v3372_v7, %v9215_v8  ;;  %v3374_v35 = vpop.f32.mrb[73].mxu1 }
 0x295   :  { %v9296_v19 = vadd.f32 %v3374_v35, %v9218_v38  ;;  %v3376_v16 = vpop.f32.mrb[74].mxu1 }
 0x296   :  { %v3377_v2 = vpop.f32.mrb[75].mxu1  ;;  %6942 = vmatmul.mubr.msk.bf16.vlgmr.msra.gmra.mrb[132].mxu1 %vm684_vm6, %v9244_v5 }
 0x297   :  { %v3413_v39 = vpop.f32.mrb[76].mxu0  ;;  %v5985_v36 = vpop.permute.xlu0 %5984  ;;  %6301 = vmatprep.mubr.bf16.mxu1 %v9464_v25 }
 0x298   :  { %v9303_v24 = vadd.f32 %v3413_v39, %v9224_v42  ;;  %v5983_v8 = vpop.permute.xlu1 %5982  ;;  %v3415_v14 = vpop.f32.mrb[77].mxu0 }
 0x299   :  { %v6006_v22 = vsel %vm5996_vm15, %v5981_v56, %v5983_v8  ;;  %v9307_v38 = vadd.f32 %v3415_v14, %v9228_v40  ;;  %v3417_v61 = vpop.f32.mrb[78].mxu0  ;;  %v6007_v62 = vsel %vm5996_vm15, %v5983_v8, %v5985_v36 }
 0x29a   :  { %v3418_v21 = vpop.f32.mrb[79].mxu0  ;;  %6943 = vmatprep.subr.msk.bf16.mxu0 %vm540_vm1, %v6006_v22  ;;  %v6047_v46 = vsel %vm540_vm1, %v6007_v62, 0 }
 0x29b   :  { %v3454_v29 = vpop.f32.mrb[76].mxu1  ;;  %6229 = vmatpush1.bf16.msra.mxu0 %v6041_v58  ;;  %v5989_v55 = vpop.permute.xlu0 %5988 }
 0x29c   :  { %v9313_v42 = vadd.f32 %v3454_v29, %v9232_v32  ;;  %v3456_v0 = vpop.f32.mrb[77].mxu1  ;;  %v5987_v31 = vpop.permute.xlu1 %5986 }
 0x29d   :  { %v9316_v11 = vadd.f32 %v3456_v0, %v9236_v43  ;;  %v6008_v40 = vsel %vm5996_vm15, %v5985_v36, %v5987_v31  ;;  %v3458_v20 = vpop.f32.mrb[78].mxu1  ;;  %v6009_v49 = vsel %vm5996_vm15, %v5987_v31, %v5989_v55 }
 0x29e   :  { %v3459_v50 = vpop.f32.mrb[79].mxu1  ;;  %6944 = vmatmul.mubr.msk.bf16.vlgmr.msra.gmra.mrb[136].mxu0 %vm684_vm6, %v9244_v5  ;;  %6945 = vmatprep.subr.msk.bf16.mxu1 %vm540_vm1, %v6008_v40  ;;  %v6053_v63 = vsel %vm540_vm1, %v6009_v49, 0 }
 0x29f   :  { %v3884_v34 = vpop.f32.mrb[80].mxu0  ;;  %6270 = vmatpush1.bf16.msra.mxu1 %v6047_v46  ;;  %6342 = vmatprep.mubr.bf16.mxu0 %v9464_v25 }
 0x2a0   :  { %v9325_v32 = vadd.f32 %v3884_v34, %v9241_v52  ;;  %v3886_v43 = vpop.f32.mrb[81].mxu0 }
 0x2a1   :  { %v9328_v44 = vadd.f32 %v3886_v43, %v9248_v54  ;;  %v3888_v28 = vpop.f32.mrb[82].mxu0 }
 0x2a2   :  { %6946 = vmatmul.mubr.msk.bf16.vlgmr.msra.gmra.mrb[136].mxu1 %vm684_vm6, %v9244_v5  ;;  %v3889_v23 = vpop.f32.mrb[83].mxu0 }
 0x2a3   :  { %v3925_v9 = vpop.f32.mrb[80].mxu1  ;;  %v5993_v57 = vpop.permute.xlu0 %5992  ;;  %6383 = vmatprep.mubr.bf16.mxu1 %v9464_v25 }
 0x2a4   :  { %v4180_v17 = vadd.f32 %v3925_v9, %v9255_v53  ;;  %v3927_v13 = vpop.f32.mrb[81].mxu1  ;;  %v5991_v52 = vpop.permute.xlu1 %5990 }
 0x2a5   :  { %v4181_v45 = vadd.f32 %v3927_v13, %v9258_v10  ;;  %v6010_v54 = vsel %vm5996_vm15, %v5989_v55, %v5991_v52  ;;  %v3929_v48 = vpop.f32.mrb[82].mxu1  ;;  %v6011_v3 = vsel %vm5996_vm15, %v5991_v52, %v5993_v57 }
 0x2a6   :  { %6947 = vmatprep.subr.msk.bf16.mxu0 %vm540_vm1, %v6010_v54  ;;  %v3930_v27 = vpop.f32.mrb[83].mxu1  ;;  %v6059_v53 = vsel %vm540_vm1, %v6011_v3, 0 }
 0x2a7   :  { %6311 = vmatpush1.bf16.msra.mxu0 %v6053_v63 }
 0x2a8   :  { %v5995_v30 = vpop.permute.xlu1 %5994 }
 0x2a9   :  { %v6012_v25 = vsel %vm5996_vm15, %v5993_v57, %v5995_v30 }
 0x2aa   :  { %6948 = vmatmul.mubr.msk.bf16.vlgmr.msra.gmra.mrb[140].mxu0 %vm684_vm6, %v9244_v5  ;;  %6949 = vmatprep.subr.msk.bf16.mxu1 %vm540_vm1, %v6012_v25 }
 0x2ab   :  { %v3966_v10 = vpop.f32.mrb[84].mxu0  ;;  %6352 = vmatpush1.bf16.msra.mxu1 %v6059_v53 }
 0x2ac   :  { %v4182_v4 = vadd.f32 %v3966_v10, %v9264_v33  ;;  %v3968_v15 = vpop.f32.mrb[85].mxu0 }
 0x2ad   :  { %v4183_v37 = vadd.f32 %v3968_v15, %v9267_v26  ;;  %v3970_v60 = vpop.f32.mrb[86].mxu0 }
 0x2ae   :  { %v3971_v56 = vpop.f32.mrb[87].mxu0  ;;  %6950 = vmatmul.mubr.msk.bf16.vlgmr.msra.gmra.mrb[140].mxu1 %vm684_vm6, %v9244_v5 }
 0x2af   :  { %v4007_v7 = vpop.f32.mrb[84].mxu1 }
 0x2b0   :  { %v4184_v35 = vadd.f32 %v4007_v7, %v9271_v1  ;;  %v4009_v16 = vpop.f32.mrb[85].mxu1 }
 0x2b1   :  { %v4185_v2 = vadd.f32 %v4009_v16, %v9274_v51  ;;  %v4011_v41 = vpop.f32.mrb[86].mxu1 }
 0x2b2   :  { %v4012_v39 = vpop.f32.mrb[87].mxu1 }
 0x2c6   :  { %v4048_v36 = vpop.f32.mrb[88].mxu0 }
 0x2c7   :  { %v4186_v33 = vadd.f32 %v4048_v36, %v9281_v47  ;;  %v4050_v8 = vpop.f32.mrb[89].mxu0 }
 0x2c8   :  { %v4187_v14 = vadd.f32 %v4050_v8, %v9285_v6  ;;  %v4052_v26 = vpop.f32.mrb[90].mxu0 }
 0x2c9   :  { %v4053_v22 = vpop.f32.mrb[91].mxu0 }
 0x2ca   :  { %v4089_v61 = vpop.f32.mrb[88].mxu1 }
 0x2cb   :  { %v4188_v58 = vadd.f32 %v4089_v61, %v9293_v59  ;;  %v4091_v5 = vpop.f32.mrb[89].mxu1 }
 0x2cc   :  { %v4189_v21 = vadd.f32 %v4091_v5, %v9296_v19  ;;  %v4093_v1 = vpop.f32.mrb[90].mxu1 }
 0x2cd   :  { %v4094_v62 = vpop.f32.mrb[91].mxu1 }
 0x2d1   :  { %v4130_v29 = vpop.f32.mrb[92].mxu0 }
 0x2d2   :  { %v4190_v51 = vadd.f32 %v4130_v29, %v9303_v24  ;;  %v4132_v0 = vpop.f32.mrb[93].mxu0 }
 0x2d3   :  { %v4191_v31 = vadd.f32 %v4132_v0, %v9307_v38  ;;  %v4134_v47 = vpop.f32.mrb[94].mxu0 }
 0x2d4   :  { %v4135_v40 = vpop.f32.mrb[95].mxu0 }
 0x2d5   :  { %v4171_v20 = vpop.f32.mrb[92].mxu1 }
 0x2d6   :  { %v4192_v6 = vadd.f32 %v4171_v20, %v9313_v42  ;;  %v4173_v46 = vpop.f32.mrb[93].mxu1 }
 0x2d7   :  { %v4193_v50 = vadd.f32 %v4173_v46, %v9316_v11  ;;  %v4175_v59 = vpop.f32.mrb[94].mxu1 }
 0x2d8   :  { %v4176_v55 = vpop.f32.mrb[95].mxu1 }
 0x2e1   :  { %v4712_v34 = vpop.f32.mrb[96].mxu0 }
 0x2e2   :  { %v5006_v19 = vadd.f32 %v4712_v34, %v9325_v32  ;;  %v4714_v43 = vpop.f32.mrb[97].mxu0 }
 0x2e3   :  { %v5007_v28 = vadd.f32 %v4714_v43, %v9328_v44  ;;  %v4716_v24 = vpop.f32.mrb[98].mxu0 }
 0x2e4   :  { %v4717_v23 = vpop.f32.mrb[99].mxu0 }
 0x2e5   :  { %v4753_v49 = vpop.f32.mrb[96].mxu1 }
 0x2e6   :  { %v5008_v38 = vadd.f32 %v4753_v49, %v4180_v17  ;;  %v4755_v9 = vpop.f32.mrb[97].mxu1 }
 0x2e7   :  { %v5009_v57 = vadd.f32 %v4755_v9, %v4181_v45  ;;  %v4757_v13 = vpop.f32.mrb[98].mxu1 }
 0x2e8   :  { %v4758_v52 = vpop.f32.mrb[99].mxu1 }
 0x2ee   :  { %v4794_v42 = vpop.f32.mrb[100].mxu0 }
 0x2ef   :  { %v5010_v54 = vadd.f32 %v4794_v42, %v4182_v4  ;;  %v4796_v48 = vpop.f32.mrb[101].mxu0 }
 0x2f0   :  { %v5011_v11 = vadd.f32 %v4796_v48, %v4183_v37  ;;  %v4798_v63 = vpop.f32.mrb[102].mxu0 }
 0x2f1   :  { %v4799_v27 = vpop.f32.mrb[103].mxu0 }
 0x2f2   :  { %v4835_v3 = vpop.f32.mrb[100].mxu1 }
 0x2f3   :  { %v5012_v30 = vadd.f32 %v4835_v3, %v4184_v35  ;;  %v4837_v32 = vpop.f32.mrb[101].mxu1 }
 0x2f4   :  { %v5013_v25 = vadd.f32 %v4837_v32, %v4185_v2  ;;  %v4839_v53 = vpop.f32.mrb[102].mxu1 }
 0x2f5   :  { %v4840_v44 = vpop.f32.mrb[103].mxu1 }
 0x2fa   :  { %v4876_v10 = vpop.f32.mrb[104].mxu0 }
 0x2fb   :  { %v5014_v15 = vadd.f32 %v4876_v10, %v4186_v33  ;;  %v4878_v60 = vpop.f32.mrb[105].mxu0 }
 0x2fc   :  { %v5015_v17 = vadd.f32 %v4878_v60, %v4187_v14  ;;  %v4880_v56 = vpop.f32.mrb[106].mxu0 }
 0x2fd   :  { %v4881_v45 = vpop.f32.mrb[107].mxu0 }
 0x2fe   :  { %v4917_v7 = vpop.f32.mrb[104].mxu1 }
 0x2ff   :  { %v5016_v16 = vadd.f32 %v4917_v7, %v4188_v58  ;;  %v4919_v41 = vpop.f32.mrb[105].mxu1 }
 0x300   :  { %v5017_v4 = vadd.f32 %v4919_v41, %v4189_v21  ;;  %v4921_v39 = vpop.f32.mrb[106].mxu1 }
 0x301   :  { %v4922_v37 = vpop.f32.mrb[107].mxu1 }
 0x305   :  { %v4958_v36 = vpop.f32.mrb[108].mxu0 }
 0x306   :  { %v5018_v8 = vadd.f32 %v4958_v36, %v4190_v51  ;;  %v4960_v26 = vpop.f32.mrb[109].mxu0 }
 0x307   :  { %v5019_v35 = vadd.f32 %v4960_v26, %v4191_v31  ;;  %v4962_v22 = vpop.f32.mrb[110].mxu0 }
 0x308   :  { %v4963_v2 = vpop.f32.mrb[111].mxu0 }
 0x309   :  { %v4999_v61 = vpop.f32.mrb[108].mxu1 }
 0x30a   :  { %v5020_v5 = vadd.f32 %v4999_v61, %v4192_v6  ;;  %v5001_v1 = vpop.f32.mrb[109].mxu1 }
 0x30b   :  { %v5021_v33 = vadd.f32 %v5001_v1, %v4193_v50  ;;  %v5003_v62 = vpop.f32.mrb[110].mxu1 }
 0x30c   :  { %v5004_v14 = vpop.f32.mrb[111].mxu1 }
 0x312   :  { %v5381_v29 = vpop.f32.mrb[112].mxu0 }
 0x313   :  { %v5675_v0 = vadd.f32 %v5381_v29, %v5006_v19  ;;  %v5383_v47 = vpop.f32.mrb[113].mxu0 }
 0x314   :  { %v5676_v58 = vadd.f32 %v5383_v47, %v5007_v28  ;;  %v5385_v40 = vpop.f32.mrb[114].mxu0 }
 0x315   :  { %v5386_v21 = vpop.f32.mrb[115].mxu0 }
 0x316   :  { %v5422_v20 = vpop.f32.mrb[112].mxu1 }
 0x317   :  { %v5677_v46 = vadd.f32 %v5422_v20, %v5008_v38  ;;  %v5424_v59 = vpop.f32.mrb[113].mxu1 }
 0x318   :  { %v5678_v51 = vadd.f32 %v5424_v59, %v5009_v57  ;;  %v5426_v55 = vpop.f32.mrb[114].mxu1 }
 0x319   :  { %v5427_v31 = vpop.f32.mrb[115].mxu1 }
 0x322   :  { %v5463_v34 = vpop.f32.mrb[116].mxu0 }
 0x323   :  { %v5679_v43 = vadd.f32 %v5463_v34, %v5010_v54  ;;  %v5465_v24 = vpop.f32.mrb[117].mxu0 }
 0x324   :  { %v5680_v6 = vadd.f32 %v5465_v24, %v5011_v11  ;;  %v5467_v23 = vpop.f32.mrb[118].mxu0 }
 0x325   :  { %v5468_v50 = vpop.f32.mrb[119].mxu0 }
 0x326   :  { %v5504_v49 = vpop.f32.mrb[116].mxu1 }
 0x327   :  { %v9361_v9 = vadd.f32 %v5504_v49, %v5012_v30  ;;  %v5506_v19 = vpop.f32.mrb[117].mxu1 }
 0x328   :  { %v9363_v13 = vadd.f32 %v5506_v19, %v5013_v25  ;;  %v5508_v28 = vpop.f32.mrb[118].mxu1 }
 0x329   :  { %v5509_v52 = vpop.f32.mrb[119].mxu1 }
 0x32e   :  { %v5545_v42 = vpop.f32.mrb[120].mxu0 }
 0x32f   :  { %v9365_v38 = vadd.f32 %v5545_v42, %v5014_v15  ;;  %v5547_v57 = vpop.f32.mrb[121].mxu0 }
 0x330   :  { %v9367_v48 = vadd.f32 %v5547_v57, %v5015_v17  ;;  %v5549_v63 = vpop.f32.mrb[122].mxu0 }
 0x331   :  { %v5550_v54 = vpop.f32.mrb[123].mxu0 }
 0x332   :  { %v5586_v27 = vpop.f32.mrb[120].mxu1 }
 0x333   :  { %v9369_v11 = vadd.f32 %v5586_v27, %v5016_v16  ;;  %v5588_v3 = vpop.f32.mrb[121].mxu1 }
 0x334   :  { %v9371_v32 = vadd.f32 %v5588_v3, %v5017_v4  ;;  %v5590_v30 = vpop.f32.mrb[122].mxu1  ;;  %v6412_v4 = vpop.permute.xlu0 %6411 }
 0x335   :  { %v5591_v53 = vpop.f32.mrb[123].mxu1  ;;  %v9382_v37 = vrot.slane %v6412_v4, %v7137_v18 }
 0x345   :  { %v5627_v25 = vpop.f32.mrb[124].mxu0 }
 0x346   :  { %v9373_v44 = vadd.f32 %v5627_v25, %v5018_v8  ;;  %v5629_v10 = vpop.f32.mrb[125].mxu0 }
 0x347   :  { %v9375_v60 = vadd.f32 %v5629_v10, %v5019_v35  ;;  %v5631_v15 = vpop.f32.mrb[126].mxu0 }
 0x348   :  { %v5632_v56 = vpop.f32.mrb[127].mxu0 }
 0x349   :  { %v5668_v17 = vpop.f32.mrb[124].mxu1 }
 0x34a   :  { %v9377_v45 = vadd.f32 %v5668_v17, %v5020_v5  ;;  %v5670_v7 = vpop.f32.mrb[125].mxu1 }
 0x34b   :  { %v9379_v41 = vadd.f32 %v5670_v7, %v5021_v33  ;;  %v5672_v16 = vpop.f32.mrb[126].mxu1 }
 0x34c   :  { %v5673_v39 = vpop.f32.mrb[127].mxu1 }
 0x354   :  { %v6098_v36 = vpop.f32.mrb[128].mxu0 }
 0x355   :  { %v6392_v8 = vadd.f32 %v6098_v36, %v5675_v0  ;;  %v6100_v26 = vpop.f32.mrb[129].mxu0 }
 0x356   :  { %v6393_v22 = vadd.f32 %v6100_v26, %v5676_v58  ;;  %v6102_v35 = vpop.f32.mrb[130].mxu0 }
 0x357   :  { %v6418_v2 = vadd.f32 %v9382_v37, %v6392_v8  ;;  %v6103_v61 = vpop.f32.mrb[131].mxu0 }
 0x358   :  { %v6419_v5 = vadd.f32 %v9382_v37, %v6393_v22  ;;  %v6139_v1 = vpop.f32.mrb[128].mxu1 }
 0x359   :  { %6996 = vtanh.f32 %v6418_v2  ;;  %v6394_v33 = vadd.f32 %v6139_v1, %v5677_v46  ;;  %v6141_v62 = vpop.f32.mrb[129].mxu1 }
 0x35a   :  { %6998 = vtanh.f32 %v6419_v5  ;;  %v6395_v14 = vadd.f32 %v6141_v62, %v5678_v51  ;;  %v6143_v29 = vpop.f32.mrb[130].mxu1 }
 0x35b   :  { %v6420_v18 = vadd.f32 %v9382_v37, %v6394_v33  ;;  %v6144_v47 = vpop.f32.mrb[131].mxu1 }
 0x35c   :  { %v6421_v0 = vadd.f32 %v9382_v37, %v6395_v14 }
 0x35d   :  { %7000 = vtanh.f32 %v6420_v18 }
 0x35e   :  { %7002 = vtanh.f32 %v6421_v0 }
 0x363   :  { %v6997_v58 = vpop.eup %6996 }
 0x364   :  { %v6999_v40 = vpop.eup %6998 }
 0x365   :  { %v6466_v21 = vcombine.low %v6997_v58, %v6999_v40  ;;  %v6180_v20 = vpop.f32.mrb[132].mxu0 }
 0x366   :  { %v6396_v59 = vadd.f32 %v6180_v20, %v5679_v43  ;;  %v6182_v55 = vpop.f32.mrb[133].mxu0 }
 0x367   :  { %v7001_v31 = vpop.eup %7000  ;;  %v6397_v34 = vadd.f32 %v6182_v55, %v5680_v6  ;;  %v6184_v46 = vpop.f32.mrb[134].mxu0  ;;  %v6476_v42 = vrot.slane %v6466_v21, %v7316_v12 }
 0x368   :  { %v7003_v24 = vpop.eup %7002  ;;  %v6422_v51 = vadd.f32 %v9382_v37, %v6396_v59  ;;  %v6185_v23 = vpop.f32.mrb[135].mxu0 }
 0x369   :  { %v6467_v50 = vcombine.low %v7001_v31, %v7003_v24  ;;  %v6423_v49 = vadd.f32 %v9382_v37, %v6397_v34  ;;  %v6221_v19 = vpop.f32.mrb[132].mxu1 }
 0x36a   :  { %7004 = vtanh.f32 %v6422_v51  ;;  %v6398_v28 = vadd.f32 %v6221_v19, %v9361_v9  ;;  %v6223_v52 = vpop.f32.mrb[133].mxu1 }
 0x36b   :  { %v6483_v43 = vrot.slane %v6467_v50, %v7316_v12  ;;  %7006 = vtanh.f32 %v6423_v49  ;;  %v6399_v6 = vadd.f32 %v6223_v52, %v9363_v13  ;;  %v6225_v57 = vpop.f32.mrb[134].mxu1 }
 0x36c   :  { %v6424_v63 = vadd.f32 %v9382_v37, %v6398_v28  ;;  %v6226_v54 = vpop.f32.mrb[135].mxu1 }
 0x36d   :  { %v6498_v27 = vcombine.low %v6476_v42, %v6483_v43  ;;  %v6425_v3 = vadd.f32 %v9382_v37, %v6399_v6 }
 0x36e   :  { %7008 = vtanh.f32 %v6424_v63 }
 0x36f   :  { %7010 = vtanh.f32 %v6425_v3  ;;  %v6506_v47 = vrot.slane %v6498_v27, %v7316_v12 }
 0x371   :  { %v6262_v30 = vpop.f32.mrb[136].mxu0 }
 0x372   :  { %v6400_v9 = vadd.f32 %v6262_v30, %v9365_v38  ;;  %v6264_v53 = vpop.f32.mrb[137].mxu0 }
 0x373   :  { %v6401_v25 = vadd.f32 %v6264_v53, %v9367_v48  ;;  %v6266_v10 = vpop.f32.mrb[138].mxu0 }
 0x374   :  { %v7005_v15 = vpop.eup %7004  ;;  %v6426_v56 = vadd.f32 %v9382_v37, %v6400_v9  ;;  %v6267_v13 = vpop.f32.mrb[139].mxu0 }
 0x375   :  { %v7007_v17 = vpop.eup %7006  ;;  %v6427_v7 = vadd.f32 %v9382_v37, %v6401_v25  ;;  %v6303_v16 = vpop.f32.mrb[136].mxu1 }
 0x376   :  { %v6468_v39 = vcombine.low %v7005_v15, %v7007_v17  ;;  %7012 = vtanh.f32 %v6426_v56  ;;  %v6402_v4 = vadd.f32 %v6303_v16, %v9369_v11  ;;  %v6305_v36 = vpop.f32.mrb[137].mxu1 }
 0x377   :  { %7014 = vtanh.f32 %v6427_v7  ;;  %v6403_v38 = vadd.f32 %v6305_v36, %v9371_v32  ;;  %v6307_v8 = vpop.f32.mrb[138].mxu1 }
 0x378   :  { %v7009_v26 = vpop.eup %7008  ;;  %v6428_v48 = vadd.f32 %v9382_v37, %v6402_v4  ;;  %v6308_v22 = vpop.f32.mrb[139].mxu1  ;;  %v6490_v5 = vrot.slane %v6468_v39, %v7316_v12 }
 0x379   :  { %v7011_v35 = vpop.eup %7010  ;;  %v6429_v2 = vadd.f32 %v9382_v37, %v6403_v38 }
 0x37a   :  { %v6469_v61 = vcombine.low %v7009_v26, %v7011_v35  ;;  %7016 = vtanh.f32 %v6428_v48 }
 0x37b   :  { %7018 = vtanh.f32 %v6429_v2 }
 0x37c   :  { %v6497_v1 = vrot.slane %v6469_v61, %v7316_v12 }
 0x37d   :  { %v6344_v11 = vpop.f32.mrb[140].mxu0 }
 0x37e   :  { %v6499_v33 = vcombine.low %v6490_v5, %v6497_v1  ;;  %v6404_v62 = vadd.f32 %v6344_v11, %v9373_v44  ;;  %v6346_v32 = vpop.f32.mrb[141].mxu0 }
 0x37f   :  { %v6405_v14 = vadd.f32 %v6346_v32, %v9375_v60  ;;  %v6348_v29 = vpop.f32.mrb[142].mxu0 }
 0x380   :  { %v7013_v18 = vpop.eup %7012  ;;  %v6513_v0 = vrot.slane %v6499_v33, %v7316_v12  ;;  %v6430_v58 = vadd.f32 %v9382_v37, %v6404_v62  ;;  %v6349_v40 = vpop.f32.mrb[143].mxu0 }
 0x381   :  { %v7015_v21 = vpop.eup %7014  ;;  %v6431_v20 = vadd.f32 %v9382_v37, %v6405_v14  ;;  %v6385_v59 = vpop.f32.mrb[140].mxu1 }
 0x382   :  { %v6514_v55 = vcombine.low %v6506_v47, %v6513_v0  ;;  %v6515_v31 = vcombine.low %v7013_v18, %v7015_v21  ;;  %7020 = vtanh.f32 %v6430_v58  ;;  %v6406_v44 = vadd.f32 %v6385_v59, %v9377_v45  ;;  %v6387_v34 = vpop.f32.mrb[141].mxu1 }
 0x383   :  { %7022 = vtanh.f32 %v6431_v20  ;;  %v6407_v60 = vadd.f32 %v6387_v34, %v9379_v41  ;;  %v6389_v46 = vpop.f32.mrb[142].mxu1 }
 0x384   :  { %v7017_v24 = vpop.eup %7016  ;;  %6566 = vst [vmem:[%s9432_s4] sm:$0xff] %v6514_v55  ;;  %v6432_v51 = vadd.f32 %v9382_v37, %v6406_v44  ;;  %v6390_v23 = vpop.f32.mrb[143].mxu1  ;;  %v6525_v45 = vrot.slane %v6515_v31, %v7316_v12 }
 0x385   :  { %v7019_v50 = vpop.eup %7018  ;;  %v6433_v49 = vadd.f32 %v9382_v37, %v6407_v60 }
 0x386   :  { %v6516_v19 = vcombine.low %v7017_v24, %v7019_v50  ;;  %7024 = vtanh.f32 %v6432_v51 }
 0x387   :  { %7026 = vtanh.f32 %v6433_v49 }
 0x388   :  { %v6532_v28 = vrot.slane %v6516_v19, %v7316_v12 }
 0x38a   :  { %v6547_v41 = vcombine.low %v6525_v45, %v6532_v28 }
 0x38c   :  { %v7021_v52 = vpop.eup %7020  ;;  %v6555_v37 = vrot.slane %v6547_v41, %v7316_v12 }
 0x38d   :  { %v7023_v42 = vpop.eup %7022 }
 0x38e   :  { %v6517_v43 = vcombine.low %v7021_v52, %v7023_v42 }
 0x390   :  { %v7025_v6 = vpop.eup %7024  ;;  %v6539_v54 = vrot.slane %v6517_v43, %v7316_v12 }
 0x391   :  { %v7027_v57 = vpop.eup %7026 }
 0x392   :  { %v6518_v63 = vcombine.low %v7025_v6, %v7027_v57 }
 0x394   :  { %v6546_v27 = vrot.slane %v6518_v63, %v7316_v12 }
 0x396   :  { %v6548_v3 = vcombine.low %v6539_v54, %v6546_v27 }
 0x398   :  { %v6562_v30 = vrot.slane %v6548_v3, %v7316_v12 }
 0x39a   :  { %v6563_v9 = vcombine.low %v6555_v37, %v6562_v30 }
 0x39c   :  { %6567 = vst [vmem:[%s9432_s4 + $0x8] sm:$0xff] %v6563_v9 }

</bundles_post_ra>
